<compile_context>
chip_gen: v7x
topology: tpu7x:2x2x1
jax: 0.10.0
libtpu: 0.0.40
codegen_flags: <defaults>
</compile_context>

<pallas_src>
import math

import jax
import jax.numpy as jnp
from jax import lax
from jax.experimental import pallas as pl
from jax.experimental.pallas import tpu as pltpu


def encoder_gru_chunk_kernel(x_ref,      # (Tc, H)  bf16 pre-gathered embedding chunk
                             wih_ref,    # (H, 3H)  bf16 W_ih^T, VMEM-resident
                             whh_ref,    # (H, 3H)  bf16 W_hh^T, VMEM-resident
                             bih_ref,    # (1, 3H)  f32, resident
                             bhh_ref,    # (1, 3H)  f32, resident
                             h0_ref,     # (1, H)   f32 initial hidden, resident
                             out_ref,    # (Tc, H)  f32 per-step outputs (== hidden)
                             h_scr,      # (1, H)   f32 scratch: hidden carry
                             gi_scr):    # (Tc, 3H) f32 scratch: hoisted input proj
    Tc, H = out_ref.shape
    cdt = whh_ref.dtype                      # MXU operand dtype (bf16)

    @pl.when(pl.program_id(0) == 0)
    def _():
        h_scr[...] = h0_ref[...]

    # Input projection for the whole chunk: one dense MXU matmul, not on the
    # serial dependency chain.  Bias folded in here.
    gi_scr[...] = jnp.dot(x_ref[...].astype(cdt), wih_ref[...],
                          preferred_element_type=jnp.float32) + bih_ref[...]

    bhh = bhh_ref[...]                       # (1, 3H) f32, hoisted (tiny)

    def step(t, h):                          # h: (1, H) f32
        gi = gi_scr[pl.ds(t, 1), :]                               # (1, 3H)
        gh = jnp.dot(h.astype(cdt), whh_ref[...],
                     preferred_element_type=jnp.float32) + bhh    # (1, 3H)
        # PyTorch GRU gate order [reset | update | new]; one EUP call for r & z.
        rz = jax.nn.sigmoid(gi[:, :2 * H] + gh[:, :2 * H])        # (1, 2H)
        r = rz[:, :H]
        z = rz[:, H:]
        n = jnp.tanh(gi[:, 2 * H:] + r * gh[:, 2 * H:])
        h_new = (1.0 - z) * n + z * h
        out_ref[pl.ds(t, 1), :] = h_new
        return h_new

    h_scr[...] = lax.fori_loop(0, Tc, step, h_scr[...], unroll=True)


def _round_up(x, m):
    return ((x + m - 1) // m) * m


def encoder_rnn_forward(tokens, hidden0, params, chunk=32):
    """Run the EncoderRNN over a token sequence.

    tokens : (T,) int32 token ids
    hidden0: (1, 1, H) f32 initial hidden (initHidden())
    Returns (outputs, hidden): outputs (T, 1, H) — per-step GRU output (each step
    equals that step's hidden, exactly like the PyTorch module's seq_len=1
    forward applied T times) — and hidden (1, 1, H), the final hidden state.
    """
    emb = params["embedding"]
    wih_t, whh_t = params["w_ih_t"], params["w_hh_t"]
    bih, bhh = params["b_ih"], params["b_hh"]

    V, H = emb.shape
    T = int(tokens.shape[0])

    # Time-tile: multiple of 16 (bf16 sublane packing of the embedding chunk).
    Tc = max(16, min(_round_up(chunk, 16), _round_up(T, 16)))
    T_pad = _round_up(T, Tc)
    n_chunks = T_pad // Tc

    # Pre-gather embedding rows in the wrapper (dense (T, H) tiles for the kernel).
    tokens = jnp.clip(tokens.astype(jnp.int32), 0, V - 1)
    x_seq = jnp.take(emb, tokens, axis=0)                         # (T, H) bf16
    if T_pad > T:
        x_seq = jnp.concatenate(
            [x_seq, jnp.zeros((T_pad - T, H), x_seq.dtype)], axis=0)

    h2d = hidden0.reshape(1, H).astype(jnp.float32)

    # Constant index_map -> block stays VMEM-resident across all grid steps.
    resident = lambda shape: pl.BlockSpec(shape, lambda c: (0, 0))

    itemsize = jnp.dtype(emb.dtype).itemsize
    cost = pl.CostEstimate(
        flops=T_pad * 2 * (2 * H * 3 * H),              # input + recurrent matmuls
        transcendentals=T_pad * 3 * H,                  # 2H sigmoid + H tanh / step
        bytes_accessed=(2 * H * 3 * H * itemsize        # resident weights (once)
                        + 2 * 3 * H * 4 + H * 4         # biases + h0 (once)
                        + T_pad * H * (itemsize + 4)),  # emb chunks in, outputs out
    )

    outs = pl.pallas_call(
        encoder_gru_chunk_kernel,
        out_shape=jax.ShapeDtypeStruct((T_pad, H), jnp.float32),
        grid_spec=pltpu.PrefetchScalarGridSpec(
            num_scalar_prefetch=0,
            grid=(n_chunks,),
            in_specs=[
                pl.BlockSpec((Tc, H), lambda c: (c, 0)),   # embedding chunk
                resident((H, 3 * H)),                      # W_ih^T (resident)
                resident((H, 3 * H)),                      # W_hh^T (resident)
                resident((1, 3 * H)),                      # b_ih
                resident((1, 3 * H)),                      # b_hh
                resident((1, H)),                          # initial hidden
            ],
            out_specs=pl.BlockSpec((Tc, H), lambda c: (c, 0)),
            scratch_shapes=[pltpu.VMEM((1, H), jnp.float32),       # hidden carry
                            pltpu.VMEM((Tc, 3 * H), jnp.float32)], # gi per chunk
        ),
        compiler_params=pltpu.CompilerParams(
            dimension_semantics=("arbitrary",)),          # recurrence: sequential
        cost_estimate=cost,
    )(x_seq, wih_t, whh_t, bih, bhh, h2d)

    outputs = outs[:T].reshape(T, 1, H)          # (seq, batch=1, H)
    hidden = outs[T - 1:T].reshape(1, 1, H)      # GRU output == new hidden
    return outputs, hidden


def init_params(key, input_size, hidden_size, param_dtype=jnp.bfloat16):
    """Parameter init mirroring nn.Embedding / nn.GRU shapes & init ranges."""
    H = hidden_size
    k_emb, k_wih, k_whh, k_bih, k_bhh = jax.random.split(key, 5)
    bound = 1.0 / math.sqrt(H)
    emb = jax.random.normal(k_emb, (input_size, H), jnp.float32)      # ~ nn.Embedding
    w_ih = jax.random.uniform(k_wih, (3 * H, H), jnp.float32, -bound, bound)
    w_hh = jax.random.uniform(k_whh, (3 * H, H), jnp.float32, -bound, bound)
    b_ih = jax.random.uniform(k_bih, (3 * H,), jnp.float32, -bound, bound)
    b_hh = jax.random.uniform(k_bhh, (3 * H,), jnp.float32, -bound, bound)
    return {
        "embedding": emb.astype(param_dtype),
        "w_ih_t": jnp.asarray(w_ih.T, param_dtype),     # (H, 3H)
        "w_hh_t": jnp.asarray(w_hh.T, param_dtype),     # (H, 3H)
        "b_ih": b_ih.reshape(1, 3 * H).astype(jnp.float32),
        "b_hh": b_hh.reshape(1, 3 * H).astype(jnp.float32),
    }


def encoder_rnn_reference(tokens, hidden0, params):
    """Pure-JAX reference: EncoderRNN.forward applied token-by-token, using the
    same precision path as the kernel (bf16 operands, f32 accumulation)."""
    emb, wih, whh = params["embedding"], params["w_ih_t"], params["w_hh_t"]
    bih, bhh = params["b_ih"], params["b_hh"]
    H = whh.shape[0]
    cdt = whh.dtype
    h = hidden0.reshape(1, H).astype(jnp.float32)
    outs = []
    for t in range(int(tokens.shape[0])):
        x = emb[tokens[t]][None, :]
        gi = jnp.dot(x.astype(cdt), wih, preferred_element_type=jnp.float32) + bih
        gh = jnp.dot(h.astype(cdt), whh, preferred_element_type=jnp.float32) + bhh
        r = jax.nn.sigmoid(gi[:, :H] + gh[:, :H])
        z = jax.nn.sigmoid(gi[:, H:2 * H] + gh[:, H:2 * H])
        n = jnp.tanh(gi[:, 2 * H:] + r * gh[:, 2 * H:])
        h = (1.0 - z) * n + z * h
        outs.append(h)
    return jnp.stack(outs, 0).reshape(-1, 1, H), h.reshape(1, 1, H)


if __name__ == "__main__":
    input_size = 160        # vocab size (small demo)
    hidden_size = 256       # spec value; matches 256-wide MXU on v6e/v7x
    seq_len = 40            # non-multiple of the chunk -> exercises padding path

    root = jax.random.PRNGKey(0)
    k_params, k_tok = jax.random.split(root)

    params = init_params(k_params, input_size, hidden_size)
    tokens = jax.random.randint(k_tok, (seq_len,), 0, input_size, jnp.int32)
    hidden0 = jnp.zeros((1, 1, hidden_size), dtype=jnp.float32)      # initHidden()

    # chunk=16 -> 3 grid steps: exercises the hidden carry across chunks.
    outputs, hidden = encoder_rnn_forward(tokens, hidden0, params, chunk=16)
    jax.block_until_ready((outputs, hidden))

    ref_out, ref_h = encoder_rnn_reference(tokens, hidden0, params)

    assert outputs.shape == (seq_len, 1, hidden_size)
    assert hidden.shape == (1, 1, hidden_size)
    assert bool(jnp.all(jnp.isfinite(outputs)))
    assert bool(jnp.allclose(outputs, ref_out, atol=1e-2, rtol=1e-2))
    assert bool(jnp.allclose(hidden, ref_h, atol=1e-2, rtol=1e-2))
    assert bool(jnp.allclose(outputs[-1], hidden[0]))     # output == hidden (GRU)
    print("KERNEL_OK")
</pallas_src>

<mosaic_0001>
module attributes {stable_mosaic.version = 11 : i64} {
  func.func @encoder_gru_chunk_kernel(%arg0: i32, %arg1: memref<16x256xbf16, #tpu.memory_space<vmem>>, %arg2: memref<256x768xbf16, #tpu.memory_space<vmem>>, %arg3: memref<256x768xbf16, #tpu.memory_space<vmem>>, %arg4: memref<1x768xf32, #tpu.memory_space<vmem>>, %arg5: memref<1x768xf32, #tpu.memory_space<vmem>>, %arg6: memref<1x256xf32, #tpu.memory_space<vmem>>, %arg7: memref<16x256xf32, #tpu.memory_space<vmem>>, %arg8: memref<1x256xf32, #tpu.memory_space<vmem>>, %arg9: memref<16x768xf32, #tpu.memory_space<vmem>>) attributes {dimension_semantics = [#tpu.dimension_semantics<arbitrary>], iteration_bounds = array<i64: 3>, scalar_prefetch = 0 : i64, scratch_operands = 2 : i64, tpu.core_type = #tpu.core_type<tc>, window_params = [{transform_indices = @transform_0, window_bounds = array<i64: 16, 256>}, {pipeline_mode = #tpu.pipeline_mode<synchronous>, transform_indices = @transform_1, window_bounds = array<i64: 256, 768>}, {pipeline_mode = #tpu.pipeline_mode<synchronous>, transform_indices = @transform_2, window_bounds = array<i64: 256, 768>}, {pipeline_mode = #tpu.pipeline_mode<synchronous>, transform_indices = @transform_3, window_bounds = array<i64: 1, 768>}, {pipeline_mode = #tpu.pipeline_mode<synchronous>, transform_indices = @transform_4, window_bounds = array<i64: 1, 768>}, {pipeline_mode = #tpu.pipeline_mode<synchronous>, transform_indices = @transform_5, window_bounds = array<i64: 1, 256>}, {transform_indices = @transform_6, window_bounds = array<i64: 16, 256>}]} {
    %c0_i32 = arith.constant 0 : i32
    %0 = arith.cmpi eq, %arg0, %c0_i32 : i32
    %1 = arith.extui %0 : i1 to i32
    %c0_i32_0 = arith.constant 0 : i32
    %2 = arith.cmpi ne, %1, %c0_i32_0 : i32
    scf.if %2 {
      %c0_127 = arith.constant 0 : index
      %c0_128 = arith.constant 0 : index
      %461 = vector.load %arg6[%c0_127, %c0_128] : memref<1x256xf32, #tpu.memory_space<vmem>>, vector<1x256xf32>
      %c0_129 = arith.constant 0 : index
      %c0_130 = arith.constant 0 : index
      %462 = vector.load %arg8[%c0_129, %c0_130] : memref<1x256xf32, #tpu.memory_space<vmem>>, vector<1x256xf32>
      tpu.vector_store %arg8[%c0_129, %c0_130], %461 {strides = array<i32>} : memref<1x256xf32, #tpu.memory_space<vmem>>, vector<1x256xf32>,
    } else {
    }
    %c0 = arith.constant 0 : index
    %c0_1 = arith.constant 0 : index
    %3 = vector.load %arg1[%c0, %c0_1] : memref<16x256xbf16, #tpu.memory_space<vmem>>, vector<16x256xbf16>
    %c0_2 = arith.constant 0 : index
    %c0_3 = arith.constant 0 : index
    %4 = vector.load %arg2[%c0_2, %c0_3] : memref<256x768xbf16, #tpu.memory_space<vmem>>, vector<256x768xbf16>
    %cst = arith.constant dense<0.000000e+00> : vector<16x768xf32>
    %5 = tpu.matmul %3, %4, %cst {dimension_numbers = #tpu.dot_dimension_numbers<[1], [0], [0], [1], [0, 0, 1, 1], [], []>} : vector<16x256xbf16>, vector<256x768xbf16>, vector<16x768xf32> -> vector<16x768xf32>
    %c0_4 = arith.constant 0 : index
    %c0_5 = arith.constant 0 : index
    %6 = vector.load %arg4[%c0_4, %c0_5] : memref<1x768xf32, #tpu.memory_space<vmem>>, vector<1x768xf32>
    %7 = vector.broadcast %6 : vector<1x768xf32> to vector<16x768xf32>
    %8 = arith.addf %5, %7 : vector<16x768xf32>
    %c0_6 = arith.constant 0 : index
    %c0_7 = arith.constant 0 : index
    %9 = vector.load %arg9[%c0_6, %c0_7] : memref<16x768xf32, #tpu.memory_space<vmem>>, vector<16x768xf32>
    tpu.vector_store %arg9[%c0_6, %c0_7], %8 {strides = array<i32>} : memref<16x768xf32, #tpu.memory_space<vmem>>, vector<16x768xf32>,
    %c0_8 = arith.constant 0 : index
    %c0_9 = arith.constant 0 : index
    %10 = vector.load %arg5[%c0_8, %c0_9] : memref<1x768xf32, #tpu.memory_space<vmem>>, vector<1x768xf32>
    %c0_10 = arith.constant 0 : index
    %c0_11 = arith.constant 0 : index
    %11 = vector.load %arg8[%c0_10, %c0_11] : memref<1x256xf32, #tpu.memory_space<vmem>>, vector<1x256xf32>
    %c0_i32_12 = arith.constant 0 : i32
    %12 = arith.index_cast %c0_i32_12 : i32 to index
    %c0_13 = arith.constant 0 : index
    %13 = vector.load %arg9[%12, %c0_13] : memref<16x768xf32, #tpu.memory_space<vmem>>, vector<1x768xf32>
    %14 = arith.truncf %11 : vector<1x256xf32> to vector<1x256xbf16>
    %c0_14 = arith.constant 0 : index
    %c0_15 = arith.constant 0 : index
    %15 = vector.load %arg3[%c0_14, %c0_15] : memref<256x768xbf16, #tpu.memory_space<vmem>>, vector<256x768xbf16>
    %cst_16 = arith.constant dense<0.000000e+00> : vector<1x768xf32>
    %16 = tpu.matmul %14, %15, %cst_16 {dimension_numbers = #tpu.dot_dimension_numbers<[1], [0], [0], [1], [0, 0, 1, 1], [], []>} : vector<1x256xbf16>, vector<256x768xbf16>, vector<1x768xf32> -> vector<1x768xf32>
    %17 = arith.addf %16, %10 : vector<1x768xf32>
    %18 = vector.extract_strided_slice %13 {offsets = [0, 0], sizes = [1, 512], strides = [1, 1]} : vector<1x768xf32> to vector<1x512xf32>
    %19 = vector.extract_strided_slice %17 {offsets = [0, 0], sizes = [1, 512], strides = [1, 1]} : vector<1x768xf32> to vector<1x512xf32>
    %20 = arith.addf %18, %19 : vector<1x512xf32>
    %21 = arith.negf %20 : vector<1x512xf32>
    %22 = math.exp %21 : vector<1x512xf32>
    %cst_17 = arith.constant 1.000000e+00 : f32
    %23 = vector.broadcast %cst_17 : f32 to vector<1x512xf32>
    %24 = arith.addf %23, %22 : vector<1x512xf32>
    %25 = arith.divf %23, %24 : vector<1x512xf32>
    %26 = vector.extract_strided_slice %25 {offsets = [0, 0], sizes = [1, 256], strides = [1, 1]} : vector<1x512xf32> to vector<1x256xf32>
    %27 = vector.extract_strided_slice %25 {offsets = [0, 256], sizes = [1, 256], strides = [1, 1]} : vector<1x512xf32> to vector<1x256xf32>
    %28 = vector.extract_strided_slice %13 {offsets = [0, 512], sizes = [1, 256], strides = [1, 1]} : vector<1x768xf32> to vector<1x256xf32>
    %29 = vector.extract_strided_slice %17 {offsets = [0, 512], sizes = [1, 256], strides = [1, 1]} : vector<1x768xf32> to vector<1x256xf32>
    %30 = arith.mulf %26, %29 : vector<1x256xf32>
    %31 = arith.addf %28, %30 : vector<1x256xf32>
    %32 = math.tanh %31 : vector<1x256xf32>
    %cst_18 = arith.constant 1.000000e+00 : f32
    %33 = vector.broadcast %cst_18 : f32 to vector<1x256xf32>
    %34 = arith.subf %33, %27 : vector<1x256xf32>
    %35 = arith.mulf %34, %32 : vector<1x256xf32>
    %36 = arith.mulf %27, %11 : vector<1x256xf32>
    %37 = arith.addf %35, %36 : vector<1x256xf32>
    %38 = arith.index_cast %c0_i32_12 : i32 to index
    %c0_19 = arith.constant 0 : index
    %39 = vector.load %arg7[%38, %c0_19] : memref<16x256xf32, #tpu.memory_space<vmem>>, vector<1x256xf32>
    tpu.vector_store %arg7[%38, %c0_19], %37 {strides = array<i32>} : memref<16x256xf32, #tpu.memory_space<vmem>>, vector<1x256xf32>,
    %c1_i32 = arith.constant 1 : i32
    %40 = arith.index_cast %c1_i32 : i32 to index
    %c0_20 = arith.constant 0 : index
    %41 = vector.load %arg9[%40, %c0_20] : memref<16x768xf32, #tpu.memory_space<vmem>>, vector<1x768xf32>
    %42 = arith.truncf %37 : vector<1x256xf32> to vector<1x256xbf16>
    %c0_21 = arith.constant 0 : index
    %c0_22 = arith.constant 0 : index
    %43 = vector.load %arg3[%c0_21, %c0_22] : memref<256x768xbf16, #tpu.memory_space<vmem>>, vector<256x768xbf16>
    %cst_23 = arith.constant dense<0.000000e+00> : vector<1x768xf32>
    %44 = tpu.matmul %42, %43, %cst_23 {dimension_numbers = #tpu.dot_dimension_numbers<[1], [0], [0], [1], [0, 0, 1, 1], [], []>} : vector<1x256xbf16>, vector<256x768xbf16>, vector<1x768xf32> -> vector<1x768xf32>
    %45 = arith.addf %44, %10 : vector<1x768xf32>
    %46 = vector.extract_strided_slice %41 {offsets = [0, 0], sizes = [1, 512], strides = [1, 1]} : vector<1x768xf32> to vector<1x512xf32>
    %47 = vector.extract_strided_slice %45 {offsets = [0, 0], sizes = [1, 512], strides = [1, 1]} : vector<1x768xf32> to vector<1x512xf32>
    %48 = arith.addf %46, %47 : vector<1x512xf32>
    %49 = arith.negf %48 : vector<1x512xf32>
    %50 = math.exp %49 : vector<1x512xf32>
    %cst_24 = arith.constant 1.000000e+00 : f32
    %51 = vector.broadcast %cst_24 : f32 to vector<1x512xf32>
    %52 = arith.addf %51, %50 : vector<1x512xf32>
    %53 = arith.divf %51, %52 : vector<1x512xf32>
    %54 = vector.extract_strided_slice %53 {offsets = [0, 0], sizes = [1, 256], strides = [1, 1]} : vector<1x512xf32> to vector<1x256xf32>
    %55 = vector.extract_strided_slice %53 {offsets = [0, 256], sizes = [1, 256], strides = [1, 1]} : vector<1x512xf32> to vector<1x256xf32>
    %56 = vector.extract_strided_slice %41 {offsets = [0, 512], sizes = [1, 256], strides = [1, 1]} : vector<1x768xf32> to vector<1x256xf32>
    %57 = vector.extract_strided_slice %45 {offsets = [0, 512], sizes = [1, 256], strides = [1, 1]} : vector<1x768xf32> to vector<1x256xf32>
    %58 = arith.mulf %54, %57 : vector<1x256xf32>
    %59 = arith.addf %56, %58 : vector<1x256xf32>
    %60 = math.tanh %59 : vector<1x256xf32>
    %cst_25 = arith.constant 1.000000e+00 : f32
    %61 = vector.broadcast %cst_25 : f32 to vector<1x256xf32>
    %62 = arith.subf %61, %55 : vector<1x256xf32>
    %63 = arith.mulf %62, %60 : vector<1x256xf32>
    %64 = arith.mulf %55, %37 : vector<1x256xf32>
    %65 = arith.addf %63, %64 : vector<1x256xf32>
    %66 = arith.index_cast %c1_i32 : i32 to index
    %c0_26 = arith.constant 0 : index
    %67 = vector.load %arg7[%66, %c0_26] : memref<16x256xf32, #tpu.memory_space<vmem>>, vector<1x256xf32>
    tpu.vector_store %arg7[%66, %c0_26], %65 {strides = array<i32>} : memref<16x256xf32, #tpu.memory_space<vmem>>, vector<1x256xf32>,
    %c2_i32 = arith.constant 2 : i32
    %68 = arith.index_cast %c2_i32 : i32 to index
    %c0_27 = arith.constant 0 : index
    %69 = vector.load %arg9[%68, %c0_27] : memref<16x768xf32, #tpu.memory_space<vmem>>, vector<1x768xf32>
    %70 = arith.truncf %65 : vector<1x256xf32> to vector<1x256xbf16>
    %c0_28 = arith.constant 0 : index
    %c0_29 = arith.constant 0 : index
    %71 = vector.load %arg3[%c0_28, %c0_29] : memref<256x768xbf16, #tpu.memory_space<vmem>>, vector<256x768xbf16>
    %cst_30 = arith.constant dense<0.000000e+00> : vector<1x768xf32>
    %72 = tpu.matmul %70, %71, %cst_30 {dimension_numbers = #tpu.dot_dimension_numbers<[1], [0], [0], [1], [0, 0, 1, 1], [], []>} : vector<1x256xbf16>, vector<256x768xbf16>, vector<1x768xf32> -> vector<1x768xf32>
    %73 = arith.addf %72, %10 : vector<1x768xf32>
    %74 = vector.extract_strided_slice %69 {offsets = [0, 0], sizes = [1, 512], strides = [1, 1]} : vector<1x768xf32> to vector<1x512xf32>
    %75 = vector.extract_strided_slice %73 {offsets = [0, 0], sizes = [1, 512], strides = [1, 1]} : vector<1x768xf32> to vector<1x512xf32>
    %76 = arith.addf %74, %75 : vector<1x512xf32>
    %77 = arith.negf %76 : vector<1x512xf32>
    %78 = math.exp %77 : vector<1x512xf32>
    %cst_31 = arith.constant 1.000000e+00 : f32
    %79 = vector.broadcast %cst_31 : f32 to vector<1x512xf32>
    %80 = arith.addf %79, %78 : vector<1x512xf32>
    %81 = arith.divf %79, %80 : vector<1x512xf32>
    %82 = vector.extract_strided_slice %81 {offsets = [0, 0], sizes = [1, 256], strides = [1, 1]} : vector<1x512xf32> to vector<1x256xf32>
    %83 = vector.extract_strided_slice %81 {offsets = [0, 256], sizes = [1, 256], strides = [1, 1]} : vector<1x512xf32> to vector<1x256xf32>
    %84 = vector.extract_strided_slice %69 {offsets = [0, 512], sizes = [1, 256], strides = [1, 1]} : vector<1x768xf32> to vector<1x256xf32>
    %85 = vector.extract_strided_slice %73 {offsets = [0, 512], sizes = [1, 256], strides = [1, 1]} : vector<1x768xf32> to vector<1x256xf32>
    %86 = arith.mulf %82, %85 : vector<1x256xf32>
    %87 = arith.addf %84, %86 : vector<1x256xf32>
    %88 = math.tanh %87 : vector<1x256xf32>
    %cst_32 = arith.constant 1.000000e+00 : f32
    %89 = vector.broadcast %cst_32 : f32 to vector<1x256xf32>
    %90 = arith.subf %89, %83 : vector<1x256xf32>
    %91 = arith.mulf %90, %88 : vector<1x256xf32>
    %92 = arith.mulf %83, %65 : vector<1x256xf32>
    %93 = arith.addf %91, %92 : vector<1x256xf32>
    %94 = arith.index_cast %c2_i32 : i32 to index
    %c0_33 = arith.constant 0 : index
    %95 = vector.load %arg7[%94, %c0_33] : memref<16x256xf32, #tpu.memory_space<vmem>>, vector<1x256xf32>
    tpu.vector_store %arg7[%94, %c0_33], %93 {strides = array<i32>} : memref<16x256xf32, #tpu.memory_space<vmem>>, vector<1x256xf32>,
    %c3_i32 = arith.constant 3 : i32
    %96 = arith.index_cast %c3_i32 : i32 to index
    %c0_34 = arith.constant 0 : index
    %97 = vector.load %arg9[%96, %c0_34] : memref<16x768xf32, #tpu.memory_space<vmem>>, vector<1x768xf32>
    %98 = arith.truncf %93 : vector<1x256xf32> to vector<1x256xbf16>
    %c0_35 = arith.constant 0 : index
    %c0_36 = arith.constant 0 : index
    %99 = vector.load %arg3[%c0_35, %c0_36] : memref<256x768xbf16, #tpu.memory_space<vmem>>, vector<256x768xbf16>
    %cst_37 = arith.constant dense<0.000000e+00> : vector<1x768xf32>
    %100 = tpu.matmul %98, %99, %cst_37 {dimension_numbers = #tpu.dot_dimension_numbers<[1], [0], [0], [1], [0, 0, 1, 1], [], []>} : vector<1x256xbf16>, vector<256x768xbf16>, vector<1x768xf32> -> vector<1x768xf32>
    %101 = arith.addf %100, %10 : vector<1x768xf32>
    %102 = vector.extract_strided_slice %97 {offsets = [0, 0], sizes = [1, 512], strides = [1, 1]} : vector<1x768xf32> to vector<1x512xf32>
    %103 = vector.extract_strided_slice %101 {offsets = [0, 0], sizes = [1, 512], strides = [1, 1]} : vector<1x768xf32> to vector<1x512xf32>
    %104 = arith.addf %102, %103 : vector<1x512xf32>
    %105 = arith.negf %104 : vector<1x512xf32>
    %106 = math.exp %105 : vector<1x512xf32>
    %cst_38 = arith.constant 1.000000e+00 : f32
    %107 = vector.broadcast %cst_38 : f32 to vector<1x512xf32>
    %108 = arith.addf %107, %106 : vector<1x512xf32>
    %109 = arith.divf %107, %108 : vector<1x512xf32>
    %110 = vector.extract_strided_slice %109 {offsets = [0, 0], sizes = [1, 256], strides = [1, 1]} : vector<1x512xf32> to vector<1x256xf32>
    %111 = vector.extract_strided_slice %109 {offsets = [0, 256], sizes = [1, 256], strides = [1, 1]} : vector<1x512xf32> to vector<1x256xf32>
    %112 = vector.extract_strided_slice %97 {offsets = [0, 512], sizes = [1, 256], strides = [1, 1]} : vector<1x768xf32> to vector<1x256xf32>
    %113 = vector.extract_strided_slice %101 {offsets = [0, 512], sizes = [1, 256], strides = [1, 1]} : vector<1x768xf32> to vector<1x256xf32>
    %114 = arith.mulf %110, %113 : vector<1x256xf32>
    %115 = arith.addf %112, %114 : vector<1x256xf32>
    %116 = math.tanh %115 : vector<1x256xf32>
    %cst_39 = arith.constant 1.000000e+00 : f32
    %117 = vector.broadcast %cst_39 : f32 to vector<1x256xf32>
    %118 = arith.subf %117, %111 : vector<1x256xf32>
    %119 = arith.mulf %118, %116 : vector<1x256xf32>
    %120 = arith.mulf %111, %93 : vector<1x256xf32>
    %121 = arith.addf %119, %120 : vector<1x256xf32>
    %122 = arith.index_cast %c3_i32 : i32 to index
    %c0_40 = arith.constant 0 : index
    %123 = vector.load %arg7[%122, %c0_40] : memref<16x256xf32, #tpu.memory_space<vmem>>, vector<1x256xf32>
    tpu.vector_store %arg7[%122, %c0_40], %121 {strides = array<i32>} : memref<16x256xf32, #tpu.memory_space<vmem>>, vector<1x256xf32>,
    %c4_i32 = arith.constant 4 : i32
    %124 = arith.index_cast %c4_i32 : i32 to index
    %c0_41 = arith.constant 0 : index
    %125 = vector.load %arg9[%124, %c0_41] : memref<16x768xf32, #tpu.memory_space<vmem>>, vector<1x768xf32>
    %126 = arith.truncf %121 : vector<1x256xf32> to vector<1x256xbf16>
    %c0_42 = arith.constant 0 : index
    %c0_43 = arith.constant 0 : index
    %127 = vector.load %arg3[%c0_42, %c0_43] : memref<256x768xbf16, #tpu.memory_space<vmem>>, vector<256x768xbf16>
    %cst_44 = arith.constant dense<0.000000e+00> : vector<1x768xf32>
    %128 = tpu.matmul %126, %127, %cst_44 {dimension_numbers = #tpu.dot_dimension_numbers<[1], [0], [0], [1], [0, 0, 1, 1], [], []>} : vector<1x256xbf16>, vector<256x768xbf16>, vector<1x768xf32> -> vector<1x768xf32>
    %129 = arith.addf %128, %10 : vector<1x768xf32>
    %130 = vector.extract_strided_slice %125 {offsets = [0, 0], sizes = [1, 512], strides = [1, 1]} : vector<1x768xf32> to vector<1x512xf32>
    %131 = vector.extract_strided_slice %129 {offsets = [0, 0], sizes = [1, 512], strides = [1, 1]} : vector<1x768xf32> to vector<1x512xf32>
    %132 = arith.addf %130, %131 : vector<1x512xf32>
    %133 = arith.negf %132 : vector<1x512xf32>
    %134 = math.exp %133 : vector<1x512xf32>
    %cst_45 = arith.constant 1.000000e+00 : f32
    %135 = vector.broadcast %cst_45 : f32 to vector<1x512xf32>
    %136 = arith.addf %135, %134 : vector<1x512xf32>
    %137 = arith.divf %135, %136 : vector<1x512xf32>
    %138 = vector.extract_strided_slice %137 {offsets = [0, 0], sizes = [1, 256], strides = [1, 1]} : vector<1x512xf32> to vector<1x256xf32>
    %139 = vector.extract_strided_slice %137 {offsets = [0, 256], sizes = [1, 256], strides = [1, 1]} : vector<1x512xf32> to vector<1x256xf32>
    %140 = vector.extract_strided_slice %125 {offsets = [0, 512], sizes = [1, 256], strides = [1, 1]} : vector<1x768xf32> to vector<1x256xf32>
    %141 = vector.extract_strided_slice %129 {offsets = [0, 512], sizes = [1, 256], strides = [1, 1]} : vector<1x768xf32> to vector<1x256xf32>
    %142 = arith.mulf %138, %141 : vector<1x256xf32>
    %143 = arith.addf %140, %142 : vector<1x256xf32>
    %144 = math.tanh %143 : vector<1x256xf32>
    %cst_46 = arith.constant 1.000000e+00 : f32
    %145 = vector.broadcast %cst_46 : f32 to vector<1x256xf32>
    %146 = arith.subf %145, %139 : vector<1x256xf32>
    %147 = arith.mulf %146, %144 : vector<1x256xf32>
    %148 = arith.mulf %139, %121 : vector<1x256xf32>
    %149 = arith.addf %147, %148 : vector<1x256xf32>
    %150 = arith.index_cast %c4_i32 : i32 to index
    %c0_47 = arith.constant 0 : index
    %151 = vector.load %arg7[%150, %c0_47] : memref<16x256xf32, #tpu.memory_space<vmem>>, vector<1x256xf32>
    tpu.vector_store %arg7[%150, %c0_47], %149 {strides = array<i32>} : memref<16x256xf32, #tpu.memory_space<vmem>>, vector<1x256xf32>,
    %c5_i32 = arith.constant 5 : i32
    %152 = arith.index_cast %c5_i32 : i32 to index
    %c0_48 = arith.constant 0 : index
    %153 = vector.load %arg9[%152, %c0_48] : memref<16x768xf32, #tpu.memory_space<vmem>>, vector<1x768xf32>
    %154 = arith.truncf %149 : vector<1x256xf32> to vector<1x256xbf16>
    %c0_49 = arith.constant 0 : index
    %c0_50 = arith.constant 0 : index
    %155 = vector.load %arg3[%c0_49, %c0_50] : memref<256x768xbf16, #tpu.memory_space<vmem>>, vector<256x768xbf16>
    %cst_51 = arith.constant dense<0.000000e+00> : vector<1x768xf32>
    %156 = tpu.matmul %154, %155, %cst_51 {dimension_numbers = #tpu.dot_dimension_numbers<[1], [0], [0], [1], [0, 0, 1, 1], [], []>} : vector<1x256xbf16>, vector<256x768xbf16>, vector<1x768xf32> -> vector<1x768xf32>
    %157 = arith.addf %156, %10 : vector<1x768xf32>
    %158 = vector.extract_strided_slice %153 {offsets = [0, 0], sizes = [1, 512], strides = [1, 1]} : vector<1x768xf32> to vector<1x512xf32>
    %159 = vector.extract_strided_slice %157 {offsets = [0, 0], sizes = [1, 512], strides = [1, 1]} : vector<1x768xf32> to vector<1x512xf32>
    %160 = arith.addf %158, %159 : vector<1x512xf32>
    %161 = arith.negf %160 : vector<1x512xf32>
    %162 = math.exp %161 : vector<1x512xf32>
    %cst_52 = arith.constant 1.000000e+00 : f32
    %163 = vector.broadcast %cst_52 : f32 to vector<1x512xf32>
    %164 = arith.addf %163, %162 : vector<1x512xf32>
    %165 = arith.divf %163, %164 : vector<1x512xf32>
    %166 = vector.extract_strided_slice %165 {offsets = [0, 0], sizes = [1, 256], strides = [1, 1]} : vector<1x512xf32> to vector<1x256xf32>
    %167 = vector.extract_strided_slice %165 {offsets = [0, 256], sizes = [1, 256], strides = [1, 1]} : vector<1x512xf32> to vector<1x256xf32>
    %168 = vector.extract_strided_slice %153 {offsets = [0, 512], sizes = [1, 256], strides = [1, 1]} : vector<1x768xf32> to vector<1x256xf32>
    %169 = vector.extract_strided_slice %157 {offsets = [0, 512], sizes = [1, 256], strides = [1, 1]} : vector<1x768xf32> to vector<1x256xf32>
    %170 = arith.mulf %166, %169 : vector<1x256xf32>
    %171 = arith.addf %168, %170 : vector<1x256xf32>
    %172 = math.tanh %171 : vector<1x256xf32>
    %cst_53 = arith.constant 1.000000e+00 : f32
    %173 = vector.broadcast %cst_53 : f32 to vector<1x256xf32>
    %174 = arith.subf %173, %167 : vector<1x256xf32>
    %175 = arith.mulf %174, %172 : vector<1x256xf32>
    %176 = arith.mulf %167, %149 : vector<1x256xf32>
    %177 = arith.addf %175, %176 : vector<1x256xf32>
    %178 = arith.index_cast %c5_i32 : i32 to index
    %c0_54 = arith.constant 0 : index
    %179 = vector.load %arg7[%178, %c0_54] : memref<16x256xf32, #tpu.memory_space<vmem>>, vector<1x256xf32>
    tpu.vector_store %arg7[%178, %c0_54], %177 {strides = array<i32>} : memref<16x256xf32, #tpu.memory_space<vmem>>, vector<1x256xf32>,
    %c6_i32 = arith.constant 6 : i32
    %180 = arith.index_cast %c6_i32 : i32 to index
    %c0_55 = arith.constant 0 : index
    %181 = vector.load %arg9[%180, %c0_55] : memref<16x768xf32, #tpu.memory_space<vmem>>, vector<1x768xf32>
    %182 = arith.truncf %177 : vector<1x256xf32> to vector<1x256xbf16>
    %c0_56 = arith.constant 0 : index
    %c0_57 = arith.constant 0 : index
    %183 = vector.load %arg3[%c0_56, %c0_57] : memref<256x768xbf16, #tpu.memory_space<vmem>>, vector<256x768xbf16>
    %cst_58 = arith.constant dense<0.000000e+00> : vector<1x768xf32>
    %184 = tpu.matmul %182, %183, %cst_58 {dimension_numbers = #tpu.dot_dimension_numbers<[1], [0], [0], [1], [0, 0, 1, 1], [], []>} : vector<1x256xbf16>, vector<256x768xbf16>, vector<1x768xf32> -> vector<1x768xf32>
    %185 = arith.addf %184, %10 : vector<1x768xf32>
    %186 = vector.extract_strided_slice %181 {offsets = [0, 0], sizes = [1, 512], strides = [1, 1]} : vector<1x768xf32> to vector<1x512xf32>
    %187 = vector.extract_strided_slice %185 {offsets = [0, 0], sizes = [1, 512], strides = [1, 1]} : vector<1x768xf32> to vector<1x512xf32>
    %188 = arith.addf %186, %187 : vector<1x512xf32>
    %189 = arith.negf %188 : vector<1x512xf32>
    %190 = math.exp %189 : vector<1x512xf32>
    %cst_59 = arith.constant 1.000000e+00 : f32
    %191 = vector.broadcast %cst_59 : f32 to vector<1x512xf32>
    %192 = arith.addf %191, %190 : vector<1x512xf32>
    %193 = arith.divf %191, %192 : vector<1x512xf32>
    %194 = vector.extract_strided_slice %193 {offsets = [0, 0], sizes = [1, 256], strides = [1, 1]} : vector<1x512xf32> to vector<1x256xf32>
    %195 = vector.extract_strided_slice %193 {offsets = [0, 256], sizes = [1, 256], strides = [1, 1]} : vector<1x512xf32> to vector<1x256xf32>
    %196 = vector.extract_strided_slice %181 {offsets = [0, 512], sizes = [1, 256], strides = [1, 1]} : vector<1x768xf32> to vector<1x256xf32>
    %197 = vector.extract_strided_slice %185 {offsets = [0, 512], sizes = [1, 256], strides = [1, 1]} : vector<1x768xf32> to vector<1x256xf32>
    %198 = arith.mulf %194, %197 : vector<1x256xf32>
    %199 = arith.addf %196, %198 : vector<1x256xf32>
    %200 = math.tanh %199 : vector<1x256xf32>
    %cst_60 = arith.constant 1.000000e+00 : f32
    %201 = vector.broadcast %cst_60 : f32 to vector<1x256xf32>
    %202 = arith.subf %201, %195 : vector<1x256xf32>
    %203 = arith.mulf %202, %200 : vector<1x256xf32>
    %204 = arith.mulf %195, %177 : vector<1x256xf32>
    %205 = arith.addf %203, %204 : vector<1x256xf32>
    %206 = arith.index_cast %c6_i32 : i32 to index
    %c0_61 = arith.constant 0 : index
    %207 = vector.load %arg7[%206, %c0_61] : memref<16x256xf32, #tpu.memory_space<vmem>>, vector<1x256xf32>
    tpu.vector_store %arg7[%206, %c0_61], %205 {strides = array<i32>} : memref<16x256xf32, #tpu.memory_space<vmem>>, vector<1x256xf32>,
    %c7_i32 = arith.constant 7 : i32
    %208 = arith.index_cast %c7_i32 : i32 to index
    %c0_62 = arith.constant 0 : index
    %209 = vector.load %arg9[%208, %c0_62] : memref<16x768xf32, #tpu.memory_space<vmem>>, vector<1x768xf32>
    %210 = arith.truncf %205 : vector<1x256xf32> to vector<1x256xbf16>
    %c0_63 = arith.constant 0 : index
    %c0_64 = arith.constant 0 : index
    %211 = vector.load %arg3[%c0_63, %c0_64] : memref<256x768xbf16, #tpu.memory_space<vmem>>, vector<256x768xbf16>
    %cst_65 = arith.constant dense<0.000000e+00> : vector<1x768xf32>
    %212 = tpu.matmul %210, %211, %cst_65 {dimension_numbers = #tpu.dot_dimension_numbers<[1], [0], [0], [1], [0, 0, 1, 1], [], []>} : vector<1x256xbf16>, vector<256x768xbf16>, vector<1x768xf32> -> vector<1x768xf32>
    %213 = arith.addf %212, %10 : vector<1x768xf32>
    %214 = vector.extract_strided_slice %209 {offsets = [0, 0], sizes = [1, 512], strides = [1, 1]} : vector<1x768xf32> to vector<1x512xf32>
    %215 = vector.extract_strided_slice %213 {offsets = [0, 0], sizes = [1, 512], strides = [1, 1]} : vector<1x768xf32> to vector<1x512xf32>
    %216 = arith.addf %214, %215 : vector<1x512xf32>
    %217 = arith.negf %216 : vector<1x512xf32>
    %218 = math.exp %217 : vector<1x512xf32>
    %cst_66 = arith.constant 1.000000e+00 : f32
    %219 = vector.broadcast %cst_66 : f32 to vector<1x512xf32>
    %220 = arith.addf %219, %218 : vector<1x512xf32>
    %221 = arith.divf %219, %220 : vector<1x512xf32>
    %222 = vector.extract_strided_slice %221 {offsets = [0, 0], sizes = [1, 256], strides = [1, 1]} : vector<1x512xf32> to vector<1x256xf32>
    %223 = vector.extract_strided_slice %221 {offsets = [0, 256], sizes = [1, 256], strides = [1, 1]} : vector<1x512xf32> to vector<1x256xf32>
    %224 = vector.extract_strided_slice %209 {offsets = [0, 512], sizes = [1, 256], strides = [1, 1]} : vector<1x768xf32> to vector<1x256xf32>
    %225 = vector.extract_strided_slice %213 {offsets = [0, 512], sizes = [1, 256], strides = [1, 1]} : vector<1x768xf32> to vector<1x256xf32>
    %226 = arith.mulf %222, %225 : vector<1x256xf32>
    %227 = arith.addf %224, %226 : vector<1x256xf32>
    %228 = math.tanh %227 : vector<1x256xf32>
    %cst_67 = arith.constant 1.000000e+00 : f32
    %229 = vector.broadcast %cst_67 : f32 to vector<1x256xf32>
    %230 = arith.subf %229, %223 : vector<1x256xf32>
    %231 = arith.mulf %230, %228 : vector<1x256xf32>
    %232 = arith.mulf %223, %205 : vector<1x256xf32>
    %233 = arith.addf %231, %232 : vector<1x256xf32>
    %234 = arith.index_cast %c7_i32 : i32 to index
    %c0_68 = arith.constant 0 : index
    %235 = vector.load %arg7[%234, %c0_68] : memref<16x256xf32, #tpu.memory_space<vmem>>, vector<1x256xf32>
    tpu.vector_store %arg7[%234, %c0_68], %233 {strides = array<i32>} : memref<16x256xf32, #tpu.memory_space<vmem>>, vector<1x256xf32>,
    %c8_i32 = arith.constant 8 : i32
    %236 = arith.index_cast %c8_i32 : i32 to index
    %c0_69 = arith.constant 0 : index
    %237 = vector.load %arg9[%236, %c0_69] : memref<16x768xf32, #tpu.memory_space<vmem>>, vector<1x768xf32>
    %238 = arith.truncf %233 : vector<1x256xf32> to vector<1x256xbf16>
    %c0_70 = arith.constant 0 : index
    %c0_71 = arith.constant 0 : index
    %239 = vector.load %arg3[%c0_70, %c0_71] : memref<256x768xbf16, #tpu.memory_space<vmem>>, vector<256x768xbf16>
    %cst_72 = arith.constant dense<0.000000e+00> : vector<1x768xf32>
    %240 = tpu.matmul %238, %239, %cst_72 {dimension_numbers = #tpu.dot_dimension_numbers<[1], [0], [0], [1], [0, 0, 1, 1], [], []>} : vector<1x256xbf16>, vector<256x768xbf16>, vector<1x768xf32> -> vector<1x768xf32>
    %241 = arith.addf %240, %10 : vector<1x768xf32>
    %242 = vector.extract_strided_slice %237 {offsets = [0, 0], sizes = [1, 512], strides = [1, 1]} : vector<1x768xf32> to vector<1x512xf32>
    %243 = vector.extract_strided_slice %241 {offsets = [0, 0], sizes = [1, 512], strides = [1, 1]} : vector<1x768xf32> to vector<1x512xf32>
    %244 = arith.addf %242, %243 : vector<1x512xf32>
    %245 = arith.negf %244 : vector<1x512xf32>
    %246 = math.exp %245 : vector<1x512xf32>
    %cst_73 = arith.constant 1.000000e+00 : f32
    %247 = vector.broadcast %cst_73 : f32 to vector<1x512xf32>
    %248 = arith.addf %247, %246 : vector<1x512xf32>
    %249 = arith.divf %247, %248 : vector<1x512xf32>
    %250 = vector.extract_strided_slice %249 {offsets = [0, 0], sizes = [1, 256], strides = [1, 1]} : vector<1x512xf32> to vector<1x256xf32>
    %251 = vector.extract_strided_slice %249 {offsets = [0, 256], sizes = [1, 256], strides = [1, 1]} : vector<1x512xf32> to vector<1x256xf32>
    %252 = vector.extract_strided_slice %237 {offsets = [0, 512], sizes = [1, 256], strides = [1, 1]} : vector<1x768xf32> to vector<1x256xf32>
    %253 = vector.extract_strided_slice %241 {offsets = [0, 512], sizes = [1, 256], strides = [1, 1]} : vector<1x768xf32> to vector<1x256xf32>
    %254 = arith.mulf %250, %253 : vector<1x256xf32>
    %255 = arith.addf %252, %254 : vector<1x256xf32>
    %256 = math.tanh %255 : vector<1x256xf32>
    %cst_74 = arith.constant 1.000000e+00 : f32
    %257 = vector.broadcast %cst_74 : f32 to vector<1x256xf32>
    %258 = arith.subf %257, %251 : vector<1x256xf32>
    %259 = arith.mulf %258, %256 : vector<1x256xf32>
    %260 = arith.mulf %251, %233 : vector<1x256xf32>
    %261 = arith.addf %259, %260 : vector<1x256xf32>
    %262 = arith.index_cast %c8_i32 : i32 to index
    %c0_75 = arith.constant 0 : index
    %263 = vector.load %arg7[%262, %c0_75] : memref<16x256xf32, #tpu.memory_space<vmem>>, vector<1x256xf32>
    tpu.vector_store %arg7[%262, %c0_75], %261 {strides = array<i32>} : memref<16x256xf32, #tpu.memory_space<vmem>>, vector<1x256xf32>,
    %c9_i32 = arith.constant 9 : i32
    %264 = arith.index_cast %c9_i32 : i32 to index
    %c0_76 = arith.constant 0 : index
    %265 = vector.load %arg9[%264, %c0_76] : memref<16x768xf32, #tpu.memory_space<vmem>>, vector<1x768xf32>
    %266 = arith.truncf %261 : vector<1x256xf32> to vector<1x256xbf16>
    %c0_77 = arith.constant 0 : index
    %c0_78 = arith.constant 0 : index
    %267 = vector.load %arg3[%c0_77, %c0_78] : memref<256x768xbf16, #tpu.memory_space<vmem>>, vector<256x768xbf16>
    %cst_79 = arith.constant dense<0.000000e+00> : vector<1x768xf32>
    %268 = tpu.matmul %266, %267, %cst_79 {dimension_numbers = #tpu.dot_dimension_numbers<[1], [0], [0], [1], [0, 0, 1, 1], [], []>} : vector<1x256xbf16>, vector<256x768xbf16>, vector<1x768xf32> -> vector<1x768xf32>
    %269 = arith.addf %268, %10 : vector<1x768xf32>
    %270 = vector.extract_strided_slice %265 {offsets = [0, 0], sizes = [1, 512], strides = [1, 1]} : vector<1x768xf32> to vector<1x512xf32>
    %271 = vector.extract_strided_slice %269 {offsets = [0, 0], sizes = [1, 512], strides = [1, 1]} : vector<1x768xf32> to vector<1x512xf32>
    %272 = arith.addf %270, %271 : vector<1x512xf32>
    %273 = arith.negf %272 : vector<1x512xf32>
    %274 = math.exp %273 : vector<1x512xf32>
    %cst_80 = arith.constant 1.000000e+00 : f32
    %275 = vector.broadcast %cst_80 : f32 to vector<1x512xf32>
    %276 = arith.addf %275, %274 : vector<1x512xf32>
    %277 = arith.divf %275, %276 : vector<1x512xf32>
    %278 = vector.extract_strided_slice %277 {offsets = [0, 0], sizes = [1, 256], strides = [1, 1]} : vector<1x512xf32> to vector<1x256xf32>
    %279 = vector.extract_strided_slice %277 {offsets = [0, 256], sizes = [1, 256], strides = [1, 1]} : vector<1x512xf32> to vector<1x256xf32>
    %280 = vector.extract_strided_slice %265 {offsets = [0, 512], sizes = [1, 256], strides = [1, 1]} : vector<1x768xf32> to vector<1x256xf32>
    %281 = vector.extract_strided_slice %269 {offsets = [0, 512], sizes = [1, 256], strides = [1, 1]} : vector<1x768xf32> to vector<1x256xf32>
    %282 = arith.mulf %278, %281 : vector<1x256xf32>
    %283 = arith.addf %280, %282 : vector<1x256xf32>
    %284 = math.tanh %283 : vector<1x256xf32>
    %cst_81 = arith.constant 1.000000e+00 : f32
    %285 = vector.broadcast %cst_81 : f32 to vector<1x256xf32>
    %286 = arith.subf %285, %279 : vector<1x256xf32>
    %287 = arith.mulf %286, %284 : vector<1x256xf32>
    %288 = arith.mulf %279, %261 : vector<1x256xf32>
    %289 = arith.addf %287, %288 : vector<1x256xf32>
    %290 = arith.index_cast %c9_i32 : i32 to index
    %c0_82 = arith.constant 0 : index
    %291 = vector.load %arg7[%290, %c0_82] : memref<16x256xf32, #tpu.memory_space<vmem>>, vector<1x256xf32>
    tpu.vector_store %arg7[%290, %c0_82], %289 {strides = array<i32>} : memref<16x256xf32, #tpu.memory_space<vmem>>, vector<1x256xf32>,
    %c10_i32 = arith.constant 10 : i32
    %292 = arith.index_cast %c10_i32 : i32 to index
    %c0_83 = arith.constant 0 : index
    %293 = vector.load %arg9[%292, %c0_83] : memref<16x768xf32, #tpu.memory_space<vmem>>, vector<1x768xf32>
    %294 = arith.truncf %289 : vector<1x256xf32> to vector<1x256xbf16>
    %c0_84 = arith.constant 0 : index
    %c0_85 = arith.constant 0 : index
    %295 = vector.load %arg3[%c0_84, %c0_85] : memref<256x768xbf16, #tpu.memory_space<vmem>>, vector<256x768xbf16>
    %cst_86 = arith.constant dense<0.000000e+00> : vector<1x768xf32>
    %296 = tpu.matmul %294, %295, %cst_86 {dimension_numbers = #tpu.dot_dimension_numbers<[1], [0], [0], [1], [0, 0, 1, 1], [], []>} : vector<1x256xbf16>, vector<256x768xbf16>, vector<1x768xf32> -> vector<1x768xf32>
    %297 = arith.addf %296, %10 : vector<1x768xf32>
    %298 = vector.extract_strided_slice %293 {offsets = [0, 0], sizes = [1, 512], strides = [1, 1]} : vector<1x768xf32> to vector<1x512xf32>
    %299 = vector.extract_strided_slice %297 {offsets = [0, 0], sizes = [1, 512], strides = [1, 1]} : vector<1x768xf32> to vector<1x512xf32>
    %300 = arith.addf %298, %299 : vector<1x512xf32>
    %301 = arith.negf %300 : vector<1x512xf32>
    %302 = math.exp %301 : vector<1x512xf32>
    %cst_87 = arith.constant 1.000000e+00 : f32
    %303 = vector.broadcast %cst_87 : f32 to vector<1x512xf32>
    %304 = arith.addf %303, %302 : vector<1x512xf32>
    %305 = arith.divf %303, %304 : vector<1x512xf32>
    %306 = vector.extract_strided_slice %305 {offsets = [0, 0], sizes = [1, 256], strides = [1, 1]} : vector<1x512xf32> to vector<1x256xf32>
    %307 = vector.extract_strided_slice %305 {offsets = [0, 256], sizes = [1, 256], strides = [1, 1]} : vector<1x512xf32> to vector<1x256xf32>
    %308 = vector.extract_strided_slice %293 {offsets = [0, 512], sizes = [1, 256], strides = [1, 1]} : vector<1x768xf32> to vector<1x256xf32>
    %309 = vector.extract_strided_slice %297 {offsets = [0, 512], sizes = [1, 256], strides = [1, 1]} : vector<1x768xf32> to vector<1x256xf32>
    %310 = arith.mulf %306, %309 : vector<1x256xf32>
    %311 = arith.addf %308, %310 : vector<1x256xf32>
    %312 = math.tanh %311 : vector<1x256xf32>
    %cst_88 = arith.constant 1.000000e+00 : f32
    %313 = vector.broadcast %cst_88 : f32 to vector<1x256xf32>
    %314 = arith.subf %313, %307 : vector<1x256xf32>
    %315 = arith.mulf %314, %312 : vector<1x256xf32>
    %316 = arith.mulf %307, %289 : vector<1x256xf32>
    %317 = arith.addf %315, %316 : vector<1x256xf32>
    %318 = arith.index_cast %c10_i32 : i32 to index
    %c0_89 = arith.constant 0 : index
    %319 = vector.load %arg7[%318, %c0_89] : memref<16x256xf32, #tpu.memory_space<vmem>>, vector<1x256xf32>
    tpu.vector_store %arg7[%318, %c0_89], %317 {strides = array<i32>} : memref<16x256xf32, #tpu.memory_space<vmem>>, vector<1x256xf32>,
    %c11_i32 = arith.constant 11 : i32
    %320 = arith.index_cast %c11_i32 : i32 to index
    %c0_90 = arith.constant 0 : index
    %321 = vector.load %arg9[%320, %c0_90] : memref<16x768xf32, #tpu.memory_space<vmem>>, vector<1x768xf32>
    %322 = arith.truncf %317 : vector<1x256xf32> to vector<1x256xbf16>
    %c0_91 = arith.constant 0 : index
    %c0_92 = arith.constant 0 : index
    %323 = vector.load %arg3[%c0_91, %c0_92] : memref<256x768xbf16, #tpu.memory_space<vmem>>, vector<256x768xbf16>
    %cst_93 = arith.constant dense<0.000000e+00> : vector<1x768xf32>
    %324 = tpu.matmul %322, %323, %cst_93 {dimension_numbers = #tpu.dot_dimension_numbers<[1], [0], [0], [1], [0, 0, 1, 1], [], []>} : vector<1x256xbf16>, vector<256x768xbf16>, vector<1x768xf32> -> vector<1x768xf32>
    %325 = arith.addf %324, %10 : vector<1x768xf32>
    %326 = vector.extract_strided_slice %321 {offsets = [0, 0], sizes = [1, 512], strides = [1, 1]} : vector<1x768xf32> to vector<1x512xf32>
    %327 = vector.extract_strided_slice %325 {offsets = [0, 0], sizes = [1, 512], strides = [1, 1]} : vector<1x768xf32> to vector<1x512xf32>
    %328 = arith.addf %326, %327 : vector<1x512xf32>
    %329 = arith.negf %328 : vector<1x512xf32>
    %330 = math.exp %329 : vector<1x512xf32>
    %cst_94 = arith.constant 1.000000e+00 : f32
    %331 = vector.broadcast %cst_94 : f32 to vector<1x512xf32>
    %332 = arith.addf %331, %330 : vector<1x512xf32>
    %333 = arith.divf %331, %332 : vector<1x512xf32>
    %334 = vector.extract_strided_slice %333 {offsets = [0, 0], sizes = [1, 256], strides = [1, 1]} : vector<1x512xf32> to vector<1x256xf32>
    %335 = vector.extract_strided_slice %333 {offsets = [0, 256], sizes = [1, 256], strides = [1, 1]} : vector<1x512xf32> to vector<1x256xf32>
    %336 = vector.extract_strided_slice %321 {offsets = [0, 512], sizes = [1, 256], strides = [1, 1]} : vector<1x768xf32> to vector<1x256xf32>
    %337 = vector.extract_strided_slice %325 {offsets = [0, 512], sizes = [1, 256], strides = [1, 1]} : vector<1x768xf32> to vector<1x256xf32>
    %338 = arith.mulf %334, %337 : vector<1x256xf32>
    %339 = arith.addf %336, %338 : vector<1x256xf32>
    %340 = math.tanh %339 : vector<1x256xf32>
    %cst_95 = arith.constant 1.000000e+00 : f32
    %341 = vector.broadcast %cst_95 : f32 to vector<1x256xf32>
    %342 = arith.subf %341, %335 : vector<1x256xf32>
    %343 = arith.mulf %342, %340 : vector<1x256xf32>
    %344 = arith.mulf %335, %317 : vector<1x256xf32>
    %345 = arith.addf %343, %344 : vector<1x256xf32>
    %346 = arith.index_cast %c11_i32 : i32 to index
    %c0_96 = arith.constant 0 : index
    %347 = vector.load %arg7[%346, %c0_96] : memref<16x256xf32, #tpu.memory_space<vmem>>, vector<1x256xf32>
    tpu.vector_store %arg7[%346, %c0_96], %345 {strides = array<i32>} : memref<16x256xf32, #tpu.memory_space<vmem>>, vector<1x256xf32>,
    %c12_i32 = arith.constant 12 : i32
    %348 = arith.index_cast %c12_i32 : i32 to index
    %c0_97 = arith.constant 0 : index
    %349 = vector.load %arg9[%348, %c0_97] : memref<16x768xf32, #tpu.memory_space<vmem>>, vector<1x768xf32>
    %350 = arith.truncf %345 : vector<1x256xf32> to vector<1x256xbf16>
    %c0_98 = arith.constant 0 : index
    %c0_99 = arith.constant 0 : index
    %351 = vector.load %arg3[%c0_98, %c0_99] : memref<256x768xbf16, #tpu.memory_space<vmem>>, vector<256x768xbf16>
    %cst_100 = arith.constant dense<0.000000e+00> : vector<1x768xf32>
    %352 = tpu.matmul %350, %351, %cst_100 {dimension_numbers = #tpu.dot_dimension_numbers<[1], [0], [0], [1], [0, 0, 1, 1], [], []>} : vector<1x256xbf16>, vector<256x768xbf16>, vector<1x768xf32> -> vector<1x768xf32>
    %353 = arith.addf %352, %10 : vector<1x768xf32>
    %354 = vector.extract_strided_slice %349 {offsets = [0, 0], sizes = [1, 512], strides = [1, 1]} : vector<1x768xf32> to vector<1x512xf32>
    %355 = vector.extract_strided_slice %353 {offsets = [0, 0], sizes = [1, 512], strides = [1, 1]} : vector<1x768xf32> to vector<1x512xf32>
    %356 = arith.addf %354, %355 : vector<1x512xf32>
    %357 = arith.negf %356 : vector<1x512xf32>
    %358 = math.exp %357 : vector<1x512xf32>
    %cst_101 = arith.constant 1.000000e+00 : f32
    %359 = vector.broadcast %cst_101 : f32 to vector<1x512xf32>
    %360 = arith.addf %359, %358 : vector<1x512xf32>
    %361 = arith.divf %359, %360 : vector<1x512xf32>
    %362 = vector.extract_strided_slice %361 {offsets = [0, 0], sizes = [1, 256], strides = [1, 1]} : vector<1x512xf32> to vector<1x256xf32>
    %363 = vector.extract_strided_slice %361 {offsets = [0, 256], sizes = [1, 256], strides = [1, 1]} : vector<1x512xf32> to vector<1x256xf32>
    %364 = vector.extract_strided_slice %349 {offsets = [0, 512], sizes = [1, 256], strides = [1, 1]} : vector<1x768xf32> to vector<1x256xf32>
    %365 = vector.extract_strided_slice %353 {offsets = [0, 512], sizes = [1, 256], strides = [1, 1]} : vector<1x768xf32> to vector<1x256xf32>
    %366 = arith.mulf %362, %365 : vector<1x256xf32>
    %367 = arith.addf %364, %366 : vector<1x256xf32>
    %368 = math.tanh %367 : vector<1x256xf32>
    %cst_102 = arith.constant 1.000000e+00 : f32
    %369 = vector.broadcast %cst_102 : f32 to vector<1x256xf32>
    %370 = arith.subf %369, %363 : vector<1x256xf32>
    %371 = arith.mulf %370, %368 : vector<1x256xf32>
    %372 = arith.mulf %363, %345 : vector<1x256xf32>
    %373 = arith.addf %371, %372 : vector<1x256xf32>
    %374 = arith.index_cast %c12_i32 : i32 to index
    %c0_103 = arith.constant 0 : index
    %375 = vector.load %arg7[%374, %c0_103] : memref<16x256xf32, #tpu.memory_space<vmem>>, vector<1x256xf32>
    tpu.vector_store %arg7[%374, %c0_103], %373 {strides = array<i32>} : memref<16x256xf32, #tpu.memory_space<vmem>>, vector<1x256xf32>,
    %c13_i32 = arith.constant 13 : i32
    %376 = arith.index_cast %c13_i32 : i32 to index
    %c0_104 = arith.constant 0 : index
    %377 = vector.load %arg9[%376, %c0_104] : memref<16x768xf32, #tpu.memory_space<vmem>>, vector<1x768xf32>
    %378 = arith.truncf %373 : vector<1x256xf32> to vector<1x256xbf16>
    %c0_105 = arith.constant 0 : index
    %c0_106 = arith.constant 0 : index
    %379 = vector.load %arg3[%c0_105, %c0_106] : memref<256x768xbf16, #tpu.memory_space<vmem>>, vector<256x768xbf16>
    %cst_107 = arith.constant dense<0.000000e+00> : vector<1x768xf32>
    %380 = tpu.matmul %378, %379, %cst_107 {dimension_numbers = #tpu.dot_dimension_numbers<[1], [0], [0], [1], [0, 0, 1, 1], [], []>} : vector<1x256xbf16>, vector<256x768xbf16>, vector<1x768xf32> -> vector<1x768xf32>
    %381 = arith.addf %380, %10 : vector<1x768xf32>
    %382 = vector.extract_strided_slice %377 {offsets = [0, 0], sizes = [1, 512], strides = [1, 1]} : vector<1x768xf32> to vector<1x512xf32>
    %383 = vector.extract_strided_slice %381 {offsets = [0, 0], sizes = [1, 512], strides = [1, 1]} : vector<1x768xf32> to vector<1x512xf32>
    %384 = arith.addf %382, %383 : vector<1x512xf32>
    %385 = arith.negf %384 : vector<1x512xf32>
    %386 = math.exp %385 : vector<1x512xf32>
    %cst_108 = arith.constant 1.000000e+00 : f32
    %387 = vector.broadcast %cst_108 : f32 to vector<1x512xf32>
    %388 = arith.addf %387, %386 : vector<1x512xf32>
    %389 = arith.divf %387, %388 : vector<1x512xf32>
    %390 = vector.extract_strided_slice %389 {offsets = [0, 0], sizes = [1, 256], strides = [1, 1]} : vector<1x512xf32> to vector<1x256xf32>
    %391 = vector.extract_strided_slice %389 {offsets = [0, 256], sizes = [1, 256], strides = [1, 1]} : vector<1x512xf32> to vector<1x256xf32>
    %392 = vector.extract_strided_slice %377 {offsets = [0, 512], sizes = [1, 256], strides = [1, 1]} : vector<1x768xf32> to vector<1x256xf32>
    %393 = vector.extract_strided_slice %381 {offsets = [0, 512], sizes = [1, 256], strides = [1, 1]} : vector<1x768xf32> to vector<1x256xf32>
    %394 = arith.mulf %390, %393 : vector<1x256xf32>
    %395 = arith.addf %392, %394 : vector<1x256xf32>
    %396 = math.tanh %395 : vector<1x256xf32>
    %cst_109 = arith.constant 1.000000e+00 : f32
    %397 = vector.broadcast %cst_109 : f32 to vector<1x256xf32>
    %398 = arith.subf %397, %391 : vector<1x256xf32>
    %399 = arith.mulf %398, %396 : vector<1x256xf32>
    %400 = arith.mulf %391, %373 : vector<1x256xf32>
    %401 = arith.addf %399, %400 : vector<1x256xf32>
    %402 = arith.index_cast %c13_i32 : i32 to index
    %c0_110 = arith.constant 0 : index
    %403 = vector.load %arg7[%402, %c0_110] : memref<16x256xf32, #tpu.memory_space<vmem>>, vector<1x256xf32>
    tpu.vector_store %arg7[%402, %c0_110], %401 {strides = array<i32>} : memref<16x256xf32, #tpu.memory_space<vmem>>, vector<1x256xf32>,
    %c14_i32 = arith.constant 14 : i32
    %404 = arith.index_cast %c14_i32 : i32 to index
    %c0_111 = arith.constant 0 : index
    %405 = vector.load %arg9[%404, %c0_111] : memref<16x768xf32, #tpu.memory_space<vmem>>, vector<1x768xf32>
    %406 = arith.truncf %401 : vector<1x256xf32> to vector<1x256xbf16>
    %c0_112 = arith.constant 0 : index
    %c0_113 = arith.constant 0 : index
    %407 = vector.load %arg3[%c0_112, %c0_113] : memref<256x768xbf16, #tpu.memory_space<vmem>>, vector<256x768xbf16>
    %cst_114 = arith.constant dense<0.000000e+00> : vector<1x768xf32>
    %408 = tpu.matmul %406, %407, %cst_114 {dimension_numbers = #tpu.dot_dimension_numbers<[1], [0], [0], [1], [0, 0, 1, 1], [], []>} : vector<1x256xbf16>, vector<256x768xbf16>, vector<1x768xf32> -> vector<1x768xf32>
    %409 = arith.addf %408, %10 : vector<1x768xf32>
    %410 = vector.extract_strided_slice %405 {offsets = [0, 0], sizes = [1, 512], strides = [1, 1]} : vector<1x768xf32> to vector<1x512xf32>
    %411 = vector.extract_strided_slice %409 {offsets = [0, 0], sizes = [1, 512], strides = [1, 1]} : vector<1x768xf32> to vector<1x512xf32>
    %412 = arith.addf %410, %411 : vector<1x512xf32>
    %413 = arith.negf %412 : vector<1x512xf32>
    %414 = math.exp %413 : vector<1x512xf32>
    %cst_115 = arith.constant 1.000000e+00 : f32
    %415 = vector.broadcast %cst_115 : f32 to vector<1x512xf32>
    %416 = arith.addf %415, %414 : vector<1x512xf32>
    %417 = arith.divf %415, %416 : vector<1x512xf32>
    %418 = vector.extract_strided_slice %417 {offsets = [0, 0], sizes = [1, 256], strides = [1, 1]} : vector<1x512xf32> to vector<1x256xf32>
    %419 = vector.extract_strided_slice %417 {offsets = [0, 256], sizes = [1, 256], strides = [1, 1]} : vector<1x512xf32> to vector<1x256xf32>
    %420 = vector.extract_strided_slice %405 {offsets = [0, 512], sizes = [1, 256], strides = [1, 1]} : vector<1x768xf32> to vector<1x256xf32>
    %421 = vector.extract_strided_slice %409 {offsets = [0, 512], sizes = [1, 256], strides = [1, 1]} : vector<1x768xf32> to vector<1x256xf32>
    %422 = arith.mulf %418, %421 : vector<1x256xf32>
    %423 = arith.addf %420, %422 : vector<1x256xf32>
    %424 = math.tanh %423 : vector<1x256xf32>
    %cst_116 = arith.constant 1.000000e+00 : f32
    %425 = vector.broadcast %cst_116 : f32 to vector<1x256xf32>
    %426 = arith.subf %425, %419 : vector<1x256xf32>
    %427 = arith.mulf %426, %424 : vector<1x256xf32>
    %428 = arith.mulf %419, %401 : vector<1x256xf32>
    %429 = arith.addf %427, %428 : vector<1x256xf32>
    %430 = arith.index_cast %c14_i32 : i32 to index
    %c0_117 = arith.constant 0 : index
    %431 = vector.load %arg7[%430, %c0_117] : memref<16x256xf32, #tpu.memory_space<vmem>>, vector<1x256xf32>
    tpu.vector_store %arg7[%430, %c0_117], %429 {strides = array<i32>} : memref<16x256xf32, #tpu.memory_space<vmem>>, vector<1x256xf32>,
    %c15_i32 = arith.constant 15 : i32
    %432 = arith.index_cast %c15_i32 : i32 to index
    %c0_118 = arith.constant 0 : index
    %433 = vector.load %arg9[%432, %c0_118] : memref<16x768xf32, #tpu.memory_space<vmem>>, vector<1x768xf32>
    %434 = arith.truncf %429 : vector<1x256xf32> to vector<1x256xbf16>
    %c0_119 = arith.constant 0 : index
    %c0_120 = arith.constant 0 : index
    %435 = vector.load %arg3[%c0_119, %c0_120] : memref<256x768xbf16, #tpu.memory_space<vmem>>, vector<256x768xbf16>
    %cst_121 = arith.constant dense<0.000000e+00> : vector<1x768xf32>
    %436 = tpu.matmul %434, %435, %cst_121 {dimension_numbers = #tpu.dot_dimension_numbers<[1], [0], [0], [1], [0, 0, 1, 1], [], []>} : vector<1x256xbf16>, vector<256x768xbf16>, vector<1x768xf32> -> vector<1x768xf32>
    %437 = arith.addf %436, %10 : vector<1x768xf32>
    %438 = vector.extract_strided_slice %433 {offsets = [0, 0], sizes = [1, 512], strides = [1, 1]} : vector<1x768xf32> to vector<1x512xf32>
    %439 = vector.extract_strided_slice %437 {offsets = [0, 0], sizes = [1, 512], strides = [1, 1]} : vector<1x768xf32> to vector<1x512xf32>
    %440 = arith.addf %438, %439 : vector<1x512xf32>
    %441 = arith.negf %440 : vector<1x512xf32>
    %442 = math.exp %441 : vector<1x512xf32>
    %cst_122 = arith.constant 1.000000e+00 : f32
    %443 = vector.broadcast %cst_122 : f32 to vector<1x512xf32>
    %444 = arith.addf %443, %442 : vector<1x512xf32>
    %445 = arith.divf %443, %444 : vector<1x512xf32>
    %446 = vector.extract_strided_slice %445 {offsets = [0, 0], sizes = [1, 256], strides = [1, 1]} : vector<1x512xf32> to vector<1x256xf32>
    %447 = vector.extract_strided_slice %445 {offsets = [0, 256], sizes = [1, 256], strides = [1, 1]} : vector<1x512xf32> to vector<1x256xf32>
    %448 = vector.extract_strided_slice %433 {offsets = [0, 512], sizes = [1, 256], strides = [1, 1]} : vector<1x768xf32> to vector<1x256xf32>
    %449 = vector.extract_strided_slice %437 {offsets = [0, 512], sizes = [1, 256], strides = [1, 1]} : vector<1x768xf32> to vector<1x256xf32>
    %450 = arith.mulf %446, %449 : vector<1x256xf32>
    %451 = arith.addf %448, %450 : vector<1x256xf32>
    %452 = math.tanh %451 : vector<1x256xf32>
    %cst_123 = arith.constant 1.000000e+00 : f32
    %453 = vector.broadcast %cst_123 : f32 to vector<1x256xf32>
    %454 = arith.subf %453, %447 : vector<1x256xf32>
    %455 = arith.mulf %454, %452 : vector<1x256xf32>
    %456 = arith.mulf %447, %429 : vector<1x256xf32>
    %457 = arith.addf %455, %456 : vector<1x256xf32>
    %458 = arith.index_cast %c15_i32 : i32 to index
    %c0_124 = arith.constant 0 : index
    %459 = vector.load %arg7[%458, %c0_124] : memref<16x256xf32, #tpu.memory_space<vmem>>, vector<1x256xf32>
    tpu.vector_store %arg7[%458, %c0_124], %457 {strides = array<i32>} : memref<16x256xf32, #tpu.memory_space<vmem>>, vector<1x256xf32>,
    %c16_i32 = arith.constant 16 : i32
    %c0_125 = arith.constant 0 : index
    %c0_126 = arith.constant 0 : index
    %460 = vector.load %arg8[%c0_125, %c0_126] : memref<1x256xf32, #tpu.memory_space<vmem>>, vector<1x256xf32>
    tpu.vector_store %arg8[%c0_125, %c0_126], %457 {strides = array<i32>} : memref<1x256xf32, #tpu.memory_space<vmem>>, vector<1x256xf32>,
    return
  }
  func.func @transform_0(%arg0: i32) -> (i32, i32) {
    %c0_i32 = arith.constant 0 : i32
    %c0_i32_0 = arith.constant 0 : i32
    return %arg0, %c0_i32 : i32, i32
  }
  func.func @transform_1(%arg0: i32) -> (i32, i32) {
    %c0_i32 = arith.constant 0 : i32
    %c0_i32_0 = arith.constant 0 : i32
    %c0_i32_1 = arith.constant 0 : i32
    return %c0_i32, %c0_i32_0 : i32, i32
  }
  func.func @transform_2(%arg0: i32) -> (i32, i32) {
    %c0_i32 = arith.constant 0 : i32
    %c0_i32_0 = arith.constant 0 : i32
    %c0_i32_1 = arith.constant 0 : i32
    return %c0_i32, %c0_i32_0 : i32, i32
  }
  func.func @transform_3(%arg0: i32) -> (i32, i32) {
    %c0_i32 = arith.constant 0 : i32
    %c0_i32_0 = arith.constant 0 : i32
    %c0_i32_1 = arith.constant 0 : i32
    return %c0_i32, %c0_i32_0 : i32, i32
  }
  func.func @transform_4(%arg0: i32) -> (i32, i32) {
    %c0_i32 = arith.constant 0 : i32
    %c0_i32_0 = arith.constant 0 : i32
    %c0_i32_1 = arith.constant 0 : i32
    return %c0_i32, %c0_i32_0 : i32, i32
  }
  func.func @transform_5(%arg0: i32) -> (i32, i32) {
    %c0_i32 = arith.constant 0 : i32
    %c0_i32_0 = arith.constant 0 : i32
    %c0_i32_1 = arith.constant 0 : i32
    return %c0_i32, %c0_i32_0 : i32, i32
  }
  func.func @transform_6(%arg0: i32) -> (i32, i32) {
    %c0_i32 = arith.constant 0 : i32
    %c0_i32_0 = arith.constant 0 : i32
    return %arg0, %c0_i32 : i32, i32
  }
}

</mosaic_0001>

<bundles_post_ra>
// kernel: tpu_custom_call.1
= control target key start
LH: loop header
LB: loop body
LE: loop exit
PB: predicated region body
PF: predicated region fallthrough
CT: control target
= control target key end

     0   :  { %11 = vsyncpa [#allocation5], 0  ;;  %s20721_s0 = inlined_call_operand.hbm [shape: bf16[48,256], index: 0, kind: input, shape index: {}]   ;;  %s20722_s1 = inlined_call_operand.hbm [shape: bf16[256,768], index: 1, kind: input, shape index: {}]   ;;  %s20723_s2 = inlined_call_operand.hbm [shape: bf16[256,768], index: 2, kind: input, shape index: {}]   ;;  %s20724_s3 = inlined_call_operand.vmem [shape: f32[1,768], index: 3, kind: input, shape index: {}]   ;;  %s20725_s4 = inlined_call_operand.vmem [shape: f32[1,768], index: 4, kind: input, shape index: {}]   ;;  %s20726_s5 = inlined_call_operand.vmem [shape: f32[1,256], index: 5, kind: input, shape index: {}]   ;;  %s20727_s6 = inlined_call_operand.hbm [shape: f32[48,256], index: 6, kind: output, shape index: {}]  }
   0x1   :  { %13 = vsyncpa [#allocation5 + $0x1], 0 }
   0x2   :  { %14 = vsyncpa [#allocation8], 0 }
   0x3   :  { %15 = vsyncpa [#allocation6], 0 }
   0x4   :  { %17 = vsyncpa [#allocation6 + $0x1], 0  ;;  %s17220_s21 = smov 0   ;;  %s17222_s22 = smov 0  }
   0x5   :  { %s17224_s23 = smov 0   ;;  %s17226_s24 = smov 0  }
   0x6 LB: > { %s17241_s25 = sadd.s32 4294967295, %s17172_s24   ;;  %s13792_s26 = sadd.s32 4294967294, %s17172_s24   ;;  %s17172_s24 = sphi %s17226_s24, %s21390_s24   ;;  %s17168_s23 = sphi %s17224_s23, %s21389_s23   ;;  %s17164_s22 = sphi %s17222_s22, %s21388_s22   ;;  %s17160_s21 = sphi %s17220_s21, %s21387_s21  }
   0x7   : > { %p43_p0 = scmp.ne.s32.totalorder %s17164_s22, %s17160_s21  ;;  %p20728_p1 = scmp.eq.s32.totalorder %s17241_s25, 0 }
   0x8   : > { %p178_p3 = scmp.eq.s32.totalorder %s13792_s26, 2  ;;  %p13793_p5 = scmp.ge.s32.totalorder %s17172_s24, 1 }
   0x9   : > { %p17250_p4 = por %p20728_p1, %p43_p0  ;;  %p185_p7 = scmp.lt.s32.totalorder %s17172_s24, 4 }
   0xa   : > { %p17255_p6 = por %p178_p3, %p43_p0  ;;  %s17174_s30 = smov [#allocation7]  }
   0xb   : > { %s20950_s27 = scalar_select %p17250_p4, 1, 0 }
   0xc   : > { %s20951_s28 = scalar_select %p17255_p6, 1, 0 }
   0xd   : > { %p17261_p9 = pnand %p13793_p5, %p185_p7  ;;  %s197_s7 = sshll.u32 %s17174_s30, 4  ;;  %s198_s7 = int_to_ptr.vmem [resolvable:$true] %s197_s7 }
   0xe   : > { %s17175_s9 = smov [#allocation9]   ;;  %s17016_s13 = scalar_lea.hbm %s20722_s1, 12288 }
   0xf   : > { %s20952_s29 = scalar_select %p17261_p9, 1, 0 }
  0x10   : > { %p15494_p10 = pneg %p17261_p9  ;;  %s210_s10 = sshll.u32 %s17175_s9, 4  ;;  %s17273_s10 = int_to_ptr.vmem [resolvable:$true] %s210_s10 }
  0x11   : > { %p17017_p12 = scmp.ne.s32.totalorder %s20722_s1, %s17016_s13  ;;  %p17023_p5 = scmp.lt.u32.totalorder %s17016_s13, %s20722_s1 }
  0x12   : > { %p17269_p11 = pnand %p15494_p10, %p20728_p1 }
  0x14   : > { %p17018_p13 = pneg %p17269_p11 }
  0x16   : > { %p17019_p0 = pnand %p17018_p13, %p17017_p12 }
  0x18   : > { %p17020_p3 = pneg %p17019_p0 }
  0x1a   : > { %p17025_p7 = pnand %p17023_p5, %p17020_p3 }
  0x1c   : > { %17028 = shalt.err (!%p17025_p7)
}
  0x1d   : > { %s17029_s18 = scalar_lea.vmem %s198_s7, 12288  ;;  %p17037_p2 = scmp.lt.s32.totalorder %s198_s7, %s198_s7 }
  0x1e   : > { %p17030_p10 = scmp.ne.s32.totalorder %s198_s7, %s17029_s18  ;;  %p17038_p6 = scmp.lt.s32.totalorder %s17029_s18, %s17029_s18 }
  0x20   : > { %p17032_p8 = pnand %p17030_p10, %p17018_p13  ;;  %p17039_p4 = por %p17038_p6, %p17037_p2 }
  0x22   : > { %p17033_p1 = pneg %p17032_p8 }
  0x24   : > { %p17040_p9 = pnand %p17039_p4, %p17033_p1 }
  0x26   : > { %17043 = shalt.err (!%p17040_p9)
}
  0x27   : > { %s17176_s19 = smov 384   ;;  %s17177_s20 = smov 24  }
  0x28   : > { %15497 = dma.hbm_to_vmem [thread:$0]  (!%p17269_p11), %s20722_s1, 12288, %s198_s7, [#allocation8], %s17176_s19, %s17176_s19, %s17177_s20  }
  0x29   : > { %s17044_s12 = scalar_lea.hbm %s20723_s2, 12288 }
  0x2a   : > { %p17045_p8 = scmp.ne.s32.totalorder %s20723_s2, %s17044_s12  ;;  %p17051_p4 = scmp.lt.u32.totalorder %s17044_s12, %s20723_s2 }
  0x2c   : > { %p17047_p1 = pnand %p17045_p8, %p17018_p13 }
  0x2e   : > { %p17048_p2 = pneg %p17047_p1 }
  0x30   : > { %p17053_p6 = pnand %p17051_p4, %p17048_p2 }
  0x32   : > { %17056 = shalt.err (!%p17053_p6)
}
  0x33   : > { %s17057_s7 = scalar_lea.vmem %s17273_s10, 12288  ;;  %p17065_p3 = scmp.lt.s32.totalorder %s17273_s10, %s17273_s10 }
  0x34   : > { %p17058_p9 = scmp.ne.s32.totalorder %s17273_s10, %s17057_s7  ;;  %p17066_p5 = scmp.lt.s32.totalorder %s17057_s7, %s17057_s7 }
  0x36   : > { %p17060_p12 = pnand %p17058_p9, %p17018_p13  ;;  %p17067_p7 = por %p17066_p5, %p17065_p3 }
  0x38   : > { %p17061_p0 = pneg %p17060_p12 }
  0x3a   : > { %p17068_p10 = pnand %p17067_p7, %p17061_p0 }
  0x3c   : > { %17071 = shalt.err (!%p17068_p10)
}
  0x3d   : > { %15500 = dma.hbm_to_vmem [thread:$0]  (!%p17269_p11), %s20723_s2, 12288, %s17273_s10, [#allocation8], %s17176_s19, %s17176_s19, %s17177_s20  }
  0x3e   : > { %s17323_s26 = sadd.s32 1, %s17172_s24   ;;  %s30_s8 = sadd.s32 1, %s17168_s23 }
  0x3f   : > { %s27_s30 = ssub.s32 %s17172_s24, %s17323_s26  ;;  %p37_p13 = scmp.ne.s32.totalorder %s17168_s23, %s17164_s22 }
  0x40   : > { %p28_p8 = scmp.eq.s32.totalorder %s27_s30, 0  ;;  %p38_p1 = scmp.eq.s32.totalorder %s17172_s24, 0 }
  0x41   : > { %p20954_p2 = scmp.eq.s32.totalorder %s17241_s25, 2  ;;  %p15511_p6 = scmp.lt.s32.totalorder %s17172_s24, 3 }
  0x42   : > { %s17339_s11 = scalar_select %p28_p8, %s17168_s23, %s30_s8  }
  0x43   : > { %p17333_p4 = por %p20954_p2, %p37_p13  ;;  %p39_p9 = por %p38_p1, %p37_p13 }
  0x44   : > { %s233_s12 = sand.u32 1, %s17168_s23   ;;  %s15479_s10 = sshll.u32 %s17172_s24, 8 }
  0x45   : > { %s13797_s13 = sshll.u32 %s233_s12, 4  ;;  %s17346_s14 = scalar_lea.hbm %s20721_s0, %s15479_s10 }
  0x46   : > { %s237_s15 = scalar_lea.vmem [#allocation4], %s13797_s13  ;;  %p17350_p11 = pnand %p15511_p6, %p39_p9 }
  0x47   : > { %s245_s16 = sshll.u32 %s237_s15, 4  ;;  %s17354_s17 = scalar_lea.sflag [#allocation5], %s233_s12  ;;  %s17348_s16 = int_to_ptr.vmem [resolvable:$true] %s245_s16 }
  0x48   : > { %s17072_s18 = scalar_lea.hbm %s17346_s14, 256  ;;  %p17074_p0 = pneg %p17350_p11 }
  0x49   : > { %p17073_p12 = scmp.ne.s32.totalorder %s17346_s14, %s17072_s18  ;;  %s17077_s13 = scalar_lea.hbm %s20721_s0, 768 }
  0x4a   : > { %p17078_p7 = scmp.lt.u32.totalorder %s17346_s14, %s20721_s0  ;;  %p17079_p10 = scmp.lt.u32.totalorder %s17077_s13, %s17072_s18 }
  0x4b   : > { %p17075_p3 = pnand %p17074_p0, %p17073_p12  ;;  %p17081_p8 = scmp.lt.u32.totalorder %s17072_s18, %s17346_s14 }
  0x4c   : > { %p17080_p13 = por %p17079_p10, %p17078_p7 }
  0x4d   : > { %p17076_p5 = pneg %p17075_p3 }
  0x4e   : > { %p17082_p1 = por %p17081_p8, %p17080_p13 }
  0x50   : > { %p17083_p2 = pnand %p17082_p1, %p17076_p5 }
  0x52   : > { %17086 = shalt.err (!%p17083_p2)
}
  0x53   : > { %s17087_s12 = scalar_lea.vmem %s17348_s16, 256  ;;  %s17178_s20 = smov [#allocation4]  }
  0x54   : > { %p17088_p6 = scmp.ne.s32.totalorder %s17348_s16, %s17087_s12  ;;  %s17092_s15 = sshll.u32 %s17178_s20, 4  ;;  %s17093_s15 = int_to_ptr.vmem [resolvable:$false] %s17092_s15 }
  0x55   : > { %s17094_s8 = scalar_lea.vmem %s17093_s15, 512  ;;  %p17095_p3 = scmp.lt.s32.totalorder %s17348_s16, %s17093_s15 }
  0x56   : > { %p17090_p9 = pnand %p17088_p6, %p17074_p0  ;;  %p17096_p7 = scmp.lt.s32.totalorder %s17094_s8, %s17087_s12 }
  0x58   : > { %p17091_p12 = pneg %p17090_p9  ;;  %p17097_p10 = por %p17096_p7, %p17095_p3 }
  0x5a   : > { %p17098_p13 = pnand %p17097_p10, %p17091_p12 }
  0x5c   : > { %17101 = shalt.err (!%p17098_p13)
}
  0x5d   : > { %s17179_s18 = smov 128   ;;  %s17180_s30 = smov 8  }
  0x5e   : > { %15504 = dma.hbm_to_vmem [thread:$0]  (!%p17350_p11), %s17346_s14, 256, %s17348_s16, %s17354_s17, %s17179_s18, %s17179_s18, %s17180_s30  }
  0x5f   : > { %p20957_p0 = scmp.ne.s32.totalorder %s20952_s29, 0 }
  0x61   : > { %257 = sbr.rel (%p20957_p0) target bundleno = 5233 (0x1471), region = 44 }
  0x68   : > { %s17385_s13 = sand.u32 1, %s17164_s22   ;;  %p20958_p5 = scmp.ne.s32.totalorder %s20950_s27, 0 }
  0x69   : > { %s13802_s10 = sshll.u32 %s17385_s13, 4  ;;  %s260_s19 = scalar_lea.sflag [#allocation5], %s17385_s13 }
  0x6a   : > { %s17389_s12 = scalar_lea.vmem [#allocation4], %s13802_s10 }
  0x6b   : > { %17147 = dma.done.wait (%p20958_p5), %s260_s19, 256  }
  0x6c   : > { %17149 = vsyncadd (%p20958_p5), %s260_s19, 4294967040  ;;  %p20959_p11 = scmp.eq.s32.totalorder %s17241_s25, 0 }
  0x6e   : > { %17151 = dma.done.wait (%p20959_p11), [#allocation8], 24576   ;;  %p20960_p8 = pmov %p20959_p11 }
  0x6f   : > { %s13805_s29 = sshll.u32 %s17385_s13, 5  ;;  %p20961_p1 = scmp.ne.s32.totalorder %s17241_s25, 0 }
  0x70   : > { %17153 = vsyncadd (%p20960_p8), [#allocation8], 4294942720  ;;  %s17400_s14 = scalar_lea.vmem [#allocation10], %s13805_s29  ;;  %v306_v0 = vld [vmem:[%s20726_s5] sm:$0x3] (!%p20961_p1)  ;;  %v307_v1 = vlaneseq (!%p20961_p1) }
  0x71   : > { %305 = sbr.rel (%p20961_p1) target bundleno = 120 (0x78), region = 60 }
  0x72   : > { %vm309_vm0 = vcmp.lt.s32.totalorder (!%p20961_p1), %v307_v1, 256 }
  0x73   : > { %311 = vst.msk [vmem:[#allocation2] sm:$0x3] (!%p20961_p1), %vm309_vm0, %v306_v0 }
  0x78 PF: > { %v15556_v2 = vld [vmem:[#allocation7 + $0x4] ss:$24 sps:$4 sm:$0xff]   ;;  %v15560_v4 = vld [vmem:[#allocation7] ss:$24 sps:$4 sm:$0xff]   ;;  %v15562_v6 = vld [vmem:[#allocation7 + $0x34] ss:$24 sps:$4 sm:$0xff]  }
  0x79   : > { %v15558_v3 = vld [vmem:[#allocation7 + $0xc] ss:$24 sps:$4 sm:$0xff]   ;;  %932 = vmatprep.subr.bf16.mxu0 %v15556_v2  ;;  %v15561_v5 = vld [vmem:[#allocation7 + $0x8] ss:$24 sps:$4 sm:$0xff]   ;;  %v15564_v7 = vld [vmem:[#allocation7 + $0x3c] ss:$24 sps:$4 sm:$0xff]  }
  0x7a   : > { %975 = vmatprep.subr.bf16.mxu1 %v15558_v3  ;;  %933 = vmatpush1.bf16.msra.mxu0 %v15560_v4  ;;  %v15566_v8 = vld [vmem:[#allocation7 + $0x30] ss:$24 sps:$4 sm:$0xff]   ;;  %v15568_v10 = vld [vmem:[#allocation7 + $0x64] ss:$24 sps:$4 sm:$0xff]   ;;  %v15572_v12 = vld [vmem:[#allocation7 + $0x60] ss:$24 sps:$4 sm:$0xff]  }
  0x7b   : > { %976 = vmatpush1.bf16.msra.mxu1 %v15561_v5  ;;  %934 = vmatprep.subr.bf16.mxu0 %v15562_v6  ;;  %v15567_v9 = vld [vmem:[#allocation7 + $0x38] ss:$24 sps:$4 sm:$0xff]   ;;  %v15570_v11 = vld [vmem:[#allocation7 + $0x6c] ss:$24 sps:$4 sm:$0xff]   ;;  %v15573_v13 = vld [vmem:[#allocation7 + $0x68] ss:$24 sps:$4 sm:$0xff]  }
  0x7c   : > { %977 = vmatprep.subr.bf16.mxu1 %v15564_v7  ;;  %v15574_v14 = vld [vmem:[#allocation7 + $0x94] ss:$24 sps:$4 sm:$0xff]   ;;  %v15578_v16 = vld [vmem:[#allocation7 + $0x90] ss:$24 sps:$4 sm:$0xff]   ;;  %v15580_v18 = vld [vmem:[#allocation7 + $0xc4] ss:$24 sps:$4 sm:$0xff]  }
  0x7d   : > { %v15576_v15 = vld [vmem:[#allocation7 + $0x9c] ss:$24 sps:$4 sm:$0xff]   ;;  %v15579_v17 = vld [vmem:[#allocation7 + $0x98] ss:$24 sps:$4 sm:$0xff]   ;;  %v15582_v19 = vld [vmem:[#allocation7 + $0xcc] ss:$24 sps:$4 sm:$0xff]  }
  0x7e   : > { %935 = vmatpush1.bf16.msra.mxu0 %v15566_v8  ;;  %v15584_v20 = vld [vmem:[#allocation7 + $0xc0] ss:$24 sps:$4 sm:$0xff]   ;;  %v15586_v22 = vld [vmem:[#allocation7 + $0xf4] ss:$24 sps:$4 sm:$0xff]   ;;  %v15590_v24 = vld [vmem:[#allocation7 + $0xf0] ss:$24 sps:$4 sm:$0xff]  }
  0x7f   : > { %978 = vmatpush1.bf16.msra.mxu1 %v15567_v9  ;;  %936 = vmatprep.subr.bf16.mxu0 %v15568_v10  ;;  %v15585_v21 = vld [vmem:[#allocation7 + $0xc8] ss:$24 sps:$4 sm:$0xff]   ;;  %v15588_v23 = vld [vmem:[#allocation7 + $0xfc] ss:$24 sps:$4 sm:$0xff]   ;;  %v15591_v25 = vld [vmem:[#allocation7 + $0xf8] ss:$24 sps:$4 sm:$0xff]  }
  0x80   : > { %979 = vmatprep.subr.bf16.mxu1 %v15570_v11  ;;  %v15592_v26 = vld [vmem:[#allocation7 + $0x124] ss:$24 sps:$4 sm:$0xff]   ;;  %v15596_v28 = vld [vmem:[#allocation7 + $0x120] ss:$24 sps:$4 sm:$0xff]   ;;  %v15598_v30 = vld [vmem:[#allocation7 + $0x154] ss:$24 sps:$4 sm:$0xff]  }
  0x81   : > { %v15594_v27 = vld [vmem:[#allocation7 + $0x12c] ss:$24 sps:$4 sm:$0xff]   ;;  %v15597_v29 = vld [vmem:[#allocation7 + $0x128] ss:$24 sps:$4 sm:$0xff]   ;;  %v15600_v31 = vld [vmem:[#allocation7 + $0x15c] ss:$24 sps:$4 sm:$0xff]  }
  0x82   : > { %937 = vmatpush1.bf16.msra.mxu0 %v15572_v12  ;;  %v15602_v32 = vld [vmem:[#allocation7 + $0x150] ss:$24 sps:$4 sm:$0xff]   ;;  %v15604_v34 = vld [vmem:[#allocation7 + $0x184] ss:$24 sps:$4 sm:$0xff]   ;;  %v15608_v36 = vld [vmem:[#allocation7 + $0x180] ss:$24 sps:$4 sm:$0xff]  }
  0x83   : > { %980 = vmatpush1.bf16.msra.mxu1 %v15573_v13  ;;  %938 = vmatprep.subr.bf16.mxu0 %v15574_v14  ;;  %v15603_v33 = vld [vmem:[#allocation7 + $0x158] ss:$24 sps:$4 sm:$0xff]   ;;  %v15606_v35 = vld [vmem:[#allocation7 + $0x18c] ss:$24 sps:$4 sm:$0xff]   ;;  %v15609_v37 = vld [vmem:[#allocation7 + $0x188] ss:$24 sps:$4 sm:$0xff]  }
  0x84   : > { %981 = vmatprep.subr.bf16.mxu1 %v15576_v15  ;;  %v15610_v38 = vld [vmem:[#allocation7 + $0x1b4] ss:$24 sps:$4 sm:$0xff]   ;;  %v15614_v40 = vld [vmem:[#allocation7 + $0x1b0] ss:$24 sps:$4 sm:$0xff]   ;;  %v15616_v42 = vld [vmem:[#allocation7 + $0x1e4] ss:$24 sps:$4 sm:$0xff]  }
  0x85   : > { %v15612_v39 = vld [vmem:[#allocation7 + $0x1bc] ss:$24 sps:$4 sm:$0xff]   ;;  %v15615_v41 = vld [vmem:[#allocation7 + $0x1b8] ss:$24 sps:$4 sm:$0xff]   ;;  %v15618_v43 = vld [vmem:[#allocation7 + $0x1ec] ss:$24 sps:$4 sm:$0xff]  }
  0x86   : > { %939 = vmatpush1.bf16.msra.mxu0 %v15578_v16  ;;  %v15620_v44 = vld [vmem:[#allocation7 + $0x1e0] ss:$24 sps:$4 sm:$0xff]   ;;  %v15622_v46 = vld [vmem:[#allocation7 + $0x214] ss:$24 sps:$4 sm:$0xff]   ;;  %v15626_v48 = vld [vmem:[#allocation7 + $0x210] ss:$24 sps:$4 sm:$0xff]  }
  0x87   : > { %982 = vmatpush1.bf16.msra.mxu1 %v15579_v17  ;;  %940 = vmatprep.subr.bf16.mxu0 %v15580_v18  ;;  %v15621_v45 = vld [vmem:[#allocation7 + $0x1e8] ss:$24 sps:$4 sm:$0xff]   ;;  %v15624_v47 = vld [vmem:[#allocation7 + $0x21c] ss:$24 sps:$4 sm:$0xff]   ;;  %v15627_v49 = vld [vmem:[#allocation7 + $0x218] ss:$24 sps:$4 sm:$0xff]  }
  0x88   : > { %983 = vmatprep.subr.bf16.mxu1 %v15582_v19  ;;  %v15652_v50 = vld [vmem:[%s17389_s12 + $0x4] ss:$8 sps:$4 sm:$0xff]   ;;  %v15632_v53 = vld [vmem:[#allocation7 + $0x240] ss:$24 sps:$4 sm:$0xff]   ;;  %v15638_v57 = vld [vmem:[#allocation7 + $0x270] ss:$24 sps:$4 sm:$0xff]  }
  0x89   : > { %v15628_v51 = vld [vmem:[#allocation7 + $0x244] ss:$24 sps:$4 sm:$0xff]   ;;  %964 = vmatprep.mubr.bf16.mxu0 %v15652_v50  ;;  %1007 = vmatprep.mubr.bf16.mxu1 %v15652_v50  ;;  %v15633_v54 = vld [vmem:[#allocation7 + $0x248] ss:$24 sps:$4 sm:$0xff]   ;;  %v15634_v55 = vld [vmem:[#allocation7 + $0x274] ss:$24 sps:$4 sm:$0xff]  }
  0x8a   : > { %941 = vmatpush1.bf16.msra.mxu0 %v15584_v20  ;;  %v15630_v52 = vld [vmem:[#allocation7 + $0x24c] ss:$24 sps:$4 sm:$0xff]   ;;  %v15636_v56 = vld [vmem:[#allocation7 + $0x27c] ss:$24 sps:$4 sm:$0xff]   ;;  %v15639_v58 = vld [vmem:[#allocation7 + $0x278] ss:$24 sps:$4 sm:$0xff]  }
  0x8b   : > { %984 = vmatpush1.bf16.msra.mxu1 %v15585_v21  ;;  %942 = vmatprep.subr.bf16.mxu0 %v15586_v22  ;;  %v15640_v59 = vld [vmem:[#allocation7 + $0x2a4] ss:$24 sps:$4 sm:$0xff]   ;;  %v15644_v61 = vld [vmem:[#allocation7 + $0x2a0] ss:$24 sps:$4 sm:$0xff]   ;;  %v15646_v63 = vld [vmem:[#allocation7 + $0x2d4] ss:$24 sps:$4 sm:$0xff]  }
  0x8c   : > { %985 = vmatprep.subr.bf16.mxu1 %v15588_v23  ;;  %v15642_v60 = vld [vmem:[#allocation7 + $0x2ac] ss:$24 sps:$4 sm:$0xff]   ;;  %v15645_v62 = vld [vmem:[#allocation7 + $0x2a8] ss:$24 sps:$4 sm:$0xff]   ;;  %v15648_v0 = vld [vmem:[#allocation7 + $0x2dc] ss:$24 sps:$4 sm:$0xff]  }
  0x8d   : > { %v15650_v1 = vld [vmem:[#allocation7 + $0x2d0] ss:$24 sps:$4 sm:$0xff]   ;;  %v15657_v3 = vld [vmem:[#allocation7 + $0x14] ss:$24 sps:$4 sm:$0xff]   ;;  %v15678_v4 = vld [vmem:[#allocation9 + $0x4] ss:$24 sps:$4 sm:$0xff]  }
  0x8e   : > { %943 = vmatpush1.bf16.msra.mxu0 %v15590_v24  ;;  %v15651_v2 = vld [vmem:[#allocation7 + $0x2d8] ss:$24 sps:$4 sm:$0xff]   ;;  %v15660_v7 = vld [vmem:[#allocation7 + $0x44] ss:$24 sps:$4 sm:$0xff]   ;;  %v15684_v9 = vld [vmem:[#allocation9 + $0x34] ss:$24 sps:$4 sm:$0xff]  }
  0x8f   : > { %986 = vmatpush1.bf16.msra.mxu1 %v15591_v25  ;;  %944 = vmatprep.subr.bf16.mxu0 %v15592_v26  ;;  %v17409_v5 = vld [vmem:[%s17389_s12] ss:$8 sps:$4 sm:$0xff]   ;;  %v15663_v11 = vld [vmem:[#allocation7 + $0x74] ss:$24 sps:$4 sm:$0xff]   ;;  %v15690_v13 = vld [vmem:[#allocation9 + $0x64] ss:$24 sps:$4 sm:$0xff]  }
  0x90   : > { %987 = vmatprep.subr.bf16.mxu1 %v15594_v27  ;;  %v15655_v6 = vld [vmem:[#allocation7 + $0x10] ss:$24 sps:$4 sm:$0xff]   ;;  %v15676_v8 = vld [vmem:[#allocation9] ss:$24 sps:$4 sm:$0xff]   ;;  %v15666_v15 = vld [vmem:[#allocation7 + $0xa4] ss:$24 sps:$4 sm:$0xff]  }
  0x91   : > { %v15658_v10 = vld [vmem:[#allocation7 + $0x40] ss:$24 sps:$4 sm:$0xff]   ;;  %v15682_v12 = vld [vmem:[#allocation9 + $0x30] ss:$24 sps:$4 sm:$0xff]   ;;  %v15696_v17 = vld [vmem:[#allocation9 + $0x94] ss:$24 sps:$4 sm:$0xff]  }
  0x92   : > { %945 = vmatpush1.bf16.msra.mxu0 %v15596_v28  ;;  %v15661_v14 = vld [vmem:[#allocation7 + $0x70] ss:$24 sps:$4 sm:$0xff]   ;;  %v15688_v16 = vld [vmem:[#allocation9 + $0x60] ss:$24 sps:$4 sm:$0xff]   ;;  %v15669_v19 = vld [vmem:[#allocation7 + $0xd4] ss:$24 sps:$4 sm:$0xff]  }
  0x93   : > { %988 = vmatpush1.bf16.msra.mxu1 %v15597_v29  ;;  %946 = vmatprep.subr.bf16.mxu0 %v15598_v30  ;;  %v15664_v18 = vld [vmem:[#allocation7 + $0xa0] ss:$24 sps:$4 sm:$0xff]   ;;  %v15694_v20 = vld [vmem:[#allocation9 + $0x90] ss:$24 sps:$4 sm:$0xff]   ;;  %v15702_v21 = vld [vmem:[#allocation9 + $0xc4] ss:$24 sps:$4 sm:$0xff]   ;;  %v412_v30 = vlaneseq }
  0x94   : > { %989 = vmatprep.subr.bf16.mxu1 %v15600_v31  ;;  %v15667_v22 = vld [vmem:[#allocation7 + $0xd0] ss:$24 sps:$4 sm:$0xff]   ;;  %v15672_v23 = vld [vmem:[#allocation7 + $0x104] ss:$24 sps:$4 sm:$0xff]   ;;  %v15700_v24 = vld [vmem:[#allocation9 + $0xc0] ss:$24 sps:$4 sm:$0xff]  }
  0x95   : > { %v15708_v25 = vld [vmem:[#allocation9 + $0xf4] ss:$24 sps:$4 sm:$0xff]   ;;  %v15670_v26 = vld [vmem:[#allocation7 + $0x100] ss:$24 sps:$4 sm:$0xff]   ;;  %v15706_v28 = vld [vmem:[#allocation9 + $0xf0] ss:$24 sps:$4 sm:$0xff]  }
  0x96   : > { %947 = vmatpush1.bf16.msra.mxu0 %v15602_v32  ;;  %v15675_v27 = vld [vmem:[#allocation7 + $0x134] ss:$24 sps:$4 sm:$0xff]   ;;  %v15714_v29 = vld [vmem:[#allocation9 + $0x124] ss:$24 sps:$4 sm:$0xff]   ;;  %v15673_v31 = vld [vmem:[#allocation7 + $0x130] ss:$24 sps:$4 sm:$0xff]  }
  0x97   : > { %990 = vmatpush1.bf16.msra.mxu1 %v15603_v33  ;;  %948 = vmatprep.subr.bf16.mxu0 %v15604_v34  ;;  %v15681_v32 = vld [vmem:[#allocation7 + $0x164] ss:$24 sps:$4 sm:$0xff]   ;;  %v15712_v33 = vld [vmem:[#allocation9 + $0x120] ss:$24 sps:$4 sm:$0xff]   ;;  %v15720_v34 = vld [vmem:[#allocation9 + $0x154] ss:$24 sps:$4 sm:$0xff]  }
  0x98   : > { %991 = vmatprep.subr.bf16.mxu1 %v15606_v35  ;;  %v17414_v35 = vshrl.u32 %v412_v30, 7  ;;  %vm17604_vm1 = vcmp.lt.s32.totalorder %v412_v30, 256  ;;  %v16985_v30 = vld [vmem:[#allocation9 + $0x10] ss:$24 sps:$4 sm:$0xff]   ;;  %s15481_s8 = sshll.u32 %s17241_s25, 9  ;;  %s13700_s18 = sshll.u32 %s17400_s14, 4  ;;  %s20673_s18 = int_to_ptr.vmem [resolvable:$true] %s13700_s18 }
  0x99   : > { %s20671_s19 = scalar_lea.hbm %s20727_s6, %s15481_s8  ;;  %s13686_s25 = scalar_lea.sflag [#allocation6], %s17385_s13 }
  0x9a   : > { %949 = vmatpush1.bf16.msra.mxu0 %v15608_v36  ;;  %v15679_v36 = vld [vmem:[#allocation7 + $0x160] ss:$24 sps:$4 sm:$0xff]   ;;  %s17102_s12 = scalar_lea.vmem %s20673_s18, 512  ;;  %s17182_s29 = smov [#allocation10]  }
  0x9b   : > { %992 = vmatpush1.bf16.msra.mxu1 %v15609_v37  ;;  %950 = vmatprep.subr.bf16.mxu0 %v15610_v38  ;;  %v15687_v37 = vld [vmem:[#allocation7 + $0x194] ss:$24 sps:$4 sm:$0xff]   ;;  %v15718_v38 = vld [vmem:[#allocation9 + $0x150] ss:$24 sps:$4 sm:$0xff]   ;;  %p17103_p2 = scmp.ne.s32.totalorder %s20673_s18, %s17102_s12  ;;  %s17106_s16 = sshll.u32 %s17182_s29, 4  ;;  %s17107_s16 = int_to_ptr.vmem [resolvable:$false] %s17106_s16 }
  0x9c   : > { %993 = vmatprep.subr.bf16.mxu1 %v15612_v39  ;;  %v15726_v39 = vld [vmem:[#allocation9 + $0x184] ss:$24 sps:$4 sm:$0xff]   ;;  %s17108_s7 = scalar_lea.vmem %s17107_s16, 1024  ;;  %p17109_p12 = scmp.lt.s32.totalorder %s20673_s18, %s17107_s16 }
  0x9d   : > { %p17104_p6 = pnand %p17103_p2, %p17333_p4  ;;  %p17110_p3 = scmp.lt.s32.totalorder %s17108_s7, %s17102_s12 }
  0x9e   : > { %951 = vmatpush1.bf16.msra.mxu0 %v15614_v40  ;;  %v17417_v40 = vsub.s32 1, %v17414_v35 }
  0x9f   : > { %994 = vmatpush1.bf16.msra.mxu1 %v15615_v41  ;;  %952 = vmatprep.subr.bf16.mxu0 %v15616_v42  ;;  %v15685_v41 = vld [vmem:[#allocation7 + $0x190] ss:$24 sps:$4 sm:$0xff]   ;;  %v15724_v42 = vld [vmem:[#allocation9 + $0x180] ss:$24 sps:$4 sm:$0xff]   ;;  %p17105_p9 = pneg %p17104_p6  ;;  %p17111_p7 = por %p17110_p3, %p17109_p12 }
  0xa0   : > { %995 = vmatprep.subr.bf16.mxu1 %v15618_v43  ;;  %v1074_v43 = vld [vmem:[#allocation2] sm:$0x3] }
  0xa1   : > { %p17112_p10 = pnand %p17111_p7, %p17105_p9 }
  0xa2   : > { %953 = vmatpush1.bf16.msra.mxu0 %v15620_v44  ;;  %v15693_v44 = vld [vmem:[#allocation7 + $0x1c4] ss:$24 sps:$4 sm:$0xff]  }
  0xa3   : > { %996 = vmatpush1.bf16.msra.mxu1 %v15621_v45  ;;  %954 = vmatprep.subr.bf16.mxu0 %v15622_v46  ;;  %v15732_v45 = vld [vmem:[#allocation9 + $0x1b4] ss:$24 sps:$4 sm:$0xff]   ;;  %v1086_v46 = vrot.slane %v1074_v43, %v17417_v40 }
  0xa4   : > { %997 = vmatprep.subr.bf16.mxu1 %v15624_v47  ;;  %v15691_v47 = vld [vmem:[#allocation7 + $0x1c0] ss:$24 sps:$4 sm:$0xff]  }
  0xa6   : > { %955 = vmatpush1.bf16.msra.mxu0 %v15626_v48  ;;  %v17420_v48 = vpack.c.bf16 %v1086_v46, %v1086_v46  ;;  %v17476_v46 = vld [vmem:[#allocation9 + $0x158] ss:$24 sps:$4 sm:$0xff]  }
  0xa7   : > { %998 = vmatpush1.bf16.msra.mxu1 %v15627_v49  ;;  %956 = vmatprep.subr.bf16.mxu0 %v15628_v51  ;;  %v15730_v49 = vld [vmem:[#allocation9 + $0x1b0] ss:$24 sps:$4 sm:$0xff]   ;;  %v15738_v51 = vld [vmem:[#allocation9 + $0x1e4] ss:$24 sps:$4 sm:$0xff]  }
  0xa8   : > { %999 = vmatprep.subr.bf16.mxu1 %v15630_v52  ;;  %v15697_v52 = vld [vmem:[#allocation7 + $0x1f0] ss:$24 sps:$4 sm:$0xff]  }
  0xaa   : > { %957 = vmatpush1.bf16.msra.mxu0 %v15632_v53  ;;  %v15736_v53 = vld [vmem:[#allocation9 + $0x1e0] ss:$24 sps:$4 sm:$0xff]  }
  0xab   : > { %1000 = vmatpush1.bf16.msra.mxu1 %v15633_v54  ;;  %958 = vmatprep.subr.bf16.mxu0 %v15634_v55  ;;  %v15705_v54 = vld [vmem:[#allocation7 + $0x224] ss:$24 sps:$4 sm:$0xff]   ;;  %v15744_v55 = vld [vmem:[#allocation9 + $0x214] ss:$24 sps:$4 sm:$0xff]  }
  0xac   : > { %1001 = vmatprep.subr.bf16.mxu1 %v15636_v56  ;;  %v15703_v56 = vld [vmem:[#allocation7 + $0x220] ss:$24 sps:$4 sm:$0xff]  }
  0xae   : > { %959 = vmatpush1.bf16.msra.mxu0 %v15638_v57  ;;  %v15742_v57 = vld [vmem:[#allocation9 + $0x210] ss:$24 sps:$4 sm:$0xff]  }
  0xaf   : > { %1002 = vmatpush1.bf16.msra.mxu1 %v15639_v58  ;;  %960 = vmatprep.subr.bf16.mxu0 %v15640_v59  ;;  %v15711_v58 = vld [vmem:[#allocation7 + $0x254] ss:$24 sps:$4 sm:$0xff]   ;;  %v15750_v59 = vld [vmem:[#allocation9 + $0x244] ss:$24 sps:$4 sm:$0xff]  }
  0xb0   : > { %1003 = vmatprep.subr.bf16.mxu1 %v15642_v60  ;;  %v15709_v60 = vld [vmem:[#allocation7 + $0x250] ss:$24 sps:$4 sm:$0xff]  }
  0xb2   : > { %961 = vmatpush1.bf16.msra.mxu0 %v15644_v61  ;;  %v15748_v61 = vld [vmem:[#allocation9 + $0x240] ss:$24 sps:$4 sm:$0xff]  }
  0xb3   : > { %1004 = vmatpush1.bf16.msra.mxu1 %v15645_v62  ;;  %962 = vmatprep.subr.bf16.mxu0 %v15646_v63  ;;  %v15717_v62 = vld [vmem:[#allocation7 + $0x284] ss:$24 sps:$4 sm:$0xff]   ;;  %v15756_v63 = vld [vmem:[#allocation9 + $0x274] ss:$24 sps:$4 sm:$0xff]  }
  0xb4   : > { %1005 = vmatprep.subr.bf16.mxu1 %v15648_v0  ;;  %v15715_v0 = vld [vmem:[#allocation7 + $0x280] ss:$24 sps:$4 sm:$0xff]  }
  0xb6   : > { %963 = vmatpush1.bf16.msra.mxu0 %v15650_v1  ;;  %v15754_v1 = vld [vmem:[#allocation9 + $0x270] ss:$24 sps:$4 sm:$0xff]  }
  0xb7   : > { %1006 = vmatpush1.bf16.msra.mxu1 %v15651_v2  ;;  %1018 = vmatprep.subr.bf16.mxu0 %v15657_v3  ;;  %v15723_v2 = vld [vmem:[#allocation7 + $0x2b4] ss:$24 sps:$4 sm:$0xff]   ;;  %v15762_v3 = vld [vmem:[#allocation9 + $0x2a4] ss:$24 sps:$4 sm:$0xff]  }
  0xb8   : > { %1698 = vmatprep.subr.bf16.mxu1 %v15678_v4  ;;  %v15721_v4 = vld [vmem:[#allocation7 + $0x2b0] ss:$24 sps:$4 sm:$0xff]  }
  0xb9   : > { %965 = vmatmul.mubr.bf16.vlgmr.msra.gmra.mrb[0].mxu0 %v17409_v5 }
  0xba   : > { %1008 = vmatmul.mubr.bf16.vlgmr.msra.gmra.mrb[0].mxu1 %v17409_v5  ;;  %1019 = vmatpush1.bf16.msra.mxu0 %v15655_v6  ;;  %v17424_v6 = vsub.s32 0, %v17414_v35 }
  0xbb   : > { %1699 = vmatpush1.bf16.msra.mxu1 %v15676_v8  ;;  %1020 = vmatprep.subr.bf16.mxu0 %v15660_v7  ;;  %v15760_v7 = vld [vmem:[#allocation9 + $0x2a0] ss:$24 sps:$4 sm:$0xff]   ;;  %v15729_v8 = vld [vmem:[#allocation7 + $0x2e4] ss:$24 sps:$4 sm:$0xff]  }
  0xbc   : > { %1700 = vmatprep.subr.bf16.mxu1 %v15684_v9  ;;  %1050 = vmatprep.mubr.bf16.mxu0 %v15652_v50  ;;  %v15699_v50 = vld [vmem:[#allocation7 + $0x1f4] ss:$24 sps:$4 sm:$0xff]  }
  0xbd   : > { %1730 = vmatprep.mubr.bf16.mxu1 %v17420_v48  ;;  %v15768_v9 = vld [vmem:[#allocation9 + $0x2d4] ss:$24 sps:$4 sm:$0xff]  }
  0xbe   : > { %1021 = vmatpush1.bf16.msra.mxu0 %v15658_v10  ;;  %v15727_v10 = vld [vmem:[#allocation7 + $0x2e0] ss:$24 sps:$4 sm:$0xff]  }
  0xbf   : > { %1701 = vmatpush1.bf16.msra.mxu1 %v15682_v12  ;;  %1022 = vmatprep.subr.bf16.mxu0 %v15663_v11  ;;  %v1082_v11 = vrot.slane %v1074_v43, %v17424_v6  ;;  %v15766_v12 = vld [vmem:[#allocation9 + $0x2d0] ss:$24 sps:$4 sm:$0xff]  }
  0xc0   : > { %1702 = vmatprep.subr.bf16.mxu1 %v15690_v13  ;;  %v17427_v13 = vld [vmem:[#allocation9 + $0xc] ss:$24 sps:$4 sm:$0xff]   ;;  %v15808_v43 = vld [vmem:[#allocation9 + $0x130] ss:$24 sps:$4 sm:$0xff]  }
  0xc2   : > { %1023 = vmatpush1.bf16.msra.mxu0 %v15661_v14  ;;  %v15774_v14 = vld [vmem:[#allocation9 + $0x14] ss:$24 sps:$4 sm:$0xff]  }
  0xc3   : > { %1703 = vmatpush1.bf16.msra.mxu1 %v15688_v16  ;;  %1024 = vmatprep.subr.bf16.mxu0 %v15666_v15  ;;  %v17429_v15 = vld [vmem:[#allocation9 + $0x8] ss:$24 sps:$4 sm:$0xff]   ;;  %v17431_v16 = vpack.c.bf16 %v1082_v11, %v1082_v11  ;;  %v15843_v11 = vld [vmem:[#allocation9 + $0x2b4] ss:$24 sps:$4 sm:$0xff]  }
  0xc4   : > { %1704 = vmatprep.subr.bf16.mxu1 %v15696_v17  ;;  %v15772_v17 = vld [vmem:[#allocation9 + $0x10] ss:$24 sps:$4 sm:$0xff]  }
  0xc6   : > { %1025 = vmatpush1.bf16.msra.mxu0 %v15664_v18  ;;  %v17434_v18 = vld [vmem:[#allocation9 + $0x3c] ss:$24 sps:$4 sm:$0xff]  }
  0xc7   : > { %1705 = vmatpush1.bf16.msra.mxu1 %v15694_v20  ;;  %1026 = vmatprep.subr.bf16.mxu0 %v15669_v19  ;;  %v15780_v19 = vld [vmem:[#allocation9 + $0x44] ss:$24 sps:$4 sm:$0xff]   ;;  %v17436_v20 = vld [vmem:[#allocation9 + $0x38] ss:$24 sps:$4 sm:$0xff]  }
  0xc8   : > { %1706 = vmatprep.subr.bf16.mxu1 %v15702_v21  ;;  %v15778_v21 = vld [vmem:[#allocation9 + $0x40] ss:$24 sps:$4 sm:$0xff]  }
  0xca   : > { %1027 = vmatpush1.bf16.msra.mxu0 %v15667_v22  ;;  %v17439_v22 = vld [vmem:[#allocation9 + $0x6c] ss:$24 sps:$4 sm:$0xff]  }
  0xcb   : > { %1707 = vmatpush1.bf16.msra.mxu1 %v15700_v24  ;;  %1028 = vmatprep.subr.bf16.mxu0 %v15672_v23  ;;  %v15786_v23 = vld [vmem:[#allocation9 + $0x74] ss:$24 sps:$4 sm:$0xff]   ;;  %v17444_v24 = vld [vmem:[#allocation9 + $0x68] ss:$24 sps:$4 sm:$0xff]  }
  0xcc   : > { %1708 = vmatprep.subr.bf16.mxu1 %v15708_v25  ;;  %v15784_v25 = vld [vmem:[#allocation9 + $0x70] ss:$24 sps:$4 sm:$0xff]  }
  0xce   : > { %1029 = vmatpush1.bf16.msra.mxu0 %v15670_v26  ;;  %v17448_v26 = vld [vmem:[#allocation9 + $0x9c] ss:$24 sps:$4 sm:$0xff]  }
  0xcf   : > { %1709 = vmatpush1.bf16.msra.mxu1 %v15706_v28  ;;  %1030 = vmatprep.subr.bf16.mxu0 %v15675_v27  ;;  %v17452_v27 = vld [vmem:[#allocation9 + $0x98] ss:$24 sps:$4 sm:$0xff]  }
  0xd0   : > { %1710 = vmatprep.subr.bf16.mxu1 %v15714_v29  ;;  %v15790_v28 = vld [vmem:[#allocation9 + $0xa0] ss:$24 sps:$4 sm:$0xff]   ;;  %v17454_v29 = vld [vmem:[#allocation9 + $0xcc] ss:$24 sps:$4 sm:$0xff]  }
  0xd2   : > { %1031 = vmatpush1.bf16.msra.mxu0 %v15673_v31  ;;  %v15798_v31 = vld [vmem:[#allocation9 + $0xd4] ss:$24 sps:$4 sm:$0xff]  }
  0xd3   : > { %1711 = vmatpush1.bf16.msra.mxu1 %v15712_v33  ;;  %1032 = vmatprep.subr.bf16.mxu0 %v15681_v32  ;;  %v17458_v32 = vld [vmem:[#allocation9 + $0xc8] ss:$24 sps:$4 sm:$0xff]  }
  0xd4   : > { %1712 = vmatprep.subr.bf16.mxu1 %v15720_v34  ;;  %v15796_v33 = vld [vmem:[#allocation9 + $0xd0] ss:$24 sps:$4 sm:$0xff]   ;;  %v17460_v34 = vld [vmem:[#allocation9 + $0xfc] ss:$24 sps:$4 sm:$0xff]  }
  0xd6   : > { %1033 = vmatpush1.bf16.msra.mxu0 %v15679_v36  ;;  %v15804_v36 = vld [vmem:[#allocation9 + $0x104] ss:$24 sps:$4 sm:$0xff]  }
  0xd7   : > { %1713 = vmatpush1.bf16.msra.mxu1 %v15718_v38  ;;  %1034 = vmatprep.subr.bf16.mxu0 %v15687_v37  ;;  %v17464_v37 = vld [vmem:[#allocation9 + $0xf8] ss:$24 sps:$4 sm:$0xff]  }
  0xd8   : > { %1714 = vmatprep.subr.bf16.mxu1 %v15726_v39  ;;  %v15802_v38 = vld [vmem:[#allocation9 + $0x100] ss:$24 sps:$4 sm:$0xff]   ;;  %v17466_v39 = vld [vmem:[#allocation9 + $0x12c] ss:$24 sps:$4 sm:$0xff]  }
  0xda   : > { %1035 = vmatpush1.bf16.msra.mxu0 %v15685_v41  ;;  %v15810_v41 = vld [vmem:[#allocation9 + $0x134] ss:$24 sps:$4 sm:$0xff]  }
  0xdb   : > { %1715 = vmatpush1.bf16.msra.mxu1 %v15724_v42  ;;  %1036 = vmatprep.subr.bf16.mxu0 %v15693_v44  ;;  %v17470_v42 = vld [vmem:[#allocation9 + $0x128] ss:$24 sps:$4 sm:$0xff]   ;;  %v17472_v44 = vld [vmem:[#allocation9 + $0x15c] ss:$24 sps:$4 sm:$0xff]  }
  0xdc   : > { %1716 = vmatprep.subr.bf16.mxu1 %v15732_v45  ;;  %v15816_v45 = vld [vmem:[#allocation9 + $0x164] ss:$24 sps:$4 sm:$0xff]  }
  0xde   : > { %1037 = vmatpush1.bf16.msra.mxu0 %v15691_v47  ;;  %v15814_v47 = vld [vmem:[#allocation9 + $0x160] ss:$24 sps:$4 sm:$0xff]  }
  0xdf   : > { %1717 = vmatpush1.bf16.msra.mxu1 %v15730_v49  ;;  %1038 = vmatprep.subr.bf16.mxu0 %v15699_v50  ;;  %v15822_v49 = vld [vmem:[#allocation9 + $0x194] ss:$24 sps:$4 sm:$0xff]   ;;  %v17482_v50 = vld [vmem:[#allocation9 + $0x188] ss:$24 sps:$4 sm:$0xff]  }
  0xe0   : > { %1718 = vmatprep.subr.bf16.mxu1 %v15738_v51  ;;  %v15820_v51 = vld [vmem:[#allocation9 + $0x190] ss:$24 sps:$4 sm:$0xff]  }
  0xe2   : > { %1039 = vmatpush1.bf16.msra.mxu0 %v15697_v52  ;;  %v17484_v52 = vld [vmem:[#allocation9 + $0x1bc] ss:$24 sps:$4 sm:$0xff]  }
  0xe3   : > { %1719 = vmatpush1.bf16.msra.mxu1 %v15736_v53  ;;  %1040 = vmatprep.subr.bf16.mxu0 %v15705_v54  ;;  %v15828_v53 = vld [vmem:[#allocation9 + $0x1c4] ss:$24 sps:$4 sm:$0xff]   ;;  %v17488_v54 = vld [vmem:[#allocation9 + $0x1b8] ss:$24 sps:$4 sm:$0xff]  }
  0xe4   : > { %1720 = vmatprep.subr.bf16.mxu1 %v15744_v55  ;;  %v15826_v55 = vld [vmem:[#allocation9 + $0x1c0] ss:$24 sps:$4 sm:$0xff]  }
  0xe6   : > { %1041 = vmatpush1.bf16.msra.mxu0 %v15703_v56  ;;  %v17490_v56 = vld [vmem:[#allocation9 + $0x1ec] ss:$24 sps:$4 sm:$0xff]  }
  0xe7   : > { %1721 = vmatpush1.bf16.msra.mxu1 %v15742_v57  ;;  %1042 = vmatprep.subr.bf16.mxu0 %v15711_v58  ;;  %v15831_v57 = vld [vmem:[#allocation9 + $0x1f4] ss:$24 sps:$4 sm:$0xff]   ;;  %v17494_v58 = vld [vmem:[#allocation9 + $0x1e8] ss:$24 sps:$4 sm:$0xff]  }
  0xe8   : > { %1722 = vmatprep.subr.bf16.mxu1 %v15750_v59  ;;  %v15829_v59 = vld [vmem:[#allocation9 + $0x1f0] ss:$24 sps:$4 sm:$0xff]  }
  0xea   : > { %1043 = vmatpush1.bf16.msra.mxu0 %v15709_v60  ;;  %v17496_v60 = vld [vmem:[#allocation9 + $0x21c] ss:$24 sps:$4 sm:$0xff]  }
  0xeb   : > { %1723 = vmatpush1.bf16.msra.mxu1 %v15748_v61  ;;  %1044 = vmatprep.subr.bf16.mxu0 %v15717_v62  ;;  %v15834_v61 = vld [vmem:[#allocation9 + $0x224] ss:$24 sps:$4 sm:$0xff]   ;;  %v17500_v62 = vld [vmem:[#allocation9 + $0x218] ss:$24 sps:$4 sm:$0xff]  }
  0xec   : > { %1724 = vmatprep.subr.bf16.mxu1 %v15756_v63  ;;  %v15832_v63 = vld [vmem:[#allocation9 + $0x220] ss:$24 sps:$4 sm:$0xff]  }
  0xee   : > { %1045 = vmatpush1.bf16.msra.mxu0 %v15715_v0  ;;  %v17502_v0 = vld [vmem:[#allocation9 + $0x24c] ss:$24 sps:$4 sm:$0xff]  }
  0xef   : > { %1725 = vmatpush1.bf16.msra.mxu1 %v15754_v1  ;;  %1046 = vmatprep.subr.bf16.mxu0 %v15723_v2  ;;  %v15837_v1 = vld [vmem:[#allocation9 + $0x254] ss:$24 sps:$4 sm:$0xff]   ;;  %v17506_v2 = vld [vmem:[#allocation9 + $0x248] ss:$24 sps:$4 sm:$0xff]  }
  0xf0   : > { %1726 = vmatprep.subr.bf16.mxu1 %v15762_v3  ;;  %v15835_v3 = vld [vmem:[#allocation9 + $0x250] ss:$24 sps:$4 sm:$0xff]  }
  0xf2   : > { %1047 = vmatpush1.bf16.msra.mxu0 %v15721_v4  ;;  %v17508_v4 = vld [vmem:[#allocation9 + $0x27c] ss:$24 sps:$4 sm:$0xff]  }
  0xf3   : > { %1727 = vmatpush1.bf16.msra.mxu1 %v15760_v7  ;;  %1048 = vmatprep.subr.bf16.mxu0 %v15729_v8  ;;  %v15840_v7 = vld [vmem:[#allocation9 + $0x284] ss:$24 sps:$4 sm:$0xff]   ;;  %v17512_v8 = vld [vmem:[#allocation9 + $0x278] ss:$24 sps:$4 sm:$0xff]  }
  0xf4   : > { %1728 = vmatprep.subr.bf16.mxu1 %v15768_v9  ;;  %v15838_v9 = vld [vmem:[#allocation9 + $0x280] ss:$24 sps:$4 sm:$0xff]  }
  0xf6   : > { %1049 = vmatpush1.bf16.msra.mxu0 %v15727_v10  ;;  %v17514_v10 = vld [vmem:[#allocation9 + $0x2ac] ss:$24 sps:$4 sm:$0xff]  }
  0xf7   : > { %1729 = vmatpush1.bf16.msra.mxu1 %v15766_v12  ;;  %1739 = vmatprep.subr.bf16.mxu0 %v17427_v13  ;;  %v17518_v12 = vld [vmem:[#allocation9 + $0x2a8] ss:$24 sps:$4 sm:$0xff]  }
  0xf8   : > { %1780 = vmatprep.subr.bf16.mxu1 %v15774_v14  ;;  %v15841_v14 = vld [vmem:[#allocation9 + $0x2b0] ss:$24 sps:$4 sm:$0xff]  }
  0xf9   : > { %1051 = vmatmul.mubr.bf16.vlgmr.msra.gmra.mrb[4].mxu0 %v17409_v5  ;;  %v15792_v5 = vld [vmem:[#allocation9 + $0xa4] ss:$24 sps:$4 sm:$0xff]  }
  0xfa   : > { %1731 = vmatmul.mubr.bf16.vlgmr.msra.gmra.mrb[4].mxu1 %v17431_v16  ;;  %1740 = vmatpush1.bf16.msra.mxu0 %v17429_v15 }
  0xfb   : > { %1781 = vmatpush1.bf16.msra.mxu1 %v15772_v17  ;;  %1741 = vmatprep.subr.bf16.mxu0 %v17434_v18  ;;  %v17520_v17 = vld [vmem:[#allocation9 + $0x2dc] ss:$24 sps:$4 sm:$0xff]  }
  0xfc   : > { %1782 = vmatprep.subr.bf16.mxu1 %v15780_v19  ;;  %1771 = vmatprep.mubr.bf16.mxu0 %v17420_v48  ;;  %v15846_v19 = vld [vmem:[#allocation9 + $0x2e4] ss:$24 sps:$4 sm:$0xff]  }
  0xfd   : > { %1812 = vmatprep.mubr.bf16.mxu1 %v17420_v48  ;;  %v17478_v48 = vld [vmem:[#allocation9 + $0x18c] ss:$24 sps:$4 sm:$0xff]  }
  0xfe   : > { %1742 = vmatpush1.bf16.msra.mxu0 %v17436_v20 }
  0xff   : > { %1783 = vmatpush1.bf16.msra.mxu1 %v15778_v21  ;;  %1743 = vmatprep.subr.bf16.mxu0 %v17439_v22  ;;  %v17524_v21 = vld [vmem:[#allocation9 + $0x2d8] ss:$24 sps:$4 sm:$0xff]  }
 0x100   : > { %1784 = vmatprep.subr.bf16.mxu1 %v15786_v23  ;;  %v15844_v23 = vld [vmem:[#allocation9 + $0x2e0] ss:$24 sps:$4 sm:$0xff]  }
 0x102   : > { %1744 = vmatpush1.bf16.msra.mxu0 %v17444_v24 }
 0x103   : > { %1785 = vmatpush1.bf16.msra.mxu1 %v15784_v25  ;;  %1745 = vmatprep.subr.bf16.mxu0 %v17448_v26  ;;  %v16951_v25 = vld [vmem:[#allocation9 + $0x4] ss:$24 sps:$4 sm:$0xff]  }
 0x104   : > { %1786 = vmatprep.subr.bf16.mxu1 %v15792_v5  ;;  %v16952_v5 = vld [vmem:[#allocation9] ss:$24 sps:$4 sm:$0xff]  }
 0x106   : > { %1746 = vmatpush1.bf16.msra.mxu0 %v17452_v27 }
 0x107   : > { %1787 = vmatpush1.bf16.msra.mxu1 %v15790_v28  ;;  %1747 = vmatprep.subr.bf16.mxu0 %v17454_v29  ;;  %v16953_v28 = vld [vmem:[#allocation9 + $0x34] ss:$24 sps:$4 sm:$0xff]  }
 0x108   : > { %1788 = vmatprep.subr.bf16.mxu1 %v15798_v31  ;;  %v16954_v31 = vld [vmem:[#allocation9 + $0x30] ss:$24 sps:$4 sm:$0xff]  }
 0x10a   : > { %1748 = vmatpush1.bf16.msra.mxu0 %v17458_v32 }
 0x10b   : > { %1789 = vmatpush1.bf16.msra.mxu1 %v15796_v33  ;;  %1749 = vmatprep.subr.bf16.mxu0 %v17460_v34  ;;  %v16955_v33 = vld [vmem:[#allocation9 + $0x64] ss:$24 sps:$4 sm:$0xff]  }
 0x10c   : > { %1790 = vmatprep.subr.bf16.mxu1 %v15804_v36  ;;  %v16968_v36 = vld [vmem:[#allocation9 + $0x180] ss:$24 sps:$4 sm:$0xff]  }
 0x10e   : > { %1750 = vmatpush1.bf16.msra.mxu0 %v17464_v37 }
 0x10f   : > { %1791 = vmatpush1.bf16.msra.mxu1 %v15802_v38  ;;  %1751 = vmatprep.subr.bf16.mxu0 %v17466_v39  ;;  %v16970_v38 = vld [vmem:[#allocation9 + $0x1b0] ss:$24 sps:$4 sm:$0xff]  }
 0x110   : > { %1792 = vmatprep.subr.bf16.mxu1 %v15810_v41  ;;  %v16972_v41 = vld [vmem:[#allocation9 + $0x1e0] ss:$24 sps:$4 sm:$0xff]  }
 0x112   : > { %1752 = vmatpush1.bf16.msra.mxu0 %v17470_v42 }
 0x113   : > { %1793 = vmatpush1.bf16.msra.mxu1 %v15808_v43  ;;  %1753 = vmatprep.subr.bf16.mxu0 %v17472_v44  ;;  %v16974_v43 = vld [vmem:[#allocation9 + $0x210] ss:$24 sps:$4 sm:$0xff]  }
 0x114   : > { %1794 = vmatprep.subr.bf16.mxu1 %v15816_v45  ;;  %v16976_v45 = vld [vmem:[#allocation9 + $0x240] ss:$24 sps:$4 sm:$0xff]  }
 0x116   : > { %1754 = vmatpush1.bf16.msra.mxu0 %v17476_v46 }
 0x117   : > { %1795 = vmatpush1.bf16.msra.mxu1 %v15814_v47  ;;  %1755 = vmatprep.subr.bf16.mxu0 %v17478_v48  ;;  %v16978_v47 = vld [vmem:[#allocation9 + $0x270] ss:$24 sps:$4 sm:$0xff]  }
 0x118   : > { %1796 = vmatprep.subr.bf16.mxu1 %v15822_v49  ;;  %v16980_v49 = vld [vmem:[#allocation9 + $0x2a0] ss:$24 sps:$4 sm:$0xff]  }
 0x11a   : > { %1756 = vmatpush1.bf16.msra.mxu0 %v17482_v50 }
 0x11b   : > { %1797 = vmatpush1.bf16.msra.mxu1 %v15820_v51  ;;  %1757 = vmatprep.subr.bf16.mxu0 %v17484_v52  ;;  %v16982_v51 = vld [vmem:[#allocation9 + $0x2d0] ss:$24 sps:$4 sm:$0xff]  }
 0x11c   : > { %1798 = vmatprep.subr.bf16.mxu1 %v15828_v53  ;;  %v410_v53 = vld [vmem:[%s20724_s3] sm:$0x3f] }
 0x11e   : > { %1758 = vmatpush1.bf16.msra.mxu0 %v17488_v54 }
 0x11f   : > { %1799 = vmatpush1.bf16.msra.mxu1 %v15826_v55  ;;  %1759 = vmatprep.subr.bf16.mxu0 %v17490_v56  ;;  %v426_v55 = vsub.s32 3, %v17414_v35 }
 0x120   : > { %1800 = vmatprep.subr.bf16.mxu1 %v15831_v57 }
 0x122   : > { %1760 = vmatpush1.bf16.msra.mxu0 %v17494_v58 }
 0x123   : > { %1801 = vmatpush1.bf16.msra.mxu1 %v15829_v59  ;;  %1761 = vmatprep.subr.bf16.mxu0 %v17496_v60  ;;  %v427_v59 = vrot.slane %v410_v53, %v426_v55 }
 0x124   : > { %1802 = vmatprep.subr.bf16.mxu1 %v15834_v61 }
 0x126   : > { %1762 = vmatpush1.bf16.msra.mxu0 %v17500_v62 }
 0x127   : > { %1803 = vmatpush1.bf16.msra.mxu1 %v15832_v63  ;;  %1763 = vmatprep.subr.bf16.mxu0 %v17502_v0 }
 0x128   : > { %1804 = vmatprep.subr.bf16.mxu1 %v15837_v1 }
 0x12a   : > { %1764 = vmatpush1.bf16.msra.mxu0 %v17506_v2 }
 0x12b   : > { %1805 = vmatpush1.bf16.msra.mxu1 %v15835_v3  ;;  %1765 = vmatprep.subr.bf16.mxu0 %v17508_v4 }
 0x12c   : > { %1806 = vmatprep.subr.bf16.mxu1 %v15840_v7 }
 0x12e   : > { %1766 = vmatpush1.bf16.msra.mxu0 %v17512_v8 }
 0x12f   : > { %1807 = vmatpush1.bf16.msra.mxu1 %v15838_v9  ;;  %1767 = vmatprep.subr.bf16.mxu0 %v17514_v10 }
 0x130   : > { %1808 = vmatprep.subr.bf16.mxu1 %v15843_v11 }
 0x132   : > { %1768 = vmatpush1.bf16.msra.mxu0 %v17518_v12 }
 0x133   : > { %1809 = vmatpush1.bf16.msra.mxu1 %v15841_v14  ;;  %1769 = vmatprep.subr.bf16.mxu0 %v17520_v17 }
 0x134   : > { %1810 = vmatprep.subr.bf16.mxu1 %v15846_v19  ;;  %v430_v19 = vsub.s32 4, %v17414_v35 }
 0x136   : > { %1770 = vmatpush1.bf16.msra.mxu0 %v17524_v21 }
 0x137   : > { %1811 = vmatpush1.bf16.msra.mxu1 %v15844_v23  ;;  %2487 = vmatprep.subr.bf16.mxu0 %v16951_v25  ;;  %v431_v23 = vrot.slane %v410_v53, %v430_v19 }
 0x138   : > { %2528 = vmatprep.subr.bf16.mxu1 %v17427_v13  ;;  %v16956_v13 = vld [vmem:[#allocation9 + $0x60] ss:$24 sps:$4 sm:$0xff]  }
 0x139   : > { %1772 = vmatmul.mubr.bf16.vlgmr.msra.gmra.mrb[8].mxu0 %v17431_v16 }
 0x13a   : > { %1813 = vmatmul.mubr.bf16.vlgmr.msra.gmra.mrb[8].mxu1 %v17431_v16  ;;  %2488 = vmatpush1.bf16.msra.mxu0 %v16952_v5  ;;  %v16957_v16 = vld [vmem:[#allocation9 + $0x94] ss:$24 sps:$4 sm:$0xff]  }
 0x13b   : > { %2529 = vmatpush1.bf16.msra.mxu1 %v17429_v15  ;;  %2489 = vmatprep.subr.bf16.mxu0 %v16953_v28  ;;  %v16958_v15 = vld [vmem:[#allocation9 + $0x90] ss:$24 sps:$4 sm:$0xff]  }
 0x13c   : > { %2530 = vmatprep.subr.bf16.mxu1 %v17434_v18  ;;  %v16959_v18 = vld [vmem:[#allocation9 + $0xc4] ss:$24 sps:$4 sm:$0xff]  }
 0x13e   : > { %2490 = vmatpush1.bf16.msra.mxu0 %v16954_v31 }
 0x13f   : > { %2531 = vmatpush1.bf16.msra.mxu1 %v17436_v20  ;;  %2491 = vmatprep.subr.bf16.mxu0 %v16955_v33  ;;  %v16960_v20 = vld [vmem:[#allocation9 + $0xc0] ss:$24 sps:$4 sm:$0xff]  }
 0x140   : > { %2532 = vmatprep.subr.bf16.mxu1 %v17439_v22  ;;  %v16961_v22 = vld [vmem:[#allocation9 + $0xf4] ss:$24 sps:$4 sm:$0xff]  }
 0x142   : > { %2492 = vmatpush1.bf16.msra.mxu0 %v16956_v13 }
 0x143   : > { %2533 = vmatpush1.bf16.msra.mxu1 %v17444_v24  ;;  %2493 = vmatprep.subr.bf16.mxu0 %v16957_v16  ;;  %v16962_v24 = vld [vmem:[#allocation9 + $0xf0] ss:$24 sps:$4 sm:$0xff]  }
 0x144   : > { %2534 = vmatprep.subr.bf16.mxu1 %v17448_v26  ;;  %v16963_v26 = vld [vmem:[#allocation9 + $0x124] ss:$24 sps:$4 sm:$0xff]  }
 0x146   : > { %2494 = vmatpush1.bf16.msra.mxu0 %v16958_v15 }
 0x147   : > { %2535 = vmatpush1.bf16.msra.mxu1 %v17452_v27  ;;  %2495 = vmatprep.subr.bf16.mxu0 %v16959_v18  ;;  %v16964_v27 = vld [vmem:[#allocation9 + $0x120] ss:$24 sps:$4 sm:$0xff]  }
 0x148   : > { %2536 = vmatprep.subr.bf16.mxu1 %v17454_v29  ;;  %v16965_v29 = vld [vmem:[#allocation9 + $0x154] ss:$24 sps:$4 sm:$0xff]  }
 0x14a   : > { %2496 = vmatpush1.bf16.msra.mxu0 %v16960_v20 }
 0x14b   : > { %2537 = vmatpush1.bf16.msra.mxu1 %v17458_v32  ;;  %2497 = vmatprep.subr.bf16.mxu0 %v16961_v22  ;;  %v16966_v32 = vld [vmem:[#allocation9 + $0x150] ss:$24 sps:$4 sm:$0xff]  }
 0x14c   : > { %2538 = vmatprep.subr.bf16.mxu1 %v17460_v34  ;;  %v16967_v34 = vld [vmem:[#allocation9 + $0x184] ss:$24 sps:$4 sm:$0xff]  }
 0x14e   : > { %2498 = vmatpush1.bf16.msra.mxu0 %v16962_v24 }
 0x14f   : > { %2539 = vmatpush1.bf16.msra.mxu1 %v17464_v37  ;;  %2499 = vmatprep.subr.bf16.mxu0 %v16963_v26  ;;  %v16969_v37 = vld [vmem:[#allocation9 + $0x1b4] ss:$24 sps:$4 sm:$0xff]  }
 0x150   : > { %2540 = vmatprep.subr.bf16.mxu1 %v17466_v39  ;;  %v16971_v39 = vld [vmem:[#allocation9 + $0x1e4] ss:$24 sps:$4 sm:$0xff]  }
 0x152   : > { %2500 = vmatpush1.bf16.msra.mxu0 %v16964_v27 }
 0x153   : > { %2541 = vmatpush1.bf16.msra.mxu1 %v17470_v42  ;;  %2501 = vmatprep.subr.bf16.mxu0 %v16965_v29  ;;  %v16973_v42 = vld [vmem:[#allocation9 + $0x214] ss:$24 sps:$4 sm:$0xff]  }
 0x154   : > { %2542 = vmatprep.subr.bf16.mxu1 %v17472_v44  ;;  %v16975_v44 = vld [vmem:[#allocation9 + $0x244] ss:$24 sps:$4 sm:$0xff]  }
 0x156   : > { %2502 = vmatpush1.bf16.msra.mxu0 %v16966_v32 }
 0x157   : > { %2543 = vmatpush1.bf16.msra.mxu1 %v17476_v46  ;;  %2503 = vmatprep.subr.bf16.mxu0 %v16967_v34  ;;  %v16977_v46 = vld [vmem:[#allocation9 + $0x274] ss:$24 sps:$4 sm:$0xff]  }
 0x158   : > { %2544 = vmatprep.subr.bf16.mxu1 %v17478_v48  ;;  %v16979_v48 = vld [vmem:[#allocation9 + $0x2a4] ss:$24 sps:$4 sm:$0xff]  }
 0x15a   : > { %2504 = vmatpush1.bf16.msra.mxu0 %v16968_v36 }
 0x15b   : > { %2545 = vmatpush1.bf16.msra.mxu1 %v17482_v50  ;;  %2505 = vmatprep.subr.bf16.mxu0 %v16969_v37  ;;  %v16981_v50 = vld [vmem:[#allocation9 + $0x2d4] ss:$24 sps:$4 sm:$0xff]   ;;  %v17181_v37 = vmov 1966171168  }
 0x15c   : > { %2546 = vmatprep.subr.bf16.mxu1 %v17484_v52  ;;  %v16983_v52 = vld [vmem:[#allocation9 + $0x14] ss:$24 sps:$4 sm:$0xff]  }
 0x15e   : > { %2506 = vmatpush1.bf16.msra.mxu0 %v16970_v38  ;;  %v1828_v38 = vunpack.c.l.s4 %v17181_v37  ;;  %v16994_v37 = vld [vmem:[#allocation9 + $0x104] ss:$24 sps:$4 sm:$0xff]  }
 0x15f   : > { %2547 = vmatpush1.bf16.msra.mxu1 %v17488_v54  ;;  %2507 = vmatprep.subr.bf16.mxu0 %v16971_v39  ;;  %v422_v54 = vsub.s32 2, %v17414_v35 }
 0x160   : > { %2548 = vmatprep.subr.bf16.mxu1 %v17490_v56  ;;  %v415_v56 = vrot.slane %v410_v53, %v17424_v6 }
 0x161   : > { %v423_v57 = vrot.slane %v410_v53, %v422_v54 }
 0x162   : > { %2508 = vmatpush1.bf16.msra.mxu0 %v16972_v41 }
 0x163   : > { %2549 = vmatpush1.bf16.msra.mxu1 %v17494_v58  ;;  %2509 = vmatprep.subr.bf16.mxu0 %v16973_v42  ;;  %v419_v58 = vrot.slane %v410_v53, %v17417_v40  ;;  %v1829_v42 = vunpack.c.0.s8 %v1828_v38  ;;  %v16995_v38 = vld [vmem:[#allocation9 + $0x100] ss:$24 sps:$4 sm:$0xff]  }
 0x164   : > { %2550 = vmatprep.subr.bf16.mxu1 %v17496_v60 }
 0x166   : > { %2510 = vmatpush1.bf16.msra.mxu0 %v16974_v43 }
 0x167   : > { %2551 = vmatpush1.bf16.msra.mxu1 %v17500_v62  ;;  %2511 = vmatprep.subr.bf16.mxu0 %v16975_v44 }
 0x168   : > { %2552 = vmatprep.subr.bf16.mxu1 %v17502_v0 }
 0x16a   : > { %2512 = vmatpush1.bf16.msra.mxu0 %v16976_v45 }
 0x16b   : > { %2553 = vmatpush1.bf16.msra.mxu1 %v17506_v2  ;;  %2513 = vmatprep.subr.bf16.mxu0 %v16977_v46 }
 0x16c   : > { %2554 = vmatprep.subr.bf16.mxu1 %v17508_v4 }
 0x16e   : > { %2514 = vmatpush1.bf16.msra.mxu0 %v16978_v47 }
 0x16f   : > { %2555 = vmatpush1.bf16.msra.mxu1 %v17512_v8  ;;  %2515 = vmatprep.subr.bf16.mxu0 %v16979_v48 }
 0x170   : > { %2556 = vmatprep.subr.bf16.mxu1 %v17514_v10 }
 0x172   : > { %2516 = vmatpush1.bf16.msra.mxu0 %v16980_v49 }
 0x173   : > { %2557 = vmatpush1.bf16.msra.mxu1 %v17518_v12  ;;  %2517 = vmatprep.subr.bf16.mxu0 %v16981_v50 }
 0x174   : > { %2558 = vmatprep.subr.bf16.mxu1 %v17520_v17  ;;  %v1073_v17 = vld [vmem:[%s20725_s4] sm:$0x3f] }
 0x175   : > { %v17576_v25 = vrot.slane %v1073_v17, %v17424_v6  ;;  %v17579_v28 = vrot.slane %v1073_v17, %v17417_v40  ;;  %v17583_v39 = vrot.slane %v1073_v17, %v422_v54  ;;  %v17585_v41 = vrot.slane %v1073_v17, %v430_v19 }
 0x176   : > { %2518 = vmatpush1.bf16.msra.mxu0 %v16982_v51  ;;  %v17587_v43 = vrot.slane %v1073_v17, %v426_v55  ;;  %v17594_v51 = vsub.s32 %v1829_v42, %v17414_v35  ;;  %v16996_v42 = vld [vmem:[#allocation9 + $0x134] ss:$24 sps:$4 sm:$0xff]  }
 0x177   : > { %2559 = vmatpush1.bf16.msra.mxu1 %v17524_v21  ;;  %2569 = vmatprep.subr.bf16.mxu0 %v16983_v52  ;;  %v434_v21 = vsub.s32 5, %v17414_v35  ;;  %20962 = vst [vmem:[#allocation14_spill] sm:$0xff] %v17576_v25  ;;  %20963 = vst [vmem:[#allocation15_spill] sm:$0xff] %v17583_v39 }
 0x179   : > { %v435_v5 = vrot.slane %v410_v53, %v434_v21  ;;  %v17589_v44 = vrot.slane %v1073_v17, %v434_v21 }
 0x18c   : > { %v966_v60 = vpop.f32.mrb[0].mxu0 }
 0x18d   : > { %v1009_v61 = vpop.f32.mrb[0].mxu1  ;;  %v967_v62 = vadd.f32 %v966_v60, %v415_v56  ;;  %v968_v0 = vpop.f32.mrb[1].mxu0 }
 0x18e   : > { %v1010_v63 = vadd.f32 %v1009_v61, %v423_v57  ;;  %v1011_v1 = vpop.f32.mrb[1].mxu1  ;;  %v969_v2 = vadd.f32 %v968_v0, %v419_v58  ;;  %v970_v4 = vpop.f32.mrb[2].mxu0 }
 0x18f   : > { %v1012_v3 = vadd.f32 %v1011_v1, %v427_v59  ;;  %v1013_v7 = vpop.f32.mrb[2].mxu1  ;;  %1061 = vst [vmem:[#allocation3] sm:$0xff] %v967_v62  ;;  %v971_v8 = vadd.f32 %v970_v4, %v415_v56  ;;  %v972_v10 = vpop.f32.mrb[3].mxu0 }
 0x190   : > { %1063 = vst [vmem:[#allocation3 + $0x10] sm:$0xff] %v1010_v63  ;;  %v1014_v9 = vadd.f32 %v1013_v7, %v423_v57  ;;  %v1015_v11 = vpop.f32.mrb[3].mxu1  ;;  %1062 = vst [vmem:[#allocation3 + $0x8] sm:$0xff] %v969_v2  ;;  %v973_v12 = vadd.f32 %v972_v10, %v419_v58 }
 0x191   : > { %1064 = vst [vmem:[#allocation3 + $0x18] sm:$0xff] %v1012_v3  ;;  %v1016_v14 = vadd.f32 %v1015_v11, %v427_v59  ;;  %1067 = vst [vmem:[#allocation3 + $0x30] sm:$0xff] %v971_v8 }
 0x192   : > { %1069 = vst [vmem:[#allocation3 + $0x40] sm:$0xff] %v1014_v9  ;;  %1068 = vst [vmem:[#allocation3 + $0x38] sm:$0xff] %v973_v12 }
 0x193   : > { %1070 = vst [vmem:[#allocation3 + $0x48] sm:$0xff] %v1016_v14 }
 0x198   : > { %v1075_v0 = vld [vmem:[#allocation3] ss:$8 sm:$0xf] }
 0x1cc   : > { %v1052_v31 = vpop.f32.mrb[4].mxu0 }
 0x1cd   : > { %v1732_v33 = vpop.f32.mrb[4].mxu1  ;;  %v1053_v13 = vadd.f32 %v1052_v31, %v431_v23  ;;  %v1054_v16 = vpop.f32.mrb[5].mxu0 }
 0x1ce   : > { %v1733_v15 = vadd.f32 %v1732_v33, %v17576_v25  ;;  %v1734_v18 = vpop.f32.mrb[5].mxu1  ;;  %v1055_v20 = vadd.f32 %v1054_v16, %v435_v5  ;;  %v1056_v22 = vpop.f32.mrb[6].mxu0 }
 0x1cf   : > { %v1735_v24 = vadd.f32 %v1734_v18, %v17579_v28  ;;  %v1736_v26 = vpop.f32.mrb[6].mxu1  ;;  %1065 = vst [vmem:[#allocation3 + $0x20] sm:$0xff] %v1053_v13  ;;  %v1057_v27 = vadd.f32 %v1056_v22, %v431_v23  ;;  %v1058_v29 = vpop.f32.mrb[7].mxu0  ;;  %v16986_v22 = vld [vmem:[#allocation9 + $0x44] ss:$24 sps:$4 sm:$0xff]  }
 0x1d0   : > { %v1737_v32 = vpop.f32.mrb[7].mxu1  ;;  %1066 = vst [vmem:[#allocation3 + $0x28] sm:$0xff] %v1055_v20  ;;  %v1059_v34 = vadd.f32 %v1058_v29, %v435_v5  ;;  %v16984_v5 = vld [vmem:[#allocation2] sm:$0x3]  ;;  %v16988_v26 = vld [vmem:[#allocation9 + $0x74] ss:$24 sps:$4 sm:$0xff]  }
 0x1d1   : > { %v1825_v36 = vcombine.low %v1733_v15, %v1735_v24  ;;  %1071 = vst [vmem:[#allocation3 + $0x50] sm:$0xff] %v1057_v27  ;;  %v16987_v24 = vld [vmem:[#allocation9 + $0x40] ss:$24 sps:$4 sm:$0xff]   ;;  %v16989_v27 = vld [vmem:[#allocation9 + $0x70] ss:$24 sps:$4 sm:$0xff]  }
 0x1d2   : > { %1072 = vst [vmem:[#allocation3 + $0x58] sm:$0xff] %v1059_v34  ;;  %v16990_v29 = vld [vmem:[#allocation9 + $0xa4] ss:$24 sps:$4 sm:$0xff]   ;;  %v16991_v32 = vld [vmem:[#allocation9 + $0xa0] ss:$24 sps:$4 sm:$0xff]  }
 0x1d3   : > { %v1833_v60 = vrot.slane %v1825_v36, %v17594_v51  ;;  %v16992_v34 = vld [vmem:[#allocation9 + $0xd4] ss:$24 sps:$4 sm:$0xff]   ;;  %v16993_v36 = vld [vmem:[#allocation9 + $0xd0] ss:$24 sps:$4 sm:$0xff]  }
 0x1d7   : > { %v1076_v62 = vld [vmem:[#allocation3] ss:$8 sm:$0x30] }
 0x1d8   : > { %v1077_v1 = vor.u32 %v1076_v62, %v1075_v0  ;;  %v17013_v62 = vld [vmem:[#allocation9 + $0x2b0] ss:$24 sps:$4 sm:$0xff]   ;;  %v17015_v0 = vld [vmem:[#allocation9 + $0x2e0] ss:$24 sps:$4 sm:$0xff]  }
 0x1da   : > { %v1877_v12 = vrot.slane %v1077_v1, 4 }
 0x20c   : > { %v1773_v45 = vpop.f32.mrb[8].mxu0 }
 0x20d   : > { %v1814_v46 = vpop.f32.mrb[8].mxu1  ;;  %v1774_v47 = vadd.f32 %v1773_v45, %v17583_v39  ;;  %v1775_v48 = vpop.f32.mrb[9].mxu0  ;;  %v16997_v45 = vld [vmem:[#allocation9 + $0x130] ss:$24 sps:$4 sm:$0xff]  }
 0x20e   : > { %v1815_v49 = vadd.f32 %v1814_v46, %v17585_v41  ;;  %v1816_v50 = vpop.f32.mrb[9].mxu1  ;;  %v1776_v52 = vadd.f32 %v1775_v48, %v17587_v43  ;;  %v1777_v53 = vpop.f32.mrb[10].mxu0  ;;  %v16998_v46 = vld [vmem:[#allocation9 + $0x164] ss:$24 sps:$4 sm:$0xff]   ;;  %v17000_v48 = vld [vmem:[#allocation9 + $0x194] ss:$24 sps:$4 sm:$0xff]  }
 0x20f   : > { %v1817_v54 = vadd.f32 %v1816_v50, %v17589_v44  ;;  %v1818_v55 = vpop.f32.mrb[10].mxu1  ;;  %v1778_v56 = vpop.f32.mrb[11].mxu0  ;;  %v17002_v50 = vld [vmem:[#allocation9 + $0x1c4] ss:$24 sps:$4 sm:$0xff]   ;;  %v17004_v53 = vld [vmem:[#allocation9 + $0x1f4] ss:$24 sps:$4 sm:$0xff]  }
 0x210   : > { %v1819_v57 = vpop.f32.mrb[11].mxu1  ;;  %v1826_v58 = vcombine.low %v1774_v47, %v1776_v52  ;;  %v16999_v47 = vld [vmem:[#allocation9 + $0x160] ss:$24 sps:$4 sm:$0xff]   ;;  %v17006_v55 = vld [vmem:[#allocation9 + $0x224] ss:$24 sps:$4 sm:$0xff]  }
 0x211   : > { %v1859_v59 = vcombine.low %v1815_v49, %v1817_v54  ;;  %v17001_v49 = vld [vmem:[#allocation9 + $0x190] ss:$24 sps:$4 sm:$0xff]   ;;  %v17003_v52 = vld [vmem:[#allocation9 + $0x1c0] ss:$24 sps:$4 sm:$0xff]   ;;  %v17008_v57 = vld [vmem:[#allocation9 + $0x254] ss:$24 sps:$4 sm:$0xff]  }
 0x212   : > { %v1840_v61 = vrot.slane %v1826_v58, %v17594_v51  ;;  %v17005_v54 = vld [vmem:[#allocation9 + $0x1f0] ss:$24 sps:$4 sm:$0xff]   ;;  %v17007_v56 = vld [vmem:[#allocation9 + $0x220] ss:$24 sps:$4 sm:$0xff]  }
 0x213   : > { %v1866_v8 = vrot.slane %v1859_v59, %v17594_v51  ;;  %v17009_v58 = vld [vmem:[#allocation9 + $0x250] ss:$24 sps:$4 sm:$0xff]   ;;  %v17010_v59 = vld [vmem:[#allocation9 + $0x284] ss:$24 sps:$4 sm:$0xff]  }
 0x214   : > { %v1841_v63 = vcombine.low %v1833_v60, %v1840_v61  ;;  %v17011_v60 = vld [vmem:[#allocation9 + $0x280] ss:$24 sps:$4 sm:$0xff]   ;;  %v17012_v61 = vld [vmem:[#allocation9 + $0x2b4] ss:$24 sps:$4 sm:$0xff]  }
 0x215   : > { %v1873_v9 = vrot.slane %v1866_v8, %v17594_v51  ;;  %v17638_v8 = vld [vmem:[#allocation9 + $0x30] ss:$24 sps:$4 sm:$0xff]  }
 0x216   : > { %v1848_v35 = vrot.slane %v1841_v63, %v17594_v51  ;;  %v17014_v63 = vld [vmem:[#allocation9 + $0x2e4] ss:$24 sps:$4 sm:$0xff]  }
 0x218   : > { %v1850_v2 = vadd.f32 %v1848_v35, %v1077_v1  ;;  %v17623_v1 = vld [vmem:[#allocation9] ss:$24 sps:$4 sm:$0xff]   ;;  %v17625_v35 = vld [vmem:[#allocation9 + $0x4] ss:$24 sps:$4 sm:$0xff]  }
 0x219   : > { %3273 = vmatprep.subr.bf16.mxu1 %v17625_v35 }
 0x21a   : > { %v14001_v3 = vmul.f32 -1.442695, %v1850_v2  ;;  %v17627_v2 = vld [vmem:[#allocation9 + $0x8] ss:$24 sps:$4 sm:$0xff]  }
 0x21c   : > { %16855 = vpow2.f32 %v14001_v3  ;;  %v17629_v3 = vld [vmem:[#allocation9 + $0xc] ss:$24 sps:$4 sm:$0xff]  }
 0x226   : > { %v16856_v4 = vpop.eup %16855 }
 0x227   : > { %v1854_v7 = vadd.f32 1.0, %v16856_v4  ;;  %v17631_v4 = vld [vmem:[#allocation9 + $0x34] ss:$24 sps:$4 sm:$0xff]  }
 0x229   : > { %16857 = vrcp.f32 %v1854_v7  ;;  %v17634_v7 = vld [vmem:[#allocation9 + $0x3c] ss:$24 sps:$4 sm:$0xff]  }
 0x233   : > { %v16858_v10 = vpop.eup %16857 }
 0x234   : > { %v1875_v11 = vmul.f32 %v16858_v10, %v1873_v9  ;;  %v1882_v17 = vrot.slane %v16858_v10, 2  ;;  %v17642_v9 = vld [vmem:[#allocation9 + $0x38] ss:$24 sps:$4 sm:$0xff]   ;;  %v17644_v10 = vld [vmem:[#allocation9 + $0x64] ss:$24 sps:$4 sm:$0xff]  }
 0x235   : > { %20966 = vst [vmem:[#allocation16_spill] sm:$0xff] %v17642_v9 }
 0x236   : > { %v1879_v14 = vadd.f32 %v1877_v12, %v1875_v11  ;;  %v1884_v19 = vsub.f32 1.0, %v1882_v17  ;;  %v1886_v31 = vmul.f32 %v16984_v5, %v1882_v17  ;;  %v17647_v11 = vld [vmem:[#allocation9 + $0x6c] ss:$24 sps:$4 sm:$0xff]   ;;  %v17650_v12 = vld [vmem:[#allocation9 + $0x60] ss:$24 sps:$4 sm:$0xff]  }
 0x237   : > { %20967 = vst [vmem:[#allocation17_spill] sm:$0xff] %v17647_v11  ;;  %v17656_v17 = vld [vmem:[#allocation9 + $0x94] ss:$24 sps:$4 sm:$0xff]   ;;  %v17668_v5 = vld [vmem:[#allocation9 + $0xc4] ss:$24 sps:$4 sm:$0xff]  }
 0x238   : > { %16859 = vtanh.f32 %v1879_v14  ;;  %v17654_v14 = vld [vmem:[#allocation9 + $0x68] ss:$24 sps:$4 sm:$0xff]  }
 0x239   : > { %20968 = vst [vmem:[#allocation18_spill] sm:$0xff] %v17654_v14 }
 0x242   : > { %v16860_v21 = vpop.eup %16859 }
 0x243   : > { %v1885_v23 = vmul.f32 %v16860_v21, %v1884_v19  ;;  %v17659_v19 = vld [vmem:[#allocation9 + $0x9c] ss:$24 sps:$4 sm:$0xff]   ;;  %v17662_v21 = vld [vmem:[#allocation9 + $0x90] ss:$24 sps:$4 sm:$0xff]  }
 0x244   : > { %20969 = vst [vmem:[#allocation19_spill] sm:$0xff] %v17659_v19 }
 0x245   : > { %v17608_v13 = vadd.f32 %v1886_v31, %v1885_v23  ;;  %v17666_v23 = vld [vmem:[#allocation9 + $0x98] ss:$24 sps:$4 sm:$0xff]   ;;  %v17671_v31 = vld [vmem:[#allocation9 + $0xcc] ss:$24 sps:$4 sm:$0xff]  }
 0x246   : > { %20970 = vst [vmem:[#allocation20_spill] sm:$0xff] %v17666_v23  ;;  %20971 = vst [vmem:[#allocation21_spill] sm:$0xff] %v17671_v31 }
 0x247   : > { %1892 = vst.msk [vmem:[%s17400_s14] ss:$8 sm:$0x3] %vm17604_vm1, %v17608_v13  ;;  %v1906_v16 = vrot.slane %v17608_v13, %v17417_v40  ;;  %v1902_v15 = vrot.slane %v17608_v13, %v17424_v6 }
 0x249   : > { %v1910_v18 = vpack.c.bf16 %v1906_v16, %v1906_v16  ;;  %v17618_v20 = vpack.c.bf16 %v1902_v15, %v1902_v15  ;;  %v17674_v16 = vld [vmem:[#allocation9 + $0xc0] ss:$24 sps:$4 sm:$0xff]  }
 0x24a   : > { %v17678_v15 = vld [vmem:[#allocation9 + $0xc8] ss:$24 sps:$4 sm:$0xff]  }
 0x24b   : > { %2519 = vmatprep.mubr.bf16.mxu0 %v1910_v18  ;;  %2560 = vmatprep.mubr.bf16.mxu1 %v1910_v18  ;;  %20972 = vst [vmem:[#allocation22_spill] sm:$0xff] %v17678_v15 }
 0x24c   : > { %2520 = vmatmul.mubr.bf16.vlgmr.msra.gmra.mrb[12].mxu0 %v17618_v20  ;;  %2561 = vmatmul.mubr.bf16.vlgmr.msra.gmra.mrb[12].mxu1 %v17618_v20 }
 0x24d   : > { %2570 = vmatpush1.bf16.msra.mxu0 %v16985_v30  ;;  %2601 = vmatprep.mubr.bf16.mxu0 %v1910_v18  ;;  %v17680_v18 = vld [vmem:[#allocation9 + $0xf4] ss:$24 sps:$4 sm:$0xff]   ;;  %v17686_v30 = vld [vmem:[#allocation9 + $0xf0] ss:$24 sps:$4 sm:$0xff]  }
 0x24e   : > { %2571 = vmatprep.subr.bf16.mxu0 %v16986_v22  ;;  %3274 = vmatpush1.bf16.msra.mxu1 %v17623_v1  ;;  %v17690_v22 = vld [vmem:[#allocation9 + $0xf8] ss:$24 sps:$4 sm:$0xff]  }
 0x24f   : > { %3275 = vmatprep.subr.bf16.mxu1 %v17631_v4  ;;  %20974 = vst [vmem:[#allocation24_spill] sm:$0xff] %v17690_v22 }
 0x251   : > { %2572 = vmatpush1.bf16.msra.mxu0 %v16987_v24  ;;  %v17692_v24 = vld [vmem:[#allocation9 + $0x124] ss:$24 sps:$4 sm:$0xff]  }
 0x252   : > { %2573 = vmatprep.subr.bf16.mxu0 %v16988_v26  ;;  %3276 = vmatpush1.bf16.msra.mxu1 %v17638_v8  ;;  %v17695_v26 = vld [vmem:[#allocation9 + $0x12c] ss:$24 sps:$4 sm:$0xff]  }
 0x253   : > { %3277 = vmatprep.subr.bf16.mxu1 %v17644_v10  ;;  %20975 = vst [vmem:[#allocation25_spill] sm:$0xff] %v17695_v26 }
 0x255   : > { %2574 = vmatpush1.bf16.msra.mxu0 %v16989_v27  ;;  %v17698_v27 = vld [vmem:[#allocation9 + $0x120] ss:$24 sps:$4 sm:$0xff]  }
 0x256   : > { %2575 = vmatprep.subr.bf16.mxu0 %v16990_v29  ;;  %3278 = vmatpush1.bf16.msra.mxu1 %v17650_v12  ;;  %v17702_v29 = vld [vmem:[#allocation9 + $0x128] ss:$24 sps:$4 sm:$0xff]  }
 0x257   : > { %3279 = vmatprep.subr.bf16.mxu1 %v17656_v17  ;;  %20976 = vst [vmem:[#allocation26_spill] sm:$0xff] %v17702_v29 }
 0x259   : > { %2576 = vmatpush1.bf16.msra.mxu0 %v16991_v32  ;;  %v17704_v32 = vld [vmem:[#allocation9 + $0x154] ss:$24 sps:$4 sm:$0xff]  }
 0x25a   : > { %2577 = vmatprep.subr.bf16.mxu0 %v16992_v34  ;;  %3280 = vmatpush1.bf16.msra.mxu1 %v17662_v21  ;;  %v17707_v34 = vld [vmem:[#allocation9 + $0x15c] ss:$24 sps:$4 sm:$0xff]  }
 0x25b   : > { %3281 = vmatprep.subr.bf16.mxu1 %v17668_v5  ;;  %20977 = vst [vmem:[#allocation27_spill] sm:$0xff] %v17707_v34 }
 0x25d   : > { %2578 = vmatpush1.bf16.msra.mxu0 %v16993_v36  ;;  %v17710_v36 = vld [vmem:[#allocation9 + $0x150] ss:$24 sps:$4 sm:$0xff]  }
 0x25e   : > { %2579 = vmatprep.subr.bf16.mxu0 %v16994_v37  ;;  %3282 = vmatpush1.bf16.msra.mxu1 %v17674_v16  ;;  %v17714_v37 = vld [vmem:[#allocation9 + $0x158] ss:$24 sps:$4 sm:$0xff]  }
 0x25f   : > { %3283 = vmatprep.subr.bf16.mxu1 %v17680_v18  ;;  %20978 = vst [vmem:[#allocation28_spill] sm:$0xff] %v17714_v37 }
 0x261   : > { %2580 = vmatpush1.bf16.msra.mxu0 %v16995_v38  ;;  %v17719_v38 = vld [vmem:[#allocation9 + $0x184] ss:$24 sps:$4 sm:$0xff]  }
 0x262   : > { %2581 = vmatprep.subr.bf16.mxu0 %v16996_v42  ;;  %3284 = vmatpush1.bf16.msra.mxu1 %v17686_v30  ;;  %v17721_v42 = vld [vmem:[#allocation9 + $0x180] ss:$24 sps:$4 sm:$0xff]  }
 0x263   : > { %3285 = vmatprep.subr.bf16.mxu1 %v17692_v24 }
 0x265   : > { %2582 = vmatpush1.bf16.msra.mxu0 %v16997_v45  ;;  %v17723_v45 = vld [vmem:[#allocation9 + $0x18c] ss:$24 sps:$4 sm:$0xff]  }
 0x266   : > { %2583 = vmatprep.subr.bf16.mxu0 %v16998_v46  ;;  %3286 = vmatpush1.bf16.msra.mxu1 %v17698_v27  ;;  %20979 = vst [vmem:[#allocation29_spill] sm:$0xff] %v17723_v45  ;;  %v17726_v46 = vld [vmem:[#allocation9 + $0x188] ss:$24 sps:$4 sm:$0xff]  }
 0x267   : > { %3287 = vmatprep.subr.bf16.mxu1 %v17704_v32  ;;  %20980 = vst [vmem:[#allocation30_spill] sm:$0xff] %v17726_v46 }
 0x269   : > { %2584 = vmatpush1.bf16.msra.mxu0 %v16999_v47  ;;  %v17731_v47 = vld [vmem:[#allocation9 + $0x1b4] ss:$24 sps:$4 sm:$0xff]  }
 0x26a   : > { %2585 = vmatprep.subr.bf16.mxu0 %v17000_v48  ;;  %3288 = vmatpush1.bf16.msra.mxu1 %v17710_v36  ;;  %v17733_v48 = vld [vmem:[#allocation9 + $0x1b0] ss:$24 sps:$4 sm:$0xff]  }
 0x26b   : > { %3289 = vmatprep.subr.bf16.mxu1 %v17719_v38 }
 0x26d   : > { %2586 = vmatpush1.bf16.msra.mxu0 %v17001_v49  ;;  %v17735_v49 = vld [vmem:[#allocation9 + $0x1bc] ss:$24 sps:$4 sm:$0xff]  }
 0x26e   : > { %2587 = vmatprep.subr.bf16.mxu0 %v17002_v50  ;;  %3290 = vmatpush1.bf16.msra.mxu1 %v17721_v42  ;;  %20981 = vst [vmem:[#allocation31_spill] sm:$0xff] %v17735_v49  ;;  %v17738_v50 = vld [vmem:[#allocation9 + $0x1b8] ss:$24 sps:$4 sm:$0xff]  }
 0x26f   : > { %3291 = vmatprep.subr.bf16.mxu1 %v17731_v47  ;;  %20982 = vst [vmem:[#allocation32_spill] sm:$0xff] %v17738_v50 }
 0x271   : > { %2588 = vmatpush1.bf16.msra.mxu0 %v17003_v52  ;;  %v17743_v52 = vld [vmem:[#allocation9 + $0x1e4] ss:$24 sps:$4 sm:$0xff]  }
 0x272   : > { %2589 = vmatprep.subr.bf16.mxu0 %v17004_v53  ;;  %3292 = vmatpush1.bf16.msra.mxu1 %v17733_v48  ;;  %v17745_v53 = vld [vmem:[#allocation9 + $0x1e0] ss:$24 sps:$4 sm:$0xff]  }
 0x273   : > { %3293 = vmatprep.subr.bf16.mxu1 %v17743_v52 }
 0x275   : > { %2590 = vmatpush1.bf16.msra.mxu0 %v17005_v54  ;;  %v17747_v54 = vld [vmem:[#allocation9 + $0x1ec] ss:$24 sps:$4 sm:$0xff]  }
 0x276   : > { %2591 = vmatprep.subr.bf16.mxu0 %v17006_v55  ;;  %20983 = vst [vmem:[#allocation33_spill] sm:$0xff] %v17747_v54  ;;  %v17750_v55 = vld [vmem:[#allocation9 + $0x1e8] ss:$24 sps:$4 sm:$0xff]   ;;  %3294 = vmatpush1.bf16.msra.mxu1 %v17745_v53 }
 0x277   : > { %20984 = vst [vmem:[#allocation34_spill] sm:$0xff] %v17750_v55 }
 0x279   : > { %2592 = vmatpush1.bf16.msra.mxu0 %v17007_v56  ;;  %v17755_v56 = vld [vmem:[#allocation9 + $0x214] ss:$24 sps:$4 sm:$0xff]  }
 0x27a   : > { %2593 = vmatprep.subr.bf16.mxu0 %v17008_v57  ;;  %v17757_v57 = vld [vmem:[#allocation9 + $0x210] ss:$24 sps:$4 sm:$0xff]   ;;  %3295 = vmatprep.subr.bf16.mxu1 %v17755_v56 }
 0x27b   : > { %3296 = vmatpush1.bf16.msra.mxu1 %v17757_v57 }
 0x27d   : > { %2594 = vmatpush1.bf16.msra.mxu0 %v17009_v58  ;;  %v17759_v58 = vld [vmem:[#allocation9 + $0x21c] ss:$24 sps:$4 sm:$0xff]  }
 0x27e   : > { %2595 = vmatprep.subr.bf16.mxu0 %v17010_v59  ;;  %20985 = vst [vmem:[#allocation35_spill] sm:$0xff] %v17759_v58  ;;  %v17762_v59 = vld [vmem:[#allocation9 + $0x218] ss:$24 sps:$4 sm:$0xff]  }
 0x27f   : > { %20986 = vst [vmem:[#allocation36_spill] sm:$0xff] %v17762_v59 }
 0x281   : > { %2596 = vmatpush1.bf16.msra.mxu0 %v17011_v60  ;;  %v17766_v60 = vld [vmem:[#allocation9 + $0x240] ss:$24 sps:$4 sm:$0xff]  }
 0x282   : > { %2597 = vmatprep.subr.bf16.mxu0 %v17012_v61  ;;  %v17768_v61 = vld [vmem:[#allocation9 + $0x244] ss:$24 sps:$4 sm:$0xff]  }
 0x283   : > { %3297 = vmatprep.subr.bf16.mxu1 %v17768_v61 }
 0x284   : > { %3298 = vmatpush1.bf16.msra.mxu1 %v17766_v60 }
 0x285   : > { %2598 = vmatpush1.bf16.msra.mxu0 %v17013_v62  ;;  %v17771_v62 = vld [vmem:[#allocation9 + $0x248] ss:$24 sps:$4 sm:$0xff]  }
 0x286   : > { %2599 = vmatprep.subr.bf16.mxu0 %v17014_v63  ;;  %20987 = vst [vmem:[#allocation37_spill] sm:$0xff] %v17771_v62  ;;  %v17773_v63 = vld [vmem:[#allocation9 + $0x24c] ss:$24 sps:$4 sm:$0xff]  }
 0x287   : > { %20988 = vst [vmem:[#allocation38_spill] sm:$0xff] %v17773_v63 }
 0x289   : > { %2600 = vmatpush1.bf16.msra.mxu0 %v17015_v0  ;;  %v17775_v0 = vld [vmem:[#allocation9 + $0x274] ss:$24 sps:$4 sm:$0xff]  }
 0x28a   : > { %3314 = vmatprep.subr.bf16.mxu0 %v17629_v3  ;;  %3299 = vmatprep.subr.bf16.mxu1 %v17775_v0 }
 0x28c   : > { %2602 = vmatmul.mubr.bf16.vlgmr.msra.gmra.mrb[16].mxu0 %v17618_v20  ;;  %v17683_v20 = vld [vmem:[#allocation9 + $0xfc] ss:$24 sps:$4 sm:$0xff]  }
 0x28d   : > { %3315 = vmatpush1.bf16.msra.mxu0 %v17627_v2  ;;  %20973 = vst [vmem:[#allocation23_spill] sm:$0xff] %v17683_v20 }
 0x28e   : > { %3316 = vmatprep.subr.bf16.mxu0 %v17634_v7 }
 0x291   : > { %3317 = vmatpush1.bf16.msra.mxu0 %v17642_v9 }
 0x292   : > { %3318 = vmatprep.subr.bf16.mxu0 %v17647_v11 }
 0x295   : > { %3319 = vmatpush1.bf16.msra.mxu0 %v17654_v14 }
 0x296   : > { %3320 = vmatprep.subr.bf16.mxu0 %v17659_v19 }
 0x299   : > { %3321 = vmatpush1.bf16.msra.mxu0 %v17666_v23 }
 0x29a   : > { %3322 = vmatprep.subr.bf16.mxu0 %v17671_v31 }
 0x29d   : > { %3323 = vmatpush1.bf16.msra.mxu0 %v17678_v15 }
 0x29e   : > { %3324 = vmatprep.subr.bf16.mxu0 %v17683_v20 }
 0x2a1   : > { %3325 = vmatpush1.bf16.msra.mxu0 %v17690_v22 }
 0x2a2   : > { %3326 = vmatprep.subr.bf16.mxu0 %v17695_v26 }
 0x2a5   : > { %3327 = vmatpush1.bf16.msra.mxu0 %v17702_v29 }
 0x2a6   : > { %3328 = vmatprep.subr.bf16.mxu0 %v17707_v34 }
 0x2a9   : > { %3329 = vmatpush1.bf16.msra.mxu0 %v17714_v37 }
 0x2aa   : > { %3330 = vmatprep.subr.bf16.mxu0 %v17723_v45  ;;  %v17810_v45 = vld [vmem:[#allocation9 + $0x2d8] ss:$24 sps:$4 sm:$0xff]  }
 0x2ab   : > { %20994 = vst [vmem:[#allocation44_spill] sm:$0xff] %v17810_v45 }
 0x2ad   : > { %3331 = vmatpush1.bf16.msra.mxu0 %v17726_v46  ;;  %v17803_v46 = vld [vmem:[#allocation9 + $0x2dc] ss:$24 sps:$4 sm:$0xff]  }
 0x2ae   : > { %3332 = vmatprep.subr.bf16.mxu0 %v17735_v49  ;;  %v17794_v49 = vld [vmem:[#allocation9 + $0x2a0] ss:$24 sps:$4 sm:$0xff]   ;;  %20993 = vst [vmem:[#allocation43_spill] sm:$0xff] %v17803_v46 }
 0x2b1   : > { %3333 = vmatpush1.bf16.msra.mxu0 %v17738_v50  ;;  %v17791_v50 = vld [vmem:[#allocation9 + $0x2ac] ss:$24 sps:$4 sm:$0xff]  }
 0x2b2   : > { %3334 = vmatprep.subr.bf16.mxu0 %v17747_v54  ;;  %v17788_v54 = vld [vmem:[#allocation9 + $0x2a4] ss:$24 sps:$4 sm:$0xff]   ;;  %20991 = vst [vmem:[#allocation41_spill] sm:$0xff] %v17791_v50 }
 0x2b5   : > { %3335 = vmatpush1.bf16.msra.mxu0 %v17750_v55  ;;  %v17778_v55 = vld [vmem:[#allocation9 + $0x27c] ss:$24 sps:$4 sm:$0xff]  }
 0x2b6   : > { %3336 = vmatprep.subr.bf16.mxu0 %v17759_v58  ;;  %20989 = vst [vmem:[#allocation39_spill] sm:$0xff] %v17778_v55  ;;  %v17782_v58 = vld [vmem:[#allocation9 + $0x270] ss:$24 sps:$4 sm:$0xff]  }
 0x2b7   : > { %3300 = vmatpush1.bf16.msra.mxu1 %v17782_v58 }
 0x2b8   : > { %3301 = vmatprep.subr.bf16.mxu1 %v17788_v54 }
 0x2b9   : > { %3337 = vmatpush1.bf16.msra.mxu0 %v17762_v59  ;;  %v17786_v59 = vld [vmem:[#allocation9 + $0x278] ss:$24 sps:$4 sm:$0xff]  }
 0x2ba   : > { %3338 = vmatprep.subr.bf16.mxu0 %v17773_v63  ;;  %20990 = vst [vmem:[#allocation40_spill] sm:$0xff] %v17786_v59  ;;  %v17798_v63 = vld [vmem:[#allocation9 + $0x2a8] ss:$24 sps:$4 sm:$0xff]  }
 0x2bb   : > { %20992 = vst [vmem:[#allocation42_spill] sm:$0xff] %v17798_v63  ;;  %3302 = vmatpush1.bf16.msra.mxu1 %v17794_v49 }
 0x2bd   : > { %3339 = vmatpush1.bf16.msra.mxu0 %v17771_v62  ;;  %v17800_v62 = vld [vmem:[#allocation9 + $0x2d4] ss:$24 sps:$4 sm:$0xff]  }
 0x2be   : > { %3340 = vmatprep.subr.bf16.mxu0 %v17778_v55  ;;  %v17806_v55 = vld [vmem:[#allocation9 + $0x2d0] ss:$24 sps:$4 sm:$0xff]   ;;  %3303 = vmatprep.subr.bf16.mxu1 %v17800_v62 }
 0x2bf   : > { %3304 = vmatpush1.bf16.msra.mxu1 %v17806_v55 }
 0x2c1   : > { %3341 = vmatpush1.bf16.msra.mxu0 %v17786_v59  ;;  %v17815_v59 = vld [vmem:[#allocation9 + $0x14] ss:$24 sps:$4 sm:$0xff]  }
 0x2c2   : > { %3342 = vmatprep.subr.bf16.mxu0 %v17791_v50  ;;  %3355 = vmatprep.subr.bf16.mxu1 %v17815_v59 }
 0x2c5   : > { %3343 = vmatpush1.bf16.msra.mxu0 %v17798_v63 }
 0x2c6   : > { %3344 = vmatprep.subr.bf16.mxu0 %v17803_v46 }
 0x2c9   : > { %3345 = vmatpush1.bf16.msra.mxu0 %v17810_v45 }
 0x2ca   : > { %4059 = vmatprep.subr.bf16.mxu0 %v17625_v35 }
 0x31f   : > { %v2521_v50 = vpop.f32.mrb[12].mxu0  ;;  %v2562_v37 = vpop.f32.mrb[12].mxu1 }
 0x320   : > { %v2522_v63 = vadd.f32 %v2521_v50, %v17576_v25  ;;  %v2563_v34 = vadd.f32 %v2562_v37, %v17583_v39  ;;  %v2523_v29 = vpop.f32.mrb[13].mxu0  ;;  %v2564_v26 = vpop.f32.mrb[13].mxu1  ;;  %v1896_v50 = vld [vmem:[#allocation3 + $0x1] ss:$8 sm:$0x30] }
 0x321   : > { %v2524_v46 = vadd.f32 %v2523_v29, %v17579_v28  ;;  %v2565_v22 = vadd.f32 %v2564_v26, %v17587_v43  ;;  %v2525_v20 = vpop.f32.mrb[14].mxu0  ;;  %v2566_v45 = vpop.f32.mrb[14].mxu1  ;;  %v1895_v39 = vld [vmem:[#allocation3 + $0x1] ss:$8 sm:$0xf] }
 0x322   : > { %v2526_v15 = vpop.f32.mrb[15].mxu0  ;;  %v2567_v31 = vpop.f32.mrb[15].mxu1  ;;  %v1897_v25 = vor.u32 %v1896_v50, %v1895_v39 }
 0x323   : > { %v2614_v23 = vcombine.low %v2522_v63, %v2524_v46  ;;  %v2615_v35 = vcombine.low %v2563_v34, %v2565_v22 }
 0x324   : > { %v2666_v46 = vrot.slane %v1897_v25, 4 }
 0x325   : > { %v2622_v19 = vrot.slane %v2614_v23, %v17594_v51  ;;  %v2629_v14 = vrot.slane %v2615_v35, %v17594_v51 }
 0x327   : > { %v2630_v11 = vcombine.low %v2622_v19, %v2629_v14 }
 0x329   : > { %v2637_v37 = vrot.slane %v2630_v11, %v17594_v51 }
 0x32b   : > { %v2639_v9 = vadd.f32 %v2637_v37, %v1897_v25 }
 0x32d   : > { %v14098_v29 = vmul.f32 -1.442695, %v2639_v9 }
 0x32f   : > { %16861 = vpow2.f32 %v14098_v29 }
 0x339   : > { %v16862_v26 = vpop.eup %16861 }
 0x33a   : > { %v2643_v20 = vadd.f32 1.0, %v16862_v26 }
 0x33c   : > { %16863 = vrcp.f32 %v2643_v20 }
 0x346   : > { %v16864_v45 = vpop.eup %16863 }
 0x347   : > { %v2671_v35 = vrot.slane %v16864_v45, 2 }
 0x349   : > { %v2673_v50 = vsub.f32 1.0, %v2671_v35  ;;  %v2675_v26 = vmul.f32 %v2671_v35, %v17608_v13  ;;  %v17850_v13 = vld [vmem:[#allocation9 + $0x40] ss:$24 sps:$4 sm:$0xff]   ;;  %v21010_v35 = vld [vmem:[#allocation31_spill] sm:$0xff] }
 0x35f   : > { %v2603_v15 = vpop.f32.mrb[16].mxu0 }
 0x360   : > { %v2604_v31 = vadd.f32 %v2603_v15, %v17585_v41  ;;  %v2605_v22 = vpop.f32.mrb[17].mxu0 }
 0x361   : > { %v2606_v23 = vadd.f32 %v2605_v22, %v17589_v44  ;;  %v2607_v34 = vpop.f32.mrb[18].mxu0  ;;  %v17841_v22 = vld [vmem:[#allocation9 + $0x10] ss:$24 sps:$4 sm:$0xff]  }
 0x362   : > { %v2608_v14 = vpop.f32.mrb[19].mxu0  ;;  %v17845_v34 = vld [vmem:[#allocation9 + $0x44] ss:$24 sps:$4 sm:$0xff]  }
 0x363   : > { %v2648_v19 = vcombine.low %v2604_v31, %v2606_v23  ;;  %v17853_v14 = vld [vmem:[#allocation9 + $0x74] ss:$24 sps:$4 sm:$0xff]  }
 0x365   : > { %v2655_v11 = vrot.slane %v2648_v19, %v17594_v51  ;;  %v17858_v19 = vld [vmem:[#allocation9 + $0x70] ss:$24 sps:$4 sm:$0xff]  }
 0x367   : > { %v2662_v39 = vrot.slane %v2655_v11, %v17594_v51  ;;  %v17861_v11 = vld [vmem:[#allocation9 + $0xa4] ss:$24 sps:$4 sm:$0xff]  }
 0x369   : > { %v2664_v9 = vmul.f32 %v16864_v45, %v2662_v39  ;;  %v17866_v39 = vld [vmem:[#allocation9 + $0xa0] ss:$24 sps:$4 sm:$0xff]   ;;  %v21006_v45 = vld [vmem:[#allocation27_spill] sm:$0xff] }
 0x36b   : > { %v2668_v63 = vadd.f32 %v2666_v46, %v2664_v9  ;;  %v21007_v9 = vld [vmem:[#allocation28_spill] sm:$0xff]  ;;  %v21008_v46 = vld [vmem:[#allocation29_spill] sm:$0xff] }
 0x36d   : > { %16865 = vtanh.f32 %v2668_v63  ;;  %v21009_v63 = vld [vmem:[#allocation30_spill] sm:$0xff] }
 0x377   : > { %v16866_v37 = vpop.eup %16865 }
 0x378   : > { %v2674_v29 = vmul.f32 %v16866_v37, %v2673_v50  ;;  %v21011_v50 = vld [vmem:[#allocation32_spill] sm:$0xff]  ;;  %v21012_v37 = vld [vmem:[#allocation33_spill] sm:$0xff] }
 0x37a   : > { %v17831_v20 = vadd.f32 %v2675_v26, %v2674_v29  ;;  %v21013_v29 = vld [vmem:[#allocation34_spill] sm:$0xff]  ;;  %v21014_v26 = vld [vmem:[#allocation35_spill] sm:$0xff] }
 0x37c   : > { %14099 = vst.msk [vmem:[%s17400_s14 + $0x1] ss:$8 sm:$0x3] %vm17604_vm1, %v17831_v20  ;;  %v2692_v15 = vrot.slane %v17831_v20, %v17417_v40  ;;  %v2688_v25 = vrot.slane %v17831_v20, %v17424_v6 }
 0x37e   : > { %v2696_v31 = vpack.c.bf16 %v2692_v15, %v2692_v15  ;;  %v17843_v23 = vpack.c.bf16 %v2688_v25, %v2688_v25  ;;  %v21015_v15 = vld [vmem:[#allocation36_spill] sm:$0xff]  ;;  %v21016_v25 = vld [vmem:[#allocation38_spill] sm:$0xff] }
 0x380   : > { %3305 = vmatprep.mubr.bf16.mxu1 %v2696_v31  ;;  %3346 = vmatprep.mubr.bf16.mxu0 %v2696_v31 }
 0x381   : > { %3306 = vmatmul.mubr.bf16.vlgmr.msra.gmra.mrb[16].mxu1 %v17843_v23  ;;  %3347 = vmatmul.mubr.bf16.vlgmr.msra.gmra.mrb[20].mxu0 %v17843_v23 }
 0x382   : > { %3356 = vmatpush1.bf16.msra.mxu1 %v17841_v22  ;;  %3387 = vmatprep.mubr.bf16.mxu1 %v2696_v31  ;;  %v21017_v31 = vld [vmem:[#allocation37_spill] sm:$0xff] }
 0x383   : > { %3357 = vmatprep.subr.bf16.mxu1 %v17845_v34  ;;  %4060 = vmatpush1.bf16.msra.mxu0 %v17623_v1  ;;  %v17869_v1 = vld [vmem:[#allocation9 + $0xd4] ss:$24 sps:$4 sm:$0xff]  }
 0x384   : > { %4061 = vmatprep.subr.bf16.mxu0 %v17631_v4  ;;  %v17874_v4 = vld [vmem:[#allocation9 + $0xd0] ss:$24 sps:$4 sm:$0xff]  }
 0x386   : > { %3358 = vmatpush1.bf16.msra.mxu1 %v17850_v13 }
 0x387   : > { %3359 = vmatprep.subr.bf16.mxu1 %v17853_v14  ;;  %4062 = vmatpush1.bf16.msra.mxu0 %v17638_v8  ;;  %v17877_v8 = vld [vmem:[#allocation9 + $0x104] ss:$24 sps:$4 sm:$0xff]  }
 0x388   : > { %4063 = vmatprep.subr.bf16.mxu0 %v17644_v10  ;;  %v17882_v10 = vld [vmem:[#allocation9 + $0x100] ss:$24 sps:$4 sm:$0xff]  }
 0x38a   : > { %3360 = vmatpush1.bf16.msra.mxu1 %v17858_v19 }
 0x38b   : > { %3361 = vmatprep.subr.bf16.mxu1 %v17861_v11  ;;  %4064 = vmatpush1.bf16.msra.mxu0 %v17650_v12  ;;  %v17885_v12 = vld [vmem:[#allocation9 + $0x134] ss:$24 sps:$4 sm:$0xff]  }
 0x38c   : > { %4065 = vmatprep.subr.bf16.mxu0 %v17656_v17  ;;  %v17890_v17 = vld [vmem:[#allocation9 + $0x130] ss:$24 sps:$4 sm:$0xff]  }
 0x38e   : > { %3362 = vmatpush1.bf16.msra.mxu1 %v17866_v39 }
 0x38f   : > { %3363 = vmatprep.subr.bf16.mxu1 %v17869_v1  ;;  %4066 = vmatpush1.bf16.msra.mxu0 %v17662_v21  ;;  %v17893_v21 = vld [vmem:[#allocation9 + $0x164] ss:$24 sps:$4 sm:$0xff]  }
 0x390   : > { %4067 = vmatprep.subr.bf16.mxu0 %v17668_v5  ;;  %v17898_v5 = vld [vmem:[#allocation9 + $0x160] ss:$24 sps:$4 sm:$0xff]  }
 0x392   : > { %3364 = vmatpush1.bf16.msra.mxu1 %v17874_v4 }
 0x393   : > { %3365 = vmatprep.subr.bf16.mxu1 %v17877_v8  ;;  %4068 = vmatpush1.bf16.msra.mxu0 %v17674_v16  ;;  %v17901_v16 = vld [vmem:[#allocation9 + $0x194] ss:$24 sps:$4 sm:$0xff]  }
 0x394   : > { %4069 = vmatprep.subr.bf16.mxu0 %v17680_v18  ;;  %v17906_v18 = vld [vmem:[#allocation9 + $0x190] ss:$24 sps:$4 sm:$0xff]  }
 0x396   : > { %3366 = vmatpush1.bf16.msra.mxu1 %v17882_v10 }
 0x397   : > { %3367 = vmatprep.subr.bf16.mxu1 %v17885_v12  ;;  %4070 = vmatpush1.bf16.msra.mxu0 %v17686_v30  ;;  %v17909_v30 = vld [vmem:[#allocation9 + $0x1c4] ss:$24 sps:$4 sm:$0xff]  }
 0x398   : > { %4071 = vmatprep.subr.bf16.mxu0 %v17692_v24  ;;  %v17914_v24 = vld [vmem:[#allocation9 + $0x1c0] ss:$24 sps:$4 sm:$0xff]  }
 0x39a   : > { %3368 = vmatpush1.bf16.msra.mxu1 %v17890_v17 }
 0x39b   : > { %3369 = vmatprep.subr.bf16.mxu1 %v17893_v21  ;;  %4072 = vmatpush1.bf16.msra.mxu0 %v17698_v27  ;;  %v17917_v27 = vld [vmem:[#allocation9 + $0x1f4] ss:$24 sps:$4 sm:$0xff]  }
 0x39c   : > { %4073 = vmatprep.subr.bf16.mxu0 %v17704_v32  ;;  %v17922_v32 = vld [vmem:[#allocation9 + $0x1f0] ss:$24 sps:$4 sm:$0xff]  }
 0x39e   : > { %3370 = vmatpush1.bf16.msra.mxu1 %v17898_v5 }
 0x39f   : > { %3371 = vmatprep.subr.bf16.mxu1 %v17901_v16  ;;  %4074 = vmatpush1.bf16.msra.mxu0 %v17710_v36  ;;  %v17925_v36 = vld [vmem:[#allocation9 + $0x224] ss:$24 sps:$4 sm:$0xff]  }
 0x3a0   : > { %4075 = vmatprep.subr.bf16.mxu0 %v17719_v38  ;;  %v17930_v38 = vld [vmem:[#allocation9 + $0x220] ss:$24 sps:$4 sm:$0xff]  }
 0x3a2   : > { %3372 = vmatpush1.bf16.msra.mxu1 %v17906_v18 }
 0x3a3   : > { %3373 = vmatprep.subr.bf16.mxu1 %v17909_v30  ;;  %4076 = vmatpush1.bf16.msra.mxu0 %v17721_v42  ;;  %v17933_v42 = vld [vmem:[#allocation9 + $0x254] ss:$24 sps:$4 sm:$0xff]  }
 0x3a4   : > { %4077 = vmatprep.subr.bf16.mxu0 %v17731_v47  ;;  %v17938_v47 = vld [vmem:[#allocation9 + $0x250] ss:$24 sps:$4 sm:$0xff]  }
 0x3a6   : > { %3374 = vmatpush1.bf16.msra.mxu1 %v17914_v24 }
 0x3a7   : > { %3375 = vmatprep.subr.bf16.mxu1 %v17917_v27  ;;  %4078 = vmatpush1.bf16.msra.mxu0 %v17733_v48  ;;  %v17941_v48 = vld [vmem:[#allocation9 + $0x284] ss:$24 sps:$4 sm:$0xff]  }
 0x3a8   : > { %4079 = vmatprep.subr.bf16.mxu0 %v17743_v52  ;;  %v17946_v52 = vld [vmem:[#allocation9 + $0x280] ss:$24 sps:$4 sm:$0xff]  }
 0x3aa   : > { %3376 = vmatpush1.bf16.msra.mxu1 %v17922_v32 }
 0x3ab   : > { %3377 = vmatprep.subr.bf16.mxu1 %v17925_v36  ;;  %4080 = vmatpush1.bf16.msra.mxu0 %v17745_v53  ;;  %v17949_v53 = vld [vmem:[#allocation9 + $0x2b4] ss:$24 sps:$4 sm:$0xff]  }
 0x3ac   : > { %4081 = vmatprep.subr.bf16.mxu0 %v17755_v56  ;;  %v17954_v56 = vld [vmem:[#allocation9 + $0x2b0] ss:$24 sps:$4 sm:$0xff]  }
 0x3ae   : > { %3378 = vmatpush1.bf16.msra.mxu1 %v17930_v38 }
 0x3af   : > { %3379 = vmatprep.subr.bf16.mxu1 %v17933_v42  ;;  %4082 = vmatpush1.bf16.msra.mxu0 %v17757_v57  ;;  %v17957_v57 = vld [vmem:[#allocation9 + $0x2e4] ss:$24 sps:$4 sm:$0xff]  }
 0x3b0   : > { %4083 = vmatprep.subr.bf16.mxu0 %v17768_v61  ;;  %v17962_v61 = vld [vmem:[#allocation9 + $0x2e0] ss:$24 sps:$4 sm:$0xff]  }
 0x3b2   : > { %3380 = vmatpush1.bf16.msra.mxu1 %v17938_v47 }
 0x3b3   : > { %3381 = vmatprep.subr.bf16.mxu1 %v17941_v48  ;;  %4084 = vmatpush1.bf16.msra.mxu0 %v17766_v60  ;;  %v20998_v60 = vld [vmem:[#allocation19_spill] sm:$0xff] }
 0x3b4   : > { %4085 = vmatprep.subr.bf16.mxu0 %v17775_v0  ;;  %v21003_v0 = vld [vmem:[#allocation24_spill] sm:$0xff] }
 0x3b6   : > { %3382 = vmatpush1.bf16.msra.mxu1 %v17946_v52 }
 0x3b7   : > { %3383 = vmatprep.subr.bf16.mxu1 %v17949_v53  ;;  %4086 = vmatpush1.bf16.msra.mxu0 %v17782_v58  ;;  %v20996_v58 = vld [vmem:[#allocation17_spill] sm:$0xff] }
 0x3b8   : > { %4087 = vmatprep.subr.bf16.mxu0 %v17788_v54  ;;  %v20995_v54 = vld [vmem:[#allocation16_spill] sm:$0xff] }
 0x3ba   : > { %3384 = vmatpush1.bf16.msra.mxu1 %v17954_v56 }
 0x3bb   : > { %3385 = vmatprep.subr.bf16.mxu1 %v17957_v57  ;;  %4088 = vmatpush1.bf16.msra.mxu0 %v17794_v49  ;;  %v20997_v49 = vld [vmem:[#allocation18_spill] sm:$0xff] }
 0x3bc   : > { %4089 = vmatprep.subr.bf16.mxu0 %v17800_v62  ;;  %v20999_v62 = vld [vmem:[#allocation20_spill] sm:$0xff] }
 0x3be   : > { %3386 = vmatpush1.bf16.msra.mxu1 %v17962_v61 }
 0x3bf   : > { %4100 = vmatprep.subr.bf16.mxu1 %v17629_v3  ;;  %4090 = vmatpush1.bf16.msra.mxu0 %v17806_v55  ;;  %v21000_v3 = vld [vmem:[#allocation21_spill] sm:$0xff]  ;;  %v21001_v55 = vld [vmem:[#allocation22_spill] sm:$0xff] }
 0x3c0   : > { %4141 = vmatprep.subr.bf16.mxu0 %v17815_v59  ;;  %v21002_v59 = vld [vmem:[#allocation23_spill] sm:$0xff] }
 0x3c1   : > { %3388 = vmatmul.mubr.bf16.vlgmr.msra.gmra.mrb[20].mxu1 %v17843_v23  ;;  %v21018_v23 = vld [vmem:[#allocation39_spill] sm:$0xff] }
 0x3c2   : > { %4101 = vmatpush1.bf16.msra.mxu1 %v17627_v2  ;;  %v21004_v2 = vld [vmem:[#allocation25_spill] sm:$0xff] }
 0x3c3   : > { %4102 = vmatprep.subr.bf16.mxu1 %v17634_v7  ;;  %v21005_v7 = vld [vmem:[#allocation26_spill] sm:$0xff] }
 0x3c6   : > { %4103 = vmatpush1.bf16.msra.mxu1 %v20995_v54  ;;  %v21019_v54 = vld [vmem:[#allocation40_spill] sm:$0xff] }
 0x3c7   : > { %4104 = vmatprep.subr.bf16.mxu1 %v20996_v58  ;;  %v21020_v58 = vld [vmem:[#allocation41_spill] sm:$0xff] }
 0x3ca   : > { %4105 = vmatpush1.bf16.msra.mxu1 %v20997_v49  ;;  %v21021_v49 = vld [vmem:[#allocation42_spill] sm:$0xff] }
 0x3cb   : > { %4106 = vmatprep.subr.bf16.mxu1 %v20998_v60  ;;  %v21022_v60 = vld [vmem:[#allocation43_spill] sm:$0xff] }
 0x3ce   : > { %4107 = vmatpush1.bf16.msra.mxu1 %v20999_v62  ;;  %v21023_v62 = vld [vmem:[#allocation44_spill] sm:$0xff] }
 0x3cf   : > { %4108 = vmatprep.subr.bf16.mxu1 %v21000_v3 }
 0x3d2   : > { %4109 = vmatpush1.bf16.msra.mxu1 %v21001_v55 }
 0x3d3   : > { %4110 = vmatprep.subr.bf16.mxu1 %v21002_v59  ;;  %v21024_v59 = vld [vmem:[#allocation14_spill] sm:$0xff] }
 0x3d6   : > { %4111 = vmatpush1.bf16.msra.mxu1 %v21003_v0 }
 0x3d7   : > { %4112 = vmatprep.subr.bf16.mxu1 %v21004_v2  ;;  %v21025_v2 = vld [vmem:[#allocation15_spill] sm:$0xff] }
 0x3da   : > { %4113 = vmatpush1.bf16.msra.mxu1 %v21005_v7 }
 0x3db   : > { %4114 = vmatprep.subr.bf16.mxu1 %v21006_v45 }
 0x3de   : > { %4115 = vmatpush1.bf16.msra.mxu1 %v21007_v9 }
 0x3df   : > { %4116 = vmatprep.subr.bf16.mxu1 %v21008_v46 }
 0x3e2   : > { %4117 = vmatpush1.bf16.msra.mxu1 %v21009_v63 }
 0x3e3   : > { %4118 = vmatprep.subr.bf16.mxu1 %v21010_v35 }
 0x3e6   : > { %4119 = vmatpush1.bf16.msra.mxu1 %v21011_v50 }
 0x3e7   : > { %4120 = vmatprep.subr.bf16.mxu1 %v21012_v37 }
 0x3ea   : > { %4121 = vmatpush1.bf16.msra.mxu1 %v21013_v29 }
 0x3eb   : > { %4122 = vmatprep.subr.bf16.mxu1 %v21014_v26 }
 0x3ee   : > { %4123 = vmatpush1.bf16.msra.mxu1 %v21015_v15 }
 0x3ef   : > { %4124 = vmatprep.subr.bf16.mxu1 %v21016_v25 }
 0x3f2   : > { %4125 = vmatpush1.bf16.msra.mxu1 %v21017_v31 }
 0x3f3   : > { %4126 = vmatprep.subr.bf16.mxu1 %v21018_v23 }
 0x3f6   : > { %4127 = vmatpush1.bf16.msra.mxu1 %v21019_v54  ;;  %v2682_v54 = vld [vmem:[#allocation3 + $0x2] ss:$8 sm:$0x30] }
 0x3f7   : > { %4128 = vmatprep.subr.bf16.mxu1 %v21020_v58 }
 0x3fa   : > { %4129 = vmatpush1.bf16.msra.mxu1 %v21021_v49  ;;  %v2681_v49 = vld [vmem:[#allocation3 + $0x2] ss:$8 sm:$0xf] }
 0x3fb   : > { %4130 = vmatprep.subr.bf16.mxu1 %v21022_v60  ;;  %v2683_v60 = vor.u32 %v2682_v54, %v2681_v49 }
 0x3fe   : > { %4131 = vmatpush1.bf16.msra.mxu1 %v21023_v62 }
 0x454   : > { %v3307_v3 = vpop.f32.mrb[16].mxu1  ;;  %v3348_v55 = vpop.f32.mrb[20].mxu0 }
 0x455   : > { %v3308_v0 = vadd.f32 %v3307_v3, %v21024_v59  ;;  %v3349_v7 = vadd.f32 %v3348_v55, %v21025_v2  ;;  %v3309_v45 = vpop.f32.mrb[17].mxu1  ;;  %v3350_v9 = vpop.f32.mrb[21].mxu0 }
 0x456   : > { %v3310_v46 = vadd.f32 %v3309_v45, %v17579_v28  ;;  %v3351_v63 = vadd.f32 %v3350_v9, %v17587_v43  ;;  %v3311_v35 = vpop.f32.mrb[18].mxu1  ;;  %v3352_v50 = vpop.f32.mrb[22].mxu0 }
 0x457   : > { %v3312_v37 = vpop.f32.mrb[19].mxu1  ;;  %v3353_v29 = vpop.f32.mrb[23].mxu0 }
 0x458   : > { %v3400_v26 = vcombine.low %v3308_v0, %v3310_v46  ;;  %v3401_v15 = vcombine.low %v3349_v7, %v3351_v63 }
 0x45a   : > { %v3408_v25 = vrot.slane %v3400_v26, %v17594_v51  ;;  %v3415_v31 = vrot.slane %v3401_v15, %v17594_v51 }
 0x45c   : > { %v3416_v23 = vcombine.low %v3408_v25, %v3415_v31  ;;  %v3452_v25 = vrot.slane %v2683_v60, 4 }
 0x45e   : > { %v3423_v58 = vrot.slane %v3416_v23, %v17594_v51 }
 0x460   : > { %v3425_v62 = vadd.f32 %v3423_v58, %v2683_v60 }
 0x462   : > { %v14196_v3 = vmul.f32 -1.442695, %v3425_v62 }
 0x464   : > { %16867 = vpow2.f32 %v14196_v3 }
 0x46e   : > { %v16868_v55 = vpop.eup %16867 }
 0x46f   : > { %v3429_v45 = vadd.f32 1.0, %v16868_v55 }
 0x471   : > { %16869 = vrcp.f32 %v3429_v45 }
 0x47b   : > { %v16870_v26 = vpop.eup %16869 }
 0x47c   : > { %v3457_v23 = vrot.slane %v16870_v26, 2 }
 0x47e   : > { %v3459_v54 = vsub.f32 1.0, %v3457_v23  ;;  %v3461_v62 = vmul.f32 %v3457_v23, %v17831_v20  ;;  %v18056_v20 = vld [vmem:[#allocation9] ss:$24 sps:$4 sm:$0xff]   ;;  %v18188_v23 = vld [vmem:[#allocation9 + $0x214] ss:$24 sps:$4 sm:$0xff]  }
 0x494   : > { %v3389_v9 = vpop.f32.mrb[20].mxu1 }
 0x495   : > { %v3390_v0 = vadd.f32 %v3389_v9, %v17585_v41  ;;  %v3391_v7 = vpop.f32.mrb[21].mxu1 }
 0x496   : > { %v3392_v46 = vadd.f32 %v3391_v7, %v17589_v44  ;;  %v3393_v63 = vpop.f32.mrb[22].mxu1  ;;  %v18154_v7 = vld [vmem:[#allocation9 + $0x180] ss:$24 sps:$4 sm:$0xff]  }
 0x497   : > { %v3394_v35 = vpop.f32.mrb[23].mxu1  ;;  %v18159_v63 = vld [vmem:[#allocation9 + $0x188] ss:$24 sps:$4 sm:$0xff]  }
 0x498   : > { %v3434_v50 = vcombine.low %v3390_v0, %v3392_v46  ;;  %v18152_v0 = vld [vmem:[#allocation9 + $0x184] ss:$24 sps:$4 sm:$0xff]   ;;  %21040 = vst [vmem:[#allocation30_spill] sm:$0xff] %v18159_v63  ;;  %v18164_v35 = vld [vmem:[#allocation9 + $0x1b4] ss:$24 sps:$4 sm:$0xff]  }
 0x499   : > { %v18156_v46 = vld [vmem:[#allocation9 + $0x18c] ss:$24 sps:$4 sm:$0xff]  }
 0x49a   : > { %v3441_v37 = vrot.slane %v3434_v50, %v17594_v51  ;;  %21039 = vst [vmem:[#allocation29_spill] sm:$0xff] %v18156_v46  ;;  %v18166_v50 = vld [vmem:[#allocation9 + $0x1b0] ss:$24 sps:$4 sm:$0xff]  }
 0x49c   : > { %v3448_v29 = vrot.slane %v3441_v37, %v17594_v51  ;;  %v18168_v37 = vld [vmem:[#allocation9 + $0x1bc] ss:$24 sps:$4 sm:$0xff]  }
 0x49d   : > { %21041 = vst [vmem:[#allocation31_spill] sm:$0xff] %v18168_v37 }
 0x49e   : > { %v3450_v15 = vmul.f32 %v16870_v26, %v3448_v29  ;;  %v18171_v29 = vld [vmem:[#allocation9 + $0x1b8] ss:$24 sps:$4 sm:$0xff]   ;;  %v18176_v26 = vld [vmem:[#allocation9 + $0x1e4] ss:$24 sps:$4 sm:$0xff]  }
 0x49f   : > { %21042 = vst [vmem:[#allocation32_spill] sm:$0xff] %v18171_v29 }
 0x4a0   : > { %v3454_v31 = vadd.f32 %v3452_v25, %v3450_v15  ;;  %v18178_v15 = vld [vmem:[#allocation9 + $0x1e0] ss:$24 sps:$4 sm:$0xff]   ;;  %v18180_v25 = vld [vmem:[#allocation9 + $0x1ec] ss:$24 sps:$4 sm:$0xff]  }
 0x4a1   : > { %21043 = vst [vmem:[#allocation33_spill] sm:$0xff] %v18180_v25 }
 0x4a2   : > { %16871 = vtanh.f32 %v3454_v31  ;;  %v18183_v31 = vld [vmem:[#allocation9 + $0x1e8] ss:$24 sps:$4 sm:$0xff]  }
 0x4a3   : > { %21044 = vst [vmem:[#allocation34_spill] sm:$0xff] %v18183_v31 }
 0x4ac   : > { %v16872_v58 = vpop.eup %16871 }
 0x4ad   : > { %v3460_v49 = vmul.f32 %v16872_v58, %v3459_v54  ;;  %v18190_v54 = vld [vmem:[#allocation9 + $0x210] ss:$24 sps:$4 sm:$0xff]   ;;  %v18192_v58 = vld [vmem:[#allocation9 + $0x21c] ss:$24 sps:$4 sm:$0xff]  }
 0x4ae   : > { %21045 = vst [vmem:[#allocation35_spill] sm:$0xff] %v18192_v58 }
 0x4af   : > { %v18015_v3 = vadd.f32 %v3461_v62, %v3460_v49  ;;  %v18195_v49 = vld [vmem:[#allocation9 + $0x218] ss:$24 sps:$4 sm:$0xff]  }
 0x4b0   : > { %21046 = vst [vmem:[#allocation36_spill] sm:$0xff] %v18195_v49  ;;  %v18199_v62 = vld [vmem:[#allocation9 + $0x240] ss:$24 sps:$4 sm:$0xff]  }
 0x4b1   : > { %14197 = vst.msk [vmem:[%s17400_s14 + $0x2] ss:$8 sm:$0x3] %vm17604_vm1, %v18015_v3  ;;  %v3478_v55 = vrot.slane %v18015_v3, %v17417_v40  ;;  %v3474_v60 = vrot.slane %v18015_v3, %v17424_v6 }
 0x4b3   : > { %v3482_v45 = vpack.c.bf16 %v3478_v55, %v3478_v55  ;;  %v3481_v9 = vpack.c.bf16 %v3474_v60, %v3474_v60  ;;  %v18201_v55 = vld [vmem:[#allocation9 + $0x244] ss:$24 sps:$4 sm:$0xff]   ;;  %v18204_v60 = vld [vmem:[#allocation9 + $0x248] ss:$24 sps:$4 sm:$0xff]  }
 0x4b4   : > { %21047 = vst [vmem:[#allocation38_spill] sm:$0xff] %v18204_v60 }
 0x4b5   : > { %4091 = vmatprep.mubr.bf16.mxu0 %v3482_v45  ;;  %4132 = vmatprep.mubr.bf16.mxu1 %v3482_v45 }
 0x4b6   : > { %4092 = vmatmul.mubr.bf16.vlgmr.msra.gmra.mrb[24].mxu0 %v3481_v9  ;;  %4133 = vmatmul.mubr.bf16.vlgmr.msra.gmra.mrb[24].mxu1 %v3481_v9 }
 0x4b7   : > { %4142 = vmatpush1.bf16.msra.mxu0 %v17841_v22  ;;  %4173 = vmatprep.mubr.bf16.mxu0 %v3482_v45  ;;  %v18058_v22 = vld [vmem:[#allocation9 + $0x4] ss:$24 sps:$4 sm:$0xff]  }
 0x4b8   : > { %4143 = vmatprep.subr.bf16.mxu0 %v17845_v34  ;;  %v18060_v34 = vld [vmem:[#allocation9 + $0x8] ss:$24 sps:$4 sm:$0xff]   ;;  %4845 = vmatprep.subr.bf16.mxu1 %v18058_v22  ;;  %v18206_v45 = vld [vmem:[#allocation9 + $0x24c] ss:$24 sps:$4 sm:$0xff]  }
 0x4b9   : > { %4846 = vmatpush1.bf16.msra.mxu1 %v18056_v20  ;;  %21048 = vst [vmem:[#allocation37_spill] sm:$0xff] %v18206_v45 }
 0x4bb   : > { %4144 = vmatpush1.bf16.msra.mxu0 %v17850_v13  ;;  %v18062_v13 = vld [vmem:[#allocation9 + $0xc] ss:$24 sps:$4 sm:$0xff]  }
 0x4bc   : > { %4145 = vmatprep.subr.bf16.mxu0 %v17853_v14  ;;  %v18064_v14 = vld [vmem:[#allocation9 + $0x34] ss:$24 sps:$4 sm:$0xff]  }
 0x4bd   : > { %4847 = vmatprep.subr.bf16.mxu1 %v18064_v14 }
 0x4bf   : > { %4146 = vmatpush1.bf16.msra.mxu0 %v17858_v19  ;;  %v18067_v19 = vld [vmem:[#allocation9 + $0x3c] ss:$24 sps:$4 sm:$0xff]  }
 0x4c0   : > { %4147 = vmatprep.subr.bf16.mxu0 %v17861_v11  ;;  %v18071_v11 = vld [vmem:[#allocation9 + $0x30] ss:$24 sps:$4 sm:$0xff]  }
 0x4c1   : > { %4848 = vmatpush1.bf16.msra.mxu1 %v18071_v11 }
 0x4c3   : > { %4148 = vmatpush1.bf16.msra.mxu0 %v17866_v39  ;;  %v18075_v39 = vld [vmem:[#allocation9 + $0x38] ss:$24 sps:$4 sm:$0xff]  }
 0x4c4   : > { %4149 = vmatprep.subr.bf16.mxu0 %v17869_v1  ;;  %21026 = vst [vmem:[#allocation16_spill] sm:$0xff] %v18075_v39  ;;  %v18077_v1 = vld [vmem:[#allocation9 + $0x64] ss:$24 sps:$4 sm:$0xff]  }
 0x4c5   : > { %4849 = vmatprep.subr.bf16.mxu1 %v18077_v1 }
 0x4c7   : > { %4150 = vmatpush1.bf16.msra.mxu0 %v17874_v4  ;;  %v18080_v4 = vld [vmem:[#allocation9 + $0x6c] ss:$24 sps:$4 sm:$0xff]  }
 0x4c8   : > { %4151 = vmatprep.subr.bf16.mxu0 %v17877_v8  ;;  %21027 = vst [vmem:[#allocation17_spill] sm:$0xff] %v18080_v4  ;;  %v18083_v8 = vld [vmem:[#allocation9 + $0x60] ss:$24 sps:$4 sm:$0xff]  }
 0x4c9   : > { %4850 = vmatpush1.bf16.msra.mxu1 %v18083_v8 }
 0x4cb   : > { %4152 = vmatpush1.bf16.msra.mxu0 %v17882_v10  ;;  %v18087_v10 = vld [vmem:[#allocation9 + $0x68] ss:$24 sps:$4 sm:$0xff]  }
 0x4cc   : > { %4153 = vmatprep.subr.bf16.mxu0 %v17885_v12  ;;  %21028 = vst [vmem:[#allocation18_spill] sm:$0xff] %v18087_v10  ;;  %v18089_v12 = vld [vmem:[#allocation9 + $0x94] ss:$24 sps:$4 sm:$0xff]  }
 0x4cd   : > { %4851 = vmatprep.subr.bf16.mxu1 %v18089_v12 }
 0x4cf   : > { %4154 = vmatpush1.bf16.msra.mxu0 %v17890_v17  ;;  %v18092_v17 = vld [vmem:[#allocation9 + $0x9c] ss:$24 sps:$4 sm:$0xff]  }
 0x4d0   : > { %4155 = vmatprep.subr.bf16.mxu0 %v17893_v21  ;;  %21029 = vst [vmem:[#allocation19_spill] sm:$0xff] %v18092_v17  ;;  %v18095_v21 = vld [vmem:[#allocation9 + $0x90] ss:$24 sps:$4 sm:$0xff]  }
 0x4d1   : > { %4852 = vmatpush1.bf16.msra.mxu1 %v18095_v21 }
 0x4d3   : > { %4156 = vmatpush1.bf16.msra.mxu0 %v17898_v5  ;;  %v18099_v5 = vld [vmem:[#allocation9 + $0x98] ss:$24 sps:$4 sm:$0xff]  }
 0x4d4   : > { %4157 = vmatprep.subr.bf16.mxu0 %v17901_v16  ;;  %21030 = vst [vmem:[#allocation20_spill] sm:$0xff] %v18099_v5  ;;  %v18101_v16 = vld [vmem:[#allocation9 + $0xc4] ss:$24 sps:$4 sm:$0xff]  }
 0x4d5   : > { %4853 = vmatprep.subr.bf16.mxu1 %v18101_v16 }
 0x4d7   : > { %4158 = vmatpush1.bf16.msra.mxu0 %v17906_v18  ;;  %v18104_v18 = vld [vmem:[#allocation9 + $0xcc] ss:$24 sps:$4 sm:$0xff]  }
 0x4d8   : > { %4159 = vmatprep.subr.bf16.mxu0 %v17909_v30  ;;  %21031 = vst [vmem:[#allocation21_spill] sm:$0xff] %v18104_v18  ;;  %v18107_v30 = vld [vmem:[#allocation9 + $0xc0] ss:$24 sps:$4 sm:$0xff]  }
 0x4d9   : > { %4854 = vmatpush1.bf16.msra.mxu1 %v18107_v30 }
 0x4db   : > { %4160 = vmatpush1.bf16.msra.mxu0 %v17914_v24  ;;  %v18111_v24 = vld [vmem:[#allocation9 + $0xc8] ss:$24 sps:$4 sm:$0xff]  }
 0x4dc   : > { %4161 = vmatprep.subr.bf16.mxu0 %v17917_v27  ;;  %21032 = vst [vmem:[#allocation22_spill] sm:$0xff] %v18111_v24  ;;  %v18113_v27 = vld [vmem:[#allocation9 + $0xf4] ss:$24 sps:$4 sm:$0xff]  }
 0x4dd   : > { %4855 = vmatprep.subr.bf16.mxu1 %v18113_v27 }
 0x4df   : > { %4162 = vmatpush1.bf16.msra.mxu0 %v17922_v32  ;;  %v18116_v32 = vld [vmem:[#allocation9 + $0xfc] ss:$24 sps:$4 sm:$0xff]  }
 0x4e0   : > { %4163 = vmatprep.subr.bf16.mxu0 %v17925_v36  ;;  %21033 = vst [vmem:[#allocation23_spill] sm:$0xff] %v18116_v32  ;;  %v18119_v36 = vld [vmem:[#allocation9 + $0xf0] ss:$24 sps:$4 sm:$0xff]  }
 0x4e1   : > { %4856 = vmatpush1.bf16.msra.mxu1 %v18119_v36 }
 0x4e3   : > { %4164 = vmatpush1.bf16.msra.mxu0 %v17930_v38  ;;  %v18123_v38 = vld [vmem:[#allocation9 + $0xf8] ss:$24 sps:$4 sm:$0xff]  }
 0x4e4   : > { %4165 = vmatprep.subr.bf16.mxu0 %v17933_v42  ;;  %21034 = vst [vmem:[#allocation24_spill] sm:$0xff] %v18123_v38  ;;  %v18125_v42 = vld [vmem:[#allocation9 + $0x124] ss:$24 sps:$4 sm:$0xff]  }
 0x4e5   : > { %4857 = vmatprep.subr.bf16.mxu1 %v18125_v42 }
 0x4e7   : > { %4166 = vmatpush1.bf16.msra.mxu0 %v17938_v47  ;;  %v18128_v47 = vld [vmem:[#allocation9 + $0x12c] ss:$24 sps:$4 sm:$0xff]  }
 0x4e8   : > { %4167 = vmatprep.subr.bf16.mxu0 %v17941_v48  ;;  %21035 = vst [vmem:[#allocation25_spill] sm:$0xff] %v18128_v47  ;;  %v18131_v48 = vld [vmem:[#allocation9 + $0x120] ss:$24 sps:$4 sm:$0xff]  }
 0x4e9   : > { %4858 = vmatpush1.bf16.msra.mxu1 %v18131_v48 }
 0x4eb   : > { %4168 = vmatpush1.bf16.msra.mxu0 %v17946_v52  ;;  %v18135_v52 = vld [vmem:[#allocation9 + $0x128] ss:$24 sps:$4 sm:$0xff]  }
 0x4ec   : > { %4169 = vmatprep.subr.bf16.mxu0 %v17949_v53  ;;  %21036 = vst [vmem:[#allocation26_spill] sm:$0xff] %v18135_v52  ;;  %v18137_v53 = vld [vmem:[#allocation9 + $0x154] ss:$24 sps:$4 sm:$0xff]  }
 0x4ed   : > { %4859 = vmatprep.subr.bf16.mxu1 %v18137_v53 }
 0x4ef   : > { %4170 = vmatpush1.bf16.msra.mxu0 %v17954_v56  ;;  %v18140_v56 = vld [vmem:[#allocation9 + $0x15c] ss:$24 sps:$4 sm:$0xff]  }
 0x4f0   : > { %4171 = vmatprep.subr.bf16.mxu0 %v17957_v57  ;;  %21037 = vst [vmem:[#allocation27_spill] sm:$0xff] %v18140_v56  ;;  %v18143_v57 = vld [vmem:[#allocation9 + $0x150] ss:$24 sps:$4 sm:$0xff]  }
 0x4f1   : > { %4860 = vmatpush1.bf16.msra.mxu1 %v18143_v57 }
 0x4f2   : > { %4861 = vmatprep.subr.bf16.mxu1 %v18152_v0 }
 0x4f3   : > { %4172 = vmatpush1.bf16.msra.mxu0 %v17962_v61  ;;  %v18147_v61 = vld [vmem:[#allocation9 + $0x158] ss:$24 sps:$4 sm:$0xff]  }
 0x4f4   : > { %4886 = vmatprep.subr.bf16.mxu0 %v18062_v13  ;;  %21038 = vst [vmem:[#allocation28_spill] sm:$0xff] %v18147_v61 }
 0x4f5   : > { %4862 = vmatpush1.bf16.msra.mxu1 %v18154_v7 }
 0x4f6   : > { %4174 = vmatmul.mubr.bf16.vlgmr.msra.gmra.mrb[28].mxu0 %v3481_v9  ;;  %4863 = vmatprep.subr.bf16.mxu1 %v18164_v35  ;;  %v18208_v9 = vld [vmem:[#allocation9 + $0x274] ss:$24 sps:$4 sm:$0xff]  }
 0x4f7   : > { %4887 = vmatpush1.bf16.msra.mxu0 %v18060_v34 }
 0x4f8   : > { %4888 = vmatprep.subr.bf16.mxu0 %v18067_v19 }
 0x4f9   : > { %4864 = vmatpush1.bf16.msra.mxu1 %v18166_v50 }
 0x4fa   : > { %4865 = vmatprep.subr.bf16.mxu1 %v18176_v26 }
 0x4fb   : > { %4889 = vmatpush1.bf16.msra.mxu0 %v18075_v39 }
 0x4fc   : > { %4890 = vmatprep.subr.bf16.mxu0 %v18080_v4 }
 0x4fd   : > { %4866 = vmatpush1.bf16.msra.mxu1 %v18178_v15 }
 0x4fe   : > { %4867 = vmatprep.subr.bf16.mxu1 %v18188_v23 }
 0x4ff   : > { %4891 = vmatpush1.bf16.msra.mxu0 %v18087_v10 }
 0x500   : > { %4892 = vmatprep.subr.bf16.mxu0 %v18092_v17 }
 0x501   : > { %4868 = vmatpush1.bf16.msra.mxu1 %v18190_v54 }
 0x502   : > { %4869 = vmatprep.subr.bf16.mxu1 %v18201_v55 }
 0x503   : > { %4893 = vmatpush1.bf16.msra.mxu0 %v18099_v5 }
 0x504   : > { %4894 = vmatprep.subr.bf16.mxu0 %v18104_v18 }
 0x505   : > { %4870 = vmatpush1.bf16.msra.mxu1 %v18199_v62 }
 0x506   : > { %4871 = vmatprep.subr.bf16.mxu1 %v18208_v9 }
 0x507   : > { %4895 = vmatpush1.bf16.msra.mxu0 %v18111_v24 }
 0x508   : > { %4896 = vmatprep.subr.bf16.mxu0 %v18116_v32 }
 0x50b   : > { %4897 = vmatpush1.bf16.msra.mxu0 %v18123_v38 }
 0x50c   : > { %4898 = vmatprep.subr.bf16.mxu0 %v18128_v47 }
 0x50f   : > { %4899 = vmatpush1.bf16.msra.mxu0 %v18135_v52 }
 0x510   : > { %4900 = vmatprep.subr.bf16.mxu0 %v18140_v56 }
 0x513   : > { %4901 = vmatpush1.bf16.msra.mxu0 %v18147_v61 }
 0x514   : > { %4902 = vmatprep.subr.bf16.mxu0 %v18156_v46  ;;  %v18243_v46 = vld [vmem:[#allocation9 + $0x2d8] ss:$24 sps:$4 sm:$0xff]  }
 0x515   : > { %21054 = vst [vmem:[#allocation44_spill] sm:$0xff] %v18243_v46 }
 0x517   : > { %4903 = vmatpush1.bf16.msra.mxu0 %v18159_v63  ;;  %v18236_v63 = vld [vmem:[#allocation9 + $0x2dc] ss:$24 sps:$4 sm:$0xff]  }
 0x518   : > { %4904 = vmatprep.subr.bf16.mxu0 %v18168_v37  ;;  %v18227_v37 = vld [vmem:[#allocation9 + $0x2a0] ss:$24 sps:$4 sm:$0xff]   ;;  %21053 = vst [vmem:[#allocation43_spill] sm:$0xff] %v18236_v63 }
 0x51b   : > { %4905 = vmatpush1.bf16.msra.mxu0 %v18171_v29  ;;  %v18224_v29 = vld [vmem:[#allocation9 + $0x2ac] ss:$24 sps:$4 sm:$0xff]  }
 0x51c   : > { %4906 = vmatprep.subr.bf16.mxu0 %v18180_v25  ;;  %v18221_v25 = vld [vmem:[#allocation9 + $0x2a4] ss:$24 sps:$4 sm:$0xff]   ;;  %21051 = vst [vmem:[#allocation41_spill] sm:$0xff] %v18224_v29 }
 0x51f   : > { %4907 = vmatpush1.bf16.msra.mxu0 %v18183_v31  ;;  %v18211_v31 = vld [vmem:[#allocation9 + $0x27c] ss:$24 sps:$4 sm:$0xff]  }
 0x520   : > { %4908 = vmatprep.subr.bf16.mxu0 %v18192_v58  ;;  %21049 = vst [vmem:[#allocation39_spill] sm:$0xff] %v18211_v31  ;;  %v18215_v58 = vld [vmem:[#allocation9 + $0x270] ss:$24 sps:$4 sm:$0xff]  }
 0x521   : > { %4872 = vmatpush1.bf16.msra.mxu1 %v18215_v58 }
 0x522   : > { %4873 = vmatprep.subr.bf16.mxu1 %v18221_v25 }
 0x523   : > { %4909 = vmatpush1.bf16.msra.mxu0 %v18195_v49  ;;  %v18219_v49 = vld [vmem:[#allocation9 + $0x278] ss:$24 sps:$4 sm:$0xff]  }
 0x524   : > { %4910 = vmatprep.subr.bf16.mxu0 %v18206_v45  ;;  %21050 = vst [vmem:[#allocation40_spill] sm:$0xff] %v18219_v49  ;;  %v18231_v45 = vld [vmem:[#allocation9 + $0x2a8] ss:$24 sps:$4 sm:$0xff]  }
 0x525   : > { %21052 = vst [vmem:[#allocation42_spill] sm:$0xff] %v18231_v45  ;;  %4874 = vmatpush1.bf16.msra.mxu1 %v18227_v37 }
 0x527   : > { %4911 = vmatpush1.bf16.msra.mxu0 %v18204_v60  ;;  %v18233_v60 = vld [vmem:[#allocation9 + $0x2d4] ss:$24 sps:$4 sm:$0xff]  }
 0x528   : > { %4912 = vmatprep.subr.bf16.mxu0 %v18211_v31  ;;  %v18239_v31 = vld [vmem:[#allocation9 + $0x2d0] ss:$24 sps:$4 sm:$0xff]   ;;  %4875 = vmatprep.subr.bf16.mxu1 %v18233_v60 }
 0x529   : > { %4876 = vmatpush1.bf16.msra.mxu1 %v18239_v31 }
 0x52b   : > { %4913 = vmatpush1.bf16.msra.mxu0 %v18219_v49  ;;  %v18248_v49 = vld [vmem:[#allocation9 + $0x14] ss:$24 sps:$4 sm:$0xff]  }
 0x52c   : > { %4914 = vmatprep.subr.bf16.mxu0 %v18224_v29  ;;  %4927 = vmatprep.subr.bf16.mxu1 %v18248_v49 }
 0x52f   : > { %4915 = vmatpush1.bf16.msra.mxu0 %v18231_v45 }
 0x530   : > { %4916 = vmatprep.subr.bf16.mxu0 %v18236_v63 }
 0x533   : > { %4917 = vmatpush1.bf16.msra.mxu0 %v18243_v46 }
 0x534   : > { %5631 = vmatprep.subr.bf16.mxu0 %v18058_v22 }
 0x589   : > { %v4093_v29 = vpop.f32.mrb[24].mxu0  ;;  %v4134_v61 = vpop.f32.mrb[24].mxu1 }
 0x58a   : > { %v4094_v45 = vadd.f32 %v4093_v29, %v21024_v59  ;;  %v4135_v56 = vadd.f32 %v4134_v61, %v21025_v2  ;;  %v4095_v52 = vpop.f32.mrb[25].mxu0  ;;  %v4136_v47 = vpop.f32.mrb[25].mxu1  ;;  %v3468_v29 = vld [vmem:[#allocation3 + $0x3] ss:$8 sm:$0x30] }
 0x58b   : > { %v4096_v63 = vadd.f32 %v4095_v52, %v17579_v28  ;;  %v4137_v38 = vadd.f32 %v4136_v47, %v17587_v43  ;;  %v4097_v32 = vpop.f32.mrb[26].mxu0  ;;  %v4138_v46 = vpop.f32.mrb[26].mxu1  ;;  %v3467_v2 = vld [vmem:[#allocation3 + $0x3] ss:$8 sm:$0xf] }
 0x58c   : > { %v4098_v24 = vpop.f32.mrb[27].mxu0  ;;  %v4139_v18 = vpop.f32.mrb[27].mxu1  ;;  %v3469_v59 = vor.u32 %v3468_v29, %v3467_v2 }
 0x58d   : > { %v4186_v5 = vcombine.low %v4094_v45, %v4096_v63  ;;  %v4187_v22 = vcombine.low %v4135_v56, %v4137_v38 }
 0x58e   : > { %v4238_v63 = vrot.slane %v3469_v59, 4 }
 0x58f   : > { %v4194_v17 = vrot.slane %v4186_v5, %v17594_v51  ;;  %v4201_v10 = vrot.slane %v4187_v22, %v17594_v51 }
 0x591   : > { %v4202_v4 = vcombine.low %v4194_v17, %v4201_v10 }
 0x593   : > { %v4209_v61 = vrot.slane %v4202_v4, %v17594_v51 }
 0x595   : > { %v4211_v39 = vadd.f32 %v4209_v61, %v3469_v59 }
 0x597   : > { %v14294_v52 = vmul.f32 -1.442695, %v4211_v39 }
 0x599   : > { %16873 = vpow2.f32 %v14294_v52 }
 0x5a3   : > { %v16874_v47 = vpop.eup %16873 }
 0x5a4   : > { %v4215_v32 = vadd.f32 1.0, %v16874_v47 }
 0x5a6   : > { %16875 = vrcp.f32 %v4215_v32 }
 0x5b0   : > { %v16876_v46 = vpop.eup %16875 }
 0x5b1   : > { %v4243_v22 = vrot.slane %v16876_v46, 2 }
 0x5b3   : > { %v4245_v29 = vsub.f32 1.0, %v4243_v22  ;;  %v4247_v47 = vmul.f32 %v4243_v22, %v18015_v3  ;;  %v18283_v3 = vld [vmem:[#allocation9 + $0x40] ss:$24 sps:$4 sm:$0xff]   ;;  %v21070_v22 = vld [vmem:[#allocation31_spill] sm:$0xff] }
 0x5c9   : > { %v4175_v24 = vpop.f32.mrb[28].mxu0 }
 0x5ca   : > { %v4176_v18 = vadd.f32 %v4175_v24, %v17585_v41  ;;  %v4177_v38 = vpop.f32.mrb[29].mxu0 }
 0x5cb   : > { %v4178_v5 = vadd.f32 %v4177_v38, %v17589_v44  ;;  %v4179_v56 = vpop.f32.mrb[30].mxu0  ;;  %v18274_v38 = vld [vmem:[#allocation9 + $0x10] ss:$24 sps:$4 sm:$0xff]  }
 0x5cc   : > { %v4180_v10 = vpop.f32.mrb[31].mxu0  ;;  %v18278_v56 = vld [vmem:[#allocation9 + $0x44] ss:$24 sps:$4 sm:$0xff]  }
 0x5cd   : > { %v4220_v17 = vcombine.low %v4176_v18, %v4178_v5  ;;  %v18286_v10 = vld [vmem:[#allocation9 + $0x74] ss:$24 sps:$4 sm:$0xff]  }
 0x5cf   : > { %v4227_v4 = vrot.slane %v4220_v17, %v17594_v51  ;;  %v18291_v17 = vld [vmem:[#allocation9 + $0x70] ss:$24 sps:$4 sm:$0xff]  }
 0x5d1   : > { %v4234_v2 = vrot.slane %v4227_v4, %v17594_v51  ;;  %v18294_v4 = vld [vmem:[#allocation9 + $0xa4] ss:$24 sps:$4 sm:$0xff]  }
 0x5d3   : > { %v4236_v39 = vmul.f32 %v16876_v46, %v4234_v2  ;;  %v18299_v2 = vld [vmem:[#allocation9 + $0xa0] ss:$24 sps:$4 sm:$0xff]   ;;  %v21066_v46 = vld [vmem:[#allocation27_spill] sm:$0xff] }
 0x5d5   : > { %v4240_v45 = vadd.f32 %v4238_v63, %v4236_v39  ;;  %v21067_v39 = vld [vmem:[#allocation28_spill] sm:$0xff]  ;;  %v21068_v63 = vld [vmem:[#allocation29_spill] sm:$0xff] }
 0x5d7   : > { %16877 = vtanh.f32 %v4240_v45  ;;  %v21069_v45 = vld [vmem:[#allocation30_spill] sm:$0xff] }
 0x5e1   : > { %v16878_v61 = vpop.eup %16877 }
 0x5e2   : > { %v4246_v52 = vmul.f32 %v16878_v61, %v4245_v29  ;;  %v21071_v29 = vld [vmem:[#allocation32_spill] sm:$0xff]  ;;  %v21072_v61 = vld [vmem:[#allocation33_spill] sm:$0xff] }
 0x5e4   : > { %v18264_v32 = vadd.f32 %v4247_v47, %v4246_v52  ;;  %v21073_v52 = vld [vmem:[#allocation34_spill] sm:$0xff]  ;;  %v21074_v47 = vld [vmem:[#allocation35_spill] sm:$0xff] }
 0x5e6   : > { %14295 = vst.msk [vmem:[%s17400_s14 + $0x3] ss:$8 sm:$0x3] %vm17604_vm1, %v18264_v32  ;;  %v4264_v24 = vrot.slane %v18264_v32, %v17417_v40  ;;  %v4260_v59 = vrot.slane %v18264_v32, %v17424_v6 }
 0x5e8   : > { %v4268_v18 = vpack.c.bf16 %v4264_v24, %v4264_v24  ;;  %v18276_v5 = vpack.c.bf16 %v4260_v59, %v4260_v59  ;;  %v21075_v24 = vld [vmem:[#allocation36_spill] sm:$0xff]  ;;  %v21076_v59 = vld [vmem:[#allocation37_spill] sm:$0xff] }
 0x5ea   : > { %4877 = vmatprep.mubr.bf16.mxu1 %v4268_v18  ;;  %4918 = vmatprep.mubr.bf16.mxu0 %v4268_v18 }
 0x5eb   : > { %4878 = vmatmul.mubr.bf16.vlgmr.msra.gmra.mrb[28].mxu1 %v18276_v5  ;;  %4919 = vmatmul.mubr.bf16.vlgmr.msra.gmra.mrb[32].mxu0 %v18276_v5 }
 0x5ec   : > { %4928 = vmatpush1.bf16.msra.mxu1 %v18274_v38  ;;  %4959 = vmatprep.mubr.bf16.mxu1 %v4268_v18  ;;  %v21077_v18 = vld [vmem:[#allocation38_spill] sm:$0xff] }
 0x5ed   : > { %4929 = vmatprep.subr.bf16.mxu1 %v18278_v56  ;;  %5632 = vmatpush1.bf16.msra.mxu0 %v18056_v20  ;;  %v18302_v20 = vld [vmem:[#allocation9 + $0xd4] ss:$24 sps:$4 sm:$0xff]  }
 0x5ee   : > { %5633 = vmatprep.subr.bf16.mxu0 %v18064_v14  ;;  %v18307_v14 = vld [vmem:[#allocation9 + $0xd0] ss:$24 sps:$4 sm:$0xff]  }
 0x5f0   : > { %4930 = vmatpush1.bf16.msra.mxu1 %v18283_v3 }
 0x5f1   : > { %4931 = vmatprep.subr.bf16.mxu1 %v18286_v10  ;;  %5634 = vmatpush1.bf16.msra.mxu0 %v18071_v11  ;;  %v18310_v11 = vld [vmem:[#allocation9 + $0x104] ss:$24 sps:$4 sm:$0xff]  }
 0x5f2   : > { %5635 = vmatprep.subr.bf16.mxu0 %v18077_v1  ;;  %v18315_v1 = vld [vmem:[#allocation9 + $0x100] ss:$24 sps:$4 sm:$0xff]  }
 0x5f4   : > { %4932 = vmatpush1.bf16.msra.mxu1 %v18291_v17 }
 0x5f5   : > { %4933 = vmatprep.subr.bf16.mxu1 %v18294_v4  ;;  %5636 = vmatpush1.bf16.msra.mxu0 %v18083_v8  ;;  %v18318_v8 = vld [vmem:[#allocation9 + $0x134] ss:$24 sps:$4 sm:$0xff]  }
 0x5f6   : > { %5637 = vmatprep.subr.bf16.mxu0 %v18089_v12  ;;  %v18323_v12 = vld [vmem:[#allocation9 + $0x130] ss:$24 sps:$4 sm:$0xff]  }
 0x5f8   : > { %4934 = vmatpush1.bf16.msra.mxu1 %v18299_v2 }
 0x5f9   : > { %4935 = vmatprep.subr.bf16.mxu1 %v18302_v20  ;;  %5638 = vmatpush1.bf16.msra.mxu0 %v18095_v21  ;;  %v18326_v21 = vld [vmem:[#allocation9 + $0x164] ss:$24 sps:$4 sm:$0xff]  }
 0x5fa   : > { %5639 = vmatprep.subr.bf16.mxu0 %v18101_v16  ;;  %v18331_v16 = vld [vmem:[#allocation9 + $0x160] ss:$24 sps:$4 sm:$0xff]  }
 0x5fc   : > { %4936 = vmatpush1.bf16.msra.mxu1 %v18307_v14 }
 0x5fd   : > { %4937 = vmatprep.subr.bf16.mxu1 %v18310_v11  ;;  %5640 = vmatpush1.bf16.msra.mxu0 %v18107_v30  ;;  %v18334_v30 = vld [vmem:[#allocation9 + $0x194] ss:$24 sps:$4 sm:$0xff]  }
 0x5fe   : > { %5641 = vmatprep.subr.bf16.mxu0 %v18113_v27  ;;  %v18339_v27 = vld [vmem:[#allocation9 + $0x190] ss:$24 sps:$4 sm:$0xff]  }
 0x600   : > { %4938 = vmatpush1.bf16.msra.mxu1 %v18315_v1 }
 0x601   : > { %4939 = vmatprep.subr.bf16.mxu1 %v18318_v8  ;;  %5642 = vmatpush1.bf16.msra.mxu0 %v18119_v36  ;;  %v18342_v36 = vld [vmem:[#allocation9 + $0x1c4] ss:$24 sps:$4 sm:$0xff]  }
 0x602   : > { %5643 = vmatprep.subr.bf16.mxu0 %v18125_v42  ;;  %v18347_v42 = vld [vmem:[#allocation9 + $0x1c0] ss:$24 sps:$4 sm:$0xff]  }
 0x604   : > { %4940 = vmatpush1.bf16.msra.mxu1 %v18323_v12 }
 0x605   : > { %4941 = vmatprep.subr.bf16.mxu1 %v18326_v21  ;;  %5644 = vmatpush1.bf16.msra.mxu0 %v18131_v48  ;;  %v18350_v48 = vld [vmem:[#allocation9 + $0x1f4] ss:$24 sps:$4 sm:$0xff]  }
 0x606   : > { %5645 = vmatprep.subr.bf16.mxu0 %v18137_v53  ;;  %v18355_v53 = vld [vmem:[#allocation9 + $0x1f0] ss:$24 sps:$4 sm:$0xff]  }
 0x608   : > { %4942 = vmatpush1.bf16.msra.mxu1 %v18331_v16 }
 0x609   : > { %4943 = vmatprep.subr.bf16.mxu1 %v18334_v30  ;;  %5646 = vmatpush1.bf16.msra.mxu0 %v18143_v57  ;;  %v18358_v57 = vld [vmem:[#allocation9 + $0x224] ss:$24 sps:$4 sm:$0xff]  }
 0x60a   : > { %5647 = vmatprep.subr.bf16.mxu0 %v18152_v0  ;;  %v18363_v0 = vld [vmem:[#allocation9 + $0x220] ss:$24 sps:$4 sm:$0xff]  }
 0x60c   : > { %4944 = vmatpush1.bf16.msra.mxu1 %v18339_v27 }
 0x60d   : > { %4945 = vmatprep.subr.bf16.mxu1 %v18342_v36  ;;  %5648 = vmatpush1.bf16.msra.mxu0 %v18154_v7  ;;  %v18366_v7 = vld [vmem:[#allocation9 + $0x254] ss:$24 sps:$4 sm:$0xff]  }
 0x60e   : > { %5649 = vmatprep.subr.bf16.mxu0 %v18164_v35  ;;  %v18371_v35 = vld [vmem:[#allocation9 + $0x250] ss:$24 sps:$4 sm:$0xff]  }
 0x610   : > { %4946 = vmatpush1.bf16.msra.mxu1 %v18347_v42 }
 0x611   : > { %4947 = vmatprep.subr.bf16.mxu1 %v18350_v48  ;;  %5650 = vmatpush1.bf16.msra.mxu0 %v18166_v50  ;;  %v18374_v50 = vld [vmem:[#allocation9 + $0x284] ss:$24 sps:$4 sm:$0xff]  }
 0x612   : > { %5651 = vmatprep.subr.bf16.mxu0 %v18176_v26  ;;  %v18379_v26 = vld [vmem:[#allocation9 + $0x280] ss:$24 sps:$4 sm:$0xff]  }
 0x614   : > { %4948 = vmatpush1.bf16.msra.mxu1 %v18355_v53 }
 0x615   : > { %4949 = vmatprep.subr.bf16.mxu1 %v18358_v57  ;;  %5652 = vmatpush1.bf16.msra.mxu0 %v18178_v15  ;;  %v18382_v15 = vld [vmem:[#allocation9 + $0x2b4] ss:$24 sps:$4 sm:$0xff]  }
 0x616   : > { %5653 = vmatprep.subr.bf16.mxu0 %v18188_v23  ;;  %v18387_v23 = vld [vmem:[#allocation9 + $0x2b0] ss:$24 sps:$4 sm:$0xff]  }
 0x618   : > { %4950 = vmatpush1.bf16.msra.mxu1 %v18363_v0 }
 0x619   : > { %4951 = vmatprep.subr.bf16.mxu1 %v18366_v7  ;;  %5654 = vmatpush1.bf16.msra.mxu0 %v18190_v54  ;;  %v18390_v54 = vld [vmem:[#allocation9 + $0x2e4] ss:$24 sps:$4 sm:$0xff]  }
 0x61a   : > { %5655 = vmatprep.subr.bf16.mxu0 %v18201_v55  ;;  %v18395_v55 = vld [vmem:[#allocation9 + $0x2e0] ss:$24 sps:$4 sm:$0xff]  }
 0x61c   : > { %4952 = vmatpush1.bf16.msra.mxu1 %v18371_v35 }
 0x61d   : > { %4953 = vmatprep.subr.bf16.mxu1 %v18374_v50  ;;  %5656 = vmatpush1.bf16.msra.mxu0 %v18199_v62  ;;  %v21058_v62 = vld [vmem:[#allocation19_spill] sm:$0xff] }
 0x61e   : > { %5657 = vmatprep.subr.bf16.mxu0 %v18208_v9  ;;  %v21063_v9 = vld [vmem:[#allocation24_spill] sm:$0xff] }
 0x620   : > { %4954 = vmatpush1.bf16.msra.mxu1 %v18379_v26 }
 0x621   : > { %4955 = vmatprep.subr.bf16.mxu1 %v18382_v15  ;;  %5658 = vmatpush1.bf16.msra.mxu0 %v18215_v58  ;;  %v21056_v58 = vld [vmem:[#allocation17_spill] sm:$0xff] }
 0x622   : > { %5659 = vmatprep.subr.bf16.mxu0 %v18221_v25  ;;  %v21055_v25 = vld [vmem:[#allocation16_spill] sm:$0xff] }
 0x624   : > { %4956 = vmatpush1.bf16.msra.mxu1 %v18387_v23 }
 0x625   : > { %4957 = vmatprep.subr.bf16.mxu1 %v18390_v54  ;;  %5660 = vmatpush1.bf16.msra.mxu0 %v18227_v37  ;;  %v21057_v37 = vld [vmem:[#allocation18_spill] sm:$0xff] }
 0x626   : > { %5661 = vmatprep.subr.bf16.mxu0 %v18233_v60  ;;  %v21059_v60 = vld [vmem:[#allocation20_spill] sm:$0xff] }
 0x628   : > { %4958 = vmatpush1.bf16.msra.mxu1 %v18395_v55 }
 0x629   : > { %5672 = vmatprep.subr.bf16.mxu1 %v18062_v13  ;;  %5662 = vmatpush1.bf16.msra.mxu0 %v18239_v31  ;;  %v21060_v13 = vld [vmem:[#allocation21_spill] sm:$0xff]  ;;  %v21061_v31 = vld [vmem:[#allocation22_spill] sm:$0xff] }
 0x62a   : > { %5713 = vmatprep.subr.bf16.mxu0 %v18248_v49  ;;  %v21062_v49 = vld [vmem:[#allocation23_spill] sm:$0xff] }
 0x62b   : > { %4960 = vmatmul.mubr.bf16.vlgmr.msra.gmra.mrb[32].mxu1 %v18276_v5  ;;  %v21078_v5 = vld [vmem:[#allocation39_spill] sm:$0xff] }
 0x62c   : > { %5673 = vmatpush1.bf16.msra.mxu1 %v18060_v34  ;;  %v21064_v34 = vld [vmem:[#allocation25_spill] sm:$0xff] }
 0x62d   : > { %5674 = vmatprep.subr.bf16.mxu1 %v18067_v19  ;;  %v21065_v19 = vld [vmem:[#allocation26_spill] sm:$0xff] }
 0x630   : > { %5675 = vmatpush1.bf16.msra.mxu1 %v21055_v25  ;;  %v21079_v25 = vld [vmem:[#allocation40_spill] sm:$0xff] }
 0x631   : > { %5676 = vmatprep.subr.bf16.mxu1 %v21056_v58  ;;  %v21080_v58 = vld [vmem:[#allocation41_spill] sm:$0xff] }
 0x634   : > { %5677 = vmatpush1.bf16.msra.mxu1 %v21057_v37  ;;  %v21081_v37 = vld [vmem:[#allocation42_spill] sm:$0xff] }
 0x635   : > { %5678 = vmatprep.subr.bf16.mxu1 %v21058_v62  ;;  %v21082_v62 = vld [vmem:[#allocation43_spill] sm:$0xff] }
 0x638   : > { %5679 = vmatpush1.bf16.msra.mxu1 %v21059_v60  ;;  %v21083_v60 = vld [vmem:[#allocation44_spill] sm:$0xff] }
 0x639   : > { %5680 = vmatprep.subr.bf16.mxu1 %v21060_v13 }
 0x63c   : > { %5681 = vmatpush1.bf16.msra.mxu1 %v21061_v31 }
 0x63d   : > { %5682 = vmatprep.subr.bf16.mxu1 %v21062_v49  ;;  %v21084_v49 = vld [vmem:[#allocation14_spill] sm:$0xff] }
 0x640   : > { %5683 = vmatpush1.bf16.msra.mxu1 %v21063_v9 }
 0x641   : > { %5684 = vmatprep.subr.bf16.mxu1 %v21064_v34  ;;  %v21085_v34 = vld [vmem:[#allocation15_spill] sm:$0xff] }
 0x644   : > { %5685 = vmatpush1.bf16.msra.mxu1 %v21065_v19 }
 0x645   : > { %5686 = vmatprep.subr.bf16.mxu1 %v21066_v46 }
 0x648   : > { %5687 = vmatpush1.bf16.msra.mxu1 %v21067_v39 }
 0x649   : > { %5688 = vmatprep.subr.bf16.mxu1 %v21068_v63 }
 0x64c   : > { %5689 = vmatpush1.bf16.msra.mxu1 %v21069_v45 }
 0x64d   : > { %5690 = vmatprep.subr.bf16.mxu1 %v21070_v22 }
 0x650   : > { %5691 = vmatpush1.bf16.msra.mxu1 %v21071_v29 }
 0x651   : > { %5692 = vmatprep.subr.bf16.mxu1 %v21072_v61 }
 0x654   : > { %5693 = vmatpush1.bf16.msra.mxu1 %v21073_v52 }
 0x655   : > { %5694 = vmatprep.subr.bf16.mxu1 %v21074_v47 }
 0x658   : > { %5695 = vmatpush1.bf16.msra.mxu1 %v21075_v24 }
 0x659   : > { %5696 = vmatprep.subr.bf16.mxu1 %v21076_v59 }
 0x65c   : > { %5697 = vmatpush1.bf16.msra.mxu1 %v21077_v18 }
 0x65d   : > { %5698 = vmatprep.subr.bf16.mxu1 %v21078_v5 }
 0x660   : > { %5699 = vmatpush1.bf16.msra.mxu1 %v21079_v25  ;;  %v4254_v25 = vld [vmem:[#allocation3 + $0x4] ss:$8 sm:$0x30] }
 0x661   : > { %5700 = vmatprep.subr.bf16.mxu1 %v21080_v58 }
 0x664   : > { %5701 = vmatpush1.bf16.msra.mxu1 %v21081_v37  ;;  %v4253_v37 = vld [vmem:[#allocation3 + $0x4] ss:$8 sm:$0xf] }
 0x665   : > { %5702 = vmatprep.subr.bf16.mxu1 %v21082_v62  ;;  %v4255_v62 = vor.u32 %v4254_v25, %v4253_v37 }
 0x668   : > { %5703 = vmatpush1.bf16.msra.mxu1 %v21083_v60 }
 0x6be   : > { %v4879_v13 = vpop.f32.mrb[28].mxu1  ;;  %v4920_v31 = vpop.f32.mrb[32].mxu0 }
 0x6bf   : > { %v4880_v9 = vadd.f32 %v4879_v13, %v21084_v49  ;;  %v4921_v19 = vadd.f32 %v4920_v31, %v21085_v34  ;;  %v4881_v46 = vpop.f32.mrb[29].mxu1  ;;  %v4922_v39 = vpop.f32.mrb[33].mxu0 }
 0x6c0   : > { %v4882_v63 = vadd.f32 %v4881_v46, %v17579_v28  ;;  %v4923_v45 = vadd.f32 %v4922_v39, %v17587_v43  ;;  %v4883_v22 = vpop.f32.mrb[30].mxu1  ;;  %v4924_v29 = vpop.f32.mrb[34].mxu0 }
 0x6c1   : > { %v4884_v61 = vpop.f32.mrb[31].mxu1  ;;  %v4925_v52 = vpop.f32.mrb[35].mxu0 }
 0x6c2   : > { %v4972_v47 = vcombine.low %v4880_v9, %v4882_v63  ;;  %v4973_v24 = vcombine.low %v4921_v19, %v4923_v45 }
 0x6c4   : > { %v4980_v59 = vrot.slane %v4972_v47, %v17594_v51  ;;  %v4987_v18 = vrot.slane %v4973_v24, %v17594_v51 }
 0x6c6   : > { %v4988_v5 = vcombine.low %v4980_v59, %v4987_v18  ;;  %v5024_v59 = vrot.slane %v4255_v62, 4 }
 0x6c8   : > { %v4995_v58 = vrot.slane %v4988_v5, %v17594_v51 }
 0x6ca   : > { %v4997_v60 = vadd.f32 %v4995_v58, %v4255_v62 }
 0x6cc   : > { %v14392_v13 = vmul.f32 -1.442695, %v4997_v60 }
 0x6ce   : > { %16879 = vpow2.f32 %v14392_v13 }
 0x6d8   : > { %v16880_v31 = vpop.eup %16879 }
 0x6d9   : > { %v5001_v46 = vadd.f32 1.0, %v16880_v31 }
 0x6db   : > { %16881 = vrcp.f32 %v5001_v46 }
 0x6e5   : > { %v16882_v47 = vpop.eup %16881 }
 0x6e6   : > { %v5029_v5 = vrot.slane %v16882_v47, 2 }
 0x6e8   : > { %v5031_v25 = vsub.f32 1.0, %v5029_v5  ;;  %v5033_v60 = vmul.f32 %v5029_v5, %v18264_v32  ;;  %v18489_v32 = vld [vmem:[#allocation9] ss:$24 sps:$4 sm:$0xff]   ;;  %v18621_v5 = vld [vmem:[#allocation9 + $0x214] ss:$24 sps:$4 sm:$0xff]  }
 0x6fe   : > { %v4961_v39 = vpop.f32.mrb[32].mxu1 }
 0x6ff   : > { %v4962_v9 = vadd.f32 %v4961_v39, %v17585_v41  ;;  %v4963_v19 = vpop.f32.mrb[33].mxu1 }
 0x700   : > { %v4964_v63 = vadd.f32 %v4963_v19, %v17589_v44  ;;  %v4965_v45 = vpop.f32.mrb[34].mxu1  ;;  %v18587_v19 = vld [vmem:[#allocation9 + $0x180] ss:$24 sps:$4 sm:$0xff]  }
 0x701   : > { %v4966_v22 = vpop.f32.mrb[35].mxu1  ;;  %v18592_v45 = vld [vmem:[#allocation9 + $0x188] ss:$24 sps:$4 sm:$0xff]  }
 0x702   : > { %v5006_v29 = vcombine.low %v4962_v9, %v4964_v63  ;;  %v18585_v9 = vld [vmem:[#allocation9 + $0x184] ss:$24 sps:$4 sm:$0xff]   ;;  %21100 = vst [vmem:[#allocation30_spill] sm:$0xff] %v18592_v45  ;;  %v18597_v22 = vld [vmem:[#allocation9 + $0x1b4] ss:$24 sps:$4 sm:$0xff]  }
 0x703   : > { %v18589_v63 = vld [vmem:[#allocation9 + $0x18c] ss:$24 sps:$4 sm:$0xff]  }
 0x704   : > { %v5013_v61 = vrot.slane %v5006_v29, %v17594_v51  ;;  %21099 = vst [vmem:[#allocation29_spill] sm:$0xff] %v18589_v63  ;;  %v18599_v29 = vld [vmem:[#allocation9 + $0x1b0] ss:$24 sps:$4 sm:$0xff]  }
 0x706   : > { %v5020_v52 = vrot.slane %v5013_v61, %v17594_v51  ;;  %v18601_v61 = vld [vmem:[#allocation9 + $0x1bc] ss:$24 sps:$4 sm:$0xff]  }
 0x707   : > { %21101 = vst [vmem:[#allocation31_spill] sm:$0xff] %v18601_v61 }
 0x708   : > { %v5022_v24 = vmul.f32 %v16882_v47, %v5020_v52  ;;  %v18604_v52 = vld [vmem:[#allocation9 + $0x1b8] ss:$24 sps:$4 sm:$0xff]   ;;  %v18609_v47 = vld [vmem:[#allocation9 + $0x1e4] ss:$24 sps:$4 sm:$0xff]  }
 0x709   : > { %21102 = vst [vmem:[#allocation32_spill] sm:$0xff] %v18604_v52 }
 0x70a   : > { %v5026_v18 = vadd.f32 %v5024_v59, %v5022_v24  ;;  %v18611_v24 = vld [vmem:[#allocation9 + $0x1e0] ss:$24 sps:$4 sm:$0xff]   ;;  %v18613_v59 = vld [vmem:[#allocation9 + $0x1ec] ss:$24 sps:$4 sm:$0xff]  }
 0x70b   : > { %21103 = vst [vmem:[#allocation33_spill] sm:$0xff] %v18613_v59 }
 0x70c   : > { %16883 = vtanh.f32 %v5026_v18  ;;  %v18616_v18 = vld [vmem:[#allocation9 + $0x1e8] ss:$24 sps:$4 sm:$0xff]  }
 0x70d   : > { %21104 = vst [vmem:[#allocation34_spill] sm:$0xff] %v18616_v18 }
 0x716   : > { %v16884_v58 = vpop.eup %16883 }
 0x717   : > { %v5032_v37 = vmul.f32 %v16884_v58, %v5031_v25  ;;  %v18623_v25 = vld [vmem:[#allocation9 + $0x210] ss:$24 sps:$4 sm:$0xff]   ;;  %v18625_v58 = vld [vmem:[#allocation9 + $0x21c] ss:$24 sps:$4 sm:$0xff]  }
 0x718   : > { %21105 = vst [vmem:[#allocation35_spill] sm:$0xff] %v18625_v58 }
 0x719   : > { %v18448_v13 = vadd.f32 %v5033_v60, %v5032_v37  ;;  %v18628_v37 = vld [vmem:[#allocation9 + $0x218] ss:$24 sps:$4 sm:$0xff]  }
 0x71a   : > { %21106 = vst [vmem:[#allocation36_spill] sm:$0xff] %v18628_v37  ;;  %v18632_v60 = vld [vmem:[#allocation9 + $0x240] ss:$24 sps:$4 sm:$0xff]  }
 0x71b   : > { %14393 = vst.msk [vmem:[%s17400_s14 + $0x4] ss:$8 sm:$0x3] %vm17604_vm1, %v18448_v13  ;;  %v5050_v31 = vrot.slane %v18448_v13, %v17417_v40  ;;  %v5046_v62 = vrot.slane %v18448_v13, %v17424_v6 }
 0x71d   : > { %v5054_v46 = vpack.c.bf16 %v5050_v31, %v5050_v31  ;;  %v5053_v39 = vpack.c.bf16 %v5046_v62, %v5046_v62  ;;  %v18634_v31 = vld [vmem:[#allocation9 + $0x244] ss:$24 sps:$4 sm:$0xff]   ;;  %v18637_v62 = vld [vmem:[#allocation9 + $0x248] ss:$24 sps:$4 sm:$0xff]  }
 0x71e   : > { %21107 = vst [vmem:[#allocation37_spill] sm:$0xff] %v18637_v62 }
 0x71f   : > { %5663 = vmatprep.mubr.bf16.mxu0 %v5054_v46  ;;  %5704 = vmatprep.mubr.bf16.mxu1 %v5054_v46 }
 0x720   : > { %5664 = vmatmul.mubr.bf16.vlgmr.msra.gmra.mrb[36].mxu0 %v5053_v39  ;;  %5705 = vmatmul.mubr.bf16.vlgmr.msra.gmra.mrb[36].mxu1 %v5053_v39 }
 0x721   : > { %5714 = vmatpush1.bf16.msra.mxu0 %v18274_v38  ;;  %5745 = vmatprep.mubr.bf16.mxu0 %v5054_v46  ;;  %v18491_v38 = vld [vmem:[#allocation9 + $0x4] ss:$24 sps:$4 sm:$0xff]  }
 0x722   : > { %5715 = vmatprep.subr.bf16.mxu0 %v18278_v56  ;;  %v18493_v56 = vld [vmem:[#allocation9 + $0x8] ss:$24 sps:$4 sm:$0xff]   ;;  %6417 = vmatprep.subr.bf16.mxu1 %v18491_v38  ;;  %v18639_v46 = vld [vmem:[#allocation9 + $0x24c] ss:$24 sps:$4 sm:$0xff]  }
 0x723   : > { %6418 = vmatpush1.bf16.msra.mxu1 %v18489_v32  ;;  %21108 = vst [vmem:[#allocation38_spill] sm:$0xff] %v18639_v46 }
 0x725   : > { %5716 = vmatpush1.bf16.msra.mxu0 %v18283_v3  ;;  %v18495_v3 = vld [vmem:[#allocation9 + $0xc] ss:$24 sps:$4 sm:$0xff]  }
 0x726   : > { %5717 = vmatprep.subr.bf16.mxu0 %v18286_v10  ;;  %v18497_v10 = vld [vmem:[#allocation9 + $0x34] ss:$24 sps:$4 sm:$0xff]  }
 0x727   : > { %6419 = vmatprep.subr.bf16.mxu1 %v18497_v10 }
 0x729   : > { %5718 = vmatpush1.bf16.msra.mxu0 %v18291_v17  ;;  %v18500_v17 = vld [vmem:[#allocation9 + $0x3c] ss:$24 sps:$4 sm:$0xff]  }
 0x72a   : > { %5719 = vmatprep.subr.bf16.mxu0 %v18294_v4  ;;  %v18504_v4 = vld [vmem:[#allocation9 + $0x30] ss:$24 sps:$4 sm:$0xff]  }
 0x72b   : > { %6420 = vmatpush1.bf16.msra.mxu1 %v18504_v4 }
 0x72d   : > { %5720 = vmatpush1.bf16.msra.mxu0 %v18299_v2  ;;  %v18508_v2 = vld [vmem:[#allocation9 + $0x38] ss:$24 sps:$4 sm:$0xff]  }
 0x72e   : > { %5721 = vmatprep.subr.bf16.mxu0 %v18302_v20  ;;  %21086 = vst [vmem:[#allocation16_spill] sm:$0xff] %v18508_v2  ;;  %v18510_v20 = vld [vmem:[#allocation9 + $0x64] ss:$24 sps:$4 sm:$0xff]  }
 0x72f   : > { %6421 = vmatprep.subr.bf16.mxu1 %v18510_v20 }
 0x731   : > { %5722 = vmatpush1.bf16.msra.mxu0 %v18307_v14  ;;  %v18513_v14 = vld [vmem:[#allocation9 + $0x6c] ss:$24 sps:$4 sm:$0xff]  }
 0x732   : > { %5723 = vmatprep.subr.bf16.mxu0 %v18310_v11  ;;  %21087 = vst [vmem:[#allocation17_spill] sm:$0xff] %v18513_v14  ;;  %v18516_v11 = vld [vmem:[#allocation9 + $0x60] ss:$24 sps:$4 sm:$0xff]  }
 0x733   : > { %6422 = vmatpush1.bf16.msra.mxu1 %v18516_v11 }
 0x735   : > { %5724 = vmatpush1.bf16.msra.mxu0 %v18315_v1  ;;  %v18520_v1 = vld [vmem:[#allocation9 + $0x68] ss:$24 sps:$4 sm:$0xff]  }
 0x736   : > { %5725 = vmatprep.subr.bf16.mxu0 %v18318_v8  ;;  %21088 = vst [vmem:[#allocation18_spill] sm:$0xff] %v18520_v1  ;;  %v18522_v8 = vld [vmem:[#allocation9 + $0x94] ss:$24 sps:$4 sm:$0xff]  }
 0x737   : > { %6423 = vmatprep.subr.bf16.mxu1 %v18522_v8 }
 0x739   : > { %5726 = vmatpush1.bf16.msra.mxu0 %v18323_v12  ;;  %v18525_v12 = vld [vmem:[#allocation9 + $0x9c] ss:$24 sps:$4 sm:$0xff]  }
 0x73a   : > { %5727 = vmatprep.subr.bf16.mxu0 %v18326_v21  ;;  %21089 = vst [vmem:[#allocation19_spill] sm:$0xff] %v18525_v12  ;;  %v18528_v21 = vld [vmem:[#allocation9 + $0x90] ss:$24 sps:$4 sm:$0xff]  }
 0x73b   : > { %6424 = vmatpush1.bf16.msra.mxu1 %v18528_v21 }
 0x73d   : > { %5728 = vmatpush1.bf16.msra.mxu0 %v18331_v16  ;;  %v18532_v16 = vld [vmem:[#allocation9 + $0x98] ss:$24 sps:$4 sm:$0xff]  }
 0x73e   : > { %5729 = vmatprep.subr.bf16.mxu0 %v18334_v30  ;;  %21090 = vst [vmem:[#allocation20_spill] sm:$0xff] %v18532_v16  ;;  %v18534_v30 = vld [vmem:[#allocation9 + $0xc4] ss:$24 sps:$4 sm:$0xff]  }
 0x73f   : > { %6425 = vmatprep.subr.bf16.mxu1 %v18534_v30 }
 0x741   : > { %5730 = vmatpush1.bf16.msra.mxu0 %v18339_v27  ;;  %v18537_v27 = vld [vmem:[#allocation9 + $0xcc] ss:$24 sps:$4 sm:$0xff]  }
 0x742   : > { %5731 = vmatprep.subr.bf16.mxu0 %v18342_v36  ;;  %21091 = vst [vmem:[#allocation21_spill] sm:$0xff] %v18537_v27  ;;  %v18540_v36 = vld [vmem:[#allocation9 + $0xc0] ss:$24 sps:$4 sm:$0xff]  }
 0x743   : > { %6426 = vmatpush1.bf16.msra.mxu1 %v18540_v36 }
 0x745   : > { %5732 = vmatpush1.bf16.msra.mxu0 %v18347_v42  ;;  %v18544_v42 = vld [vmem:[#allocation9 + $0xc8] ss:$24 sps:$4 sm:$0xff]  }
 0x746   : > { %5733 = vmatprep.subr.bf16.mxu0 %v18350_v48  ;;  %21092 = vst [vmem:[#allocation22_spill] sm:$0xff] %v18544_v42  ;;  %v18546_v48 = vld [vmem:[#allocation9 + $0xf4] ss:$24 sps:$4 sm:$0xff]  }
 0x747   : > { %6427 = vmatprep.subr.bf16.mxu1 %v18546_v48 }
 0x749   : > { %5734 = vmatpush1.bf16.msra.mxu0 %v18355_v53  ;;  %v18549_v53 = vld [vmem:[#allocation9 + $0xfc] ss:$24 sps:$4 sm:$0xff]  }
 0x74a   : > { %5735 = vmatprep.subr.bf16.mxu0 %v18358_v57  ;;  %21093 = vst [vmem:[#allocation23_spill] sm:$0xff] %v18549_v53  ;;  %v18552_v57 = vld [vmem:[#allocation9 + $0xf0] ss:$24 sps:$4 sm:$0xff]  }
 0x74b   : > { %6428 = vmatpush1.bf16.msra.mxu1 %v18552_v57 }
 0x74d   : > { %5736 = vmatpush1.bf16.msra.mxu0 %v18363_v0  ;;  %v18556_v0 = vld [vmem:[#allocation9 + $0xf8] ss:$24 sps:$4 sm:$0xff]  }
 0x74e   : > { %5737 = vmatprep.subr.bf16.mxu0 %v18366_v7  ;;  %21094 = vst [vmem:[#allocation24_spill] sm:$0xff] %v18556_v0  ;;  %v18558_v7 = vld [vmem:[#allocation9 + $0x124] ss:$24 sps:$4 sm:$0xff]  }
 0x74f   : > { %6429 = vmatprep.subr.bf16.mxu1 %v18558_v7 }
 0x751   : > { %5738 = vmatpush1.bf16.msra.mxu0 %v18371_v35  ;;  %v18561_v35 = vld [vmem:[#allocation9 + $0x12c] ss:$24 sps:$4 sm:$0xff]  }
 0x752   : > { %5739 = vmatprep.subr.bf16.mxu0 %v18374_v50  ;;  %21095 = vst [vmem:[#allocation25_spill] sm:$0xff] %v18561_v35  ;;  %v18564_v50 = vld [vmem:[#allocation9 + $0x120] ss:$24 sps:$4 sm:$0xff]  }
 0x753   : > { %6430 = vmatpush1.bf16.msra.mxu1 %v18564_v50 }
 0x755   : > { %5740 = vmatpush1.bf16.msra.mxu0 %v18379_v26  ;;  %v18568_v26 = vld [vmem:[#allocation9 + $0x128] ss:$24 sps:$4 sm:$0xff]  }
 0x756   : > { %5741 = vmatprep.subr.bf16.mxu0 %v18382_v15  ;;  %21096 = vst [vmem:[#allocation26_spill] sm:$0xff] %v18568_v26  ;;  %v18570_v15 = vld [vmem:[#allocation9 + $0x154] ss:$24 sps:$4 sm:$0xff]  }
 0x757   : > { %6431 = vmatprep.subr.bf16.mxu1 %v18570_v15 }
 0x759   : > { %5742 = vmatpush1.bf16.msra.mxu0 %v18387_v23  ;;  %v18573_v23 = vld [vmem:[#allocation9 + $0x15c] ss:$24 sps:$4 sm:$0xff]  }
 0x75a   : > { %5743 = vmatprep.subr.bf16.mxu0 %v18390_v54  ;;  %21097 = vst [vmem:[#allocation27_spill] sm:$0xff] %v18573_v23  ;;  %v18576_v54 = vld [vmem:[#allocation9 + $0x150] ss:$24 sps:$4 sm:$0xff]  }
 0x75b   : > { %6432 = vmatpush1.bf16.msra.mxu1 %v18576_v54 }
 0x75c   : > { %6433 = vmatprep.subr.bf16.mxu1 %v18585_v9 }
 0x75d   : > { %5744 = vmatpush1.bf16.msra.mxu0 %v18395_v55  ;;  %v18580_v55 = vld [vmem:[#allocation9 + $0x158] ss:$24 sps:$4 sm:$0xff]  }
 0x75e   : > { %6458 = vmatprep.subr.bf16.mxu0 %v18495_v3  ;;  %21098 = vst [vmem:[#allocation28_spill] sm:$0xff] %v18580_v55 }
 0x75f   : > { %6434 = vmatpush1.bf16.msra.mxu1 %v18587_v19 }
 0x760   : > { %5746 = vmatmul.mubr.bf16.vlgmr.msra.gmra.mrb[40].mxu0 %v5053_v39  ;;  %6435 = vmatprep.subr.bf16.mxu1 %v18597_v22  ;;  %v18641_v39 = vld [vmem:[#allocation9 + $0x274] ss:$24 sps:$4 sm:$0xff]  }
 0x761   : > { %6459 = vmatpush1.bf16.msra.mxu0 %v18493_v56 }
 0x762   : > { %6460 = vmatprep.subr.bf16.mxu0 %v18500_v17 }
 0x763   : > { %6436 = vmatpush1.bf16.msra.mxu1 %v18599_v29 }
 0x764   : > { %6437 = vmatprep.subr.bf16.mxu1 %v18609_v47 }
 0x765   : > { %6461 = vmatpush1.bf16.msra.mxu0 %v18508_v2 }
 0x766   : > { %6462 = vmatprep.subr.bf16.mxu0 %v18513_v14 }
 0x767   : > { %6438 = vmatpush1.bf16.msra.mxu1 %v18611_v24 }
 0x768   : > { %6439 = vmatprep.subr.bf16.mxu1 %v18621_v5 }
 0x769   : > { %6463 = vmatpush1.bf16.msra.mxu0 %v18520_v1 }
 0x76a   : > { %6464 = vmatprep.subr.bf16.mxu0 %v18525_v12 }
 0x76b   : > { %6440 = vmatpush1.bf16.msra.mxu1 %v18623_v25 }
 0x76c   : > { %6441 = vmatprep.subr.bf16.mxu1 %v18634_v31 }
 0x76d   : > { %6465 = vmatpush1.bf16.msra.mxu0 %v18532_v16 }
 0x76e   : > { %6466 = vmatprep.subr.bf16.mxu0 %v18537_v27 }
 0x76f   : > { %6442 = vmatpush1.bf16.msra.mxu1 %v18632_v60 }
 0x770   : > { %6443 = vmatprep.subr.bf16.mxu1 %v18641_v39 }
 0x771   : > { %6467 = vmatpush1.bf16.msra.mxu0 %v18544_v42 }
 0x772   : > { %6468 = vmatprep.subr.bf16.mxu0 %v18549_v53 }
 0x775   : > { %6469 = vmatpush1.bf16.msra.mxu0 %v18556_v0 }
 0x776   : > { %6470 = vmatprep.subr.bf16.mxu0 %v18561_v35 }
 0x779   : > { %6471 = vmatpush1.bf16.msra.mxu0 %v18568_v26 }
 0x77a   : > { %6472 = vmatprep.subr.bf16.mxu0 %v18573_v23 }
 0x77d   : > { %6473 = vmatpush1.bf16.msra.mxu0 %v18580_v55 }
 0x77e   : > { %6474 = vmatprep.subr.bf16.mxu0 %v18589_v63  ;;  %v18676_v63 = vld [vmem:[#allocation9 + $0x2d8] ss:$24 sps:$4 sm:$0xff]  }
 0x77f   : > { %21114 = vst [vmem:[#allocation44_spill] sm:$0xff] %v18676_v63 }
 0x781   : > { %6475 = vmatpush1.bf16.msra.mxu0 %v18592_v45  ;;  %v18669_v45 = vld [vmem:[#allocation9 + $0x2dc] ss:$24 sps:$4 sm:$0xff]  }
 0x782   : > { %6476 = vmatprep.subr.bf16.mxu0 %v18601_v61  ;;  %v18660_v61 = vld [vmem:[#allocation9 + $0x2a0] ss:$24 sps:$4 sm:$0xff]   ;;  %21113 = vst [vmem:[#allocation43_spill] sm:$0xff] %v18669_v45 }
 0x785   : > { %6477 = vmatpush1.bf16.msra.mxu0 %v18604_v52  ;;  %v18657_v52 = vld [vmem:[#allocation9 + $0x2ac] ss:$24 sps:$4 sm:$0xff]  }
 0x786   : > { %6478 = vmatprep.subr.bf16.mxu0 %v18613_v59  ;;  %v18654_v59 = vld [vmem:[#allocation9 + $0x2a4] ss:$24 sps:$4 sm:$0xff]   ;;  %21111 = vst [vmem:[#allocation41_spill] sm:$0xff] %v18657_v52 }
 0x789   : > { %6479 = vmatpush1.bf16.msra.mxu0 %v18616_v18  ;;  %v18644_v18 = vld [vmem:[#allocation9 + $0x27c] ss:$24 sps:$4 sm:$0xff]  }
 0x78a   : > { %6480 = vmatprep.subr.bf16.mxu0 %v18625_v58  ;;  %21109 = vst [vmem:[#allocation39_spill] sm:$0xff] %v18644_v18  ;;  %v18648_v58 = vld [vmem:[#allocation9 + $0x270] ss:$24 sps:$4 sm:$0xff]  }
 0x78b   : > { %6444 = vmatpush1.bf16.msra.mxu1 %v18648_v58 }
 0x78c   : > { %6445 = vmatprep.subr.bf16.mxu1 %v18654_v59 }
 0x78d   : > { %6481 = vmatpush1.bf16.msra.mxu0 %v18628_v37  ;;  %v18652_v37 = vld [vmem:[#allocation9 + $0x278] ss:$24 sps:$4 sm:$0xff]  }
 0x78e   : > { %6482 = vmatprep.subr.bf16.mxu0 %v18639_v46  ;;  %21110 = vst [vmem:[#allocation40_spill] sm:$0xff] %v18652_v37  ;;  %v18664_v46 = vld [vmem:[#allocation9 + $0x2a8] ss:$24 sps:$4 sm:$0xff]  }
 0x78f   : > { %21112 = vst [vmem:[#allocation42_spill] sm:$0xff] %v18664_v46  ;;  %6446 = vmatpush1.bf16.msra.mxu1 %v18660_v61 }
 0x791   : > { %6483 = vmatpush1.bf16.msra.mxu0 %v18637_v62  ;;  %v18666_v62 = vld [vmem:[#allocation9 + $0x2d4] ss:$24 sps:$4 sm:$0xff]  }
 0x792   : > { %6484 = vmatprep.subr.bf16.mxu0 %v18644_v18  ;;  %v18672_v18 = vld [vmem:[#allocation9 + $0x2d0] ss:$24 sps:$4 sm:$0xff]   ;;  %6447 = vmatprep.subr.bf16.mxu1 %v18666_v62 }
 0x793   : > { %6448 = vmatpush1.bf16.msra.mxu1 %v18672_v18 }
 0x795   : > { %6485 = vmatpush1.bf16.msra.mxu0 %v18652_v37  ;;  %v18681_v37 = vld [vmem:[#allocation9 + $0x14] ss:$24 sps:$4 sm:$0xff]  }
 0x796   : > { %6486 = vmatprep.subr.bf16.mxu0 %v18657_v52  ;;  %6499 = vmatprep.subr.bf16.mxu1 %v18681_v37 }
 0x799   : > { %6487 = vmatpush1.bf16.msra.mxu0 %v18664_v46 }
 0x79a   : > { %6488 = vmatprep.subr.bf16.mxu0 %v18669_v45 }
 0x79d   : > { %6489 = vmatpush1.bf16.msra.mxu0 %v18676_v63 }
 0x79e   : > { %7203 = vmatprep.subr.bf16.mxu0 %v18491_v38 }
 0x7f3   : > { %v5665_v52 = vpop.f32.mrb[36].mxu0  ;;  %v5706_v55 = vpop.f32.mrb[36].mxu1 }
 0x7f4   : > { %v5666_v46 = vadd.f32 %v5665_v52, %v21084_v49  ;;  %v5707_v23 = vadd.f32 %v5706_v55, %v21085_v34  ;;  %v5667_v26 = vpop.f32.mrb[37].mxu0  ;;  %v5708_v35 = vpop.f32.mrb[37].mxu1  ;;  %v5040_v52 = vld [vmem:[#allocation3 + $0x5] ss:$8 sm:$0x30] }
 0x7f5   : > { %v5668_v45 = vadd.f32 %v5667_v26, %v17579_v28  ;;  %v5709_v0 = vadd.f32 %v5708_v35, %v17587_v43  ;;  %v5669_v53 = vpop.f32.mrb[38].mxu0  ;;  %v5710_v63 = vpop.f32.mrb[38].mxu1  ;;  %v5039_v34 = vld [vmem:[#allocation3 + $0x5] ss:$8 sm:$0xf] }
 0x7f6   : > { %v5670_v42 = vpop.f32.mrb[39].mxu0  ;;  %v5711_v27 = vpop.f32.mrb[39].mxu1  ;;  %v5041_v49 = vor.u32 %v5040_v52, %v5039_v34 }
 0x7f7   : > { %v5758_v16 = vcombine.low %v5666_v46, %v5668_v45  ;;  %v5759_v38 = vcombine.low %v5707_v23, %v5709_v0 }
 0x7f8   : > { %v5810_v45 = vrot.slane %v5041_v49, 4 }
 0x7f9   : > { %v5766_v12 = vrot.slane %v5758_v16, %v17594_v51  ;;  %v5773_v1 = vrot.slane %v5759_v38, %v17594_v51 }
 0x7fb   : > { %v5774_v14 = vcombine.low %v5766_v12, %v5773_v1 }
 0x7fd   : > { %v5781_v55 = vrot.slane %v5774_v14, %v17594_v51 }
 0x7ff   : > { %v5783_v2 = vadd.f32 %v5781_v55, %v5041_v49 }
 0x801   : > { %v14490_v26 = vmul.f32 -1.442695, %v5783_v2 }
 0x803   : > { %16885 = vpow2.f32 %v14490_v26 }
 0x80d   : > { %v16886_v35 = vpop.eup %16885 }
 0x80e   : > { %v5787_v53 = vadd.f32 1.0, %v16886_v35 }
 0x810   : > { %16887 = vrcp.f32 %v5787_v53 }
 0x81a   : > { %v16888_v63 = vpop.eup %16887 }
 0x81b   : > { %v5815_v38 = vrot.slane %v16888_v63, 2 }
 0x81d   : > { %v5817_v52 = vsub.f32 1.0, %v5815_v38  ;;  %v5819_v35 = vmul.f32 %v5815_v38, %v18448_v13  ;;  %v18716_v13 = vld [vmem:[#allocation9 + $0x40] ss:$24 sps:$4 sm:$0xff]   ;;  %v21130_v38 = vld [vmem:[#allocation31_spill] sm:$0xff] }
 0x833   : > { %v5747_v42 = vpop.f32.mrb[40].mxu0 }
 0x834   : > { %v5748_v27 = vadd.f32 %v5747_v42, %v17585_v41  ;;  %v5749_v0 = vpop.f32.mrb[41].mxu0 }
 0x835   : > { %v5750_v16 = vadd.f32 %v5749_v0, %v17589_v44  ;;  %v5751_v23 = vpop.f32.mrb[42].mxu0  ;;  %v18707_v0 = vld [vmem:[#allocation9 + $0x10] ss:$24 sps:$4 sm:$0xff]  }
 0x836   : > { %v5752_v1 = vpop.f32.mrb[43].mxu0  ;;  %v18711_v23 = vld [vmem:[#allocation9 + $0x44] ss:$24 sps:$4 sm:$0xff]  }
 0x837   : > { %v5792_v12 = vcombine.low %v5748_v27, %v5750_v16  ;;  %v18719_v1 = vld [vmem:[#allocation9 + $0x74] ss:$24 sps:$4 sm:$0xff]  }
 0x839   : > { %v5799_v14 = vrot.slane %v5792_v12, %v17594_v51  ;;  %v18724_v12 = vld [vmem:[#allocation9 + $0x70] ss:$24 sps:$4 sm:$0xff]  }
 0x83b   : > { %v5806_v34 = vrot.slane %v5799_v14, %v17594_v51  ;;  %v18727_v14 = vld [vmem:[#allocation9 + $0xa4] ss:$24 sps:$4 sm:$0xff]  }
 0x83d   : > { %v5808_v2 = vmul.f32 %v16888_v63, %v5806_v34  ;;  %v18732_v34 = vld [vmem:[#allocation9 + $0xa0] ss:$24 sps:$4 sm:$0xff]   ;;  %v21126_v63 = vld [vmem:[#allocation27_spill] sm:$0xff] }
 0x83f   : > { %v5812_v46 = vadd.f32 %v5810_v45, %v5808_v2  ;;  %v21127_v2 = vld [vmem:[#allocation28_spill] sm:$0xff]  ;;  %v21128_v45 = vld [vmem:[#allocation29_spill] sm:$0xff] }
 0x841   : > { %16889 = vtanh.f32 %v5812_v46  ;;  %v21129_v46 = vld [vmem:[#allocation30_spill] sm:$0xff] }
 0x84b   : > { %v16890_v55 = vpop.eup %16889 }
 0x84c   : > { %v5818_v26 = vmul.f32 %v16890_v55, %v5817_v52  ;;  %v21131_v52 = vld [vmem:[#allocation32_spill] sm:$0xff]  ;;  %v21132_v55 = vld [vmem:[#allocation33_spill] sm:$0xff] }
 0x84e   : > { %v18697_v53 = vadd.f32 %v5819_v35, %v5818_v26  ;;  %v21133_v26 = vld [vmem:[#allocation34_spill] sm:$0xff]  ;;  %v21134_v35 = vld [vmem:[#allocation35_spill] sm:$0xff] }
 0x850   : > { %14491 = vst.msk [vmem:[%s17400_s14 + $0x5] ss:$8 sm:$0x3] %vm17604_vm1, %v18697_v53  ;;  %v5836_v42 = vrot.slane %v18697_v53, %v17417_v40  ;;  %v5832_v49 = vrot.slane %v18697_v53, %v17424_v6 }
 0x852   : > { %v5840_v27 = vpack.c.bf16 %v5836_v42, %v5836_v42  ;;  %v18709_v16 = vpack.c.bf16 %v5832_v49, %v5832_v49  ;;  %v21135_v42 = vld [vmem:[#allocation36_spill] sm:$0xff]  ;;  %v21136_v49 = vld [vmem:[#allocation38_spill] sm:$0xff] }
 0x854   : > { %6449 = vmatprep.mubr.bf16.mxu1 %v5840_v27  ;;  %6490 = vmatprep.mubr.bf16.mxu0 %v5840_v27 }
 0x855   : > { %6450 = vmatmul.mubr.bf16.vlgmr.msra.gmra.mrb[40].mxu1 %v18709_v16  ;;  %6491 = vmatmul.mubr.bf16.vlgmr.msra.gmra.mrb[44].mxu0 %v18709_v16 }
 0x856   : > { %6500 = vmatpush1.bf16.msra.mxu1 %v18707_v0  ;;  %6531 = vmatprep.mubr.bf16.mxu1 %v5840_v27  ;;  %v21137_v27 = vld [vmem:[#allocation37_spill] sm:$0xff] }
 0x857   : > { %6501 = vmatprep.subr.bf16.mxu1 %v18711_v23  ;;  %7204 = vmatpush1.bf16.msra.mxu0 %v18489_v32  ;;  %v18735_v32 = vld [vmem:[#allocation9 + $0xd4] ss:$24 sps:$4 sm:$0xff]  }
 0x858   : > { %7205 = vmatprep.subr.bf16.mxu0 %v18497_v10  ;;  %v18740_v10 = vld [vmem:[#allocation9 + $0xd0] ss:$24 sps:$4 sm:$0xff]  }
 0x85a   : > { %6502 = vmatpush1.bf16.msra.mxu1 %v18716_v13 }
 0x85b   : > { %6503 = vmatprep.subr.bf16.mxu1 %v18719_v1  ;;  %7206 = vmatpush1.bf16.msra.mxu0 %v18504_v4  ;;  %v18743_v4 = vld [vmem:[#allocation9 + $0x104] ss:$24 sps:$4 sm:$0xff]  }
 0x85c   : > { %7207 = vmatprep.subr.bf16.mxu0 %v18510_v20  ;;  %v18748_v20 = vld [vmem:[#allocation9 + $0x100] ss:$24 sps:$4 sm:$0xff]  }
 0x85e   : > { %6504 = vmatpush1.bf16.msra.mxu1 %v18724_v12 }
 0x85f   : > { %6505 = vmatprep.subr.bf16.mxu1 %v18727_v14  ;;  %7208 = vmatpush1.bf16.msra.mxu0 %v18516_v11  ;;  %v18751_v11 = vld [vmem:[#allocation9 + $0x134] ss:$24 sps:$4 sm:$0xff]  }
 0x860   : > { %7209 = vmatprep.subr.bf16.mxu0 %v18522_v8  ;;  %v18756_v8 = vld [vmem:[#allocation9 + $0x130] ss:$24 sps:$4 sm:$0xff]  }
 0x862   : > { %6506 = vmatpush1.bf16.msra.mxu1 %v18732_v34 }
 0x863   : > { %6507 = vmatprep.subr.bf16.mxu1 %v18735_v32  ;;  %7210 = vmatpush1.bf16.msra.mxu0 %v18528_v21  ;;  %v18759_v21 = vld [vmem:[#allocation9 + $0x164] ss:$24 sps:$4 sm:$0xff]  }
 0x864   : > { %7211 = vmatprep.subr.bf16.mxu0 %v18534_v30  ;;  %v18764_v30 = vld [vmem:[#allocation9 + $0x160] ss:$24 sps:$4 sm:$0xff]  }
 0x866   : > { %6508 = vmatpush1.bf16.msra.mxu1 %v18740_v10 }
 0x867   : > { %6509 = vmatprep.subr.bf16.mxu1 %v18743_v4  ;;  %7212 = vmatpush1.bf16.msra.mxu0 %v18540_v36  ;;  %v18767_v36 = vld [vmem:[#allocation9 + $0x194] ss:$24 sps:$4 sm:$0xff]  }
 0x868   : > { %7213 = vmatprep.subr.bf16.mxu0 %v18546_v48  ;;  %v18772_v48 = vld [vmem:[#allocation9 + $0x190] ss:$24 sps:$4 sm:$0xff]  }
 0x86a   : > { %6510 = vmatpush1.bf16.msra.mxu1 %v18748_v20 }
 0x86b   : > { %6511 = vmatprep.subr.bf16.mxu1 %v18751_v11  ;;  %7214 = vmatpush1.bf16.msra.mxu0 %v18552_v57  ;;  %v18775_v57 = vld [vmem:[#allocation9 + $0x1c4] ss:$24 sps:$4 sm:$0xff]  }
 0x86c   : > { %7215 = vmatprep.subr.bf16.mxu0 %v18558_v7  ;;  %v18780_v7 = vld [vmem:[#allocation9 + $0x1c0] ss:$24 sps:$4 sm:$0xff]  }
 0x86e   : > { %6512 = vmatpush1.bf16.msra.mxu1 %v18756_v8 }
 0x86f   : > { %6513 = vmatprep.subr.bf16.mxu1 %v18759_v21  ;;  %7216 = vmatpush1.bf16.msra.mxu0 %v18564_v50  ;;  %v18783_v50 = vld [vmem:[#allocation9 + $0x1f4] ss:$24 sps:$4 sm:$0xff]  }
 0x870   : > { %7217 = vmatprep.subr.bf16.mxu0 %v18570_v15  ;;  %v18788_v15 = vld [vmem:[#allocation9 + $0x1f0] ss:$24 sps:$4 sm:$0xff]  }
 0x872   : > { %6514 = vmatpush1.bf16.msra.mxu1 %v18764_v30 }
 0x873   : > { %6515 = vmatprep.subr.bf16.mxu1 %v18767_v36  ;;  %7218 = vmatpush1.bf16.msra.mxu0 %v18576_v54  ;;  %v18791_v54 = vld [vmem:[#allocation9 + $0x224] ss:$24 sps:$4 sm:$0xff]  }
 0x874   : > { %7219 = vmatprep.subr.bf16.mxu0 %v18585_v9  ;;  %v18796_v9 = vld [vmem:[#allocation9 + $0x220] ss:$24 sps:$4 sm:$0xff]  }
 0x876   : > { %6516 = vmatpush1.bf16.msra.mxu1 %v18772_v48 }
 0x877   : > { %6517 = vmatprep.subr.bf16.mxu1 %v18775_v57  ;;  %7220 = vmatpush1.bf16.msra.mxu0 %v18587_v19  ;;  %v18799_v19 = vld [vmem:[#allocation9 + $0x254] ss:$24 sps:$4 sm:$0xff]  }
 0x878   : > { %7221 = vmatprep.subr.bf16.mxu0 %v18597_v22  ;;  %v18804_v22 = vld [vmem:[#allocation9 + $0x250] ss:$24 sps:$4 sm:$0xff]  }
 0x87a   : > { %6518 = vmatpush1.bf16.msra.mxu1 %v18780_v7 }
 0x87b   : > { %6519 = vmatprep.subr.bf16.mxu1 %v18783_v50  ;;  %7222 = vmatpush1.bf16.msra.mxu0 %v18599_v29  ;;  %v18807_v29 = vld [vmem:[#allocation9 + $0x284] ss:$24 sps:$4 sm:$0xff]  }
 0x87c   : > { %7223 = vmatprep.subr.bf16.mxu0 %v18609_v47  ;;  %v18812_v47 = vld [vmem:[#allocation9 + $0x280] ss:$24 sps:$4 sm:$0xff]  }
 0x87e   : > { %6520 = vmatpush1.bf16.msra.mxu1 %v18788_v15 }
 0x87f   : > { %6521 = vmatprep.subr.bf16.mxu1 %v18791_v54  ;;  %7224 = vmatpush1.bf16.msra.mxu0 %v18611_v24  ;;  %v18815_v24 = vld [vmem:[#allocation9 + $0x2b4] ss:$24 sps:$4 sm:$0xff]  }
 0x880   : > { %7225 = vmatprep.subr.bf16.mxu0 %v18621_v5  ;;  %v18820_v5 = vld [vmem:[#allocation9 + $0x2b0] ss:$24 sps:$4 sm:$0xff]  }
 0x882   : > { %6522 = vmatpush1.bf16.msra.mxu1 %v18796_v9 }
 0x883   : > { %6523 = vmatprep.subr.bf16.mxu1 %v18799_v19  ;;  %7226 = vmatpush1.bf16.msra.mxu0 %v18623_v25  ;;  %v18823_v25 = vld [vmem:[#allocation9 + $0x2e4] ss:$24 sps:$4 sm:$0xff]  }
 0x884   : > { %7227 = vmatprep.subr.bf16.mxu0 %v18634_v31  ;;  %v18828_v31 = vld [vmem:[#allocation9 + $0x2e0] ss:$24 sps:$4 sm:$0xff]  }
 0x886   : > { %6524 = vmatpush1.bf16.msra.mxu1 %v18804_v22 }
 0x887   : > { %6525 = vmatprep.subr.bf16.mxu1 %v18807_v29  ;;  %7228 = vmatpush1.bf16.msra.mxu0 %v18632_v60  ;;  %v21118_v60 = vld [vmem:[#allocation19_spill] sm:$0xff] }
 0x888   : > { %7229 = vmatprep.subr.bf16.mxu0 %v18641_v39  ;;  %v21123_v39 = vld [vmem:[#allocation24_spill] sm:$0xff] }
 0x88a   : > { %6526 = vmatpush1.bf16.msra.mxu1 %v18812_v47 }
 0x88b   : > { %6527 = vmatprep.subr.bf16.mxu1 %v18815_v24  ;;  %7230 = vmatpush1.bf16.msra.mxu0 %v18648_v58  ;;  %v21116_v58 = vld [vmem:[#allocation17_spill] sm:$0xff] }
 0x88c   : > { %7231 = vmatprep.subr.bf16.mxu0 %v18654_v59  ;;  %v21115_v59 = vld [vmem:[#allocation16_spill] sm:$0xff] }
 0x88e   : > { %6528 = vmatpush1.bf16.msra.mxu1 %v18820_v5 }
 0x88f   : > { %6529 = vmatprep.subr.bf16.mxu1 %v18823_v25  ;;  %7232 = vmatpush1.bf16.msra.mxu0 %v18660_v61  ;;  %v21117_v61 = vld [vmem:[#allocation18_spill] sm:$0xff] }
 0x890   : > { %7233 = vmatprep.subr.bf16.mxu0 %v18666_v62  ;;  %v21119_v62 = vld [vmem:[#allocation20_spill] sm:$0xff] }
 0x892   : > { %6530 = vmatpush1.bf16.msra.mxu1 %v18828_v31 }
 0x893   : > { %7244 = vmatprep.subr.bf16.mxu1 %v18495_v3  ;;  %7234 = vmatpush1.bf16.msra.mxu0 %v18672_v18  ;;  %v21120_v3 = vld [vmem:[#allocation21_spill] sm:$0xff]  ;;  %v21121_v18 = vld [vmem:[#allocation22_spill] sm:$0xff] }
 0x894   : > { %7285 = vmatprep.subr.bf16.mxu0 %v18681_v37  ;;  %v21122_v37 = vld [vmem:[#allocation23_spill] sm:$0xff] }
 0x895   : > { %6532 = vmatmul.mubr.bf16.vlgmr.msra.gmra.mrb[44].mxu1 %v18709_v16  ;;  %v21138_v16 = vld [vmem:[#allocation39_spill] sm:$0xff] }
 0x896   : > { %7245 = vmatpush1.bf16.msra.mxu1 %v18493_v56  ;;  %v21124_v56 = vld [vmem:[#allocation25_spill] sm:$0xff] }
 0x897   : > { %7246 = vmatprep.subr.bf16.mxu1 %v18500_v17  ;;  %v21125_v17 = vld [vmem:[#allocation26_spill] sm:$0xff] }
 0x89a   : > { %7247 = vmatpush1.bf16.msra.mxu1 %v21115_v59  ;;  %v21139_v59 = vld [vmem:[#allocation40_spill] sm:$0xff] }
 0x89b   : > { %7248 = vmatprep.subr.bf16.mxu1 %v21116_v58  ;;  %v21140_v58 = vld [vmem:[#allocation41_spill] sm:$0xff] }
 0x89e   : > { %7249 = vmatpush1.bf16.msra.mxu1 %v21117_v61  ;;  %v21141_v61 = vld [vmem:[#allocation42_spill] sm:$0xff] }
 0x89f   : > { %7250 = vmatprep.subr.bf16.mxu1 %v21118_v60  ;;  %v21142_v60 = vld [vmem:[#allocation43_spill] sm:$0xff] }
 0x8a2   : > { %7251 = vmatpush1.bf16.msra.mxu1 %v21119_v62  ;;  %v21143_v62 = vld [vmem:[#allocation44_spill] sm:$0xff] }
 0x8a3   : > { %7252 = vmatprep.subr.bf16.mxu1 %v21120_v3 }
 0x8a6   : > { %7253 = vmatpush1.bf16.msra.mxu1 %v21121_v18 }
 0x8a7   : > { %7254 = vmatprep.subr.bf16.mxu1 %v21122_v37  ;;  %v21144_v37 = vld [vmem:[#allocation14_spill] sm:$0xff] }
 0x8aa   : > { %7255 = vmatpush1.bf16.msra.mxu1 %v21123_v39 }
 0x8ab   : > { %7256 = vmatprep.subr.bf16.mxu1 %v21124_v56  ;;  %v21145_v56 = vld [vmem:[#allocation15_spill] sm:$0xff] }
 0x8ae   : > { %7257 = vmatpush1.bf16.msra.mxu1 %v21125_v17 }
 0x8af   : > { %7258 = vmatprep.subr.bf16.mxu1 %v21126_v63 }
 0x8b2   : > { %7259 = vmatpush1.bf16.msra.mxu1 %v21127_v2 }
 0x8b3   : > { %7260 = vmatprep.subr.bf16.mxu1 %v21128_v45 }
 0x8b6   : > { %7261 = vmatpush1.bf16.msra.mxu1 %v21129_v46 }
 0x8b7   : > { %7262 = vmatprep.subr.bf16.mxu1 %v21130_v38 }
 0x8ba   : > { %7263 = vmatpush1.bf16.msra.mxu1 %v21131_v52 }
 0x8bb   : > { %7264 = vmatprep.subr.bf16.mxu1 %v21132_v55 }
 0x8be   : > { %7265 = vmatpush1.bf16.msra.mxu1 %v21133_v26 }
 0x8bf   : > { %7266 = vmatprep.subr.bf16.mxu1 %v21134_v35 }
 0x8c2   : > { %7267 = vmatpush1.bf16.msra.mxu1 %v21135_v42 }
 0x8c3   : > { %7268 = vmatprep.subr.bf16.mxu1 %v21136_v49 }
 0x8c6   : > { %7269 = vmatpush1.bf16.msra.mxu1 %v21137_v27 }
 0x8c7   : > { %7270 = vmatprep.subr.bf16.mxu1 %v21138_v16 }
 0x8ca   : > { %7271 = vmatpush1.bf16.msra.mxu1 %v21139_v59  ;;  %v5826_v59 = vld [vmem:[#allocation3 + $0x6] ss:$8 sm:$0x30] }
 0x8cb   : > { %7272 = vmatprep.subr.bf16.mxu1 %v21140_v58 }
 0x8ce   : > { %7273 = vmatpush1.bf16.msra.mxu1 %v21141_v61  ;;  %v5825_v61 = vld [vmem:[#allocation3 + $0x6] ss:$8 sm:$0xf] }
 0x8cf   : > { %7274 = vmatprep.subr.bf16.mxu1 %v21142_v60  ;;  %v5827_v60 = vor.u32 %v5826_v59, %v5825_v61 }
 0x8d2   : > { %7275 = vmatpush1.bf16.msra.mxu1 %v21143_v62 }
 0x928   : > { %v6451_v3 = vpop.f32.mrb[40].mxu1  ;;  %v6492_v18 = vpop.f32.mrb[44].mxu0 }
 0x929   : > { %v6452_v39 = vadd.f32 %v6451_v3, %v21144_v37  ;;  %v6493_v17 = vadd.f32 %v6492_v18, %v21145_v56  ;;  %v6453_v63 = vpop.f32.mrb[41].mxu1  ;;  %v6494_v2 = vpop.f32.mrb[45].mxu0 }
 0x92a   : > { %v6454_v45 = vadd.f32 %v6453_v63, %v17579_v28  ;;  %v6495_v46 = vadd.f32 %v6494_v2, %v17587_v43  ;;  %v6455_v38 = vpop.f32.mrb[42].mxu1  ;;  %v6496_v52 = vpop.f32.mrb[46].mxu0 }
 0x92b   : > { %v6456_v55 = vpop.f32.mrb[43].mxu1  ;;  %v6497_v26 = vpop.f32.mrb[47].mxu0 }
 0x92c   : > { %v6544_v35 = vcombine.low %v6452_v39, %v6454_v45  ;;  %v6545_v42 = vcombine.low %v6493_v17, %v6495_v46 }
 0x92e   : > { %v6552_v49 = vrot.slane %v6544_v35, %v17594_v51  ;;  %v6559_v27 = vrot.slane %v6545_v42, %v17594_v51 }
 0x930   : > { %v6560_v16 = vcombine.low %v6552_v49, %v6559_v27  ;;  %v6596_v49 = vrot.slane %v5827_v60, 4 }
 0x932   : > { %v6567_v58 = vrot.slane %v6560_v16, %v17594_v51 }
 0x934   : > { %v6569_v62 = vadd.f32 %v6567_v58, %v5827_v60 }
 0x936   : > { %v14588_v3 = vmul.f32 -1.442695, %v6569_v62 }
 0x938   : > { %16891 = vpow2.f32 %v14588_v3 }
 0x942   : > { %v16892_v18 = vpop.eup %16891 }
 0x943   : > { %v6573_v63 = vadd.f32 1.0, %v16892_v18 }
 0x945   : > { %16893 = vrcp.f32 %v6573_v63 }
 0x94f   : > { %v16894_v35 = vpop.eup %16893 }
 0x950   : > { %v6601_v16 = vrot.slane %v16894_v35, 2 }
 0x952   : > { %v6603_v59 = vsub.f32 1.0, %v6601_v16  ;;  %v6605_v62 = vmul.f32 %v6601_v16, %v18697_v53  ;;  %v18922_v53 = vld [vmem:[#allocation9] ss:$24 sps:$4 sm:$0xff]   ;;  %v19054_v16 = vld [vmem:[#allocation9 + $0x214] ss:$24 sps:$4 sm:$0xff]  }
 0x968   : > { %v6533_v2 = vpop.f32.mrb[44].mxu1 }
 0x969   : > { %v6534_v39 = vadd.f32 %v6533_v2, %v17585_v41  ;;  %v6535_v17 = vpop.f32.mrb[45].mxu1 }
 0x96a   : > { %v6536_v45 = vadd.f32 %v6535_v17, %v17589_v44  ;;  %v6537_v46 = vpop.f32.mrb[46].mxu1  ;;  %v19020_v17 = vld [vmem:[#allocation9 + $0x180] ss:$24 sps:$4 sm:$0xff]  }
 0x96b   : > { %v6538_v38 = vpop.f32.mrb[47].mxu1  ;;  %v19025_v46 = vld [vmem:[#allocation9 + $0x188] ss:$24 sps:$4 sm:$0xff]  }
 0x96c   : > { %v6578_v52 = vcombine.low %v6534_v39, %v6536_v45  ;;  %v19018_v39 = vld [vmem:[#allocation9 + $0x184] ss:$24 sps:$4 sm:$0xff]   ;;  %21160 = vst [vmem:[#allocation30_spill] sm:$0xff] %v19025_v46  ;;  %v19030_v38 = vld [vmem:[#allocation9 + $0x1b4] ss:$24 sps:$4 sm:$0xff]  }
 0x96d   : > { %v19022_v45 = vld [vmem:[#allocation9 + $0x18c] ss:$24 sps:$4 sm:$0xff]  }
 0x96e   : > { %v6585_v55 = vrot.slane %v6578_v52, %v17594_v51  ;;  %21159 = vst [vmem:[#allocation29_spill] sm:$0xff] %v19022_v45  ;;  %v19032_v52 = vld [vmem:[#allocation9 + $0x1b0] ss:$24 sps:$4 sm:$0xff]  }
 0x970   : > { %v6592_v26 = vrot.slane %v6585_v55, %v17594_v51  ;;  %v19034_v55 = vld [vmem:[#allocation9 + $0x1bc] ss:$24 sps:$4 sm:$0xff]  }
 0x971   : > { %21161 = vst [vmem:[#allocation31_spill] sm:$0xff] %v19034_v55 }
 0x972   : > { %v6594_v42 = vmul.f32 %v16894_v35, %v6592_v26  ;;  %v19037_v26 = vld [vmem:[#allocation9 + $0x1b8] ss:$24 sps:$4 sm:$0xff]   ;;  %v19042_v35 = vld [vmem:[#allocation9 + $0x1e4] ss:$24 sps:$4 sm:$0xff]  }
 0x973   : > { %21162 = vst [vmem:[#allocation32_spill] sm:$0xff] %v19037_v26 }
 0x974   : > { %v6598_v27 = vadd.f32 %v6596_v49, %v6594_v42  ;;  %v19044_v42 = vld [vmem:[#allocation9 + $0x1e0] ss:$24 sps:$4 sm:$0xff]   ;;  %v19046_v49 = vld [vmem:[#allocation9 + $0x1ec] ss:$24 sps:$4 sm:$0xff]  }
 0x975   : > { %21163 = vst [vmem:[#allocation33_spill] sm:$0xff] %v19046_v49 }
 0x976   : > { %16895 = vtanh.f32 %v6598_v27  ;;  %v19049_v27 = vld [vmem:[#allocation9 + $0x1e8] ss:$24 sps:$4 sm:$0xff]  }
 0x977   : > { %21164 = vst [vmem:[#allocation34_spill] sm:$0xff] %v19049_v27 }
 0x980   : > { %v16896_v58 = vpop.eup %16895 }
 0x981   : > { %v6604_v61 = vmul.f32 %v16896_v58, %v6603_v59  ;;  %v19056_v59 = vld [vmem:[#allocation9 + $0x210] ss:$24 sps:$4 sm:$0xff]   ;;  %v19058_v58 = vld [vmem:[#allocation9 + $0x21c] ss:$24 sps:$4 sm:$0xff]  }
 0x982   : > { %21165 = vst [vmem:[#allocation35_spill] sm:$0xff] %v19058_v58 }
 0x983   : > { %v18881_v3 = vadd.f32 %v6605_v62, %v6604_v61  ;;  %v19061_v61 = vld [vmem:[#allocation9 + $0x218] ss:$24 sps:$4 sm:$0xff]  }
 0x984   : > { %21166 = vst [vmem:[#allocation36_spill] sm:$0xff] %v19061_v61  ;;  %v19065_v62 = vld [vmem:[#allocation9 + $0x240] ss:$24 sps:$4 sm:$0xff]  }
 0x985   : > { %14589 = vst.msk [vmem:[%s17400_s14 + $0x6] ss:$8 sm:$0x3] %vm17604_vm1, %v18881_v3  ;;  %v6622_v18 = vrot.slane %v18881_v3, %v17417_v40  ;;  %v6618_v60 = vrot.slane %v18881_v3, %v17424_v6 }
 0x987   : > { %v6626_v63 = vpack.c.bf16 %v6622_v18, %v6622_v18  ;;  %v6625_v2 = vpack.c.bf16 %v6618_v60, %v6618_v60  ;;  %v19067_v18 = vld [vmem:[#allocation9 + $0x244] ss:$24 sps:$4 sm:$0xff]   ;;  %v19070_v60 = vld [vmem:[#allocation9 + $0x248] ss:$24 sps:$4 sm:$0xff]  }
 0x988   : > { %21167 = vst [vmem:[#allocation38_spill] sm:$0xff] %v19070_v60 }
 0x989   : > { %7235 = vmatprep.mubr.bf16.mxu0 %v6626_v63  ;;  %7276 = vmatprep.mubr.bf16.mxu1 %v6626_v63 }
 0x98a   : > { %7236 = vmatmul.mubr.bf16.vlgmr.msra.gmra.mrb[48].mxu0 %v6625_v2  ;;  %7277 = vmatmul.mubr.bf16.vlgmr.msra.gmra.mrb[48].mxu1 %v6625_v2 }
 0x98b   : > { %7286 = vmatpush1.bf16.msra.mxu0 %v18707_v0  ;;  %7317 = vmatprep.mubr.bf16.mxu0 %v6626_v63  ;;  %v18924_v0 = vld [vmem:[#allocation9 + $0x4] ss:$24 sps:$4 sm:$0xff]  }
 0x98c   : > { %7287 = vmatprep.subr.bf16.mxu0 %v18711_v23  ;;  %v18926_v23 = vld [vmem:[#allocation9 + $0x8] ss:$24 sps:$4 sm:$0xff]   ;;  %7989 = vmatprep.subr.bf16.mxu1 %v18924_v0  ;;  %v19072_v63 = vld [vmem:[#allocation9 + $0x24c] ss:$24 sps:$4 sm:$0xff]  }
 0x98d   : > { %7990 = vmatpush1.bf16.msra.mxu1 %v18922_v53  ;;  %21168 = vst [vmem:[#allocation37_spill] sm:$0xff] %v19072_v63 }
 0x98f   : > { %7288 = vmatpush1.bf16.msra.mxu0 %v18716_v13  ;;  %v18928_v13 = vld [vmem:[#allocation9 + $0xc] ss:$24 sps:$4 sm:$0xff]  }
 0x990   : > { %7289 = vmatprep.subr.bf16.mxu0 %v18719_v1  ;;  %v18930_v1 = vld [vmem:[#allocation9 + $0x34] ss:$24 sps:$4 sm:$0xff]  }
 0x991   : > { %7991 = vmatprep.subr.bf16.mxu1 %v18930_v1 }
 0x993   : > { %7290 = vmatpush1.bf16.msra.mxu0 %v18724_v12  ;;  %v18933_v12 = vld [vmem:[#allocation9 + $0x3c] ss:$24 sps:$4 sm:$0xff]  }
 0x994   : > { %7291 = vmatprep.subr.bf16.mxu0 %v18727_v14  ;;  %v18937_v14 = vld [vmem:[#allocation9 + $0x30] ss:$24 sps:$4 sm:$0xff]  }
 0x995   : > { %7992 = vmatpush1.bf16.msra.mxu1 %v18937_v14 }
 0x997   : > { %7292 = vmatpush1.bf16.msra.mxu0 %v18732_v34  ;;  %v18941_v34 = vld [vmem:[#allocation9 + $0x38] ss:$24 sps:$4 sm:$0xff]  }
 0x998   : > { %7293 = vmatprep.subr.bf16.mxu0 %v18735_v32  ;;  %21146 = vst [vmem:[#allocation16_spill] sm:$0xff] %v18941_v34  ;;  %v18943_v32 = vld [vmem:[#allocation9 + $0x64] ss:$24 sps:$4 sm:$0xff]  }
 0x999   : > { %7993 = vmatprep.subr.bf16.mxu1 %v18943_v32 }
 0x99b   : > { %7294 = vmatpush1.bf16.msra.mxu0 %v18740_v10  ;;  %v18946_v10 = vld [vmem:[#allocation9 + $0x6c] ss:$24 sps:$4 sm:$0xff]  }
 0x99c   : > { %7295 = vmatprep.subr.bf16.mxu0 %v18743_v4  ;;  %21147 = vst [vmem:[#allocation17_spill] sm:$0xff] %v18946_v10  ;;  %v18949_v4 = vld [vmem:[#allocation9 + $0x60] ss:$24 sps:$4 sm:$0xff]  }
 0x99d   : > { %7994 = vmatpush1.bf16.msra.mxu1 %v18949_v4 }
 0x99f   : > { %7296 = vmatpush1.bf16.msra.mxu0 %v18748_v20  ;;  %v18953_v20 = vld [vmem:[#allocation9 + $0x68] ss:$24 sps:$4 sm:$0xff]  }
 0x9a0   : > { %7297 = vmatprep.subr.bf16.mxu0 %v18751_v11  ;;  %21148 = vst [vmem:[#allocation18_spill] sm:$0xff] %v18953_v20  ;;  %v18955_v11 = vld [vmem:[#allocation9 + $0x94] ss:$24 sps:$4 sm:$0xff]  }
 0x9a1   : > { %7995 = vmatprep.subr.bf16.mxu1 %v18955_v11 }
 0x9a3   : > { %7298 = vmatpush1.bf16.msra.mxu0 %v18756_v8  ;;  %v18958_v8 = vld [vmem:[#allocation9 + $0x9c] ss:$24 sps:$4 sm:$0xff]  }
 0x9a4   : > { %7299 = vmatprep.subr.bf16.mxu0 %v18759_v21  ;;  %21149 = vst [vmem:[#allocation19_spill] sm:$0xff] %v18958_v8  ;;  %v18961_v21 = vld [vmem:[#allocation9 + $0x90] ss:$24 sps:$4 sm:$0xff]  }
 0x9a5   : > { %7996 = vmatpush1.bf16.msra.mxu1 %v18961_v21 }
 0x9a7   : > { %7300 = vmatpush1.bf16.msra.mxu0 %v18764_v30  ;;  %v18965_v30 = vld [vmem:[#allocation9 + $0x98] ss:$24 sps:$4 sm:$0xff]  }
 0x9a8   : > { %7301 = vmatprep.subr.bf16.mxu0 %v18767_v36  ;;  %21150 = vst [vmem:[#allocation20_spill] sm:$0xff] %v18965_v30  ;;  %v18967_v36 = vld [vmem:[#allocation9 + $0xc4] ss:$24 sps:$4 sm:$0xff]  }
 0x9a9   : > { %7997 = vmatprep.subr.bf16.mxu1 %v18967_v36 }
 0x9ab   : > { %7302 = vmatpush1.bf16.msra.mxu0 %v18772_v48  ;;  %v18970_v48 = vld [vmem:[#allocation9 + $0xcc] ss:$24 sps:$4 sm:$0xff]  }
 0x9ac   : > { %7303 = vmatprep.subr.bf16.mxu0 %v18775_v57  ;;  %21151 = vst [vmem:[#allocation21_spill] sm:$0xff] %v18970_v48  ;;  %v18973_v57 = vld [vmem:[#allocation9 + $0xc0] ss:$24 sps:$4 sm:$0xff]  }
 0x9ad   : > { %7998 = vmatpush1.bf16.msra.mxu1 %v18973_v57 }
 0x9af   : > { %7304 = vmatpush1.bf16.msra.mxu0 %v18780_v7  ;;  %v18977_v7 = vld [vmem:[#allocation9 + $0xc8] ss:$24 sps:$4 sm:$0xff]  }
 0x9b0   : > { %7305 = vmatprep.subr.bf16.mxu0 %v18783_v50  ;;  %21152 = vst [vmem:[#allocation22_spill] sm:$0xff] %v18977_v7  ;;  %v18979_v50 = vld [vmem:[#allocation9 + $0xf4] ss:$24 sps:$4 sm:$0xff]  }
 0x9b1   : > { %7999 = vmatprep.subr.bf16.mxu1 %v18979_v50 }
 0x9b3   : > { %7306 = vmatpush1.bf16.msra.mxu0 %v18788_v15  ;;  %v18982_v15 = vld [vmem:[#allocation9 + $0xfc] ss:$24 sps:$4 sm:$0xff]  }
 0x9b4   : > { %7307 = vmatprep.subr.bf16.mxu0 %v18791_v54  ;;  %21153 = vst [vmem:[#allocation23_spill] sm:$0xff] %v18982_v15  ;;  %v18985_v54 = vld [vmem:[#allocation9 + $0xf0] ss:$24 sps:$4 sm:$0xff]  }
 0x9b5   : > { %8000 = vmatpush1.bf16.msra.mxu1 %v18985_v54 }
 0x9b7   : > { %7308 = vmatpush1.bf16.msra.mxu0 %v18796_v9  ;;  %v18989_v9 = vld [vmem:[#allocation9 + $0xf8] ss:$24 sps:$4 sm:$0xff]  }
 0x9b8   : > { %7309 = vmatprep.subr.bf16.mxu0 %v18799_v19  ;;  %21154 = vst [vmem:[#allocation24_spill] sm:$0xff] %v18989_v9  ;;  %v18991_v19 = vld [vmem:[#allocation9 + $0x124] ss:$24 sps:$4 sm:$0xff]  }
 0x9b9   : > { %8001 = vmatprep.subr.bf16.mxu1 %v18991_v19 }
 0x9bb   : > { %7310 = vmatpush1.bf16.msra.mxu0 %v18804_v22  ;;  %v18994_v22 = vld [vmem:[#allocation9 + $0x12c] ss:$24 sps:$4 sm:$0xff]  }
 0x9bc   : > { %7311 = vmatprep.subr.bf16.mxu0 %v18807_v29  ;;  %21155 = vst [vmem:[#allocation25_spill] sm:$0xff] %v18994_v22  ;;  %v18997_v29 = vld [vmem:[#allocation9 + $0x120] ss:$24 sps:$4 sm:$0xff]  }
 0x9bd   : > { %8002 = vmatpush1.bf16.msra.mxu1 %v18997_v29 }
 0x9bf   : > { %7312 = vmatpush1.bf16.msra.mxu0 %v18812_v47  ;;  %v19001_v47 = vld [vmem:[#allocation9 + $0x128] ss:$24 sps:$4 sm:$0xff]  }
 0x9c0   : > { %7313 = vmatprep.subr.bf16.mxu0 %v18815_v24  ;;  %21156 = vst [vmem:[#allocation26_spill] sm:$0xff] %v19001_v47  ;;  %v19003_v24 = vld [vmem:[#allocation9 + $0x154] ss:$24 sps:$4 sm:$0xff]  }
 0x9c1   : > { %8003 = vmatprep.subr.bf16.mxu1 %v19003_v24 }
 0x9c3   : > { %7314 = vmatpush1.bf16.msra.mxu0 %v18820_v5  ;;  %v19006_v5 = vld [vmem:[#allocation9 + $0x15c] ss:$24 sps:$4 sm:$0xff]  }
 0x9c4   : > { %7315 = vmatprep.subr.bf16.mxu0 %v18823_v25  ;;  %21157 = vst [vmem:[#allocation27_spill] sm:$0xff] %v19006_v5  ;;  %v19009_v25 = vld [vmem:[#allocation9 + $0x150] ss:$24 sps:$4 sm:$0xff]  }
 0x9c5   : > { %8004 = vmatpush1.bf16.msra.mxu1 %v19009_v25 }
 0x9c6   : > { %8005 = vmatprep.subr.bf16.mxu1 %v19018_v39 }
 0x9c7   : > { %7316 = vmatpush1.bf16.msra.mxu0 %v18828_v31  ;;  %v19013_v31 = vld [vmem:[#allocation9 + $0x158] ss:$24 sps:$4 sm:$0xff]  }
 0x9c8   : > { %8030 = vmatprep.subr.bf16.mxu0 %v18928_v13  ;;  %21158 = vst [vmem:[#allocation28_spill] sm:$0xff] %v19013_v31 }
 0x9c9   : > { %8006 = vmatpush1.bf16.msra.mxu1 %v19020_v17 }
 0x9ca   : > { %7318 = vmatmul.mubr.bf16.vlgmr.msra.gmra.mrb[52].mxu0 %v6625_v2  ;;  %8007 = vmatprep.subr.bf16.mxu1 %v19030_v38  ;;  %v19074_v2 = vld [vmem:[#allocation9 + $0x274] ss:$24 sps:$4 sm:$0xff]  }
 0x9cb   : > { %8031 = vmatpush1.bf16.msra.mxu0 %v18926_v23 }
 0x9cc   : > { %8032 = vmatprep.subr.bf16.mxu0 %v18933_v12 }
 0x9cd   : > { %8008 = vmatpush1.bf16.msra.mxu1 %v19032_v52 }
 0x9ce   : > { %8009 = vmatprep.subr.bf16.mxu1 %v19042_v35 }
 0x9cf   : > { %8033 = vmatpush1.bf16.msra.mxu0 %v18941_v34 }
 0x9d0   : > { %8034 = vmatprep.subr.bf16.mxu0 %v18946_v10 }
 0x9d1   : > { %8010 = vmatpush1.bf16.msra.mxu1 %v19044_v42 }
 0x9d2   : > { %8011 = vmatprep.subr.bf16.mxu1 %v19054_v16 }
 0x9d3   : > { %8035 = vmatpush1.bf16.msra.mxu0 %v18953_v20 }
 0x9d4   : > { %8036 = vmatprep.subr.bf16.mxu0 %v18958_v8 }
 0x9d5   : > { %8012 = vmatpush1.bf16.msra.mxu1 %v19056_v59 }
 0x9d6   : > { %8013 = vmatprep.subr.bf16.mxu1 %v19067_v18 }
 0x9d7   : > { %8037 = vmatpush1.bf16.msra.mxu0 %v18965_v30 }
 0x9d8   : > { %8038 = vmatprep.subr.bf16.mxu0 %v18970_v48 }
 0x9d9   : > { %8014 = vmatpush1.bf16.msra.mxu1 %v19065_v62 }
 0x9da   : > { %8015 = vmatprep.subr.bf16.mxu1 %v19074_v2 }
 0x9db   : > { %8039 = vmatpush1.bf16.msra.mxu0 %v18977_v7 }
 0x9dc   : > { %8040 = vmatprep.subr.bf16.mxu0 %v18982_v15 }
 0x9df   : > { %8041 = vmatpush1.bf16.msra.mxu0 %v18989_v9 }
 0x9e0   : > { %8042 = vmatprep.subr.bf16.mxu0 %v18994_v22 }
 0x9e3   : > { %8043 = vmatpush1.bf16.msra.mxu0 %v19001_v47 }
 0x9e4   : > { %8044 = vmatprep.subr.bf16.mxu0 %v19006_v5 }
 0x9e7   : > { %8045 = vmatpush1.bf16.msra.mxu0 %v19013_v31 }
 0x9e8   : > { %8046 = vmatprep.subr.bf16.mxu0 %v19022_v45  ;;  %v19109_v45 = vld [vmem:[#allocation9 + $0x2d8] ss:$24 sps:$4 sm:$0xff]  }
 0x9e9   : > { %21174 = vst [vmem:[#allocation44_spill] sm:$0xff] %v19109_v45 }
 0x9eb   : > { %8047 = vmatpush1.bf16.msra.mxu0 %v19025_v46  ;;  %v19102_v46 = vld [vmem:[#allocation9 + $0x2dc] ss:$24 sps:$4 sm:$0xff]  }
 0x9ec   : > { %8048 = vmatprep.subr.bf16.mxu0 %v19034_v55  ;;  %v19093_v55 = vld [vmem:[#allocation9 + $0x2a0] ss:$24 sps:$4 sm:$0xff]   ;;  %21173 = vst [vmem:[#allocation43_spill] sm:$0xff] %v19102_v46 }
 0x9ef   : > { %8049 = vmatpush1.bf16.msra.mxu0 %v19037_v26  ;;  %v19090_v26 = vld [vmem:[#allocation9 + $0x2ac] ss:$24 sps:$4 sm:$0xff]  }
 0x9f0   : > { %8050 = vmatprep.subr.bf16.mxu0 %v19046_v49  ;;  %v19087_v49 = vld [vmem:[#allocation9 + $0x2a4] ss:$24 sps:$4 sm:$0xff]   ;;  %21171 = vst [vmem:[#allocation41_spill] sm:$0xff] %v19090_v26 }
 0x9f3   : > { %8051 = vmatpush1.bf16.msra.mxu0 %v19049_v27  ;;  %v19077_v27 = vld [vmem:[#allocation9 + $0x27c] ss:$24 sps:$4 sm:$0xff]  }
 0x9f4   : > { %8052 = vmatprep.subr.bf16.mxu0 %v19058_v58  ;;  %21169 = vst [vmem:[#allocation39_spill] sm:$0xff] %v19077_v27  ;;  %v19081_v58 = vld [vmem:[#allocation9 + $0x270] ss:$24 sps:$4 sm:$0xff]  }
 0x9f5   : > { %8016 = vmatpush1.bf16.msra.mxu1 %v19081_v58 }
 0x9f6   : > { %8017 = vmatprep.subr.bf16.mxu1 %v19087_v49 }
 0x9f7   : > { %8053 = vmatpush1.bf16.msra.mxu0 %v19061_v61  ;;  %v19085_v61 = vld [vmem:[#allocation9 + $0x278] ss:$24 sps:$4 sm:$0xff]  }
 0x9f8   : > { %8054 = vmatprep.subr.bf16.mxu0 %v19072_v63  ;;  %21170 = vst [vmem:[#allocation40_spill] sm:$0xff] %v19085_v61  ;;  %v19097_v63 = vld [vmem:[#allocation9 + $0x2a8] ss:$24 sps:$4 sm:$0xff]  }
 0x9f9   : > { %21172 = vst [vmem:[#allocation42_spill] sm:$0xff] %v19097_v63  ;;  %8018 = vmatpush1.bf16.msra.mxu1 %v19093_v55 }
 0x9fb   : > { %8055 = vmatpush1.bf16.msra.mxu0 %v19070_v60  ;;  %v19099_v60 = vld [vmem:[#allocation9 + $0x2d4] ss:$24 sps:$4 sm:$0xff]  }
 0x9fc   : > { %8056 = vmatprep.subr.bf16.mxu0 %v19077_v27  ;;  %v19105_v27 = vld [vmem:[#allocation9 + $0x2d0] ss:$24 sps:$4 sm:$0xff]   ;;  %8019 = vmatprep.subr.bf16.mxu1 %v19099_v60 }
 0x9fd   : > { %8020 = vmatpush1.bf16.msra.mxu1 %v19105_v27 }
 0x9ff   : > { %8057 = vmatpush1.bf16.msra.mxu0 %v19085_v61  ;;  %v19114_v61 = vld [vmem:[#allocation9 + $0x14] ss:$24 sps:$4 sm:$0xff]  }
 0xa00   : > { %8058 = vmatprep.subr.bf16.mxu0 %v19090_v26  ;;  %8071 = vmatprep.subr.bf16.mxu1 %v19114_v61 }
 0xa03   : > { %8059 = vmatpush1.bf16.msra.mxu0 %v19097_v63 }
 0xa04   : > { %8060 = vmatprep.subr.bf16.mxu0 %v19102_v46 }
 0xa07   : > { %8061 = vmatpush1.bf16.msra.mxu0 %v19109_v45 }
 0xa08   : > { %8775 = vmatprep.subr.bf16.mxu0 %v18924_v0 }
 0xa5d   : > { %v7237_v26 = vpop.f32.mrb[48].mxu0  ;;  %v7278_v31 = vpop.f32.mrb[48].mxu1 }
 0xa5e   : > { %v7238_v63 = vadd.f32 %v7237_v26, %v21144_v37  ;;  %v7279_v5 = vadd.f32 %v7278_v31, %v21145_v56  ;;  %v7239_v47 = vpop.f32.mrb[49].mxu0  ;;  %v7280_v22 = vpop.f32.mrb[49].mxu1  ;;  %v6612_v26 = vld [vmem:[#allocation3 + $0x7] ss:$8 sm:$0x30] }
 0xa5f   : > { %v7240_v46 = vadd.f32 %v7239_v47, %v17579_v28  ;;  %v7281_v9 = vadd.f32 %v7280_v22, %v17587_v43  ;;  %v7241_v15 = vpop.f32.mrb[50].mxu0  ;;  %v7282_v45 = vpop.f32.mrb[50].mxu1  ;;  %v6611_v56 = vld [vmem:[#allocation3 + $0x7] ss:$8 sm:$0xf] }
 0xa60   : > { %v7242_v7 = vpop.f32.mrb[51].mxu0  ;;  %v7283_v48 = vpop.f32.mrb[51].mxu1  ;;  %v6613_v37 = vor.u32 %v6612_v26, %v6611_v56 }
 0xa61   : > { %v7330_v30 = vcombine.low %v7238_v63, %v7240_v46  ;;  %v7331_v0 = vcombine.low %v7279_v5, %v7281_v9 }
 0xa62   : > { %v7382_v46 = vrot.slane %v6613_v37, 4 }
 0xa63   : > { %v7338_v8 = vrot.slane %v7330_v30, %v17594_v51  ;;  %v7345_v20 = vrot.slane %v7331_v0, %v17594_v51 }
 0xa65   : > { %v7346_v10 = vcombine.low %v7338_v8, %v7345_v20 }
 0xa67   : > { %v7353_v31 = vrot.slane %v7346_v10, %v17594_v51 }
 0xa69   : > { %v7355_v34 = vadd.f32 %v7353_v31, %v6613_v37 }
 0xa6b   : > { %v14686_v47 = vmul.f32 -1.442695, %v7355_v34 }
 0xa6d   : > { %16897 = vpow2.f32 %v14686_v47 }
 0xa77   : > { %v16898_v22 = vpop.eup %16897 }
 0xa78   : > { %v7359_v15 = vadd.f32 1.0, %v16898_v22 }
 0xa7a   : > { %16899 = vrcp.f32 %v7359_v15 }
 0xa84   : > { %v16900_v45 = vpop.eup %16899 }
 0xa85   : > { %v7387_v0 = vrot.slane %v16900_v45, 2 }
 0xa87   : > { %v7389_v26 = vsub.f32 1.0, %v7387_v0  ;;  %v7391_v22 = vmul.f32 %v7387_v0, %v18881_v3  ;;  %v19149_v3 = vld [vmem:[#allocation9 + $0x40] ss:$24 sps:$4 sm:$0xff]   ;;  %v21190_v0 = vld [vmem:[#allocation31_spill] sm:$0xff] }
 0xa9d   : > { %v7319_v7 = vpop.f32.mrb[52].mxu0 }
 0xa9e   : > { %v7320_v48 = vadd.f32 %v7319_v7, %v17585_v41  ;;  %v7321_v9 = vpop.f32.mrb[53].mxu0 }
 0xa9f   : > { %v7322_v30 = vadd.f32 %v7321_v9, %v17589_v44  ;;  %v7323_v5 = vpop.f32.mrb[54].mxu0  ;;  %v19140_v9 = vld [vmem:[#allocation9 + $0x10] ss:$24 sps:$4 sm:$0xff]  }
 0xaa0   : > { %v7324_v20 = vpop.f32.mrb[55].mxu0  ;;  %v19144_v5 = vld [vmem:[#allocation9 + $0x44] ss:$24 sps:$4 sm:$0xff]  }
 0xaa1   : > { %v7364_v8 = vcombine.low %v7320_v48, %v7322_v30  ;;  %v19152_v20 = vld [vmem:[#allocation9 + $0x74] ss:$24 sps:$4 sm:$0xff]  }
 0xaa3   : > { %v7371_v10 = vrot.slane %v7364_v8, %v17594_v51  ;;  %v19157_v8 = vld [vmem:[#allocation9 + $0x70] ss:$24 sps:$4 sm:$0xff]  }
 0xaa5   : > { %v7378_v56 = vrot.slane %v7371_v10, %v17594_v51  ;;  %v19160_v10 = vld [vmem:[#allocation9 + $0xa4] ss:$24 sps:$4 sm:$0xff]  }
 0xaa7   : > { %v7380_v34 = vmul.f32 %v16900_v45, %v7378_v56  ;;  %v19165_v56 = vld [vmem:[#allocation9 + $0xa0] ss:$24 sps:$4 sm:$0xff]   ;;  %v21186_v45 = vld [vmem:[#allocation27_spill] sm:$0xff] }
 0xaa9   : > { %v7384_v63 = vadd.f32 %v7382_v46, %v7380_v34  ;;  %v21187_v34 = vld [vmem:[#allocation28_spill] sm:$0xff]  ;;  %v21188_v46 = vld [vmem:[#allocation29_spill] sm:$0xff] }
 0xaab   : > { %16901 = vtanh.f32 %v7384_v63  ;;  %v21189_v63 = vld [vmem:[#allocation30_spill] sm:$0xff] }
 0xab5   : > { %v16902_v31 = vpop.eup %16901 }
 0xab6   : > { %v7390_v47 = vmul.f32 %v16902_v31, %v7389_v26  ;;  %v21191_v26 = vld [vmem:[#allocation32_spill] sm:$0xff]  ;;  %v21192_v31 = vld [vmem:[#allocation33_spill] sm:$0xff] }
 0xab8   : > { %v19130_v15 = vadd.f32 %v7391_v22, %v7390_v47  ;;  %v21193_v47 = vld [vmem:[#allocation34_spill] sm:$0xff]  ;;  %v21194_v22 = vld [vmem:[#allocation35_spill] sm:$0xff] }
 0xaba   : > { %14687 = vst.msk [vmem:[%s17400_s14 + $0x7] ss:$8 sm:$0x3] %vm17604_vm1, %v19130_v15  ;;  %v7408_v7 = vrot.slane %v19130_v15, %v17417_v40  ;;  %v7404_v37 = vrot.slane %v19130_v15, %v17424_v6 }
 0xabc   : > { %v7412_v48 = vpack.c.bf16 %v7408_v7, %v7408_v7  ;;  %v19142_v30 = vpack.c.bf16 %v7404_v37, %v7404_v37  ;;  %v21195_v7 = vld [vmem:[#allocation36_spill] sm:$0xff]  ;;  %v21196_v37 = vld [vmem:[#allocation37_spill] sm:$0xff] }
 0xabe   : > { %8021 = vmatprep.mubr.bf16.mxu1 %v7412_v48  ;;  %8062 = vmatprep.mubr.bf16.mxu0 %v7412_v48 }
 0xabf   : > { %8022 = vmatmul.mubr.bf16.vlgmr.msra.gmra.mrb[52].mxu1 %v19142_v30  ;;  %8063 = vmatmul.mubr.bf16.vlgmr.msra.gmra.mrb[56].mxu0 %v19142_v30 }
 0xac0   : > { %8072 = vmatpush1.bf16.msra.mxu1 %v19140_v9  ;;  %8103 = vmatprep.mubr.bf16.mxu1 %v7412_v48  ;;  %v21197_v48 = vld [vmem:[#allocation38_spill] sm:$0xff] }
 0xac1   : > { %8073 = vmatprep.subr.bf16.mxu1 %v19144_v5  ;;  %8776 = vmatpush1.bf16.msra.mxu0 %v18922_v53  ;;  %v19168_v53 = vld [vmem:[#allocation9 + $0xd4] ss:$24 sps:$4 sm:$0xff]  }
 0xac2   : > { %8777 = vmatprep.subr.bf16.mxu0 %v18930_v1  ;;  %v19173_v1 = vld [vmem:[#allocation9 + $0xd0] ss:$24 sps:$4 sm:$0xff]  }
 0xac4   : > { %8074 = vmatpush1.bf16.msra.mxu1 %v19149_v3 }
 0xac5   : > { %8075 = vmatprep.subr.bf16.mxu1 %v19152_v20  ;;  %8778 = vmatpush1.bf16.msra.mxu0 %v18937_v14  ;;  %v19176_v14 = vld [vmem:[#allocation9 + $0x104] ss:$24 sps:$4 sm:$0xff]  }
 0xac6   : > { %8779 = vmatprep.subr.bf16.mxu0 %v18943_v32  ;;  %v19181_v32 = vld [vmem:[#allocation9 + $0x100] ss:$24 sps:$4 sm:$0xff]  }
 0xac8   : > { %8076 = vmatpush1.bf16.msra.mxu1 %v19157_v8 }
 0xac9   : > { %8077 = vmatprep.subr.bf16.mxu1 %v19160_v10  ;;  %8780 = vmatpush1.bf16.msra.mxu0 %v18949_v4  ;;  %v19184_v4 = vld [vmem:[#allocation9 + $0x134] ss:$24 sps:$4 sm:$0xff]  }
 0xaca   : > { %8781 = vmatprep.subr.bf16.mxu0 %v18955_v11  ;;  %v19189_v11 = vld [vmem:[#allocation9 + $0x130] ss:$24 sps:$4 sm:$0xff]  }
 0xacc   : > { %8078 = vmatpush1.bf16.msra.mxu1 %v19165_v56 }
 0xacd   : > { %8079 = vmatprep.subr.bf16.mxu1 %v19168_v53  ;;  %8782 = vmatpush1.bf16.msra.mxu0 %v18961_v21  ;;  %v19192_v21 = vld [vmem:[#allocation9 + $0x164] ss:$24 sps:$4 sm:$0xff]  }
 0xace   : > { %8783 = vmatprep.subr.bf16.mxu0 %v18967_v36  ;;  %v19197_v36 = vld [vmem:[#allocation9 + $0x160] ss:$24 sps:$4 sm:$0xff]  }
 0xad0   : > { %8080 = vmatpush1.bf16.msra.mxu1 %v19173_v1 }
 0xad1   : > { %8081 = vmatprep.subr.bf16.mxu1 %v19176_v14  ;;  %8784 = vmatpush1.bf16.msra.mxu0 %v18973_v57  ;;  %v19200_v57 = vld [vmem:[#allocation9 + $0x194] ss:$24 sps:$4 sm:$0xff]  }
 0xad2   : > { %8785 = vmatprep.subr.bf16.mxu0 %v18979_v50  ;;  %v19205_v50 = vld [vmem:[#allocation9 + $0x190] ss:$24 sps:$4 sm:$0xff]  }
 0xad4   : > { %8082 = vmatpush1.bf16.msra.mxu1 %v19181_v32 }
 0xad5   : > { %8083 = vmatprep.subr.bf16.mxu1 %v19184_v4  ;;  %8786 = vmatpush1.bf16.msra.mxu0 %v18985_v54  ;;  %v19208_v54 = vld [vmem:[#allocation9 + $0x1c4] ss:$24 sps:$4 sm:$0xff]  }
 0xad6   : > { %8787 = vmatprep.subr.bf16.mxu0 %v18991_v19  ;;  %v19213_v19 = vld [vmem:[#allocation9 + $0x1c0] ss:$24 sps:$4 sm:$0xff]  }
 0xad8   : > { %8084 = vmatpush1.bf16.msra.mxu1 %v19189_v11 }
 0xad9   : > { %8085 = vmatprep.subr.bf16.mxu1 %v19192_v21  ;;  %8788 = vmatpush1.bf16.msra.mxu0 %v18997_v29  ;;  %v19216_v29 = vld [vmem:[#allocation9 + $0x1f4] ss:$24 sps:$4 sm:$0xff]  }
 0xada   : > { %8789 = vmatprep.subr.bf16.mxu0 %v19003_v24  ;;  %v19221_v24 = vld [vmem:[#allocation9 + $0x1f0] ss:$24 sps:$4 sm:$0xff]  }
 0xadc   : > { %8086 = vmatpush1.bf16.msra.mxu1 %v19197_v36 }
 0xadd   : > { %8087 = vmatprep.subr.bf16.mxu1 %v19200_v57  ;;  %8790 = vmatpush1.bf16.msra.mxu0 %v19009_v25  ;;  %v19224_v25 = vld [vmem:[#allocation9 + $0x224] ss:$24 sps:$4 sm:$0xff]  }
 0xade   : > { %8791 = vmatprep.subr.bf16.mxu0 %v19018_v39  ;;  %v19229_v39 = vld [vmem:[#allocation9 + $0x220] ss:$24 sps:$4 sm:$0xff]  }
 0xae0   : > { %8088 = vmatpush1.bf16.msra.mxu1 %v19205_v50 }
 0xae1   : > { %8089 = vmatprep.subr.bf16.mxu1 %v19208_v54  ;;  %8792 = vmatpush1.bf16.msra.mxu0 %v19020_v17  ;;  %v19232_v17 = vld [vmem:[#allocation9 + $0x254] ss:$24 sps:$4 sm:$0xff]  }
 0xae2   : > { %8793 = vmatprep.subr.bf16.mxu0 %v19030_v38  ;;  %v19237_v38 = vld [vmem:[#allocation9 + $0x250] ss:$24 sps:$4 sm:$0xff]  }
 0xae4   : > { %8090 = vmatpush1.bf16.msra.mxu1 %v19213_v19 }
 0xae5   : > { %8091 = vmatprep.subr.bf16.mxu1 %v19216_v29  ;;  %8794 = vmatpush1.bf16.msra.mxu0 %v19032_v52  ;;  %v19240_v52 = vld [vmem:[#allocation9 + $0x284] ss:$24 sps:$4 sm:$0xff]  }
 0xae6   : > { %8795 = vmatprep.subr.bf16.mxu0 %v19042_v35  ;;  %v19245_v35 = vld [vmem:[#allocation9 + $0x280] ss:$24 sps:$4 sm:$0xff]  }
 0xae8   : > { %8092 = vmatpush1.bf16.msra.mxu1 %v19221_v24 }
 0xae9   : > { %8093 = vmatprep.subr.bf16.mxu1 %v19224_v25  ;;  %8796 = vmatpush1.bf16.msra.mxu0 %v19044_v42  ;;  %v19248_v42 = vld [vmem:[#allocation9 + $0x2b4] ss:$24 sps:$4 sm:$0xff]  }
 0xaea   : > { %8797 = vmatprep.subr.bf16.mxu0 %v19054_v16  ;;  %v19253_v16 = vld [vmem:[#allocation9 + $0x2b0] ss:$24 sps:$4 sm:$0xff]  }
 0xaec   : > { %8094 = vmatpush1.bf16.msra.mxu1 %v19229_v39 }
 0xaed   : > { %8095 = vmatprep.subr.bf16.mxu1 %v19232_v17  ;;  %8798 = vmatpush1.bf16.msra.mxu0 %v19056_v59  ;;  %v19256_v59 = vld [vmem:[#allocation9 + $0x2e4] ss:$24 sps:$4 sm:$0xff]  }
 0xaee   : > { %8799 = vmatprep.subr.bf16.mxu0 %v19067_v18  ;;  %v19261_v18 = vld [vmem:[#allocation9 + $0x2e0] ss:$24 sps:$4 sm:$0xff]  }
 0xaf0   : > { %8096 = vmatpush1.bf16.msra.mxu1 %v19237_v38 }
 0xaf1   : > { %8097 = vmatprep.subr.bf16.mxu1 %v19240_v52  ;;  %8800 = vmatpush1.bf16.msra.mxu0 %v19065_v62  ;;  %v21178_v62 = vld [vmem:[#allocation19_spill] sm:$0xff] }
 0xaf2   : > { %8801 = vmatprep.subr.bf16.mxu0 %v19074_v2  ;;  %v21183_v2 = vld [vmem:[#allocation24_spill] sm:$0xff] }
 0xaf4   : > { %8098 = vmatpush1.bf16.msra.mxu1 %v19245_v35 }
 0xaf5   : > { %8099 = vmatprep.subr.bf16.mxu1 %v19248_v42  ;;  %8802 = vmatpush1.bf16.msra.mxu0 %v19081_v58  ;;  %v21176_v58 = vld [vmem:[#allocation17_spill] sm:$0xff] }
 0xaf6   : > { %8803 = vmatprep.subr.bf16.mxu0 %v19087_v49  ;;  %v21175_v49 = vld [vmem:[#allocation16_spill] sm:$0xff] }
 0xaf8   : > { %8100 = vmatpush1.bf16.msra.mxu1 %v19253_v16 }
 0xaf9   : > { %8101 = vmatprep.subr.bf16.mxu1 %v19256_v59  ;;  %8804 = vmatpush1.bf16.msra.mxu0 %v19093_v55  ;;  %v21177_v55 = vld [vmem:[#allocation18_spill] sm:$0xff] }
 0xafa   : > { %8805 = vmatprep.subr.bf16.mxu0 %v19099_v60  ;;  %v21179_v60 = vld [vmem:[#allocation20_spill] sm:$0xff] }
 0xafc   : > { %8102 = vmatpush1.bf16.msra.mxu1 %v19261_v18 }
 0xafd   : > { %8816 = vmatprep.subr.bf16.mxu1 %v18928_v13  ;;  %8806 = vmatpush1.bf16.msra.mxu0 %v19105_v27  ;;  %v21180_v13 = vld [vmem:[#allocation21_spill] sm:$0xff]  ;;  %v21181_v27 = vld [vmem:[#allocation22_spill] sm:$0xff] }
 0xafe   : > { %8857 = vmatprep.subr.bf16.mxu0 %v19114_v61  ;;  %v21182_v61 = vld [vmem:[#allocation23_spill] sm:$0xff] }
 0xaff   : > { %8104 = vmatmul.mubr.bf16.vlgmr.msra.gmra.mrb[56].mxu1 %v19142_v30  ;;  %v21198_v30 = vld [vmem:[#allocation39_spill] sm:$0xff] }
 0xb00   : > { %8817 = vmatpush1.bf16.msra.mxu1 %v18926_v23  ;;  %v21184_v23 = vld [vmem:[#allocation25_spill] sm:$0xff] }
 0xb01   : > { %8818 = vmatprep.subr.bf16.mxu1 %v18933_v12  ;;  %v21185_v12 = vld [vmem:[#allocation26_spill] sm:$0xff] }
 0xb04   : > { %8819 = vmatpush1.bf16.msra.mxu1 %v21175_v49  ;;  %v21199_v49 = vld [vmem:[#allocation40_spill] sm:$0xff] }
 0xb05   : > { %8820 = vmatprep.subr.bf16.mxu1 %v21176_v58  ;;  %v21200_v58 = vld [vmem:[#allocation41_spill] sm:$0xff] }
 0xb08   : > { %8821 = vmatpush1.bf16.msra.mxu1 %v21177_v55  ;;  %v21201_v55 = vld [vmem:[#allocation42_spill] sm:$0xff] }
 0xb09   : > { %8822 = vmatprep.subr.bf16.mxu1 %v21178_v62  ;;  %v21202_v62 = vld [vmem:[#allocation43_spill] sm:$0xff] }
 0xb0c   : > { %8823 = vmatpush1.bf16.msra.mxu1 %v21179_v60  ;;  %v21203_v60 = vld [vmem:[#allocation44_spill] sm:$0xff] }
 0xb0d   : > { %8824 = vmatprep.subr.bf16.mxu1 %v21180_v13 }
 0xb10   : > { %8825 = vmatpush1.bf16.msra.mxu1 %v21181_v27 }
 0xb11   : > { %8826 = vmatprep.subr.bf16.mxu1 %v21182_v61  ;;  %v21204_v61 = vld [vmem:[#allocation14_spill] sm:$0xff] }
 0xb14   : > { %8827 = vmatpush1.bf16.msra.mxu1 %v21183_v2 }
 0xb15   : > { %8828 = vmatprep.subr.bf16.mxu1 %v21184_v23  ;;  %v21205_v23 = vld [vmem:[#allocation15_spill] sm:$0xff] }
 0xb18   : > { %8829 = vmatpush1.bf16.msra.mxu1 %v21185_v12 }
 0xb19   : > { %8830 = vmatprep.subr.bf16.mxu1 %v21186_v45 }
 0xb1c   : > { %8831 = vmatpush1.bf16.msra.mxu1 %v21187_v34 }
 0xb1d   : > { %8832 = vmatprep.subr.bf16.mxu1 %v21188_v46 }
 0xb20   : > { %8833 = vmatpush1.bf16.msra.mxu1 %v21189_v63 }
 0xb21   : > { %8834 = vmatprep.subr.bf16.mxu1 %v21190_v0 }
 0xb24   : > { %8835 = vmatpush1.bf16.msra.mxu1 %v21191_v26 }
 0xb25   : > { %8836 = vmatprep.subr.bf16.mxu1 %v21192_v31 }
 0xb28   : > { %8837 = vmatpush1.bf16.msra.mxu1 %v21193_v47 }
 0xb29   : > { %8838 = vmatprep.subr.bf16.mxu1 %v21194_v22 }
 0xb2c   : > { %8839 = vmatpush1.bf16.msra.mxu1 %v21195_v7 }
 0xb2d   : > { %8840 = vmatprep.subr.bf16.mxu1 %v21196_v37 }
 0xb30   : > { %8841 = vmatpush1.bf16.msra.mxu1 %v21197_v48 }
 0xb31   : > { %8842 = vmatprep.subr.bf16.mxu1 %v21198_v30 }
 0xb34   : > { %8843 = vmatpush1.bf16.msra.mxu1 %v21199_v49  ;;  %v7398_v49 = vld [vmem:[#allocation3 + $0x30] ss:$8 sm:$0x30] }
 0xb35   : > { %8844 = vmatprep.subr.bf16.mxu1 %v21200_v58 }
 0xb38   : > { %8845 = vmatpush1.bf16.msra.mxu1 %v21201_v55  ;;  %v7397_v55 = vld [vmem:[#allocation3 + $0x30] ss:$8 sm:$0xf] }
 0xb39   : > { %8846 = vmatprep.subr.bf16.mxu1 %v21202_v62  ;;  %v7399_v62 = vor.u32 %v7398_v49, %v7397_v55 }
 0xb3c   : > { %8847 = vmatpush1.bf16.msra.mxu1 %v21203_v60 }
 0xb92   : > { %v8023_v13 = vpop.f32.mrb[52].mxu1  ;;  %v8064_v27 = vpop.f32.mrb[56].mxu0 }
 0xb93   : > { %v8024_v2 = vadd.f32 %v8023_v13, %v21204_v61  ;;  %v8065_v12 = vadd.f32 %v8064_v27, %v21205_v23  ;;  %v8025_v45 = vpop.f32.mrb[53].mxu1  ;;  %v8066_v34 = vpop.f32.mrb[57].mxu0 }
 0xb94   : > { %v8026_v46 = vadd.f32 %v8025_v45, %v17579_v28  ;;  %v8067_v63 = vadd.f32 %v8066_v34, %v17587_v43  ;;  %v8027_v0 = vpop.f32.mrb[54].mxu1  ;;  %v8068_v26 = vpop.f32.mrb[58].mxu0 }
 0xb95   : > { %v8028_v31 = vpop.f32.mrb[55].mxu1  ;;  %v8069_v47 = vpop.f32.mrb[59].mxu0 }
 0xb96   : > { %v8116_v22 = vcombine.low %v8024_v2, %v8026_v46  ;;  %v8117_v7 = vcombine.low %v8065_v12, %v8067_v63 }
 0xb98   : > { %v8124_v37 = vrot.slane %v8116_v22, %v17594_v51  ;;  %v8131_v48 = vrot.slane %v8117_v7, %v17594_v51 }
 0xb9a   : > { %v8132_v30 = vcombine.low %v8124_v37, %v8131_v48  ;;  %v8168_v37 = vrot.slane %v7399_v62, 4 }
 0xb9c   : > { %v8139_v58 = vrot.slane %v8132_v30, %v17594_v51 }
 0xb9e   : > { %v8141_v60 = vadd.f32 %v8139_v58, %v7399_v62 }
 0xba0   : > { %v14784_v13 = vmul.f32 -1.442695, %v8141_v60 }
 0xba2   : > { %16903 = vpow2.f32 %v14784_v13 }
 0xbac   : > { %v16904_v27 = vpop.eup %16903 }
 0xbad   : > { %v8145_v45 = vadd.f32 1.0, %v16904_v27 }
 0xbaf   : > { %16905 = vrcp.f32 %v8145_v45 }
 0xbb9   : > { %v16906_v22 = vpop.eup %16905 }
 0xbba   : > { %v8173_v30 = vrot.slane %v16906_v22, 2 }
 0xbbc   : > { %v8175_v49 = vsub.f32 1.0, %v8173_v30  ;;  %v8177_v60 = vmul.f32 %v8173_v30, %v19130_v15  ;;  %v19355_v15 = vld [vmem:[#allocation9] ss:$24 sps:$4 sm:$0xff]   ;;  %v19487_v30 = vld [vmem:[#allocation9 + $0x214] ss:$24 sps:$4 sm:$0xff]  }
 0xbd2   : > { %v8105_v34 = vpop.f32.mrb[56].mxu1 }
 0xbd3   : > { %v8106_v2 = vadd.f32 %v8105_v34, %v17585_v41  ;;  %v8107_v12 = vpop.f32.mrb[57].mxu1 }
 0xbd4   : > { %v8108_v46 = vadd.f32 %v8107_v12, %v17589_v44  ;;  %v8109_v63 = vpop.f32.mrb[58].mxu1  ;;  %v19453_v12 = vld [vmem:[#allocation9 + $0x180] ss:$24 sps:$4 sm:$0xff]  }
 0xbd5   : > { %v8110_v0 = vpop.f32.mrb[59].mxu1  ;;  %v19458_v63 = vld [vmem:[#allocation9 + $0x188] ss:$24 sps:$4 sm:$0xff]  }
 0xbd6   : > { %v8150_v26 = vcombine.low %v8106_v2, %v8108_v46  ;;  %v19451_v2 = vld [vmem:[#allocation9 + $0x184] ss:$24 sps:$4 sm:$0xff]   ;;  %21220 = vst [vmem:[#allocation30_spill] sm:$0xff] %v19458_v63  ;;  %v19463_v0 = vld [vmem:[#allocation9 + $0x1b4] ss:$24 sps:$4 sm:$0xff]  }
 0xbd7   : > { %v19455_v46 = vld [vmem:[#allocation9 + $0x18c] ss:$24 sps:$4 sm:$0xff]  }
 0xbd8   : > { %v8157_v31 = vrot.slane %v8150_v26, %v17594_v51  ;;  %21219 = vst [vmem:[#allocation29_spill] sm:$0xff] %v19455_v46  ;;  %v19465_v26 = vld [vmem:[#allocation9 + $0x1b0] ss:$24 sps:$4 sm:$0xff]  }
 0xbda   : > { %v8164_v47 = vrot.slane %v8157_v31, %v17594_v51  ;;  %v19467_v31 = vld [vmem:[#allocation9 + $0x1bc] ss:$24 sps:$4 sm:$0xff]  }
 0xbdb   : > { %21221 = vst [vmem:[#allocation31_spill] sm:$0xff] %v19467_v31 }
 0xbdc   : > { %v8166_v7 = vmul.f32 %v16906_v22, %v8164_v47  ;;  %v19470_v47 = vld [vmem:[#allocation9 + $0x1b8] ss:$24 sps:$4 sm:$0xff]   ;;  %v19475_v22 = vld [vmem:[#allocation9 + $0x1e4] ss:$24 sps:$4 sm:$0xff]  }
 0xbdd   : > { %21222 = vst [vmem:[#allocation32_spill] sm:$0xff] %v19470_v47 }
 0xbde   : > { %v8170_v48 = vadd.f32 %v8168_v37, %v8166_v7  ;;  %v19477_v7 = vld [vmem:[#allocation9 + $0x1e0] ss:$24 sps:$4 sm:$0xff]   ;;  %v19479_v37 = vld [vmem:[#allocation9 + $0x1ec] ss:$24 sps:$4 sm:$0xff]  }
 0xbdf   : > { %21223 = vst [vmem:[#allocation33_spill] sm:$0xff] %v19479_v37 }
 0xbe0   : > { %16907 = vtanh.f32 %v8170_v48  ;;  %v19482_v48 = vld [vmem:[#allocation9 + $0x1e8] ss:$24 sps:$4 sm:$0xff]  }
 0xbe1   : > { %21224 = vst [vmem:[#allocation34_spill] sm:$0xff] %v19482_v48 }
 0xbea   : > { %v16908_v58 = vpop.eup %16907 }
 0xbeb   : > { %v8176_v55 = vmul.f32 %v16908_v58, %v8175_v49  ;;  %v19489_v49 = vld [vmem:[#allocation9 + $0x210] ss:$24 sps:$4 sm:$0xff]   ;;  %v19491_v58 = vld [vmem:[#allocation9 + $0x21c] ss:$24 sps:$4 sm:$0xff]  }
 0xbec   : > { %21225 = vst [vmem:[#allocation35_spill] sm:$0xff] %v19491_v58 }
 0xbed   : > { %v19314_v13 = vadd.f32 %v8177_v60, %v8176_v55  ;;  %v19494_v55 = vld [vmem:[#allocation9 + $0x218] ss:$24 sps:$4 sm:$0xff]  }
 0xbee   : > { %21226 = vst [vmem:[#allocation36_spill] sm:$0xff] %v19494_v55  ;;  %v19498_v60 = vld [vmem:[#allocation9 + $0x240] ss:$24 sps:$4 sm:$0xff]  }
 0xbef   : > { %14785 = vst.msk [vmem:[%s17400_s14 + $0x10] ss:$8 sm:$0x3] %vm17604_vm1, %v19314_v13  ;;  %v8194_v27 = vrot.slane %v19314_v13, %v17417_v40  ;;  %v8190_v62 = vrot.slane %v19314_v13, %v17424_v6 }
 0xbf1   : > { %v8198_v45 = vpack.c.bf16 %v8194_v27, %v8194_v27  ;;  %v8197_v34 = vpack.c.bf16 %v8190_v62, %v8190_v62  ;;  %v19500_v27 = vld [vmem:[#allocation9 + $0x244] ss:$24 sps:$4 sm:$0xff]   ;;  %v19503_v62 = vld [vmem:[#allocation9 + $0x248] ss:$24 sps:$4 sm:$0xff]  }
 0xbf2   : > { %21227 = vst [vmem:[#allocation37_spill] sm:$0xff] %v19503_v62 }
 0xbf3   : > { %8807 = vmatprep.mubr.bf16.mxu0 %v8198_v45  ;;  %8848 = vmatprep.mubr.bf16.mxu1 %v8198_v45 }
 0xbf4   : > { %8808 = vmatmul.mubr.bf16.vlgmr.msra.gmra.mrb[60].mxu0 %v8197_v34  ;;  %8849 = vmatmul.mubr.bf16.vlgmr.msra.gmra.mrb[60].mxu1 %v8197_v34 }
 0xbf5   : > { %8858 = vmatpush1.bf16.msra.mxu0 %v19140_v9  ;;  %8889 = vmatprep.mubr.bf16.mxu0 %v8198_v45  ;;  %v19357_v9 = vld [vmem:[#allocation9 + $0x4] ss:$24 sps:$4 sm:$0xff]  }
 0xbf6   : > { %8859 = vmatprep.subr.bf16.mxu0 %v19144_v5  ;;  %v19359_v5 = vld [vmem:[#allocation9 + $0x8] ss:$24 sps:$4 sm:$0xff]   ;;  %9561 = vmatprep.subr.bf16.mxu1 %v19357_v9  ;;  %v19505_v45 = vld [vmem:[#allocation9 + $0x24c] ss:$24 sps:$4 sm:$0xff]  }
 0xbf7   : > { %9562 = vmatpush1.bf16.msra.mxu1 %v19355_v15  ;;  %21228 = vst [vmem:[#allocation38_spill] sm:$0xff] %v19505_v45 }
 0xbf9   : > { %8860 = vmatpush1.bf16.msra.mxu0 %v19149_v3  ;;  %v19361_v3 = vld [vmem:[#allocation9 + $0xc] ss:$24 sps:$4 sm:$0xff]  }
 0xbfa   : > { %8861 = vmatprep.subr.bf16.mxu0 %v19152_v20  ;;  %v19363_v20 = vld [vmem:[#allocation9 + $0x34] ss:$24 sps:$4 sm:$0xff]  }
 0xbfb   : > { %9563 = vmatprep.subr.bf16.mxu1 %v19363_v20 }
 0xbfd   : > { %8862 = vmatpush1.bf16.msra.mxu0 %v19157_v8  ;;  %v19366_v8 = vld [vmem:[#allocation9 + $0x3c] ss:$24 sps:$4 sm:$0xff]  }
 0xbfe   : > { %8863 = vmatprep.subr.bf16.mxu0 %v19160_v10  ;;  %v19370_v10 = vld [vmem:[#allocation9 + $0x30] ss:$24 sps:$4 sm:$0xff]  }
 0xbff   : > { %9564 = vmatpush1.bf16.msra.mxu1 %v19370_v10 }
 0xc01   : > { %8864 = vmatpush1.bf16.msra.mxu0 %v19165_v56  ;;  %v19374_v56 = vld [vmem:[#allocation9 + $0x38] ss:$24 sps:$4 sm:$0xff]  }
 0xc02   : > { %8865 = vmatprep.subr.bf16.mxu0 %v19168_v53  ;;  %21206 = vst [vmem:[#allocation16_spill] sm:$0xff] %v19374_v56  ;;  %v19376_v53 = vld [vmem:[#allocation9 + $0x64] ss:$24 sps:$4 sm:$0xff]  }
 0xc03   : > { %9565 = vmatprep.subr.bf16.mxu1 %v19376_v53 }
 0xc05   : > { %8866 = vmatpush1.bf16.msra.mxu0 %v19173_v1  ;;  %v19379_v1 = vld [vmem:[#allocation9 + $0x6c] ss:$24 sps:$4 sm:$0xff]  }
 0xc06   : > { %8867 = vmatprep.subr.bf16.mxu0 %v19176_v14  ;;  %21207 = vst [vmem:[#allocation17_spill] sm:$0xff] %v19379_v1  ;;  %v19382_v14 = vld [vmem:[#allocation9 + $0x60] ss:$24 sps:$4 sm:$0xff]  }
 0xc07   : > { %9566 = vmatpush1.bf16.msra.mxu1 %v19382_v14 }
 0xc09   : > { %8868 = vmatpush1.bf16.msra.mxu0 %v19181_v32  ;;  %v19386_v32 = vld [vmem:[#allocation9 + $0x68] ss:$24 sps:$4 sm:$0xff]  }
 0xc0a   : > { %8869 = vmatprep.subr.bf16.mxu0 %v19184_v4  ;;  %21208 = vst [vmem:[#allocation18_spill] sm:$0xff] %v19386_v32  ;;  %v19388_v4 = vld [vmem:[#allocation9 + $0x94] ss:$24 sps:$4 sm:$0xff]  }
 0xc0b   : > { %9567 = vmatprep.subr.bf16.mxu1 %v19388_v4 }
 0xc0d   : > { %8870 = vmatpush1.bf16.msra.mxu0 %v19189_v11  ;;  %v19391_v11 = vld [vmem:[#allocation9 + $0x9c] ss:$24 sps:$4 sm:$0xff]  }
 0xc0e   : > { %8871 = vmatprep.subr.bf16.mxu0 %v19192_v21  ;;  %21209 = vst [vmem:[#allocation19_spill] sm:$0xff] %v19391_v11  ;;  %v19394_v21 = vld [vmem:[#allocation9 + $0x90] ss:$24 sps:$4 sm:$0xff]  }
 0xc0f   : > { %9568 = vmatpush1.bf16.msra.mxu1 %v19394_v21 }
 0xc11   : > { %8872 = vmatpush1.bf16.msra.mxu0 %v19197_v36  ;;  %v19398_v36 = vld [vmem:[#allocation9 + $0x98] ss:$24 sps:$4 sm:$0xff]  }
 0xc12   : > { %8873 = vmatprep.subr.bf16.mxu0 %v19200_v57  ;;  %21210 = vst [vmem:[#allocation20_spill] sm:$0xff] %v19398_v36  ;;  %v19400_v57 = vld [vmem:[#allocation9 + $0xc4] ss:$24 sps:$4 sm:$0xff]  }
 0xc13   : > { %9569 = vmatprep.subr.bf16.mxu1 %v19400_v57 }
 0xc15   : > { %8874 = vmatpush1.bf16.msra.mxu0 %v19205_v50  ;;  %v19403_v50 = vld [vmem:[#allocation9 + $0xcc] ss:$24 sps:$4 sm:$0xff]  }
 0xc16   : > { %8875 = vmatprep.subr.bf16.mxu0 %v19208_v54  ;;  %21211 = vst [vmem:[#allocation21_spill] sm:$0xff] %v19403_v50  ;;  %v19406_v54 = vld [vmem:[#allocation9 + $0xc0] ss:$24 sps:$4 sm:$0xff]  }
 0xc17   : > { %9570 = vmatpush1.bf16.msra.mxu1 %v19406_v54 }
 0xc19   : > { %8876 = vmatpush1.bf16.msra.mxu0 %v19213_v19  ;;  %v19410_v19 = vld [vmem:[#allocation9 + $0xc8] ss:$24 sps:$4 sm:$0xff]  }
 0xc1a   : > { %8877 = vmatprep.subr.bf16.mxu0 %v19216_v29  ;;  %21212 = vst [vmem:[#allocation22_spill] sm:$0xff] %v19410_v19  ;;  %v19412_v29 = vld [vmem:[#allocation9 + $0xf4] ss:$24 sps:$4 sm:$0xff]  }
 0xc1b   : > { %9571 = vmatprep.subr.bf16.mxu1 %v19412_v29 }
 0xc1d   : > { %8878 = vmatpush1.bf16.msra.mxu0 %v19221_v24  ;;  %v19415_v24 = vld [vmem:[#allocation9 + $0xfc] ss:$24 sps:$4 sm:$0xff]  }
 0xc1e   : > { %8879 = vmatprep.subr.bf16.mxu0 %v19224_v25  ;;  %21213 = vst [vmem:[#allocation23_spill] sm:$0xff] %v19415_v24  ;;  %v19418_v25 = vld [vmem:[#allocation9 + $0xf0] ss:$24 sps:$4 sm:$0xff]  }
 0xc1f   : > { %9572 = vmatpush1.bf16.msra.mxu1 %v19418_v25 }
 0xc21   : > { %8880 = vmatpush1.bf16.msra.mxu0 %v19229_v39  ;;  %v19422_v39 = vld [vmem:[#allocation9 + $0xf8] ss:$24 sps:$4 sm:$0xff]  }
 0xc22   : > { %8881 = vmatprep.subr.bf16.mxu0 %v19232_v17  ;;  %21214 = vst [vmem:[#allocation24_spill] sm:$0xff] %v19422_v39  ;;  %v19424_v17 = vld [vmem:[#allocation9 + $0x124] ss:$24 sps:$4 sm:$0xff]  }
 0xc23   : > { %9573 = vmatprep.subr.bf16.mxu1 %v19424_v17 }
 0xc25   : > { %8882 = vmatpush1.bf16.msra.mxu0 %v19237_v38  ;;  %v19427_v38 = vld [vmem:[#allocation9 + $0x12c] ss:$24 sps:$4 sm:$0xff]  }
 0xc26   : > { %8883 = vmatprep.subr.bf16.mxu0 %v19240_v52  ;;  %21215 = vst [vmem:[#allocation25_spill] sm:$0xff] %v19427_v38  ;;  %v19430_v52 = vld [vmem:[#allocation9 + $0x120] ss:$24 sps:$4 sm:$0xff]  }
 0xc27   : > { %9574 = vmatpush1.bf16.msra.mxu1 %v19430_v52 }
 0xc29   : > { %8884 = vmatpush1.bf16.msra.mxu0 %v19245_v35  ;;  %v19434_v35 = vld [vmem:[#allocation9 + $0x128] ss:$24 sps:$4 sm:$0xff]  }
 0xc2a   : > { %8885 = vmatprep.subr.bf16.mxu0 %v19248_v42  ;;  %21216 = vst [vmem:[#allocation26_spill] sm:$0xff] %v19434_v35  ;;  %v19436_v42 = vld [vmem:[#allocation9 + $0x154] ss:$24 sps:$4 sm:$0xff]  }
 0xc2b   : > { %9575 = vmatprep.subr.bf16.mxu1 %v19436_v42 }
 0xc2d   : > { %8886 = vmatpush1.bf16.msra.mxu0 %v19253_v16  ;;  %v19439_v16 = vld [vmem:[#allocation9 + $0x15c] ss:$24 sps:$4 sm:$0xff]  }
 0xc2e   : > { %8887 = vmatprep.subr.bf16.mxu0 %v19256_v59  ;;  %21217 = vst [vmem:[#allocation27_spill] sm:$0xff] %v19439_v16  ;;  %v19442_v59 = vld [vmem:[#allocation9 + $0x150] ss:$24 sps:$4 sm:$0xff]  }
 0xc2f   : > { %9576 = vmatpush1.bf16.msra.mxu1 %v19442_v59 }
 0xc30   : > { %9577 = vmatprep.subr.bf16.mxu1 %v19451_v2 }
 0xc31   : > { %8888 = vmatpush1.bf16.msra.mxu0 %v19261_v18  ;;  %v19446_v18 = vld [vmem:[#allocation9 + $0x158] ss:$24 sps:$4 sm:$0xff]  }
 0xc32   : > { %9602 = vmatprep.subr.bf16.mxu0 %v19361_v3  ;;  %21218 = vst [vmem:[#allocation28_spill] sm:$0xff] %v19446_v18 }
 0xc33   : > { %9578 = vmatpush1.bf16.msra.mxu1 %v19453_v12 }
 0xc34   : > { %8890 = vmatmul.mubr.bf16.vlgmr.msra.gmra.mrb[64].mxu0 %v8197_v34  ;;  %9579 = vmatprep.subr.bf16.mxu1 %v19463_v0  ;;  %v19507_v34 = vld [vmem:[#allocation9 + $0x274] ss:$24 sps:$4 sm:$0xff]  }
 0xc35   : > { %9603 = vmatpush1.bf16.msra.mxu0 %v19359_v5 }
 0xc36   : > { %9604 = vmatprep.subr.bf16.mxu0 %v19366_v8 }
 0xc37   : > { %9580 = vmatpush1.bf16.msra.mxu1 %v19465_v26 }
 0xc38   : > { %9581 = vmatprep.subr.bf16.mxu1 %v19475_v22 }
 0xc39   : > { %9605 = vmatpush1.bf16.msra.mxu0 %v19374_v56 }
 0xc3a   : > { %9606 = vmatprep.subr.bf16.mxu0 %v19379_v1 }
 0xc3b   : > { %9582 = vmatpush1.bf16.msra.mxu1 %v19477_v7 }
 0xc3c   : > { %9583 = vmatprep.subr.bf16.mxu1 %v19487_v30 }
 0xc3d   : > { %9607 = vmatpush1.bf16.msra.mxu0 %v19386_v32 }
 0xc3e   : > { %9608 = vmatprep.subr.bf16.mxu0 %v19391_v11 }
 0xc3f   : > { %9584 = vmatpush1.bf16.msra.mxu1 %v19489_v49 }
 0xc40   : > { %9585 = vmatprep.subr.bf16.mxu1 %v19500_v27 }
 0xc41   : > { %9609 = vmatpush1.bf16.msra.mxu0 %v19398_v36 }
 0xc42   : > { %9610 = vmatprep.subr.bf16.mxu0 %v19403_v50 }
 0xc43   : > { %9586 = vmatpush1.bf16.msra.mxu1 %v19498_v60 }
 0xc44   : > { %9587 = vmatprep.subr.bf16.mxu1 %v19507_v34 }
 0xc45   : > { %9611 = vmatpush1.bf16.msra.mxu0 %v19410_v19 }
 0xc46   : > { %9612 = vmatprep.subr.bf16.mxu0 %v19415_v24 }
 0xc49   : > { %9613 = vmatpush1.bf16.msra.mxu0 %v19422_v39 }
 0xc4a   : > { %9614 = vmatprep.subr.bf16.mxu0 %v19427_v38 }
 0xc4d   : > { %9615 = vmatpush1.bf16.msra.mxu0 %v19434_v35 }
 0xc4e   : > { %9616 = vmatprep.subr.bf16.mxu0 %v19439_v16 }
 0xc51   : > { %9617 = vmatpush1.bf16.msra.mxu0 %v19446_v18 }
 0xc52   : > { %9618 = vmatprep.subr.bf16.mxu0 %v19455_v46  ;;  %v19542_v46 = vld [vmem:[#allocation9 + $0x2d8] ss:$24 sps:$4 sm:$0xff]  }
 0xc53   : > { %21234 = vst [vmem:[#allocation44_spill] sm:$0xff] %v19542_v46 }
 0xc55   : > { %9619 = vmatpush1.bf16.msra.mxu0 %v19458_v63  ;;  %v19535_v63 = vld [vmem:[#allocation9 + $0x2dc] ss:$24 sps:$4 sm:$0xff]  }
 0xc56   : > { %9620 = vmatprep.subr.bf16.mxu0 %v19467_v31  ;;  %v19526_v31 = vld [vmem:[#allocation9 + $0x2a0] ss:$24 sps:$4 sm:$0xff]   ;;  %21233 = vst [vmem:[#allocation43_spill] sm:$0xff] %v19535_v63 }
 0xc59   : > { %9621 = vmatpush1.bf16.msra.mxu0 %v19470_v47  ;;  %v19523_v47 = vld [vmem:[#allocation9 + $0x2ac] ss:$24 sps:$4 sm:$0xff]  }
 0xc5a   : > { %9622 = vmatprep.subr.bf16.mxu0 %v19479_v37  ;;  %v19520_v37 = vld [vmem:[#allocation9 + $0x2a4] ss:$24 sps:$4 sm:$0xff]   ;;  %21231 = vst [vmem:[#allocation41_spill] sm:$0xff] %v19523_v47 }
 0xc5d   : > { %9623 = vmatpush1.bf16.msra.mxu0 %v19482_v48  ;;  %v19510_v48 = vld [vmem:[#allocation9 + $0x27c] ss:$24 sps:$4 sm:$0xff]  }
 0xc5e   : > { %9624 = vmatprep.subr.bf16.mxu0 %v19491_v58  ;;  %21229 = vst [vmem:[#allocation39_spill] sm:$0xff] %v19510_v48  ;;  %v19514_v58 = vld [vmem:[#allocation9 + $0x270] ss:$24 sps:$4 sm:$0xff]  }
 0xc5f   : > { %9588 = vmatpush1.bf16.msra.mxu1 %v19514_v58 }
 0xc60   : > { %9589 = vmatprep.subr.bf16.mxu1 %v19520_v37 }
 0xc61   : > { %9625 = vmatpush1.bf16.msra.mxu0 %v19494_v55  ;;  %v19518_v55 = vld [vmem:[#allocation9 + $0x278] ss:$24 sps:$4 sm:$0xff]  }
 0xc62   : > { %9626 = vmatprep.subr.bf16.mxu0 %v19505_v45  ;;  %21230 = vst [vmem:[#allocation40_spill] sm:$0xff] %v19518_v55  ;;  %v19530_v45 = vld [vmem:[#allocation9 + $0x2a8] ss:$24 sps:$4 sm:$0xff]  }
 0xc63   : > { %21232 = vst [vmem:[#allocation42_spill] sm:$0xff] %v19530_v45  ;;  %9590 = vmatpush1.bf16.msra.mxu1 %v19526_v31 }
 0xc65   : > { %9627 = vmatpush1.bf16.msra.mxu0 %v19503_v62  ;;  %v19532_v62 = vld [vmem:[#allocation9 + $0x2d4] ss:$24 sps:$4 sm:$0xff]  }
 0xc66   : > { %9628 = vmatprep.subr.bf16.mxu0 %v19510_v48  ;;  %v19538_v48 = vld [vmem:[#allocation9 + $0x2d0] ss:$24 sps:$4 sm:$0xff]   ;;  %9591 = vmatprep.subr.bf16.mxu1 %v19532_v62 }
 0xc67   : > { %9592 = vmatpush1.bf16.msra.mxu1 %v19538_v48 }
 0xc69   : > { %9629 = vmatpush1.bf16.msra.mxu0 %v19518_v55  ;;  %v19547_v55 = vld [vmem:[#allocation9 + $0x14] ss:$24 sps:$4 sm:$0xff]  }
 0xc6a   : > { %9630 = vmatprep.subr.bf16.mxu0 %v19523_v47  ;;  %9643 = vmatprep.subr.bf16.mxu1 %v19547_v55 }
 0xc6d   : > { %9631 = vmatpush1.bf16.msra.mxu0 %v19530_v45 }
 0xc6e   : > { %9632 = vmatprep.subr.bf16.mxu0 %v19535_v63 }
 0xc71   : > { %9633 = vmatpush1.bf16.msra.mxu0 %v19542_v46 }
 0xc72   : > { %10347 = vmatprep.subr.bf16.mxu0 %v19357_v9 }
 0xcc7   : > { %v8809_v47 = vpop.f32.mrb[60].mxu0  ;;  %v8850_v18 = vpop.f32.mrb[60].mxu1 }
 0xcc8   : > { %v8810_v45 = vadd.f32 %v8809_v47, %v21204_v61  ;;  %v8851_v16 = vadd.f32 %v8850_v18, %v21205_v23  ;;  %v8811_v35 = vpop.f32.mrb[61].mxu0  ;;  %v8852_v38 = vpop.f32.mrb[61].mxu1  ;;  %v8184_v47 = vld [vmem:[#allocation3 + $0x31] ss:$8 sm:$0x30] }
 0xcc9   : > { %v8812_v63 = vadd.f32 %v8811_v35, %v17579_v28  ;;  %v8853_v39 = vadd.f32 %v8852_v38, %v17587_v43  ;;  %v8813_v24 = vpop.f32.mrb[62].mxu0  ;;  %v8854_v46 = vpop.f32.mrb[62].mxu1  ;;  %v8183_v23 = vld [vmem:[#allocation3 + $0x31] ss:$8 sm:$0xf] }
 0xcca   : > { %v8814_v19 = vpop.f32.mrb[63].mxu0  ;;  %v8855_v50 = vpop.f32.mrb[63].mxu1  ;;  %v8185_v61 = vor.u32 %v8184_v47, %v8183_v23 }
 0xccb   : > { %v8902_v36 = vcombine.low %v8810_v45, %v8812_v63  ;;  %v8903_v9 = vcombine.low %v8851_v16, %v8853_v39 }
 0xccc   : > { %v8954_v63 = vrot.slane %v8185_v61, 4 }
 0xccd   : > { %v8910_v11 = vrot.slane %v8902_v36, %v17594_v51  ;;  %v8917_v32 = vrot.slane %v8903_v9, %v17594_v51 }
 0xccf   : > { %v8918_v1 = vcombine.low %v8910_v11, %v8917_v32 }
 0xcd1   : > { %v8925_v18 = vrot.slane %v8918_v1, %v17594_v51 }
 0xcd3   : > { %v8927_v56 = vadd.f32 %v8925_v18, %v8185_v61 }
 0xcd5   : > { %v14882_v35 = vmul.f32 -1.442695, %v8927_v56 }
 0xcd7   : > { %16909 = vpow2.f32 %v14882_v35 }
 0xce1   : > { %v16910_v38 = vpop.eup %16909 }
 0xce2   : > { %v8931_v24 = vadd.f32 1.0, %v16910_v38 }
 0xce4   : > { %16911 = vrcp.f32 %v8931_v24 }
 0xcee   : > { %v16912_v46 = vpop.eup %16911 }
 0xcef   : > { %v8959_v9 = vrot.slane %v16912_v46, 2 }
 0xcf1   : > { %v8961_v47 = vsub.f32 1.0, %v8959_v9  ;;  %v8963_v38 = vmul.f32 %v8959_v9, %v19314_v13  ;;  %v19582_v13 = vld [vmem:[#allocation9 + $0x40] ss:$24 sps:$4 sm:$0xff]   ;;  %v21250_v9 = vld [vmem:[#allocation31_spill] sm:$0xff] }
 0xd07   : > { %v8891_v19 = vpop.f32.mrb[64].mxu0 }
 0xd08   : > { %v8892_v50 = vadd.f32 %v8891_v19, %v17585_v41  ;;  %v8893_v39 = vpop.f32.mrb[65].mxu0 }
 0xd09   : > { %v8894_v36 = vadd.f32 %v8893_v39, %v17589_v44  ;;  %v8895_v16 = vpop.f32.mrb[66].mxu0  ;;  %v19573_v39 = vld [vmem:[#allocation9 + $0x10] ss:$24 sps:$4 sm:$0xff]  }
 0xd0a   : > { %v8896_v32 = vpop.f32.mrb[67].mxu0  ;;  %v19577_v16 = vld [vmem:[#allocation9 + $0x44] ss:$24 sps:$4 sm:$0xff]  }
 0xd0b   : > { %v8936_v11 = vcombine.low %v8892_v50, %v8894_v36  ;;  %v19585_v32 = vld [vmem:[#allocation9 + $0x74] ss:$24 sps:$4 sm:$0xff]  }
 0xd0d   : > { %v8943_v1 = vrot.slane %v8936_v11, %v17594_v51  ;;  %v19590_v11 = vld [vmem:[#allocation9 + $0x70] ss:$24 sps:$4 sm:$0xff]  }
 0xd0f   : > { %v8950_v23 = vrot.slane %v8943_v1, %v17594_v51  ;;  %v19593_v1 = vld [vmem:[#allocation9 + $0xa4] ss:$24 sps:$4 sm:$0xff]  }
 0xd11   : > { %v8952_v56 = vmul.f32 %v16912_v46, %v8950_v23  ;;  %v19598_v23 = vld [vmem:[#allocation9 + $0xa0] ss:$24 sps:$4 sm:$0xff]   ;;  %v21246_v46 = vld [vmem:[#allocation27_spill] sm:$0xff] }
 0xd13   : > { %v8956_v45 = vadd.f32 %v8954_v63, %v8952_v56  ;;  %v21247_v56 = vld [vmem:[#allocation28_spill] sm:$0xff]  ;;  %v21248_v63 = vld [vmem:[#allocation29_spill] sm:$0xff] }
 0xd15   : > { %16913 = vtanh.f32 %v8956_v45  ;;  %v21249_v45 = vld [vmem:[#allocation30_spill] sm:$0xff] }
 0xd1f   : > { %v16914_v18 = vpop.eup %16913 }
 0xd20   : > { %v8962_v35 = vmul.f32 %v16914_v18, %v8961_v47  ;;  %v21251_v47 = vld [vmem:[#allocation32_spill] sm:$0xff]  ;;  %v21252_v18 = vld [vmem:[#allocation33_spill] sm:$0xff] }
 0xd22   : > { %v19563_v24 = vadd.f32 %v8963_v38, %v8962_v35  ;;  %v21253_v35 = vld [vmem:[#allocation34_spill] sm:$0xff]  ;;  %v21254_v38 = vld [vmem:[#allocation35_spill] sm:$0xff] }
 0xd24   : > { %14883 = vst.msk [vmem:[%s17400_s14 + $0x11] ss:$8 sm:$0x3] %vm17604_vm1, %v19563_v24  ;;  %v8980_v19 = vrot.slane %v19563_v24, %v17417_v40  ;;  %v8976_v61 = vrot.slane %v19563_v24, %v17424_v6 }
 0xd26   : > { %v8984_v50 = vpack.c.bf16 %v8980_v19, %v8980_v19  ;;  %v19575_v36 = vpack.c.bf16 %v8976_v61, %v8976_v61  ;;  %v21255_v19 = vld [vmem:[#allocation36_spill] sm:$0xff]  ;;  %v21256_v61 = vld [vmem:[#allocation38_spill] sm:$0xff] }
 0xd28   : > { %9593 = vmatprep.mubr.bf16.mxu1 %v8984_v50  ;;  %9634 = vmatprep.mubr.bf16.mxu0 %v8984_v50 }
 0xd29   : > { %9594 = vmatmul.mubr.bf16.vlgmr.msra.gmra.mrb[64].mxu1 %v19575_v36  ;;  %9635 = vmatmul.mubr.bf16.vlgmr.msra.gmra.mrb[68].mxu0 %v19575_v36 }
 0xd2a   : > { %9644 = vmatpush1.bf16.msra.mxu1 %v19573_v39  ;;  %9675 = vmatprep.mubr.bf16.mxu1 %v8984_v50  ;;  %v21257_v50 = vld [vmem:[#allocation37_spill] sm:$0xff] }
 0xd2b   : > { %9645 = vmatprep.subr.bf16.mxu1 %v19577_v16  ;;  %10348 = vmatpush1.bf16.msra.mxu0 %v19355_v15  ;;  %v19601_v15 = vld [vmem:[#allocation9 + $0xd4] ss:$24 sps:$4 sm:$0xff]  }
 0xd2c   : > { %10349 = vmatprep.subr.bf16.mxu0 %v19363_v20  ;;  %v19606_v20 = vld [vmem:[#allocation9 + $0xd0] ss:$24 sps:$4 sm:$0xff]  }
 0xd2e   : > { %9646 = vmatpush1.bf16.msra.mxu1 %v19582_v13 }
 0xd2f   : > { %9647 = vmatprep.subr.bf16.mxu1 %v19585_v32  ;;  %10350 = vmatpush1.bf16.msra.mxu0 %v19370_v10  ;;  %v19609_v10 = vld [vmem:[#allocation9 + $0x104] ss:$24 sps:$4 sm:$0xff]  }
 0xd30   : > { %10351 = vmatprep.subr.bf16.mxu0 %v19376_v53  ;;  %v19614_v53 = vld [vmem:[#allocation9 + $0x100] ss:$24 sps:$4 sm:$0xff]  }
 0xd32   : > { %9648 = vmatpush1.bf16.msra.mxu1 %v19590_v11 }
 0xd33   : > { %9649 = vmatprep.subr.bf16.mxu1 %v19593_v1  ;;  %10352 = vmatpush1.bf16.msra.mxu0 %v19382_v14  ;;  %v19617_v14 = vld [vmem:[#allocation9 + $0x134] ss:$24 sps:$4 sm:$0xff]  }
 0xd34   : > { %10353 = vmatprep.subr.bf16.mxu0 %v19388_v4  ;;  %v19622_v4 = vld [vmem:[#allocation9 + $0x130] ss:$24 sps:$4 sm:$0xff]  }
 0xd36   : > { %9650 = vmatpush1.bf16.msra.mxu1 %v19598_v23 }
 0xd37   : > { %9651 = vmatprep.subr.bf16.mxu1 %v19601_v15  ;;  %10354 = vmatpush1.bf16.msra.mxu0 %v19394_v21  ;;  %v19625_v21 = vld [vmem:[#allocation9 + $0x164] ss:$24 sps:$4 sm:$0xff]  }
 0xd38   : > { %10355 = vmatprep.subr.bf16.mxu0 %v19400_v57  ;;  %v19630_v57 = vld [vmem:[#allocation9 + $0x160] ss:$24 sps:$4 sm:$0xff]  }
 0xd3a   : > { %9652 = vmatpush1.bf16.msra.mxu1 %v19606_v20 }
 0xd3b   : > { %9653 = vmatprep.subr.bf16.mxu1 %v19609_v10  ;;  %10356 = vmatpush1.bf16.msra.mxu0 %v19406_v54  ;;  %v19633_v54 = vld [vmem:[#allocation9 + $0x194] ss:$24 sps:$4 sm:$0xff]  }
 0xd3c   : > { %10357 = vmatprep.subr.bf16.mxu0 %v19412_v29  ;;  %v19638_v29 = vld [vmem:[#allocation9 + $0x190] ss:$24 sps:$4 sm:$0xff]  }
 0xd3e   : > { %9654 = vmatpush1.bf16.msra.mxu1 %v19614_v53 }
 0xd3f   : > { %9655 = vmatprep.subr.bf16.mxu1 %v19617_v14  ;;  %10358 = vmatpush1.bf16.msra.mxu0 %v19418_v25  ;;  %v19641_v25 = vld [vmem:[#allocation9 + $0x1c4] ss:$24 sps:$4 sm:$0xff]  }
 0xd40   : > { %10359 = vmatprep.subr.bf16.mxu0 %v19424_v17  ;;  %v19646_v17 = vld [vmem:[#allocation9 + $0x1c0] ss:$24 sps:$4 sm:$0xff]  }
 0xd42   : > { %9656 = vmatpush1.bf16.msra.mxu1 %v19622_v4 }
 0xd43   : > { %9657 = vmatprep.subr.bf16.mxu1 %v19625_v21  ;;  %10360 = vmatpush1.bf16.msra.mxu0 %v19430_v52  ;;  %v19649_v52 = vld [vmem:[#allocation9 + $0x1f4] ss:$24 sps:$4 sm:$0xff]  }
 0xd44   : > { %10361 = vmatprep.subr.bf16.mxu0 %v19436_v42  ;;  %v19654_v42 = vld [vmem:[#allocation9 + $0x1f0] ss:$24 sps:$4 sm:$0xff]  }
 0xd46   : > { %9658 = vmatpush1.bf16.msra.mxu1 %v19630_v57 }
 0xd47   : > { %9659 = vmatprep.subr.bf16.mxu1 %v19633_v54  ;;  %10362 = vmatpush1.bf16.msra.mxu0 %v19442_v59  ;;  %v19657_v59 = vld [vmem:[#allocation9 + $0x224] ss:$24 sps:$4 sm:$0xff]  }
 0xd48   : > { %10363 = vmatprep.subr.bf16.mxu0 %v19451_v2  ;;  %v19662_v2 = vld [vmem:[#allocation9 + $0x220] ss:$24 sps:$4 sm:$0xff]  }
 0xd4a   : > { %9660 = vmatpush1.bf16.msra.mxu1 %v19638_v29 }
 0xd4b   : > { %9661 = vmatprep.subr.bf16.mxu1 %v19641_v25  ;;  %10364 = vmatpush1.bf16.msra.mxu0 %v19453_v12  ;;  %v19665_v12 = vld [vmem:[#allocation9 + $0x254] ss:$24 sps:$4 sm:$0xff]  }
 0xd4c   : > { %10365 = vmatprep.subr.bf16.mxu0 %v19463_v0  ;;  %v19670_v0 = vld [vmem:[#allocation9 + $0x250] ss:$24 sps:$4 sm:$0xff]  }
 0xd4e   : > { %9662 = vmatpush1.bf16.msra.mxu1 %v19646_v17 }
 0xd4f   : > { %9663 = vmatprep.subr.bf16.mxu1 %v19649_v52  ;;  %10366 = vmatpush1.bf16.msra.mxu0 %v19465_v26  ;;  %v19673_v26 = vld [vmem:[#allocation9 + $0x284] ss:$24 sps:$4 sm:$0xff]  }
 0xd50   : > { %10367 = vmatprep.subr.bf16.mxu0 %v19475_v22  ;;  %v19678_v22 = vld [vmem:[#allocation9 + $0x280] ss:$24 sps:$4 sm:$0xff]  }
 0xd52   : > { %9664 = vmatpush1.bf16.msra.mxu1 %v19654_v42 }
 0xd53   : > { %9665 = vmatprep.subr.bf16.mxu1 %v19657_v59  ;;  %10368 = vmatpush1.bf16.msra.mxu0 %v19477_v7  ;;  %v19681_v7 = vld [vmem:[#allocation9 + $0x2b4] ss:$24 sps:$4 sm:$0xff]  }
 0xd54   : > { %10369 = vmatprep.subr.bf16.mxu0 %v19487_v30  ;;  %v19686_v30 = vld [vmem:[#allocation9 + $0x2b0] ss:$24 sps:$4 sm:$0xff]  }
 0xd56   : > { %9666 = vmatpush1.bf16.msra.mxu1 %v19662_v2 }
 0xd57   : > { %9667 = vmatprep.subr.bf16.mxu1 %v19665_v12  ;;  %10370 = vmatpush1.bf16.msra.mxu0 %v19489_v49  ;;  %v19689_v49 = vld [vmem:[#allocation9 + $0x2e4] ss:$24 sps:$4 sm:$0xff]  }
 0xd58   : > { %10371 = vmatprep.subr.bf16.mxu0 %v19500_v27  ;;  %v19694_v27 = vld [vmem:[#allocation9 + $0x2e0] ss:$24 sps:$4 sm:$0xff]  }
 0xd5a   : > { %9668 = vmatpush1.bf16.msra.mxu1 %v19670_v0 }
 0xd5b   : > { %9669 = vmatprep.subr.bf16.mxu1 %v19673_v26  ;;  %10372 = vmatpush1.bf16.msra.mxu0 %v19498_v60  ;;  %v21238_v60 = vld [vmem:[#allocation19_spill] sm:$0xff] }
 0xd5c   : > { %10373 = vmatprep.subr.bf16.mxu0 %v19507_v34  ;;  %v21243_v34 = vld [vmem:[#allocation24_spill] sm:$0xff] }
 0xd5e   : > { %9670 = vmatpush1.bf16.msra.mxu1 %v19678_v22 }
 0xd5f   : > { %9671 = vmatprep.subr.bf16.mxu1 %v19681_v7  ;;  %10374 = vmatpush1.bf16.msra.mxu0 %v19514_v58  ;;  %v21236_v58 = vld [vmem:[#allocation17_spill] sm:$0xff] }
 0xd60   : > { %10375 = vmatprep.subr.bf16.mxu0 %v19520_v37  ;;  %v21235_v37 = vld [vmem:[#allocation16_spill] sm:$0xff] }
 0xd62   : > { %9672 = vmatpush1.bf16.msra.mxu1 %v19686_v30 }
 0xd63   : > { %9673 = vmatprep.subr.bf16.mxu1 %v19689_v49  ;;  %10376 = vmatpush1.bf16.msra.mxu0 %v19526_v31  ;;  %v21237_v31 = vld [vmem:[#allocation18_spill] sm:$0xff] }
 0xd64   : > { %10377 = vmatprep.subr.bf16.mxu0 %v19532_v62  ;;  %v21239_v62 = vld [vmem:[#allocation20_spill] sm:$0xff] }
 0xd66   : > { %9674 = vmatpush1.bf16.msra.mxu1 %v19694_v27 }
 0xd67   : > { %10388 = vmatprep.subr.bf16.mxu1 %v19361_v3  ;;  %10378 = vmatpush1.bf16.msra.mxu0 %v19538_v48  ;;  %v21240_v3 = vld [vmem:[#allocation21_spill] sm:$0xff]  ;;  %v21241_v48 = vld [vmem:[#allocation22_spill] sm:$0xff] }
 0xd68   : > { %10429 = vmatprep.subr.bf16.mxu0 %v19547_v55  ;;  %v21242_v55 = vld [vmem:[#allocation23_spill] sm:$0xff] }
 0xd69   : > { %9676 = vmatmul.mubr.bf16.vlgmr.msra.gmra.mrb[68].mxu1 %v19575_v36  ;;  %v21258_v36 = vld [vmem:[#allocation39_spill] sm:$0xff] }
 0xd6a   : > { %10389 = vmatpush1.bf16.msra.mxu1 %v19359_v5  ;;  %v21244_v5 = vld [vmem:[#allocation25_spill] sm:$0xff] }
 0xd6b   : > { %10390 = vmatprep.subr.bf16.mxu1 %v19366_v8  ;;  %v21245_v8 = vld [vmem:[#allocation26_spill] sm:$0xff] }
 0xd6e   : > { %10391 = vmatpush1.bf16.msra.mxu1 %v21235_v37  ;;  %v21259_v37 = vld [vmem:[#allocation40_spill] sm:$0xff] }
 0xd6f   : > { %10392 = vmatprep.subr.bf16.mxu1 %v21236_v58  ;;  %v21260_v58 = vld [vmem:[#allocation41_spill] sm:$0xff] }
 0xd72   : > { %10393 = vmatpush1.bf16.msra.mxu1 %v21237_v31  ;;  %v21261_v31 = vld [vmem:[#allocation42_spill] sm:$0xff] }
 0xd73   : > { %10394 = vmatprep.subr.bf16.mxu1 %v21238_v60  ;;  %v21262_v60 = vld [vmem:[#allocation43_spill] sm:$0xff] }
 0xd76   : > { %10395 = vmatpush1.bf16.msra.mxu1 %v21239_v62  ;;  %v21263_v62 = vld [vmem:[#allocation44_spill] sm:$0xff] }
 0xd77   : > { %10396 = vmatprep.subr.bf16.mxu1 %v21240_v3 }
 0xd7a   : > { %10397 = vmatpush1.bf16.msra.mxu1 %v21241_v48 }
 0xd7b   : > { %10398 = vmatprep.subr.bf16.mxu1 %v21242_v55  ;;  %v21264_v55 = vld [vmem:[#allocation14_spill] sm:$0xff] }
 0xd7e   : > { %10399 = vmatpush1.bf16.msra.mxu1 %v21243_v34 }
 0xd7f   : > { %10400 = vmatprep.subr.bf16.mxu1 %v21244_v5  ;;  %v21265_v5 = vld [vmem:[#allocation15_spill] sm:$0xff] }
 0xd82   : > { %10401 = vmatpush1.bf16.msra.mxu1 %v21245_v8 }
 0xd83   : > { %10402 = vmatprep.subr.bf16.mxu1 %v21246_v46 }
 0xd86   : > { %10403 = vmatpush1.bf16.msra.mxu1 %v21247_v56 }
 0xd87   : > { %10404 = vmatprep.subr.bf16.mxu1 %v21248_v63 }
 0xd8a   : > { %10405 = vmatpush1.bf16.msra.mxu1 %v21249_v45 }
 0xd8b   : > { %10406 = vmatprep.subr.bf16.mxu1 %v21250_v9 }
 0xd8e   : > { %10407 = vmatpush1.bf16.msra.mxu1 %v21251_v47 }
 0xd8f   : > { %10408 = vmatprep.subr.bf16.mxu1 %v21252_v18 }
 0xd92   : > { %10409 = vmatpush1.bf16.msra.mxu1 %v21253_v35 }
 0xd93   : > { %10410 = vmatprep.subr.bf16.mxu1 %v21254_v38 }
 0xd96   : > { %10411 = vmatpush1.bf16.msra.mxu1 %v21255_v19 }
 0xd97   : > { %10412 = vmatprep.subr.bf16.mxu1 %v21256_v61 }
 0xd9a   : > { %10413 = vmatpush1.bf16.msra.mxu1 %v21257_v50 }
 0xd9b   : > { %10414 = vmatprep.subr.bf16.mxu1 %v21258_v36 }
 0xd9e   : > { %10415 = vmatpush1.bf16.msra.mxu1 %v21259_v37  ;;  %v8970_v37 = vld [vmem:[#allocation3 + $0x32] ss:$8 sm:$0x30] }
 0xd9f   : > { %10416 = vmatprep.subr.bf16.mxu1 %v21260_v58 }
 0xda2   : > { %10417 = vmatpush1.bf16.msra.mxu1 %v21261_v31  ;;  %v8969_v31 = vld [vmem:[#allocation3 + $0x32] ss:$8 sm:$0xf] }
 0xda3   : > { %10418 = vmatprep.subr.bf16.mxu1 %v21262_v60  ;;  %v8971_v60 = vor.u32 %v8970_v37, %v8969_v31 }
 0xda6   : > { %10419 = vmatpush1.bf16.msra.mxu1 %v21263_v62 }
 0xdfc   : > { %v9595_v3 = vpop.f32.mrb[64].mxu1  ;;  %v9636_v48 = vpop.f32.mrb[68].mxu0 }
 0xdfd   : > { %v9596_v34 = vadd.f32 %v9595_v3, %v21264_v55  ;;  %v9637_v8 = vadd.f32 %v9636_v48, %v21265_v5  ;;  %v9597_v46 = vpop.f32.mrb[65].mxu1  ;;  %v9638_v56 = vpop.f32.mrb[69].mxu0 }
 0xdfe   : > { %v9598_v63 = vadd.f32 %v9597_v46, %v17579_v28  ;;  %v9639_v45 = vadd.f32 %v9638_v56, %v17587_v43  ;;  %v9599_v9 = vpop.f32.mrb[66].mxu1  ;;  %v9640_v47 = vpop.f32.mrb[70].mxu0 }
 0xdff   : > { %v9600_v18 = vpop.f32.mrb[67].mxu1  ;;  %v9641_v35 = vpop.f32.mrb[71].mxu0 }
 0xe00   : > { %v9688_v38 = vcombine.low %v9596_v34, %v9598_v63  ;;  %v9689_v19 = vcombine.low %v9637_v8, %v9639_v45 }
 0xe02   : > { %v9696_v61 = vrot.slane %v9688_v38, %v17594_v51  ;;  %v9703_v50 = vrot.slane %v9689_v19, %v17594_v51 }
 0xe04   : > { %v9704_v36 = vcombine.low %v9696_v61, %v9703_v50  ;;  %v9740_v61 = vrot.slane %v8971_v60, 4 }
 0xe06   : > { %v9711_v58 = vrot.slane %v9704_v36, %v17594_v51 }
 0xe08   : > { %v9713_v62 = vadd.f32 %v9711_v58, %v8971_v60 }
 0xe0a   : > { %v14980_v3 = vmul.f32 -1.442695, %v9713_v62 }
 0xe0c   : > { %16915 = vpow2.f32 %v14980_v3 }
 0xe16   : > { %v16916_v48 = vpop.eup %16915 }
 0xe17   : > { %v9717_v46 = vadd.f32 1.0, %v16916_v48 }
 0xe19   : > { %16917 = vrcp.f32 %v9717_v46 }
 0xe23   : > { %v16918_v38 = vpop.eup %16917 }
 0xe24   : > { %v9745_v36 = vrot.slane %v16918_v38, 2 }
 0xe26   : > { %v9747_v37 = vsub.f32 1.0, %v9745_v36  ;;  %v9749_v62 = vmul.f32 %v9745_v36, %v19563_v24  ;;  %v19788_v24 = vld [vmem:[#allocation9] ss:$24 sps:$4 sm:$0xff]   ;;  %v19920_v36 = vld [vmem:[#allocation9 + $0x214] ss:$24 sps:$4 sm:$0xff]  }
 0xe3c   : > { %v9677_v56 = vpop.f32.mrb[68].mxu1 }
 0xe3d   : > { %v9678_v34 = vadd.f32 %v9677_v56, %v17585_v41  ;;  %v9679_v8 = vpop.f32.mrb[69].mxu1 }
 0xe3e   : > { %v9680_v63 = vadd.f32 %v9679_v8, %v17589_v44  ;;  %v9681_v45 = vpop.f32.mrb[70].mxu1  ;;  %v19886_v8 = vld [vmem:[#allocation9 + $0x180] ss:$24 sps:$4 sm:$0xff]  }
 0xe3f   : > { %v9682_v9 = vpop.f32.mrb[71].mxu1  ;;  %v19891_v45 = vld [vmem:[#allocation9 + $0x188] ss:$24 sps:$4 sm:$0xff]  }
 0xe40   : > { %v9722_v47 = vcombine.low %v9678_v34, %v9680_v63  ;;  %v19884_v34 = vld [vmem:[#allocation9 + $0x184] ss:$24 sps:$4 sm:$0xff]   ;;  %21280 = vst [vmem:[#allocation30_spill] sm:$0xff] %v19891_v45  ;;  %v19896_v9 = vld [vmem:[#allocation9 + $0x1b4] ss:$24 sps:$4 sm:$0xff]  }
 0xe41   : > { %v19888_v63 = vld [vmem:[#allocation9 + $0x18c] ss:$24 sps:$4 sm:$0xff]  }
 0xe42   : > { %v9729_v18 = vrot.slane %v9722_v47, %v17594_v51  ;;  %21279 = vst [vmem:[#allocation29_spill] sm:$0xff] %v19888_v63  ;;  %v19898_v47 = vld [vmem:[#allocation9 + $0x1b0] ss:$24 sps:$4 sm:$0xff]  }
 0xe44   : > { %v9736_v35 = vrot.slane %v9729_v18, %v17594_v51  ;;  %v19900_v18 = vld [vmem:[#allocation9 + $0x1bc] ss:$24 sps:$4 sm:$0xff]  }
 0xe45   : > { %21281 = vst [vmem:[#allocation31_spill] sm:$0xff] %v19900_v18 }
 0xe46   : > { %v9738_v19 = vmul.f32 %v16918_v38, %v9736_v35  ;;  %v19903_v35 = vld [vmem:[#allocation9 + $0x1b8] ss:$24 sps:$4 sm:$0xff]   ;;  %v19908_v38 = vld [vmem:[#allocation9 + $0x1e4] ss:$24 sps:$4 sm:$0xff]  }
 0xe47   : > { %21282 = vst [vmem:[#allocation32_spill] sm:$0xff] %v19903_v35 }
 0xe48   : > { %v9742_v50 = vadd.f32 %v9740_v61, %v9738_v19  ;;  %v19910_v19 = vld [vmem:[#allocation9 + $0x1e0] ss:$24 sps:$4 sm:$0xff]   ;;  %v19912_v61 = vld [vmem:[#allocation9 + $0x1ec] ss:$24 sps:$4 sm:$0xff]  }
 0xe49   : > { %21283 = vst [vmem:[#allocation33_spill] sm:$0xff] %v19912_v61 }
 0xe4a   : > { %16919 = vtanh.f32 %v9742_v50  ;;  %v19915_v50 = vld [vmem:[#allocation9 + $0x1e8] ss:$24 sps:$4 sm:$0xff]  }
 0xe4b   : > { %21284 = vst [vmem:[#allocation34_spill] sm:$0xff] %v19915_v50 }
 0xe54   : > { %v16920_v58 = vpop.eup %16919 }
 0xe55   : > { %v9748_v31 = vmul.f32 %v16920_v58, %v9747_v37  ;;  %v19922_v37 = vld [vmem:[#allocation9 + $0x210] ss:$24 sps:$4 sm:$0xff]   ;;  %v19924_v58 = vld [vmem:[#allocation9 + $0x21c] ss:$24 sps:$4 sm:$0xff]  }
 0xe56   : > { %21285 = vst [vmem:[#allocation35_spill] sm:$0xff] %v19924_v58 }
 0xe57   : > { %v19747_v3 = vadd.f32 %v9749_v62, %v9748_v31  ;;  %v19927_v31 = vld [vmem:[#allocation9 + $0x218] ss:$24 sps:$4 sm:$0xff]  }
 0xe58   : > { %21286 = vst [vmem:[#allocation36_spill] sm:$0xff] %v19927_v31  ;;  %v19931_v62 = vld [vmem:[#allocation9 + $0x240] ss:$24 sps:$4 sm:$0xff]  }
 0xe59   : > { %14981 = vst.msk [vmem:[%s17400_s14 + $0x12] ss:$8 sm:$0x3] %vm17604_vm1, %v19747_v3  ;;  %v9766_v48 = vrot.slane %v19747_v3, %v17417_v40  ;;  %v9762_v60 = vrot.slane %v19747_v3, %v17424_v6 }
 0xe5b   : > { %v9770_v46 = vpack.c.bf16 %v9766_v48, %v9766_v48  ;;  %v9769_v56 = vpack.c.bf16 %v9762_v60, %v9762_v60  ;;  %v19933_v48 = vld [vmem:[#allocation9 + $0x244] ss:$24 sps:$4 sm:$0xff]   ;;  %v19936_v60 = vld [vmem:[#allocation9 + $0x248] ss:$24 sps:$4 sm:$0xff]  }
 0xe5c   : > { %21287 = vst [vmem:[#allocation38_spill] sm:$0xff] %v19936_v60 }
 0xe5d   : > { %10379 = vmatprep.mubr.bf16.mxu0 %v9770_v46  ;;  %10420 = vmatprep.mubr.bf16.mxu1 %v9770_v46 }
 0xe5e   : > { %10380 = vmatmul.mubr.bf16.vlgmr.msra.gmra.mrb[72].mxu0 %v9769_v56  ;;  %10421 = vmatmul.mubr.bf16.vlgmr.msra.gmra.mrb[72].mxu1 %v9769_v56 }
 0xe5f   : > { %10430 = vmatpush1.bf16.msra.mxu0 %v19573_v39  ;;  %10461 = vmatprep.mubr.bf16.mxu0 %v9770_v46  ;;  %v19790_v39 = vld [vmem:[#allocation9 + $0x4] ss:$24 sps:$4 sm:$0xff]  }
 0xe60   : > { %10431 = vmatprep.subr.bf16.mxu0 %v19577_v16  ;;  %v19792_v16 = vld [vmem:[#allocation9 + $0x8] ss:$24 sps:$4 sm:$0xff]   ;;  %11133 = vmatprep.subr.bf16.mxu1 %v19790_v39  ;;  %v19938_v46 = vld [vmem:[#allocation9 + $0x24c] ss:$24 sps:$4 sm:$0xff]  }
 0xe61   : > { %11134 = vmatpush1.bf16.msra.mxu1 %v19788_v24  ;;  %21288 = vst [vmem:[#allocation37_spill] sm:$0xff] %v19938_v46 }
 0xe63   : > { %10432 = vmatpush1.bf16.msra.mxu0 %v19582_v13  ;;  %v19794_v13 = vld [vmem:[#allocation9 + $0xc] ss:$24 sps:$4 sm:$0xff]  }
 0xe64   : > { %10433 = vmatprep.subr.bf16.mxu0 %v19585_v32  ;;  %v19796_v32 = vld [vmem:[#allocation9 + $0x34] ss:$24 sps:$4 sm:$0xff]  }
 0xe65   : > { %11135 = vmatprep.subr.bf16.mxu1 %v19796_v32 }
 0xe67   : > { %10434 = vmatpush1.bf16.msra.mxu0 %v19590_v11  ;;  %v19799_v11 = vld [vmem:[#allocation9 + $0x3c] ss:$24 sps:$4 sm:$0xff]  }
 0xe68   : > { %10435 = vmatprep.subr.bf16.mxu0 %v19593_v1  ;;  %v19803_v1 = vld [vmem:[#allocation9 + $0x30] ss:$24 sps:$4 sm:$0xff]  }
 0xe69   : > { %11136 = vmatpush1.bf16.msra.mxu1 %v19803_v1 }
 0xe6b   : > { %10436 = vmatpush1.bf16.msra.mxu0 %v19598_v23  ;;  %v19807_v23 = vld [vmem:[#allocation9 + $0x38] ss:$24 sps:$4 sm:$0xff]  }
 0xe6c   : > { %10437 = vmatprep.subr.bf16.mxu0 %v19601_v15  ;;  %21266 = vst [vmem:[#allocation16_spill] sm:$0xff] %v19807_v23  ;;  %v19809_v15 = vld [vmem:[#allocation9 + $0x64] ss:$24 sps:$4 sm:$0xff]  }
 0xe6d   : > { %11137 = vmatprep.subr.bf16.mxu1 %v19809_v15 }
 0xe6f   : > { %10438 = vmatpush1.bf16.msra.mxu0 %v19606_v20  ;;  %v19812_v20 = vld [vmem:[#allocation9 + $0x6c] ss:$24 sps:$4 sm:$0xff]  }
 0xe70   : > { %10439 = vmatprep.subr.bf16.mxu0 %v19609_v10  ;;  %21267 = vst [vmem:[#allocation17_spill] sm:$0xff] %v19812_v20  ;;  %v19815_v10 = vld [vmem:[#allocation9 + $0x60] ss:$24 sps:$4 sm:$0xff]  }
 0xe71   : > { %11138 = vmatpush1.bf16.msra.mxu1 %v19815_v10 }
 0xe73   : > { %10440 = vmatpush1.bf16.msra.mxu0 %v19614_v53  ;;  %v19819_v53 = vld [vmem:[#allocation9 + $0x68] ss:$24 sps:$4 sm:$0xff]  }
 0xe74   : > { %10441 = vmatprep.subr.bf16.mxu0 %v19617_v14  ;;  %21268 = vst [vmem:[#allocation18_spill] sm:$0xff] %v19819_v53  ;;  %v19821_v14 = vld [vmem:[#allocation9 + $0x94] ss:$24 sps:$4 sm:$0xff]  }
 0xe75   : > { %11139 = vmatprep.subr.bf16.mxu1 %v19821_v14 }
 0xe77   : > { %10442 = vmatpush1.bf16.msra.mxu0 %v19622_v4  ;;  %v19824_v4 = vld [vmem:[#allocation9 + $0x9c] ss:$24 sps:$4 sm:$0xff]  }
 0xe78   : > { %10443 = vmatprep.subr.bf16.mxu0 %v19625_v21  ;;  %21269 = vst [vmem:[#allocation19_spill] sm:$0xff] %v19824_v4  ;;  %v19827_v21 = vld [vmem:[#allocation9 + $0x90] ss:$24 sps:$4 sm:$0xff]  }
 0xe79   : > { %11140 = vmatpush1.bf16.msra.mxu1 %v19827_v21 }
 0xe7b   : > { %10444 = vmatpush1.bf16.msra.mxu0 %v19630_v57  ;;  %v19831_v57 = vld [vmem:[#allocation9 + $0x98] ss:$24 sps:$4 sm:$0xff]  }
 0xe7c   : > { %10445 = vmatprep.subr.bf16.mxu0 %v19633_v54  ;;  %21270 = vst [vmem:[#allocation20_spill] sm:$0xff] %v19831_v57  ;;  %v19833_v54 = vld [vmem:[#allocation9 + $0xc4] ss:$24 sps:$4 sm:$0xff]  }
 0xe7d   : > { %11141 = vmatprep.subr.bf16.mxu1 %v19833_v54 }
 0xe7f   : > { %10446 = vmatpush1.bf16.msra.mxu0 %v19638_v29  ;;  %v19836_v29 = vld [vmem:[#allocation9 + $0xcc] ss:$24 sps:$4 sm:$0xff]  }
 0xe80   : > { %10447 = vmatprep.subr.bf16.mxu0 %v19641_v25  ;;  %21271 = vst [vmem:[#allocation21_spill] sm:$0xff] %v19836_v29  ;;  %v19839_v25 = vld [vmem:[#allocation9 + $0xc0] ss:$24 sps:$4 sm:$0xff]  }
 0xe81   : > { %11142 = vmatpush1.bf16.msra.mxu1 %v19839_v25 }
 0xe83   : > { %10448 = vmatpush1.bf16.msra.mxu0 %v19646_v17  ;;  %v19843_v17 = vld [vmem:[#allocation9 + $0xc8] ss:$24 sps:$4 sm:$0xff]  }
 0xe84   : > { %10449 = vmatprep.subr.bf16.mxu0 %v19649_v52  ;;  %21272 = vst [vmem:[#allocation22_spill] sm:$0xff] %v19843_v17  ;;  %v19845_v52 = vld [vmem:[#allocation9 + $0xf4] ss:$24 sps:$4 sm:$0xff]  }
 0xe85   : > { %11143 = vmatprep.subr.bf16.mxu1 %v19845_v52 }
 0xe87   : > { %10450 = vmatpush1.bf16.msra.mxu0 %v19654_v42  ;;  %v19848_v42 = vld [vmem:[#allocation9 + $0xfc] ss:$24 sps:$4 sm:$0xff]  }
 0xe88   : > { %10451 = vmatprep.subr.bf16.mxu0 %v19657_v59  ;;  %21273 = vst [vmem:[#allocation23_spill] sm:$0xff] %v19848_v42  ;;  %v19851_v59 = vld [vmem:[#allocation9 + $0xf0] ss:$24 sps:$4 sm:$0xff]  }
 0xe89   : > { %11144 = vmatpush1.bf16.msra.mxu1 %v19851_v59 }
 0xe8b   : > { %10452 = vmatpush1.bf16.msra.mxu0 %v19662_v2  ;;  %v19855_v2 = vld [vmem:[#allocation9 + $0xf8] ss:$24 sps:$4 sm:$0xff]  }
 0xe8c   : > { %10453 = vmatprep.subr.bf16.mxu0 %v19665_v12  ;;  %21274 = vst [vmem:[#allocation24_spill] sm:$0xff] %v19855_v2  ;;  %v19857_v12 = vld [vmem:[#allocation9 + $0x124] ss:$24 sps:$4 sm:$0xff]  }
 0xe8d   : > { %11145 = vmatprep.subr.bf16.mxu1 %v19857_v12 }
 0xe8f   : > { %10454 = vmatpush1.bf16.msra.mxu0 %v19670_v0  ;;  %v19860_v0 = vld [vmem:[#allocation9 + $0x12c] ss:$24 sps:$4 sm:$0xff]  }
 0xe90   : > { %10455 = vmatprep.subr.bf16.mxu0 %v19673_v26  ;;  %21275 = vst [vmem:[#allocation25_spill] sm:$0xff] %v19860_v0  ;;  %v19863_v26 = vld [vmem:[#allocation9 + $0x120] ss:$24 sps:$4 sm:$0xff]  }
 0xe91   : > { %11146 = vmatpush1.bf16.msra.mxu1 %v19863_v26 }
 0xe93   : > { %10456 = vmatpush1.bf16.msra.mxu0 %v19678_v22  ;;  %v19867_v22 = vld [vmem:[#allocation9 + $0x128] ss:$24 sps:$4 sm:$0xff]  }
 0xe94   : > { %10457 = vmatprep.subr.bf16.mxu0 %v19681_v7  ;;  %21276 = vst [vmem:[#allocation26_spill] sm:$0xff] %v19867_v22  ;;  %v19869_v7 = vld [vmem:[#allocation9 + $0x154] ss:$24 sps:$4 sm:$0xff]  }
 0xe95   : > { %11147 = vmatprep.subr.bf16.mxu1 %v19869_v7 }
 0xe97   : > { %10458 = vmatpush1.bf16.msra.mxu0 %v19686_v30  ;;  %v19872_v30 = vld [vmem:[#allocation9 + $0x15c] ss:$24 sps:$4 sm:$0xff]  }
 0xe98   : > { %10459 = vmatprep.subr.bf16.mxu0 %v19689_v49  ;;  %21277 = vst [vmem:[#allocation27_spill] sm:$0xff] %v19872_v30  ;;  %v19875_v49 = vld [vmem:[#allocation9 + $0x150] ss:$24 sps:$4 sm:$0xff]  }
 0xe99   : > { %11148 = vmatpush1.bf16.msra.mxu1 %v19875_v49 }
 0xe9a   : > { %11149 = vmatprep.subr.bf16.mxu1 %v19884_v34 }
 0xe9b   : > { %10460 = vmatpush1.bf16.msra.mxu0 %v19694_v27  ;;  %v19879_v27 = vld [vmem:[#allocation9 + $0x158] ss:$24 sps:$4 sm:$0xff]  }
 0xe9c   : > { %11174 = vmatprep.subr.bf16.mxu0 %v19794_v13  ;;  %21278 = vst [vmem:[#allocation28_spill] sm:$0xff] %v19879_v27 }
 0xe9d   : > { %11150 = vmatpush1.bf16.msra.mxu1 %v19886_v8 }
 0xe9e   : > { %10462 = vmatmul.mubr.bf16.vlgmr.msra.gmra.mrb[76].mxu0 %v9769_v56  ;;  %11151 = vmatprep.subr.bf16.mxu1 %v19896_v9  ;;  %v19940_v56 = vld [vmem:[#allocation9 + $0x274] ss:$24 sps:$4 sm:$0xff]  }
 0xe9f   : > { %11175 = vmatpush1.bf16.msra.mxu0 %v19792_v16 }
 0xea0   : > { %11176 = vmatprep.subr.bf16.mxu0 %v19799_v11 }
 0xea1   : > { %11152 = vmatpush1.bf16.msra.mxu1 %v19898_v47 }
 0xea2   : > { %11153 = vmatprep.subr.bf16.mxu1 %v19908_v38 }
 0xea3   : > { %11177 = vmatpush1.bf16.msra.mxu0 %v19807_v23 }
 0xea4   : > { %11178 = vmatprep.subr.bf16.mxu0 %v19812_v20 }
 0xea5   : > { %11154 = vmatpush1.bf16.msra.mxu1 %v19910_v19 }
 0xea6   : > { %11155 = vmatprep.subr.bf16.mxu1 %v19920_v36 }
 0xea7   : > { %11179 = vmatpush1.bf16.msra.mxu0 %v19819_v53 }
 0xea8   : > { %11180 = vmatprep.subr.bf16.mxu0 %v19824_v4 }
 0xea9   : > { %11156 = vmatpush1.bf16.msra.mxu1 %v19922_v37 }
 0xeaa   : > { %11157 = vmatprep.subr.bf16.mxu1 %v19933_v48 }
 0xeab   : > { %11181 = vmatpush1.bf16.msra.mxu0 %v19831_v57 }
 0xeac   : > { %11182 = vmatprep.subr.bf16.mxu0 %v19836_v29 }
 0xead   : > { %11158 = vmatpush1.bf16.msra.mxu1 %v19931_v62 }
 0xeae   : > { %11159 = vmatprep.subr.bf16.mxu1 %v19940_v56 }
 0xeaf   : > { %11183 = vmatpush1.bf16.msra.mxu0 %v19843_v17 }
 0xeb0   : > { %11184 = vmatprep.subr.bf16.mxu0 %v19848_v42 }
 0xeb3   : > { %11185 = vmatpush1.bf16.msra.mxu0 %v19855_v2 }
 0xeb4   : > { %11186 = vmatprep.subr.bf16.mxu0 %v19860_v0 }
 0xeb7   : > { %11187 = vmatpush1.bf16.msra.mxu0 %v19867_v22 }
 0xeb8   : > { %11188 = vmatprep.subr.bf16.mxu0 %v19872_v30 }
 0xebb   : > { %11189 = vmatpush1.bf16.msra.mxu0 %v19879_v27 }
 0xebc   : > { %11190 = vmatprep.subr.bf16.mxu0 %v19888_v63  ;;  %v19975_v63 = vld [vmem:[#allocation9 + $0x2d8] ss:$24 sps:$4 sm:$0xff]  }
 0xebd   : > { %21294 = vst [vmem:[#allocation44_spill] sm:$0xff] %v19975_v63 }
 0xebf   : > { %11191 = vmatpush1.bf16.msra.mxu0 %v19891_v45  ;;  %v19968_v45 = vld [vmem:[#allocation9 + $0x2dc] ss:$24 sps:$4 sm:$0xff]  }
 0xec0   : > { %11192 = vmatprep.subr.bf16.mxu0 %v19900_v18  ;;  %v19959_v18 = vld [vmem:[#allocation9 + $0x2a0] ss:$24 sps:$4 sm:$0xff]   ;;  %21293 = vst [vmem:[#allocation43_spill] sm:$0xff] %v19968_v45 }
 0xec3   : > { %11193 = vmatpush1.bf16.msra.mxu0 %v19903_v35  ;;  %v19956_v35 = vld [vmem:[#allocation9 + $0x2ac] ss:$24 sps:$4 sm:$0xff]  }
 0xec4   : > { %11194 = vmatprep.subr.bf16.mxu0 %v19912_v61  ;;  %v19953_v61 = vld [vmem:[#allocation9 + $0x2a4] ss:$24 sps:$4 sm:$0xff]   ;;  %21291 = vst [vmem:[#allocation41_spill] sm:$0xff] %v19956_v35 }
 0xec7   : > { %11195 = vmatpush1.bf16.msra.mxu0 %v19915_v50  ;;  %v19943_v50 = vld [vmem:[#allocation9 + $0x27c] ss:$24 sps:$4 sm:$0xff]  }
 0xec8   : > { %11196 = vmatprep.subr.bf16.mxu0 %v19924_v58  ;;  %21289 = vst [vmem:[#allocation39_spill] sm:$0xff] %v19943_v50  ;;  %v19947_v58 = vld [vmem:[#allocation9 + $0x270] ss:$24 sps:$4 sm:$0xff]  }
 0xec9   : > { %11160 = vmatpush1.bf16.msra.mxu1 %v19947_v58 }
 0xeca   : > { %11161 = vmatprep.subr.bf16.mxu1 %v19953_v61 }
 0xecb   : > { %11197 = vmatpush1.bf16.msra.mxu0 %v19927_v31  ;;  %v19951_v31 = vld [vmem:[#allocation9 + $0x278] ss:$24 sps:$4 sm:$0xff]  }
 0xecc   : > { %11198 = vmatprep.subr.bf16.mxu0 %v19938_v46  ;;  %21290 = vst [vmem:[#allocation40_spill] sm:$0xff] %v19951_v31  ;;  %v19963_v46 = vld [vmem:[#allocation9 + $0x2a8] ss:$24 sps:$4 sm:$0xff]  }
 0xecd   : > { %21292 = vst [vmem:[#allocation42_spill] sm:$0xff] %v19963_v46  ;;  %11162 = vmatpush1.bf16.msra.mxu1 %v19959_v18 }
 0xecf   : > { %11199 = vmatpush1.bf16.msra.mxu0 %v19936_v60  ;;  %v19965_v60 = vld [vmem:[#allocation9 + $0x2d4] ss:$24 sps:$4 sm:$0xff]  }
 0xed0   : > { %11200 = vmatprep.subr.bf16.mxu0 %v19943_v50  ;;  %v19971_v50 = vld [vmem:[#allocation9 + $0x2d0] ss:$24 sps:$4 sm:$0xff]   ;;  %11163 = vmatprep.subr.bf16.mxu1 %v19965_v60 }
 0xed1   : > { %11164 = vmatpush1.bf16.msra.mxu1 %v19971_v50 }
 0xed3   : > { %11201 = vmatpush1.bf16.msra.mxu0 %v19951_v31  ;;  %v19980_v31 = vld [vmem:[#allocation9 + $0x14] ss:$24 sps:$4 sm:$0xff]  }
 0xed4   : > { %11202 = vmatprep.subr.bf16.mxu0 %v19956_v35  ;;  %11215 = vmatprep.subr.bf16.mxu1 %v19980_v31 }
 0xed7   : > { %11203 = vmatpush1.bf16.msra.mxu0 %v19963_v46 }
 0xed8   : > { %11204 = vmatprep.subr.bf16.mxu0 %v19968_v45 }
 0xedb   : > { %11205 = vmatpush1.bf16.msra.mxu0 %v19975_v63 }
 0xedc   : > { %11919 = vmatprep.subr.bf16.mxu0 %v19790_v39 }
 0xf31   : > { %v10381_v35 = vpop.f32.mrb[72].mxu0  ;;  %v10422_v27 = vpop.f32.mrb[72].mxu1 }
 0xf32   : > { %v10382_v46 = vadd.f32 %v10381_v35, %v21264_v55  ;;  %v10423_v30 = vadd.f32 %v10422_v27, %v21265_v5  ;;  %v10383_v22 = vpop.f32.mrb[73].mxu0  ;;  %v10424_v0 = vpop.f32.mrb[73].mxu1  ;;  %v9756_v35 = vld [vmem:[#allocation3 + $0x33] ss:$8 sm:$0x30] }
 0xf33   : > { %v10384_v45 = vadd.f32 %v10383_v22, %v17579_v28  ;;  %v10425_v2 = vadd.f32 %v10424_v0, %v17587_v43  ;;  %v10385_v42 = vpop.f32.mrb[74].mxu0  ;;  %v10426_v63 = vpop.f32.mrb[74].mxu1  ;;  %v9755_v5 = vld [vmem:[#allocation3 + $0x33] ss:$8 sm:$0xf] }
 0xf34   : > { %v10386_v17 = vpop.f32.mrb[75].mxu0  ;;  %v10427_v29 = vpop.f32.mrb[75].mxu1  ;;  %v9757_v55 = vor.u32 %v9756_v35, %v9755_v5 }
 0xf35   : > { %v10474_v57 = vcombine.low %v10382_v46, %v10384_v45  ;;  %v10475_v39 = vcombine.low %v10423_v30, %v10425_v2 }
 0xf36   : > { %v10526_v45 = vrot.slane %v9757_v55, 4 }
 0xf37   : > { %v10482_v4 = vrot.slane %v10474_v57, %v17594_v51  ;;  %v10489_v53 = vrot.slane %v10475_v39, %v17594_v51 }
 0xf39   : > { %v10490_v20 = vcombine.low %v10482_v4, %v10489_v53 }
 0xf3b   : > { %v10497_v27 = vrot.slane %v10490_v20, %v17594_v51 }
 0xf3d   : > { %v10499_v23 = vadd.f32 %v10497_v27, %v9757_v55 }
 0xf3f   : > { %v15078_v22 = vmul.f32 -1.442695, %v10499_v23 }
 0xf41   : > { %16921 = vpow2.f32 %v15078_v22 }
 0xf4b   : > { %v16922_v0 = vpop.eup %16921 }
 0xf4c   : > { %v10503_v42 = vadd.f32 1.0, %v16922_v0 }
 0xf4e   : > { %16923 = vrcp.f32 %v10503_v42 }
 0xf58   : > { %v16924_v63 = vpop.eup %16923 }
 0xf59   : > { %v10531_v39 = vrot.slane %v16924_v63, 2 }
 0xf5b   : > { %v10533_v35 = vsub.f32 1.0, %v10531_v39  ;;  %v10535_v0 = vmul.f32 %v10531_v39, %v19747_v3  ;;  %v20015_v3 = vld [vmem:[#allocation9 + $0x40] ss:$24 sps:$4 sm:$0xff]   ;;  %v21310_v39 = vld [vmem:[#allocation31_spill] sm:$0xff] }
 0xf71   : > { %v10463_v17 = vpop.f32.mrb[76].mxu0 }
 0xf72   : > { %v10464_v29 = vadd.f32 %v10463_v17, %v17585_v41  ;;  %v10465_v2 = vpop.f32.mrb[77].mxu0 }
 0xf73   : > { %v10466_v57 = vadd.f32 %v10465_v2, %v17589_v44  ;;  %v10467_v30 = vpop.f32.mrb[78].mxu0  ;;  %v20006_v2 = vld [vmem:[#allocation9 + $0x10] ss:$24 sps:$4 sm:$0xff]  }
 0xf74   : > { %v10468_v53 = vpop.f32.mrb[79].mxu0  ;;  %v20010_v30 = vld [vmem:[#allocation9 + $0x44] ss:$24 sps:$4 sm:$0xff]  }
 0xf75   : > { %v10508_v4 = vcombine.low %v10464_v29, %v10466_v57  ;;  %v20018_v53 = vld [vmem:[#allocation9 + $0x74] ss:$24 sps:$4 sm:$0xff]  }
 0xf77   : > { %v10515_v20 = vrot.slane %v10508_v4, %v17594_v51  ;;  %v20023_v4 = vld [vmem:[#allocation9 + $0x70] ss:$24 sps:$4 sm:$0xff]  }
 0xf79   : > { %v10522_v5 = vrot.slane %v10515_v20, %v17594_v51  ;;  %v20026_v20 = vld [vmem:[#allocation9 + $0xa4] ss:$24 sps:$4 sm:$0xff]  }
 0xf7b   : > { %v10524_v23 = vmul.f32 %v16924_v63, %v10522_v5  ;;  %v20031_v5 = vld [vmem:[#allocation9 + $0xa0] ss:$24 sps:$4 sm:$0xff]   ;;  %v21306_v63 = vld [vmem:[#allocation27_spill] sm:$0xff] }
 0xf7d   : > { %v10528_v46 = vadd.f32 %v10526_v45, %v10524_v23  ;;  %v21307_v23 = vld [vmem:[#allocation28_spill] sm:$0xff]  ;;  %v21308_v45 = vld [vmem:[#allocation29_spill] sm:$0xff] }
 0xf7f   : > { %16925 = vtanh.f32 %v10528_v46  ;;  %v21309_v46 = vld [vmem:[#allocation30_spill] sm:$0xff] }
 0xf89   : > { %v16926_v27 = vpop.eup %16925 }
 0xf8a   : > { %v10534_v22 = vmul.f32 %v16926_v27, %v10533_v35  ;;  %v21311_v35 = vld [vmem:[#allocation32_spill] sm:$0xff]  ;;  %v21312_v27 = vld [vmem:[#allocation33_spill] sm:$0xff] }
 0xf8c   : > { %v19996_v42 = vadd.f32 %v10535_v0, %v10534_v22  ;;  %v21313_v22 = vld [vmem:[#allocation34_spill] sm:$0xff]  ;;  %v21314_v0 = vld [vmem:[#allocation35_spill] sm:$0xff] }
 0xf8e   : > { %15079 = vst.msk [vmem:[%s17400_s14 + $0x13] ss:$8 sm:$0x3] %vm17604_vm1, %v19996_v42  ;;  %v10552_v17 = vrot.slane %v19996_v42, %v17417_v40  ;;  %v10548_v55 = vrot.slane %v19996_v42, %v17424_v6 }
 0xf90   : > { %v10556_v29 = vpack.c.bf16 %v10552_v17, %v10552_v17  ;;  %v20008_v57 = vpack.c.bf16 %v10548_v55, %v10548_v55  ;;  %v21315_v17 = vld [vmem:[#allocation36_spill] sm:$0xff]  ;;  %v21316_v55 = vld [vmem:[#allocation37_spill] sm:$0xff] }
 0xf92   : > { %11165 = vmatprep.mubr.bf16.mxu1 %v10556_v29  ;;  %11206 = vmatprep.mubr.bf16.mxu0 %v10556_v29 }
 0xf93   : > { %11166 = vmatmul.mubr.bf16.vlgmr.msra.gmra.mrb[76].mxu1 %v20008_v57  ;;  %11207 = vmatmul.mubr.bf16.vlgmr.msra.gmra.mrb[80].mxu0 %v20008_v57 }
 0xf94   : > { %11216 = vmatpush1.bf16.msra.mxu1 %v20006_v2  ;;  %11247 = vmatprep.mubr.bf16.mxu1 %v10556_v29  ;;  %v21317_v29 = vld [vmem:[#allocation38_spill] sm:$0xff] }
 0xf95   : > { %11217 = vmatprep.subr.bf16.mxu1 %v20010_v30  ;;  %11920 = vmatpush1.bf16.msra.mxu0 %v19788_v24  ;;  %v20034_v24 = vld [vmem:[#allocation9 + $0xd4] ss:$24 sps:$4 sm:$0xff]  }
 0xf96   : > { %11921 = vmatprep.subr.bf16.mxu0 %v19796_v32  ;;  %v20039_v32 = vld [vmem:[#allocation9 + $0xd0] ss:$24 sps:$4 sm:$0xff]  }
 0xf98   : > { %11218 = vmatpush1.bf16.msra.mxu1 %v20015_v3 }
 0xf99   : > { %11219 = vmatprep.subr.bf16.mxu1 %v20018_v53  ;;  %11922 = vmatpush1.bf16.msra.mxu0 %v19803_v1  ;;  %v20042_v1 = vld [vmem:[#allocation9 + $0x104] ss:$24 sps:$4 sm:$0xff]  }
 0xf9a   : > { %11923 = vmatprep.subr.bf16.mxu0 %v19809_v15  ;;  %v20047_v15 = vld [vmem:[#allocation9 + $0x100] ss:$24 sps:$4 sm:$0xff]  }
 0xf9c   : > { %11220 = vmatpush1.bf16.msra.mxu1 %v20023_v4 }
 0xf9d   : > { %11221 = vmatprep.subr.bf16.mxu1 %v20026_v20  ;;  %11924 = vmatpush1.bf16.msra.mxu0 %v19815_v10  ;;  %v20050_v10 = vld [vmem:[#allocation9 + $0x134] ss:$24 sps:$4 sm:$0xff]  }
 0xf9e   : > { %11925 = vmatprep.subr.bf16.mxu0 %v19821_v14  ;;  %v20055_v14 = vld [vmem:[#allocation9 + $0x130] ss:$24 sps:$4 sm:$0xff]  }
 0xfa0   : > { %11222 = vmatpush1.bf16.msra.mxu1 %v20031_v5 }
 0xfa1   : > { %11223 = vmatprep.subr.bf16.mxu1 %v20034_v24  ;;  %11926 = vmatpush1.bf16.msra.mxu0 %v19827_v21  ;;  %v20058_v21 = vld [vmem:[#allocation9 + $0x164] ss:$24 sps:$4 sm:$0xff]  }
 0xfa2   : > { %11927 = vmatprep.subr.bf16.mxu0 %v19833_v54  ;;  %v20063_v54 = vld [vmem:[#allocation9 + $0x160] ss:$24 sps:$4 sm:$0xff]  }
 0xfa4   : > { %11224 = vmatpush1.bf16.msra.mxu1 %v20039_v32 }
 0xfa5   : > { %11225 = vmatprep.subr.bf16.mxu1 %v20042_v1  ;;  %11928 = vmatpush1.bf16.msra.mxu0 %v19839_v25  ;;  %v20066_v25 = vld [vmem:[#allocation9 + $0x194] ss:$24 sps:$4 sm:$0xff]  }
 0xfa6   : > { %11929 = vmatprep.subr.bf16.mxu0 %v19845_v52  ;;  %v20071_v52 = vld [vmem:[#allocation9 + $0x190] ss:$24 sps:$4 sm:$0xff]  }
 0xfa8   : > { %11226 = vmatpush1.bf16.msra.mxu1 %v20047_v15 }
 0xfa9   : > { %11227 = vmatprep.subr.bf16.mxu1 %v20050_v10  ;;  %11930 = vmatpush1.bf16.msra.mxu0 %v19851_v59  ;;  %v20074_v59 = vld [vmem:[#allocation9 + $0x1c4] ss:$24 sps:$4 sm:$0xff]  }
 0xfaa   : > { %11931 = vmatprep.subr.bf16.mxu0 %v19857_v12  ;;  %v20079_v12 = vld [vmem:[#allocation9 + $0x1c0] ss:$24 sps:$4 sm:$0xff]  }
 0xfac   : > { %11228 = vmatpush1.bf16.msra.mxu1 %v20055_v14 }
 0xfad   : > { %11229 = vmatprep.subr.bf16.mxu1 %v20058_v21  ;;  %11932 = vmatpush1.bf16.msra.mxu0 %v19863_v26  ;;  %v20082_v26 = vld [vmem:[#allocation9 + $0x1f4] ss:$24 sps:$4 sm:$0xff]  }
 0xfae   : > { %11933 = vmatprep.subr.bf16.mxu0 %v19869_v7  ;;  %v20087_v7 = vld [vmem:[#allocation9 + $0x1f0] ss:$24 sps:$4 sm:$0xff]  }
 0xfb0   : > { %11230 = vmatpush1.bf16.msra.mxu1 %v20063_v54 }
 0xfb1   : > { %11231 = vmatprep.subr.bf16.mxu1 %v20066_v25  ;;  %11934 = vmatpush1.bf16.msra.mxu0 %v19875_v49  ;;  %v20090_v49 = vld [vmem:[#allocation9 + $0x224] ss:$24 sps:$4 sm:$0xff]  }
 0xfb2   : > { %11935 = vmatprep.subr.bf16.mxu0 %v19884_v34  ;;  %v20095_v34 = vld [vmem:[#allocation9 + $0x220] ss:$24 sps:$4 sm:$0xff]  }
 0xfb4   : > { %11232 = vmatpush1.bf16.msra.mxu1 %v20071_v52 }
 0xfb5   : > { %11233 = vmatprep.subr.bf16.mxu1 %v20074_v59  ;;  %11936 = vmatpush1.bf16.msra.mxu0 %v19886_v8  ;;  %v20098_v8 = vld [vmem:[#allocation9 + $0x254] ss:$24 sps:$4 sm:$0xff]  }
 0xfb6   : > { %11937 = vmatprep.subr.bf16.mxu0 %v19896_v9  ;;  %v20103_v9 = vld [vmem:[#allocation9 + $0x250] ss:$24 sps:$4 sm:$0xff]  }
 0xfb8   : > { %11234 = vmatpush1.bf16.msra.mxu1 %v20079_v12 }
 0xfb9   : > { %11235 = vmatprep.subr.bf16.mxu1 %v20082_v26  ;;  %11938 = vmatpush1.bf16.msra.mxu0 %v19898_v47  ;;  %v20106_v47 = vld [vmem:[#allocation9 + $0x284] ss:$24 sps:$4 sm:$0xff]  }
 0xfba   : > { %11939 = vmatprep.subr.bf16.mxu0 %v19908_v38  ;;  %v20111_v38 = vld [vmem:[#allocation9 + $0x280] ss:$24 sps:$4 sm:$0xff]  }
 0xfbc   : > { %11236 = vmatpush1.bf16.msra.mxu1 %v20087_v7 }
 0xfbd   : > { %11237 = vmatprep.subr.bf16.mxu1 %v20090_v49  ;;  %11940 = vmatpush1.bf16.msra.mxu0 %v19910_v19  ;;  %v20114_v19 = vld [vmem:[#allocation9 + $0x2b4] ss:$24 sps:$4 sm:$0xff]  }
 0xfbe   : > { %11941 = vmatprep.subr.bf16.mxu0 %v19920_v36  ;;  %v20119_v36 = vld [vmem:[#allocation9 + $0x2b0] ss:$24 sps:$4 sm:$0xff]  }
 0xfc0   : > { %11238 = vmatpush1.bf16.msra.mxu1 %v20095_v34 }
 0xfc1   : > { %11239 = vmatprep.subr.bf16.mxu1 %v20098_v8  ;;  %11942 = vmatpush1.bf16.msra.mxu0 %v19922_v37  ;;  %v20122_v37 = vld [vmem:[#allocation9 + $0x2e4] ss:$24 sps:$4 sm:$0xff]  }
 0xfc2   : > { %11943 = vmatprep.subr.bf16.mxu0 %v19933_v48  ;;  %v20127_v48 = vld [vmem:[#allocation9 + $0x2e0] ss:$24 sps:$4 sm:$0xff]  }
 0xfc4   : > { %11240 = vmatpush1.bf16.msra.mxu1 %v20103_v9 }
 0xfc5   : > { %11241 = vmatprep.subr.bf16.mxu1 %v20106_v47  ;;  %11944 = vmatpush1.bf16.msra.mxu0 %v19931_v62  ;;  %v21298_v62 = vld [vmem:[#allocation19_spill] sm:$0xff] }
 0xfc6   : > { %11945 = vmatprep.subr.bf16.mxu0 %v19940_v56  ;;  %v21303_v56 = vld [vmem:[#allocation24_spill] sm:$0xff] }
 0xfc8   : > { %11242 = vmatpush1.bf16.msra.mxu1 %v20111_v38 }
 0xfc9   : > { %11243 = vmatprep.subr.bf16.mxu1 %v20114_v19  ;;  %11946 = vmatpush1.bf16.msra.mxu0 %v19947_v58  ;;  %v21296_v58 = vld [vmem:[#allocation17_spill] sm:$0xff] }
 0xfca   : > { %11947 = vmatprep.subr.bf16.mxu0 %v19953_v61  ;;  %v21295_v61 = vld [vmem:[#allocation16_spill] sm:$0xff] }
 0xfcc   : > { %11244 = vmatpush1.bf16.msra.mxu1 %v20119_v36 }
 0xfcd   : > { %11245 = vmatprep.subr.bf16.mxu1 %v20122_v37  ;;  %11948 = vmatpush1.bf16.msra.mxu0 %v19959_v18  ;;  %v21297_v18 = vld [vmem:[#allocation18_spill] sm:$0xff] }
 0xfce   : > { %11949 = vmatprep.subr.bf16.mxu0 %v19965_v60  ;;  %v21299_v60 = vld [vmem:[#allocation20_spill] sm:$0xff] }
 0xfd0   : > { %11246 = vmatpush1.bf16.msra.mxu1 %v20127_v48 }
 0xfd1   : > { %11960 = vmatprep.subr.bf16.mxu1 %v19794_v13  ;;  %11950 = vmatpush1.bf16.msra.mxu0 %v19971_v50  ;;  %v21300_v13 = vld [vmem:[#allocation21_spill] sm:$0xff]  ;;  %v21301_v50 = vld [vmem:[#allocation22_spill] sm:$0xff] }
 0xfd2   : > { %12001 = vmatprep.subr.bf16.mxu0 %v19980_v31  ;;  %v21302_v31 = vld [vmem:[#allocation23_spill] sm:$0xff] }
 0xfd3   : > { %11248 = vmatmul.mubr.bf16.vlgmr.msra.gmra.mrb[80].mxu1 %v20008_v57  ;;  %v21318_v57 = vld [vmem:[#allocation39_spill] sm:$0xff] }
 0xfd4   : > { %11961 = vmatpush1.bf16.msra.mxu1 %v19792_v16  ;;  %v21304_v16 = vld [vmem:[#allocation25_spill] sm:$0xff] }
 0xfd5   : > { %11962 = vmatprep.subr.bf16.mxu1 %v19799_v11  ;;  %v21305_v11 = vld [vmem:[#allocation26_spill] sm:$0xff] }
 0xfd8   : > { %11963 = vmatpush1.bf16.msra.mxu1 %v21295_v61  ;;  %v21319_v61 = vld [vmem:[#allocation40_spill] sm:$0xff] }
 0xfd9   : > { %11964 = vmatprep.subr.bf16.mxu1 %v21296_v58  ;;  %v21320_v58 = vld [vmem:[#allocation41_spill] sm:$0xff] }
 0xfdc   : > { %11965 = vmatpush1.bf16.msra.mxu1 %v21297_v18  ;;  %v21321_v18 = vld [vmem:[#allocation42_spill] sm:$0xff] }
 0xfdd   : > { %11966 = vmatprep.subr.bf16.mxu1 %v21298_v62  ;;  %v21322_v62 = vld [vmem:[#allocation43_spill] sm:$0xff] }
 0xfe0   : > { %11967 = vmatpush1.bf16.msra.mxu1 %v21299_v60  ;;  %v21323_v60 = vld [vmem:[#allocation44_spill] sm:$0xff] }
 0xfe1   : > { %11968 = vmatprep.subr.bf16.mxu1 %v21300_v13 }
 0xfe4   : > { %11969 = vmatpush1.bf16.msra.mxu1 %v21301_v50 }
 0xfe5   : > { %11970 = vmatprep.subr.bf16.mxu1 %v21302_v31  ;;  %v21324_v31 = vld [vmem:[#allocation14_spill] sm:$0xff] }
 0xfe8   : > { %11971 = vmatpush1.bf16.msra.mxu1 %v21303_v56 }
 0xfe9   : > { %11972 = vmatprep.subr.bf16.mxu1 %v21304_v16  ;;  %v21325_v16 = vld [vmem:[#allocation15_spill] sm:$0xff] }
 0xfec   : > { %11973 = vmatpush1.bf16.msra.mxu1 %v21305_v11 }
 0xfed   : > { %11974 = vmatprep.subr.bf16.mxu1 %v21306_v63 }
 0xff0   : > { %11975 = vmatpush1.bf16.msra.mxu1 %v21307_v23 }
 0xff1   : > { %11976 = vmatprep.subr.bf16.mxu1 %v21308_v45 }
 0xff4   : > { %11977 = vmatpush1.bf16.msra.mxu1 %v21309_v46 }
 0xff5   : > { %11978 = vmatprep.subr.bf16.mxu1 %v21310_v39 }
 0xff8   : > { %11979 = vmatpush1.bf16.msra.mxu1 %v21311_v35 }
 0xff9   : > { %11980 = vmatprep.subr.bf16.mxu1 %v21312_v27 }
 0xffc   : > { %11981 = vmatpush1.bf16.msra.mxu1 %v21313_v22 }
 0xffd   : > { %11982 = vmatprep.subr.bf16.mxu1 %v21314_v0 }
0x1000   : > { %11983 = vmatpush1.bf16.msra.mxu1 %v21315_v17 }
0x1001   : > { %11984 = vmatprep.subr.bf16.mxu1 %v21316_v55 }
0x1004   : > { %11985 = vmatpush1.bf16.msra.mxu1 %v21317_v29 }
0x1005   : > { %11986 = vmatprep.subr.bf16.mxu1 %v21318_v57 }
0x1008   : > { %11987 = vmatpush1.bf16.msra.mxu1 %v21319_v61  ;;  %v10542_v61 = vld [vmem:[#allocation3 + $0x34] ss:$8 sm:$0x30] }
0x1009   : > { %11988 = vmatprep.subr.bf16.mxu1 %v21320_v58 }
0x100c   : > { %11989 = vmatpush1.bf16.msra.mxu1 %v21321_v18  ;;  %v10541_v18 = vld [vmem:[#allocation3 + $0x34] ss:$8 sm:$0xf] }
0x100d   : > { %11990 = vmatprep.subr.bf16.mxu1 %v21322_v62  ;;  %v10543_v62 = vor.u32 %v10542_v61, %v10541_v18 }
0x1010   : > { %11991 = vmatpush1.bf16.msra.mxu1 %v21323_v60 }
0x1066   : > { %v11167_v13 = vpop.f32.mrb[76].mxu1  ;;  %v11208_v50 = vpop.f32.mrb[80].mxu0 }
0x1067   : > { %v11168_v56 = vadd.f32 %v11167_v13, %v21324_v31  ;;  %v11209_v11 = vadd.f32 %v11208_v50, %v21325_v16  ;;  %v11169_v63 = vpop.f32.mrb[77].mxu1  ;;  %v11210_v23 = vpop.f32.mrb[81].mxu0 }
0x1068   : > { %v11170_v45 = vadd.f32 %v11169_v63, %v17579_v28  ;;  %v11211_v46 = vadd.f32 %v11210_v23, %v17587_v43  ;;  %v11171_v39 = vpop.f32.mrb[78].mxu1  ;;  %v11212_v35 = vpop.f32.mrb[82].mxu0 }
0x1069   : > { %v11172_v27 = vpop.f32.mrb[79].mxu1  ;;  %v11213_v22 = vpop.f32.mrb[83].mxu0 }
0x106a   : > { %v11260_v0 = vcombine.low %v11168_v56, %v11170_v45  ;;  %v11261_v17 = vcombine.low %v11209_v11, %v11211_v46 }
0x106c   : > { %v11268_v55 = vrot.slane %v11260_v0, %v17594_v51  ;;  %v11275_v29 = vrot.slane %v11261_v17, %v17594_v51 }
0x106e   : > { %v11276_v57 = vcombine.low %v11268_v55, %v11275_v29  ;;  %v11312_v55 = vrot.slane %v10543_v62, 4 }
0x1070   : > { %v11283_v58 = vrot.slane %v11276_v57, %v17594_v51 }
0x1072   : > { %v11285_v60 = vadd.f32 %v11283_v58, %v10543_v62 }
0x1074   : > { %v15176_v13 = vmul.f32 -1.442695, %v11285_v60 }
0x1076   : > { %16927 = vpow2.f32 %v15176_v13 }
0x1080   : > { %v16928_v50 = vpop.eup %16927 }
0x1081   : > { %v11289_v63 = vadd.f32 1.0, %v16928_v50 }
0x1083   : > { %16929 = vrcp.f32 %v11289_v63 }
0x108d   : > { %v16930_v0 = vpop.eup %16929 }
0x108e   : > { %v11317_v57 = vrot.slane %v16930_v0, 2 }
0x1090   : > { %v11319_v61 = vsub.f32 1.0, %v11317_v57  ;;  %v11321_v60 = vmul.f32 %v11317_v57, %v19996_v42  ;;  %v20221_v42 = vld [vmem:[#allocation9] ss:$24 sps:$4 sm:$0xff]   ;;  %v20350_v57 = vld [vmem:[#allocation9 + $0x214] ss:$24 sps:$4 sm:$0xff]  }
0x10a6   : > { %v11249_v23 = vpop.f32.mrb[80].mxu1 }
0x10a7   : > { %v11250_v56 = vadd.f32 %v11249_v23, %v17585_v41  ;;  %v11251_v11 = vpop.f32.mrb[81].mxu1 }
0x10a8   : > { %v11252_v45 = vadd.f32 %v11251_v11, %v17589_v44  ;;  %v11253_v46 = vpop.f32.mrb[82].mxu1  ;;  %v20319_v11 = vld [vmem:[#allocation9 + $0x184] ss:$24 sps:$4 sm:$0xff]  }
0x10a9   : > { %v11254_v39 = vpop.f32.mrb[83].mxu1  ;;  %v20323_v46 = vld [vmem:[#allocation9 + $0x18c] ss:$24 sps:$4 sm:$0xff]  }
0x10aa   : > { %v11294_v35 = vcombine.low %v11250_v56, %v11252_v45  ;;  %v20317_v56 = vld [vmem:[#allocation9 + $0x180] ss:$24 sps:$4 sm:$0xff]   ;;  %21340 = vst [vmem:[#allocation30_spill] sm:$0xff] %v20323_v46  ;;  %v20325_v39 = vld [vmem:[#allocation9 + $0x1b4] ss:$24 sps:$4 sm:$0xff]  }
0x10ab   : > { %v20321_v45 = vld [vmem:[#allocation9 + $0x188] ss:$24 sps:$4 sm:$0xff]  }
0x10ac   : > { %v11301_v27 = vrot.slane %v11294_v35, %v17594_v51  ;;  %21339 = vst [vmem:[#allocation29_spill] sm:$0xff] %v20321_v45  ;;  %v20328_v35 = vld [vmem:[#allocation9 + $0x1bc] ss:$24 sps:$4 sm:$0xff]  }
0x10ad   : > { %21341 = vst [vmem:[#allocation31_spill] sm:$0xff] %v20328_v35 }
0x10ae   : > { %v11308_v22 = vrot.slane %v11301_v27, %v17594_v51  ;;  %v20332_v27 = vld [vmem:[#allocation9 + $0x1b0] ss:$24 sps:$4 sm:$0xff]  }
0x10b0   : > { %v11310_v17 = vmul.f32 %v16930_v0, %v11308_v22  ;;  %v20336_v22 = vld [vmem:[#allocation9 + $0x1b8] ss:$24 sps:$4 sm:$0xff]   ;;  %v20338_v0 = vld [vmem:[#allocation9 + $0x1e4] ss:$24 sps:$4 sm:$0xff]  }
0x10b1   : > { %21342 = vst [vmem:[#allocation32_spill] sm:$0xff] %v20336_v22 }
0x10b2   : > { %v11314_v29 = vadd.f32 %v11312_v55, %v11310_v17  ;;  %v20341_v17 = vld [vmem:[#allocation9 + $0x1ec] ss:$24 sps:$4 sm:$0xff]   ;;  %v20344_v55 = vld [vmem:[#allocation9 + $0x1e0] ss:$24 sps:$4 sm:$0xff]  }
0x10b3   : > { %21343 = vst [vmem:[#allocation33_spill] sm:$0xff] %v20341_v17 }
0x10b4   : > { %16931 = vtanh.f32 %v11314_v29  ;;  %v20348_v29 = vld [vmem:[#allocation9 + $0x1e8] ss:$24 sps:$4 sm:$0xff]  }
0x10b5   : > { %21344 = vst [vmem:[#allocation34_spill] sm:$0xff] %v20348_v29 }
0x10be   : > { %v16932_v58 = vpop.eup %16931 }
0x10bf   : > { %v11320_v18 = vmul.f32 %v16932_v58, %v11319_v61  ;;  %v20353_v61 = vld [vmem:[#allocation9 + $0x21c] ss:$24 sps:$4 sm:$0xff]   ;;  %v20356_v58 = vld [vmem:[#allocation9 + $0x210] ss:$24 sps:$4 sm:$0xff]  }
0x10c0   : > { %21345 = vst [vmem:[#allocation35_spill] sm:$0xff] %v20353_v61 }
0x10c1   : > { %v20180_v13 = vadd.f32 %v11321_v60, %v11320_v18  ;;  %v20360_v18 = vld [vmem:[#allocation9 + $0x218] ss:$24 sps:$4 sm:$0xff]   ;;  %v20362_v60 = vld [vmem:[#allocation9 + $0x244] ss:$24 sps:$4 sm:$0xff]  }
0x10c2   : > { %21346 = vst [vmem:[#allocation36_spill] sm:$0xff] %v20360_v18 }
0x10c3   : > { %15177 = vst.msk [vmem:[%s17400_s14 + $0x14] ss:$8 sm:$0x3] %vm17604_vm1, %v20180_v13  ;;  %v11338_v50 = vrot.slane %v20180_v13, %v17417_v40  ;;  %v11334_v62 = vrot.slane %v20180_v13, %v17424_v6 }
0x10c5   : > { %v11342_v63 = vpack.c.bf16 %v11338_v50, %v11338_v50  ;;  %v11341_v23 = vpack.c.bf16 %v11334_v62, %v11334_v62  ;;  %v20365_v50 = vld [vmem:[#allocation9 + $0x24c] ss:$24 sps:$4 sm:$0xff]   ;;  %v20368_v62 = vld [vmem:[#allocation9 + $0x240] ss:$24 sps:$4 sm:$0xff]  }
0x10c6   : > { %21347 = vst [vmem:[#allocation37_spill] sm:$0xff] %v20365_v50 }
0x10c7   : > { %11951 = vmatprep.mubr.bf16.mxu0 %v11342_v63  ;;  %11992 = vmatprep.mubr.bf16.mxu1 %v11342_v63 }
0x10c8   : > { %11952 = vmatmul.mubr.bf16.vlgmr.msra.gmra.mrb[84].mxu0 %v11341_v23  ;;  %11993 = vmatmul.mubr.bf16.vlgmr.msra.gmra.mrb[84].mxu1 %v11341_v23 }
0x10c9   : > { %12002 = vmatpush1.bf16.msra.mxu0 %v20006_v2  ;;  %12033 = vmatprep.mubr.bf16.mxu0 %v11342_v63  ;;  %v20223_v2 = vld [vmem:[#allocation9 + $0x4] ss:$24 sps:$4 sm:$0xff]   ;;  %v20372_v63 = vld [vmem:[#allocation9 + $0x248] ss:$24 sps:$4 sm:$0xff]  }
0x10ca   : > { %12003 = vmatprep.subr.bf16.mxu0 %v20010_v30  ;;  %v20225_v30 = vld [vmem:[#allocation9 + $0x8] ss:$24 sps:$4 sm:$0xff]   ;;  %12705 = vmatprep.subr.bf16.mxu1 %v20223_v2  ;;  %21348 = vst [vmem:[#allocation38_spill] sm:$0xff] %v20372_v63 }
0x10cb   : > { %12706 = vmatpush1.bf16.msra.mxu1 %v20221_v42 }
0x10cd   : > { %12004 = vmatpush1.bf16.msra.mxu0 %v20015_v3  ;;  %v20227_v3 = vld [vmem:[#allocation9 + $0xc] ss:$24 sps:$4 sm:$0xff]  }
0x10ce   : > { %12005 = vmatprep.subr.bf16.mxu0 %v20018_v53  ;;  %v20229_v53 = vld [vmem:[#allocation9 + $0x34] ss:$24 sps:$4 sm:$0xff]  }
0x10cf   : > { %12707 = vmatprep.subr.bf16.mxu1 %v20229_v53 }
0x10d1   : > { %12006 = vmatpush1.bf16.msra.mxu0 %v20023_v4  ;;  %v20232_v4 = vld [vmem:[#allocation9 + $0x3c] ss:$24 sps:$4 sm:$0xff]  }
0x10d2   : > { %12007 = vmatprep.subr.bf16.mxu0 %v20026_v20  ;;  %v20236_v20 = vld [vmem:[#allocation9 + $0x30] ss:$24 sps:$4 sm:$0xff]  }
0x10d3   : > { %12708 = vmatpush1.bf16.msra.mxu1 %v20236_v20 }
0x10d5   : > { %12008 = vmatpush1.bf16.msra.mxu0 %v20031_v5  ;;  %v20240_v5 = vld [vmem:[#allocation9 + $0x38] ss:$24 sps:$4 sm:$0xff]  }
0x10d6   : > { %12009 = vmatprep.subr.bf16.mxu0 %v20034_v24  ;;  %21326 = vst [vmem:[#allocation16_spill] sm:$0xff] %v20240_v5  ;;  %v20242_v24 = vld [vmem:[#allocation9 + $0x64] ss:$24 sps:$4 sm:$0xff]  }
0x10d7   : > { %12709 = vmatprep.subr.bf16.mxu1 %v20242_v24 }
0x10d9   : > { %12010 = vmatpush1.bf16.msra.mxu0 %v20039_v32  ;;  %v20245_v32 = vld [vmem:[#allocation9 + $0x6c] ss:$24 sps:$4 sm:$0xff]  }
0x10da   : > { %12011 = vmatprep.subr.bf16.mxu0 %v20042_v1  ;;  %21327 = vst [vmem:[#allocation17_spill] sm:$0xff] %v20245_v32  ;;  %v20248_v1 = vld [vmem:[#allocation9 + $0x60] ss:$24 sps:$4 sm:$0xff]  }
0x10db   : > { %12710 = vmatpush1.bf16.msra.mxu1 %v20248_v1 }
0x10dd   : > { %12012 = vmatpush1.bf16.msra.mxu0 %v20047_v15  ;;  %v20252_v15 = vld [vmem:[#allocation9 + $0x68] ss:$24 sps:$4 sm:$0xff]  }
0x10de   : > { %12013 = vmatprep.subr.bf16.mxu0 %v20050_v10  ;;  %21328 = vst [vmem:[#allocation18_spill] sm:$0xff] %v20252_v15  ;;  %v20254_v10 = vld [vmem:[#allocation9 + $0x94] ss:$24 sps:$4 sm:$0xff]  }
0x10df   : > { %12711 = vmatprep.subr.bf16.mxu1 %v20254_v10 }
0x10e1   : > { %12014 = vmatpush1.bf16.msra.mxu0 %v20055_v14  ;;  %v20257_v14 = vld [vmem:[#allocation9 + $0x9c] ss:$24 sps:$4 sm:$0xff]  }
0x10e2   : > { %12015 = vmatprep.subr.bf16.mxu0 %v20058_v21  ;;  %21329 = vst [vmem:[#allocation19_spill] sm:$0xff] %v20257_v14  ;;  %v20260_v21 = vld [vmem:[#allocation9 + $0x90] ss:$24 sps:$4 sm:$0xff]  }
0x10e3   : > { %12712 = vmatpush1.bf16.msra.mxu1 %v20260_v21 }
0x10e5   : > { %12016 = vmatpush1.bf16.msra.mxu0 %v20063_v54  ;;  %v20264_v54 = vld [vmem:[#allocation9 + $0x98] ss:$24 sps:$4 sm:$0xff]  }
0x10e6   : > { %12017 = vmatprep.subr.bf16.mxu0 %v20066_v25  ;;  %21330 = vst [vmem:[#allocation20_spill] sm:$0xff] %v20264_v54  ;;  %v20266_v25 = vld [vmem:[#allocation9 + $0xc4] ss:$24 sps:$4 sm:$0xff]  }
0x10e7   : > { %12713 = vmatprep.subr.bf16.mxu1 %v20266_v25 }
0x10e9   : > { %12018 = vmatpush1.bf16.msra.mxu0 %v20071_v52  ;;  %v20269_v52 = vld [vmem:[#allocation9 + $0xcc] ss:$24 sps:$4 sm:$0xff]  }
0x10ea   : > { %12019 = vmatprep.subr.bf16.mxu0 %v20074_v59  ;;  %21331 = vst [vmem:[#allocation21_spill] sm:$0xff] %v20269_v52  ;;  %v20272_v59 = vld [vmem:[#allocation9 + $0xc0] ss:$24 sps:$4 sm:$0xff]  }
0x10eb   : > { %12714 = vmatpush1.bf16.msra.mxu1 %v20272_v59 }
0x10ed   : > { %12020 = vmatpush1.bf16.msra.mxu0 %v20079_v12  ;;  %v20276_v12 = vld [vmem:[#allocation9 + $0xc8] ss:$24 sps:$4 sm:$0xff]  }
0x10ee   : > { %12021 = vmatprep.subr.bf16.mxu0 %v20082_v26  ;;  %21332 = vst [vmem:[#allocation22_spill] sm:$0xff] %v20276_v12  ;;  %v20278_v26 = vld [vmem:[#allocation9 + $0xf4] ss:$24 sps:$4 sm:$0xff]  }
0x10ef   : > { %12715 = vmatprep.subr.bf16.mxu1 %v20278_v26 }
0x10f1   : > { %12022 = vmatpush1.bf16.msra.mxu0 %v20087_v7  ;;  %v20281_v7 = vld [vmem:[#allocation9 + $0xfc] ss:$24 sps:$4 sm:$0xff]  }
0x10f2   : > { %12023 = vmatprep.subr.bf16.mxu0 %v20090_v49  ;;  %21333 = vst [vmem:[#allocation23_spill] sm:$0xff] %v20281_v7  ;;  %v20284_v49 = vld [vmem:[#allocation9 + $0xf0] ss:$24 sps:$4 sm:$0xff]  }
0x10f3   : > { %12716 = vmatpush1.bf16.msra.mxu1 %v20284_v49 }
0x10f5   : > { %12024 = vmatpush1.bf16.msra.mxu0 %v20095_v34  ;;  %v20288_v34 = vld [vmem:[#allocation9 + $0xf8] ss:$24 sps:$4 sm:$0xff]  }
0x10f6   : > { %12025 = vmatprep.subr.bf16.mxu0 %v20098_v8  ;;  %21334 = vst [vmem:[#allocation24_spill] sm:$0xff] %v20288_v34  ;;  %v20290_v8 = vld [vmem:[#allocation9 + $0x124] ss:$24 sps:$4 sm:$0xff]  }
0x10f7   : > { %12717 = vmatprep.subr.bf16.mxu1 %v20290_v8 }
0x10f9   : > { %12026 = vmatpush1.bf16.msra.mxu0 %v20103_v9  ;;  %v20293_v9 = vld [vmem:[#allocation9 + $0x12c] ss:$24 sps:$4 sm:$0xff]  }
0x10fa   : > { %12027 = vmatprep.subr.bf16.mxu0 %v20106_v47  ;;  %21335 = vst [vmem:[#allocation25_spill] sm:$0xff] %v20293_v9  ;;  %v20296_v47 = vld [vmem:[#allocation9 + $0x120] ss:$24 sps:$4 sm:$0xff]  }
0x10fb   : > { %12718 = vmatpush1.bf16.msra.mxu1 %v20296_v47 }
0x10fd   : > { %12028 = vmatpush1.bf16.msra.mxu0 %v20111_v38  ;;  %v20300_v38 = vld [vmem:[#allocation9 + $0x128] ss:$24 sps:$4 sm:$0xff]  }
0x10fe   : > { %12029 = vmatprep.subr.bf16.mxu0 %v20114_v19  ;;  %21336 = vst [vmem:[#allocation26_spill] sm:$0xff] %v20300_v38  ;;  %v20302_v19 = vld [vmem:[#allocation9 + $0x154] ss:$24 sps:$4 sm:$0xff]  }
0x10ff   : > { %12719 = vmatprep.subr.bf16.mxu1 %v20302_v19 }
0x1101   : > { %12030 = vmatpush1.bf16.msra.mxu0 %v20119_v36  ;;  %v20305_v36 = vld [vmem:[#allocation9 + $0x15c] ss:$24 sps:$4 sm:$0xff]  }
0x1102   : > { %12031 = vmatprep.subr.bf16.mxu0 %v20122_v37  ;;  %21337 = vst [vmem:[#allocation27_spill] sm:$0xff] %v20305_v36  ;;  %v20308_v37 = vld [vmem:[#allocation9 + $0x150] ss:$24 sps:$4 sm:$0xff]  }
0x1103   : > { %12720 = vmatpush1.bf16.msra.mxu1 %v20308_v37 }
0x1104   : > { %12721 = vmatprep.subr.bf16.mxu1 %v20319_v11 }
0x1105   : > { %12032 = vmatpush1.bf16.msra.mxu0 %v20127_v48  ;;  %v20312_v48 = vld [vmem:[#allocation9 + $0x158] ss:$24 sps:$4 sm:$0xff]  }
0x1106   : > { %12746 = vmatprep.subr.bf16.mxu0 %v20227_v3  ;;  %21338 = vst [vmem:[#allocation28_spill] sm:$0xff] %v20312_v48 }
0x1107   : > { %12722 = vmatpush1.bf16.msra.mxu1 %v20317_v56 }
0x1108   : > { %12034 = vmatmul.mubr.bf16.vlgmr.msra.gmra.mrb[88].mxu0 %v11341_v23  ;;  %12723 = vmatprep.subr.bf16.mxu1 %v20325_v39  ;;  %v20374_v23 = vld [vmem:[#allocation9 + $0x274] ss:$24 sps:$4 sm:$0xff]  }
0x1109   : > { %12747 = vmatpush1.bf16.msra.mxu0 %v20225_v30 }
0x110a   : > { %12748 = vmatprep.subr.bf16.mxu0 %v20232_v4 }
0x110b   : > { %12724 = vmatpush1.bf16.msra.mxu1 %v20332_v27 }
0x110c   : > { %12725 = vmatprep.subr.bf16.mxu1 %v20338_v0 }
0x110d   : > { %12749 = vmatpush1.bf16.msra.mxu0 %v20240_v5 }
0x110e   : > { %12750 = vmatprep.subr.bf16.mxu0 %v20245_v32 }
0x110f   : > { %12726 = vmatpush1.bf16.msra.mxu1 %v20344_v55 }
0x1110   : > { %12727 = vmatprep.subr.bf16.mxu1 %v20350_v57 }
0x1111   : > { %12751 = vmatpush1.bf16.msra.mxu0 %v20252_v15 }
0x1112   : > { %12752 = vmatprep.subr.bf16.mxu0 %v20257_v14 }
0x1113   : > { %12728 = vmatpush1.bf16.msra.mxu1 %v20356_v58 }
0x1114   : > { %12729 = vmatprep.subr.bf16.mxu1 %v20362_v60 }
0x1115   : > { %12753 = vmatpush1.bf16.msra.mxu0 %v20264_v54 }
0x1116   : > { %12754 = vmatprep.subr.bf16.mxu0 %v20269_v52 }
0x1117   : > { %12730 = vmatpush1.bf16.msra.mxu1 %v20368_v62 }
0x1118   : > { %12731 = vmatprep.subr.bf16.mxu1 %v20374_v23 }
0x1119   : > { %12755 = vmatpush1.bf16.msra.mxu0 %v20276_v12 }
0x111a   : > { %12756 = vmatprep.subr.bf16.mxu0 %v20281_v7 }
0x111d   : > { %12757 = vmatpush1.bf16.msra.mxu0 %v20288_v34 }
0x111e   : > { %12758 = vmatprep.subr.bf16.mxu0 %v20293_v9 }
0x1121   : > { %12759 = vmatpush1.bf16.msra.mxu0 %v20300_v38 }
0x1122   : > { %12760 = vmatprep.subr.bf16.mxu0 %v20305_v36 }
0x1125   : > { %12761 = vmatpush1.bf16.msra.mxu0 %v20312_v48 }
0x1126   : > { %12762 = vmatprep.subr.bf16.mxu0 %v20323_v46  ;;  %v20408_v46 = vld [vmem:[#allocation9 + $0x2d8] ss:$24 sps:$4 sm:$0xff]  }
0x1127   : > { %21354 = vst [vmem:[#allocation44_spill] sm:$0xff] %v20408_v46 }
0x1129   : > { %12763 = vmatpush1.bf16.msra.mxu0 %v20321_v45  ;;  %v20401_v45 = vld [vmem:[#allocation9 + $0x2dc] ss:$24 sps:$4 sm:$0xff]  }
0x112a   : > { %12764 = vmatprep.subr.bf16.mxu0 %v20328_v35  ;;  %v20396_v35 = vld [vmem:[#allocation9 + $0x2a8] ss:$24 sps:$4 sm:$0xff]   ;;  %21353 = vst [vmem:[#allocation43_spill] sm:$0xff] %v20401_v45 }
0x112b   : > { %21352 = vst [vmem:[#allocation42_spill] sm:$0xff] %v20396_v35 }
0x112d   : > { %12765 = vmatpush1.bf16.msra.mxu0 %v20336_v22  ;;  %v20389_v22 = vld [vmem:[#allocation9 + $0x2ac] ss:$24 sps:$4 sm:$0xff]  }
0x112e   : > { %12766 = vmatprep.subr.bf16.mxu0 %v20341_v17  ;;  %v20384_v17 = vld [vmem:[#allocation9 + $0x278] ss:$24 sps:$4 sm:$0xff]   ;;  %21351 = vst [vmem:[#allocation41_spill] sm:$0xff] %v20389_v22 }
0x112f   : > { %21350 = vst [vmem:[#allocation40_spill] sm:$0xff] %v20384_v17 }
0x1131   : > { %12767 = vmatpush1.bf16.msra.mxu0 %v20348_v29  ;;  %v20377_v29 = vld [vmem:[#allocation9 + $0x27c] ss:$24 sps:$4 sm:$0xff]  }
0x1132   : > { %12768 = vmatprep.subr.bf16.mxu0 %v20353_v61  ;;  %21349 = vst [vmem:[#allocation39_spill] sm:$0xff] %v20377_v29  ;;  %v20380_v61 = vld [vmem:[#allocation9 + $0x270] ss:$24 sps:$4 sm:$0xff]  }
0x1133   : > { %12732 = vmatpush1.bf16.msra.mxu1 %v20380_v61 }
0x1135   : > { %12769 = vmatpush1.bf16.msra.mxu0 %v20360_v18  ;;  %v20386_v18 = vld [vmem:[#allocation9 + $0x2a4] ss:$24 sps:$4 sm:$0xff]  }
0x1136   : > { %12770 = vmatprep.subr.bf16.mxu0 %v20365_v50  ;;  %v20392_v50 = vld [vmem:[#allocation9 + $0x2a0] ss:$24 sps:$4 sm:$0xff]   ;;  %12733 = vmatprep.subr.bf16.mxu1 %v20386_v18 }
0x1137   : > { %12734 = vmatpush1.bf16.msra.mxu1 %v20392_v50 }
0x1139   : > { %12771 = vmatpush1.bf16.msra.mxu0 %v20372_v63  ;;  %v20398_v63 = vld [vmem:[#allocation9 + $0x2d4] ss:$24 sps:$4 sm:$0xff]  }
0x113a   : > { %12772 = vmatprep.subr.bf16.mxu0 %v20377_v29  ;;  %v20404_v29 = vld [vmem:[#allocation9 + $0x2d0] ss:$24 sps:$4 sm:$0xff]   ;;  %12735 = vmatprep.subr.bf16.mxu1 %v20398_v63 }
0x113b   : > { %12736 = vmatpush1.bf16.msra.mxu1 %v20404_v29 }
0x113d   : > { %12773 = vmatpush1.bf16.msra.mxu0 %v20384_v17  ;;  %v20410_v17 = vld [vmem:[#allocation9 + $0x14] ss:$24 sps:$4 sm:$0xff]  }
0x113e   : > { %12774 = vmatprep.subr.bf16.mxu0 %v20389_v22  ;;  %12787 = vmatprep.subr.bf16.mxu1 %v20410_v17 }
0x1141   : > { %12775 = vmatpush1.bf16.msra.mxu0 %v20396_v35 }
0x1142   : > { %12776 = vmatprep.subr.bf16.mxu0 %v20401_v45 }
0x1145   : > { %12777 = vmatpush1.bf16.msra.mxu0 %v20408_v46 }
0x1146   : > { %13491 = vmatprep.subr.bf16.mxu0 %v20223_v2 }
0x119b   : > { %v11953_v22 = vpop.f32.mrb[84].mxu0  ;;  %v11994_v48 = vpop.f32.mrb[84].mxu1 }
0x119c   : > { %v11954_v35 = vadd.f32 %v11953_v22, %v21324_v31  ;;  %v11995_v36 = vadd.f32 %v11994_v48, %v21325_v16  ;;  %v11955_v38 = vpop.f32.mrb[85].mxu0  ;;  %v11996_v9 = vpop.f32.mrb[85].mxu1  ;;  %v11328_v22 = vld [vmem:[#allocation3 + $0x35] ss:$8 sm:$0x30] }
0x119d   : > { %v11956_v34 = vadd.f32 %v11955_v38, %v17579_v28  ;;  %v11997_v45 = vadd.f32 %v11996_v9, %v17587_v43  ;;  %v11957_v7 = vpop.f32.mrb[86].mxu0  ;;  %v11998_v12 = vpop.f32.mrb[86].mxu1  ;;  %v11327_v16 = vld [vmem:[#allocation3 + $0x35] ss:$8 sm:$0xf] }
0x119e   : > { %v11958_v52 = vpop.f32.mrb[87].mxu0  ;;  %v11999_v46 = vpop.f32.mrb[87].mxu1  ;;  %v11329_v31 = vor.u32 %v11328_v22, %v11327_v16 }
0x119f   : > { %v12046_v54 = vcombine.low %v11954_v35, %v11956_v34  ;;  %v12047_v14 = vcombine.low %v11995_v36, %v11997_v45 }
0x11a0   : > { %v12098_v46 = vrot.slane %v11329_v31, 4 }
0x11a1   : > { %v12054_v2 = vrot.slane %v12046_v54, %v17594_v51  ;;  %v12061_v15 = vrot.slane %v12047_v14, %v17594_v51 }
0x11a3   : > { %v12062_v32 = vcombine.low %v12054_v2, %v12061_v15 }
0x11a5   : > { %v12069_v48 = vrot.slane %v12062_v32, %v17594_v51 }
0x11a7   : > { %v12071_v5 = vadd.f32 %v12069_v48, %v11329_v31 }
0x11a9   : > { %v15274_v38 = vmul.f32 -1.442695, %v12071_v5 }
0x11ab   : > { %16933 = vpow2.f32 %v15274_v38 }
0x11b5   : > { %v16934_v9 = vpop.eup %16933 }
0x11b6   : > { %v12075_v7 = vadd.f32 1.0, %v16934_v9 }
0x11b8   : > { %16935 = vrcp.f32 %v12075_v7 }
0x11c2   : > { %v16936_v45 = vpop.eup %16935 }
0x11c3   : > { %v12103_v2 = vrot.slane %v16936_v45, 2 }
0x11c5   : > { %v12105_v22 = vsub.f32 1.0, %v12103_v2  ;;  %v12107_v9 = vmul.f32 %v12103_v2, %v20180_v13  ;;  %v20448_v13 = vld [vmem:[#allocation9 + $0x40] ss:$24 sps:$4 sm:$0xff]   ;;  %v21370_v2 = vld [vmem:[#allocation31_spill] sm:$0xff] }
0x11db   : > { %v12035_v52 = vpop.f32.mrb[88].mxu0 }
0x11dc   : > { %v12036_v12 = vadd.f32 %v12035_v52, %v17585_v41  ;;  %v12037_v34 = vpop.f32.mrb[89].mxu0 }
0x11dd   : > { %v12038_v54 = vadd.f32 %v12037_v34, %v17589_v44  ;;  %v12039_v36 = vpop.f32.mrb[90].mxu0  ;;  %v20439_v34 = vld [vmem:[#allocation9 + $0x10] ss:$24 sps:$4 sm:$0xff]  }
0x11de   : > { %v12040_v15 = vpop.f32.mrb[91].mxu0  ;;  %v20443_v36 = vld [vmem:[#allocation9 + $0x44] ss:$24 sps:$4 sm:$0xff]  }
0x11df   : > { %v12080_v14 = vcombine.low %v12036_v12, %v12038_v54  ;;  %v20451_v15 = vld [vmem:[#allocation9 + $0x74] ss:$24 sps:$4 sm:$0xff]  }
0x11e1   : > { %v12087_v32 = vrot.slane %v12080_v14, %v17594_v51  ;;  %v20456_v14 = vld [vmem:[#allocation9 + $0x70] ss:$24 sps:$4 sm:$0xff]  }
0x11e3   : > { %v12094_v16 = vrot.slane %v12087_v32, %v17594_v51  ;;  %v20459_v32 = vld [vmem:[#allocation9 + $0xa4] ss:$24 sps:$4 sm:$0xff]  }
0x11e5   : > { %v12096_v5 = vmul.f32 %v16936_v45, %v12094_v16  ;;  %v20464_v16 = vld [vmem:[#allocation9 + $0xa0] ss:$24 sps:$4 sm:$0xff]   ;;  %v21366_v45 = vld [vmem:[#allocation27_spill] sm:$0xff] }
0x11e7   : > { %v12100_v35 = vadd.f32 %v12098_v46, %v12096_v5  ;;  %v21367_v5 = vld [vmem:[#allocation28_spill] sm:$0xff]  ;;  %v21368_v46 = vld [vmem:[#allocation30_spill] sm:$0xff] }
0x11e9   : > { %16937 = vtanh.f32 %v12100_v35  ;;  %v21369_v35 = vld [vmem:[#allocation29_spill] sm:$0xff] }
0x11f3   : > { %v16938_v48 = vpop.eup %16937 }
0x11f4   : > { %v12106_v38 = vmul.f32 %v16938_v48, %v12105_v22  ;;  %v21371_v22 = vld [vmem:[#allocation32_spill] sm:$0xff]  ;;  %v21372_v48 = vld [vmem:[#allocation33_spill] sm:$0xff] }
0x11f6   : > { %v20429_v7 = vadd.f32 %v12107_v9, %v12106_v38  ;;  %v21373_v38 = vld [vmem:[#allocation34_spill] sm:$0xff]  ;;  %v21374_v9 = vld [vmem:[#allocation35_spill] sm:$0xff] }
0x11f8   : > { %15275 = vst.msk [vmem:[%s17400_s14 + $0x15] ss:$8 sm:$0x3] %vm17604_vm1, %v20429_v7  ;;  %v12124_v52 = vrot.slane %v20429_v7, %v17417_v40  ;;  %v12120_v31 = vrot.slane %v20429_v7, %v17424_v6 }
0x11fa   : > { %v12128_v12 = vpack.c.bf16 %v12124_v52, %v12124_v52  ;;  %v20441_v54 = vpack.c.bf16 %v12120_v31, %v12120_v31  ;;  %v21375_v52 = vld [vmem:[#allocation36_spill] sm:$0xff]  ;;  %v21376_v31 = vld [vmem:[#allocation37_spill] sm:$0xff] }
0x11fc   : > { %12737 = vmatprep.mubr.bf16.mxu1 %v12128_v12  ;;  %12778 = vmatprep.mubr.bf16.mxu0 %v12128_v12 }
0x11fd   : > { %12738 = vmatmul.mubr.bf16.vlgmr.msra.gmra.mrb[88].mxu1 %v20441_v54  ;;  %12779 = vmatmul.mubr.bf16.vlgmr.msra.gmra.mrb[92].mxu0 %v20441_v54 }
0x11fe   : > { %12788 = vmatpush1.bf16.msra.mxu1 %v20439_v34  ;;  %12819 = vmatprep.mubr.bf16.mxu1 %v12128_v12  ;;  %v21377_v12 = vld [vmem:[#allocation38_spill] sm:$0xff] }
0x11ff   : > { %12789 = vmatprep.subr.bf16.mxu1 %v20443_v36  ;;  %13492 = vmatpush1.bf16.msra.mxu0 %v20221_v42  ;;  %v20467_v42 = vld [vmem:[#allocation9 + $0xd4] ss:$24 sps:$4 sm:$0xff]  }
0x1200   : > { %13493 = vmatprep.subr.bf16.mxu0 %v20229_v53  ;;  %v20472_v53 = vld [vmem:[#allocation9 + $0xd0] ss:$24 sps:$4 sm:$0xff]  }
0x1202   : > { %12790 = vmatpush1.bf16.msra.mxu1 %v20448_v13 }
0x1203   : > { %12791 = vmatprep.subr.bf16.mxu1 %v20451_v15  ;;  %13494 = vmatpush1.bf16.msra.mxu0 %v20236_v20  ;;  %v20475_v20 = vld [vmem:[#allocation9 + $0x104] ss:$24 sps:$4 sm:$0xff]  }
0x1204   : > { %13495 = vmatprep.subr.bf16.mxu0 %v20242_v24  ;;  %v20480_v24 = vld [vmem:[#allocation9 + $0x100] ss:$24 sps:$4 sm:$0xff]  }
0x1206   : > { %12792 = vmatpush1.bf16.msra.mxu1 %v20456_v14 }
0x1207   : > { %12793 = vmatprep.subr.bf16.mxu1 %v20459_v32  ;;  %13496 = vmatpush1.bf16.msra.mxu0 %v20248_v1  ;;  %v20483_v1 = vld [vmem:[#allocation9 + $0x134] ss:$24 sps:$4 sm:$0xff]  }
0x1208   : > { %13497 = vmatprep.subr.bf16.mxu0 %v20254_v10  ;;  %v20488_v10 = vld [vmem:[#allocation9 + $0x130] ss:$24 sps:$4 sm:$0xff]  }
0x120a   : > { %12794 = vmatpush1.bf16.msra.mxu1 %v20464_v16 }
0x120b   : > { %12795 = vmatprep.subr.bf16.mxu1 %v20467_v42  ;;  %13498 = vmatpush1.bf16.msra.mxu0 %v20260_v21  ;;  %v20491_v21 = vld [vmem:[#allocation9 + $0x164] ss:$24 sps:$4 sm:$0xff]  }
0x120c   : > { %13499 = vmatprep.subr.bf16.mxu0 %v20266_v25  ;;  %v20496_v25 = vld [vmem:[#allocation9 + $0x160] ss:$24 sps:$4 sm:$0xff]  }
0x120e   : > { %12796 = vmatpush1.bf16.msra.mxu1 %v20472_v53 }
0x120f   : > { %12797 = vmatprep.subr.bf16.mxu1 %v20475_v20  ;;  %13500 = vmatpush1.bf16.msra.mxu0 %v20272_v59  ;;  %v20499_v59 = vld [vmem:[#allocation9 + $0x194] ss:$24 sps:$4 sm:$0xff]  }
0x1210   : > { %13501 = vmatprep.subr.bf16.mxu0 %v20278_v26  ;;  %v20504_v26 = vld [vmem:[#allocation9 + $0x190] ss:$24 sps:$4 sm:$0xff]  }
0x1212   : > { %12798 = vmatpush1.bf16.msra.mxu1 %v20480_v24 }
0x1213   : > { %12799 = vmatprep.subr.bf16.mxu1 %v20483_v1  ;;  %13502 = vmatpush1.bf16.msra.mxu0 %v20284_v49  ;;  %v20507_v49 = vld [vmem:[#allocation9 + $0x1c4] ss:$24 sps:$4 sm:$0xff]  }
0x1214   : > { %13503 = vmatprep.subr.bf16.mxu0 %v20290_v8  ;;  %v20512_v8 = vld [vmem:[#allocation9 + $0x1c0] ss:$24 sps:$4 sm:$0xff]  }
0x1216   : > { %12800 = vmatpush1.bf16.msra.mxu1 %v20488_v10 }
0x1217   : > { %12801 = vmatprep.subr.bf16.mxu1 %v20491_v21  ;;  %13504 = vmatpush1.bf16.msra.mxu0 %v20296_v47  ;;  %v20515_v47 = vld [vmem:[#allocation9 + $0x1f4] ss:$24 sps:$4 sm:$0xff]  }
0x1218   : > { %13505 = vmatprep.subr.bf16.mxu0 %v20302_v19  ;;  %v20520_v19 = vld [vmem:[#allocation9 + $0x1f0] ss:$24 sps:$4 sm:$0xff]  }
0x121a   : > { %12802 = vmatpush1.bf16.msra.mxu1 %v20496_v25 }
0x121b   : > { %12803 = vmatprep.subr.bf16.mxu1 %v20499_v59  ;;  %13506 = vmatpush1.bf16.msra.mxu0 %v20308_v37  ;;  %v20523_v37 = vld [vmem:[#allocation9 + $0x224] ss:$24 sps:$4 sm:$0xff]  }
0x121c   : > { %13507 = vmatprep.subr.bf16.mxu0 %v20319_v11  ;;  %v20528_v11 = vld [vmem:[#allocation9 + $0x220] ss:$24 sps:$4 sm:$0xff]  }
0x121e   : > { %12804 = vmatpush1.bf16.msra.mxu1 %v20504_v26 }
0x121f   : > { %12805 = vmatprep.subr.bf16.mxu1 %v20507_v49  ;;  %13508 = vmatpush1.bf16.msra.mxu0 %v20317_v56  ;;  %v20531_v56 = vld [vmem:[#allocation9 + $0x254] ss:$24 sps:$4 sm:$0xff]  }
0x1220   : > { %13509 = vmatprep.subr.bf16.mxu0 %v20325_v39  ;;  %v20536_v39 = vld [vmem:[#allocation9 + $0x250] ss:$24 sps:$4 sm:$0xff]  }
0x1222   : > { %12806 = vmatpush1.bf16.msra.mxu1 %v20512_v8 }
0x1223   : > { %12807 = vmatprep.subr.bf16.mxu1 %v20515_v47  ;;  %13510 = vmatpush1.bf16.msra.mxu0 %v20332_v27  ;;  %v20539_v27 = vld [vmem:[#allocation9 + $0x284] ss:$24 sps:$4 sm:$0xff]  }
0x1224   : > { %13511 = vmatprep.subr.bf16.mxu0 %v20338_v0  ;;  %v20544_v0 = vld [vmem:[#allocation9 + $0x280] ss:$24 sps:$4 sm:$0xff]  }
0x1226   : > { %12808 = vmatpush1.bf16.msra.mxu1 %v20520_v19 }
0x1227   : > { %12809 = vmatprep.subr.bf16.mxu1 %v20523_v37  ;;  %13512 = vmatpush1.bf16.msra.mxu0 %v20344_v55  ;;  %v20547_v55 = vld [vmem:[#allocation9 + $0x2b4] ss:$24 sps:$4 sm:$0xff]  }
0x1228   : > { %13513 = vmatprep.subr.bf16.mxu0 %v20350_v57  ;;  %v20552_v57 = vld [vmem:[#allocation9 + $0x2b0] ss:$24 sps:$4 sm:$0xff]  }
0x122a   : > { %12810 = vmatpush1.bf16.msra.mxu1 %v20528_v11 }
0x122b   : > { %12811 = vmatprep.subr.bf16.mxu1 %v20531_v56  ;;  %13514 = vmatpush1.bf16.msra.mxu0 %v20356_v58  ;;  %v20555_v58 = vld [vmem:[#allocation9 + $0x2e4] ss:$24 sps:$4 sm:$0xff]  }
0x122c   : > { %13515 = vmatprep.subr.bf16.mxu0 %v20362_v60  ;;  %v20560_v60 = vld [vmem:[#allocation9 + $0x2e0] ss:$24 sps:$4 sm:$0xff]  }
0x122e   : > { %12812 = vmatpush1.bf16.msra.mxu1 %v20536_v39 }
0x122f   : > { %12813 = vmatprep.subr.bf16.mxu1 %v20539_v27  ;;  %13516 = vmatpush1.bf16.msra.mxu0 %v20368_v62  ;;  %v21358_v62 = vld [vmem:[#allocation19_spill] sm:$0xff] }
0x1230   : > { %13517 = vmatprep.subr.bf16.mxu0 %v20374_v23  ;;  %v21363_v23 = vld [vmem:[#allocation24_spill] sm:$0xff] }
0x1232   : > { %12814 = vmatpush1.bf16.msra.mxu1 %v20544_v0 }
0x1233   : > { %12815 = vmatprep.subr.bf16.mxu1 %v20547_v55  ;;  %13518 = vmatpush1.bf16.msra.mxu0 %v20380_v61  ;;  %v21355_v61 = vld [vmem:[#allocation16_spill] sm:$0xff] }
0x1234   : > { %13519 = vmatprep.subr.bf16.mxu0 %v20386_v18  ;;  %v21356_v18 = vld [vmem:[#allocation17_spill] sm:$0xff] }
0x1236   : > { %12816 = vmatpush1.bf16.msra.mxu1 %v20552_v57 }
0x1237   : > { %12817 = vmatprep.subr.bf16.mxu1 %v20555_v58  ;;  %13520 = vmatpush1.bf16.msra.mxu0 %v20392_v50  ;;  %v21357_v50 = vld [vmem:[#allocation18_spill] sm:$0xff] }
0x1238   : > { %13521 = vmatprep.subr.bf16.mxu0 %v20398_v63  ;;  %v21359_v63 = vld [vmem:[#allocation20_spill] sm:$0xff] }
0x123a   : > { %12818 = vmatpush1.bf16.msra.mxu1 %v20560_v60 }
0x123b   : > { %13532 = vmatprep.subr.bf16.mxu1 %v20227_v3  ;;  %13522 = vmatpush1.bf16.msra.mxu0 %v20404_v29  ;;  %v21360_v3 = vld [vmem:[#allocation21_spill] sm:$0xff]  ;;  %v21361_v29 = vld [vmem:[#allocation22_spill] sm:$0xff] }
0x123c   : > { %13573 = vmatprep.subr.bf16.mxu0 %v20410_v17  ;;  %v21362_v17 = vld [vmem:[#allocation23_spill] sm:$0xff] }
0x123d   : > { %12820 = vmatmul.mubr.bf16.vlgmr.msra.gmra.mrb[92].mxu1 %v20441_v54  ;;  %v21378_v54 = vld [vmem:[#allocation39_spill] sm:$0xff] }
0x123e   : > { %13533 = vmatpush1.bf16.msra.mxu1 %v20225_v30  ;;  %v21364_v30 = vld [vmem:[#allocation25_spill] sm:$0xff] }
0x123f   : > { %13534 = vmatprep.subr.bf16.mxu1 %v20232_v4  ;;  %v21365_v4 = vld [vmem:[#allocation26_spill] sm:$0xff] }
0x1242   : > { %13535 = vmatpush1.bf16.msra.mxu1 %v21355_v61  ;;  %v21379_v61 = vld [vmem:[#allocation40_spill] sm:$0xff] }
0x1243   : > { %13536 = vmatprep.subr.bf16.mxu1 %v21356_v18  ;;  %v21380_v18 = vld [vmem:[#allocation41_spill] sm:$0xff] }
0x1246   : > { %13537 = vmatpush1.bf16.msra.mxu1 %v21357_v50  ;;  %v21381_v50 = vld [vmem:[#allocation42_spill] sm:$0xff] }
0x1247   : > { %13538 = vmatprep.subr.bf16.mxu1 %v21358_v62  ;;  %v21382_v62 = vld [vmem:[#allocation43_spill] sm:$0xff] }
0x124a   : > { %13539 = vmatpush1.bf16.msra.mxu1 %v21359_v63  ;;  %v21383_v63 = vld [vmem:[#allocation44_spill] sm:$0xff] }
0x124b   : > { %13540 = vmatprep.subr.bf16.mxu1 %v21360_v3 }
0x124e   : > { %13541 = vmatpush1.bf16.msra.mxu1 %v21361_v29 }
0x124f   : > { %13542 = vmatprep.subr.bf16.mxu1 %v21362_v17  ;;  %v21384_v17 = vld [vmem:[#allocation14_spill] sm:$0xff] }
0x1252   : > { %13543 = vmatpush1.bf16.msra.mxu1 %v21363_v23 }
0x1253   : > { %13544 = vmatprep.subr.bf16.mxu1 %v21364_v30  ;;  %v21385_v30 = vld [vmem:[#allocation15_spill] sm:$0xff] }
0x1256   : > { %13545 = vmatpush1.bf16.msra.mxu1 %v21365_v4 }
0x1257   : > { %13546 = vmatprep.subr.bf16.mxu1 %v21366_v45 }
0x125a   : > { %13547 = vmatpush1.bf16.msra.mxu1 %v21367_v5 }
0x125b   : > { %13548 = vmatprep.subr.bf16.mxu1 %v21368_v46 }
0x125e   : > { %13549 = vmatpush1.bf16.msra.mxu1 %v21369_v35 }
0x125f   : > { %13550 = vmatprep.subr.bf16.mxu1 %v21370_v2 }
0x1262   : > { %13551 = vmatpush1.bf16.msra.mxu1 %v21371_v22 }
0x1263   : > { %13552 = vmatprep.subr.bf16.mxu1 %v21372_v48 }
0x1266   : > { %13553 = vmatpush1.bf16.msra.mxu1 %v21373_v38 }
0x1267   : > { %13554 = vmatprep.subr.bf16.mxu1 %v21374_v9 }
0x126a   : > { %13555 = vmatpush1.bf16.msra.mxu1 %v21375_v52 }
0x126b   : > { %13556 = vmatprep.subr.bf16.mxu1 %v21376_v31 }
0x126e   : > { %13557 = vmatpush1.bf16.msra.mxu1 %v21377_v12 }
0x126f   : > { %13558 = vmatprep.subr.bf16.mxu1 %v21378_v54 }
0x1272   : > { %13559 = vmatpush1.bf16.msra.mxu1 %v21379_v61  ;;  %v12114_v61 = vld [vmem:[#allocation3 + $0x36] ss:$8 sm:$0x30] }
0x1273   : > { %13560 = vmatprep.subr.bf16.mxu1 %v21380_v18 }
0x1276   : > { %13561 = vmatpush1.bf16.msra.mxu1 %v21381_v50  ;;  %v12113_v50 = vld [vmem:[#allocation3 + $0x36] ss:$8 sm:$0xf] }
0x1277   : > { %13562 = vmatprep.subr.bf16.mxu1 %v21382_v62  ;;  %v12115_v62 = vor.u32 %v12114_v61, %v12113_v50 }
0x127a   : > { %13563 = vmatpush1.bf16.msra.mxu1 %v21383_v63 }
0x12d0   : > { %v12739_v3 = vpop.f32.mrb[88].mxu1  ;;  %v12780_v29 = vpop.f32.mrb[92].mxu0 }
0x12d1   : > { %v12740_v23 = vadd.f32 %v12739_v3, %v21384_v17  ;;  %v12781_v4 = vadd.f32 %v12780_v29, %v21385_v30  ;;  %v12741_v45 = vpop.f32.mrb[89].mxu1  ;;  %v12782_v5 = vpop.f32.mrb[93].mxu0 }
0x12d2   : > { %v12742_v46 = vadd.f32 %v12741_v45, %v17579_v28  ;;  %v12783_v35 = vadd.f32 %v12782_v5, %v17587_v43  ;;  %v12743_v2 = vpop.f32.mrb[90].mxu1  ;;  %v12784_v22 = vpop.f32.mrb[94].mxu0 }
0x12d3   : > { %v12744_v48 = vpop.f32.mrb[91].mxu1  ;;  %v12785_v38 = vpop.f32.mrb[95].mxu0 }
0x12d4   : > { %v12832_v9 = vcombine.low %v12740_v23, %v12742_v46  ;;  %v12833_v52 = vcombine.low %v12781_v4, %v12783_v35 }
0x12d6   : > { %v12840_v31 = vrot.slane %v12832_v9, %v17594_v51  ;;  %v12847_v12 = vrot.slane %v12833_v52, %v17594_v51 }
0x12d8   : > { %v12848_v54 = vcombine.low %v12840_v31, %v12847_v12  ;;  %v12884_v31 = vrot.slane %v12115_v62, 4 }
0x12da   : > { %v12855_v18 = vrot.slane %v12848_v54, %v17594_v51 }
0x12dc   : > { %v12857_v63 = vadd.f32 %v12855_v18, %v12115_v62 }
0x12de   : > { %v15372_v3 = vmul.f32 -1.442695, %v12857_v63 }
0x12e0   : > { %16939 = vpow2.f32 %v15372_v3 }
0x12ea   : > { %v16940_v29 = vpop.eup %16939 }
0x12eb   : > { %v12861_v45 = vadd.f32 1.0, %v16940_v29 }
0x12ed   : > { %16941 = vrcp.f32 %v12861_v45 }
0x12f7   : > { %v16942_v9 = vpop.eup %16941 }
0x12f8   : > { %v12889_v54 = vrot.slane %v16942_v9, 2 }
0x12fa   : > { %v12891_v61 = vsub.f32 1.0, %v12889_v54  ;;  %v12893_v63 = vmul.f32 %v12889_v54, %v20429_v7 }
0x1310   : > { %v12821_v5 = vpop.f32.mrb[92].mxu1 }
0x1311   : > { %v12822_v23 = vadd.f32 %v12821_v5, %v17585_v41  ;;  %v12823_v4 = vpop.f32.mrb[93].mxu1 }
0x1312   : > { %v12824_v46 = vadd.f32 %v12823_v4, %v17589_v44  ;;  %v12825_v35 = vpop.f32.mrb[94].mxu1 }
0x1313   : > { %v12826_v2 = vpop.f32.mrb[95].mxu1 }
0x1314   : > { %v12866_v22 = vcombine.low %v12822_v23, %v12824_v46 }
0x1316   : > { %v12873_v48 = vrot.slane %v12866_v22, %v17594_v51 }
0x1318   : > { %v12880_v38 = vrot.slane %v12873_v48, %v17594_v51 }
0x131a   : > { %v12882_v52 = vmul.f32 %v16942_v9, %v12880_v38 }
0x131c   : > { %v12886_v12 = vadd.f32 %v12884_v31, %v12882_v52 }
0x131e   : > { %16943 = vtanh.f32 %v12886_v12 }
0x1328   : > { %v16944_v18 = vpop.eup %16943 }
0x1329   : > { %v12892_v50 = vmul.f32 %v16944_v18, %v12891_v61 }
0x132b   : > { %v20613_v3 = vadd.f32 %v12893_v63, %v12892_v50 }
0x132d   : > { %15373 = vst.msk [vmem:[%s17400_s14 + $0x16] ss:$8 sm:$0x3] %vm17604_vm1, %v20613_v3  ;;  %v12910_v29 = vrot.slane %v20613_v3, %v17417_v40  ;;  %v12906_v62 = vrot.slane %v20613_v3, %v17424_v6 }
0x132f   : > { %v12914_v45 = vpack.c.bf16 %v12910_v29, %v12910_v29  ;;  %v12913_v5 = vpack.c.bf16 %v12906_v62, %v12906_v62 }
0x1331   : > { %13523 = vmatprep.mubr.bf16.mxu0 %v12914_v45  ;;  %13564 = vmatprep.mubr.bf16.mxu1 %v12914_v45 }
0x1332   : > { %13524 = vmatmul.mubr.bf16.vlgmr.msra.gmra.mrb[96].mxu0 %v12913_v5  ;;  %13565 = vmatmul.mubr.bf16.vlgmr.msra.gmra.mrb[96].mxu1 %v12913_v5 }
0x1333   : > { %13574 = vmatpush1.bf16.msra.mxu0 %v20439_v34  ;;  %13605 = vmatprep.mubr.bf16.mxu0 %v12914_v45 }
0x1334   : > { %13575 = vmatprep.subr.bf16.mxu0 %v20443_v36 }
0x1337   : > { %13576 = vmatpush1.bf16.msra.mxu0 %v20448_v13 }
0x1338   : > { %13577 = vmatprep.subr.bf16.mxu0 %v20451_v15 }
0x133b   : > { %13578 = vmatpush1.bf16.msra.mxu0 %v20456_v14 }
0x133c   : > { %13579 = vmatprep.subr.bf16.mxu0 %v20459_v32 }
0x133f   : > { %13580 = vmatpush1.bf16.msra.mxu0 %v20464_v16 }
0x1340   : > { %13581 = vmatprep.subr.bf16.mxu0 %v20467_v42 }
0x1343   : > { %13582 = vmatpush1.bf16.msra.mxu0 %v20472_v53 }
0x1344   : > { %13583 = vmatprep.subr.bf16.mxu0 %v20475_v20 }
0x1347   : > { %13584 = vmatpush1.bf16.msra.mxu0 %v20480_v24 }
0x1348   : > { %13585 = vmatprep.subr.bf16.mxu0 %v20483_v1 }
0x134b   : > { %13586 = vmatpush1.bf16.msra.mxu0 %v20488_v10 }
0x134c   : > { %13587 = vmatprep.subr.bf16.mxu0 %v20491_v21 }
0x134f   : > { %13588 = vmatpush1.bf16.msra.mxu0 %v20496_v25  ;;  %v12900_v25 = vld [vmem:[#allocation3 + $0x37] ss:$8 sm:$0x30] }
0x1350   : > { %13589 = vmatprep.subr.bf16.mxu0 %v20499_v59 }
0x1353   : > { %13590 = vmatpush1.bf16.msra.mxu0 %v20504_v26  ;;  %v12899_v26 = vld [vmem:[#allocation3 + $0x37] ss:$8 sm:$0xf] }
0x1354   : > { %13591 = vmatprep.subr.bf16.mxu0 %v20507_v49  ;;  %v12901_v49 = vor.u32 %v12900_v25, %v12899_v26 }
0x1357   : > { %13592 = vmatpush1.bf16.msra.mxu0 %v20512_v8 }
0x1358   : > { %13593 = vmatprep.subr.bf16.mxu0 %v20515_v47 }
0x135b   : > { %13594 = vmatpush1.bf16.msra.mxu0 %v20520_v19 }
0x135c   : > { %13595 = vmatprep.subr.bf16.mxu0 %v20523_v37 }
0x135f   : > { %13596 = vmatpush1.bf16.msra.mxu0 %v20528_v11 }
0x1360   : > { %13597 = vmatprep.subr.bf16.mxu0 %v20531_v56 }
0x1363   : > { %13598 = vmatpush1.bf16.msra.mxu0 %v20536_v39 }
0x1364   : > { %13599 = vmatprep.subr.bf16.mxu0 %v20539_v27 }
0x1367   : > { %13600 = vmatpush1.bf16.msra.mxu0 %v20544_v0 }
0x1368   : > { %13601 = vmatprep.subr.bf16.mxu0 %v20547_v55 }
0x136b   : > { %13602 = vmatpush1.bf16.msra.mxu0 %v20552_v57 }
0x136c   : > { %13603 = vmatprep.subr.bf16.mxu0 %v20555_v58 }
0x136f   : > { %13604 = vmatpush1.bf16.msra.mxu0 %v20560_v60 }
0x1372   : > { %13606 = vmatmul.mubr.bf16.vlgmr.msra.gmra.mrb[100].mxu0 %v12913_v5 }
0x1405   : > { %v13525_v40 = vpop.f32.mrb[96].mxu0  ;;  %v13566_v6 = vpop.f32.mrb[96].mxu1 }
0x1406   : > { %v13526_v7 = vadd.f32 %v13525_v40, %v21384_v17  ;;  %v13567_v34 = vadd.f32 %v13566_v6, %v21385_v30  ;;  %v13527_v36 = vpop.f32.mrb[97].mxu0  ;;  %v13568_v13 = vpop.f32.mrb[97].mxu1  ;;  %v13670_v17 = vrot.slane %v12901_v49, 4 }
0x1407   : > { %v13528_v15 = vadd.f32 %v13527_v36, %v17579_v28  ;;  %v13569_v14 = vadd.f32 %v13568_v13, %v17587_v43  ;;  %v13529_v32 = vpop.f32.mrb[98].mxu0  ;;  %v13570_v16 = vpop.f32.mrb[98].mxu1 }
0x1408   : > { %v13530_v42 = vpop.f32.mrb[99].mxu0  ;;  %v13571_v53 = vpop.f32.mrb[99].mxu1 }
0x1409   : > { %v13618_v20 = vcombine.low %v13526_v7, %v13528_v15  ;;  %v13619_v24 = vcombine.low %v13567_v34, %v13569_v14 }
0x140b   : > { %v13626_v1 = vrot.slane %v13618_v20, %v17594_v51  ;;  %v13633_v10 = vrot.slane %v13619_v24, %v17594_v51 }
0x140d   : > { %v13634_v21 = vcombine.low %v13626_v1, %v13633_v10 }
0x140f   : > { %v13641_v59 = vrot.slane %v13634_v21, %v17594_v51 }
0x1411   : > { %v13643_v8 = vadd.f32 %v13641_v59, %v12901_v49 }
0x1413   : > { %v15470_v28 = vmul.f32 -1.442695, %v13643_v8 }
0x1415   : > { %16945 = vpow2.f32 %v15470_v28 }
0x141f   : > { %v16946_v43 = vpop.eup %16945 }
0x1420   : > { %v13647_v47 = vadd.f32 1.0, %v16946_v43 }
0x1422   : > { %16947 = vrcp.f32 %v13647_v47 }
0x142c   : > { %v16948_v58 = vpop.eup %16947 }
0x1445   : > { %v13607_v19 = vpop.f32.mrb[100].mxu0 }
0x1446   : > { %v13608_v37 = vadd.f32 %v13607_v19, %v17585_v41  ;;  %v13609_v11 = vpop.f32.mrb[101].mxu0  ;;  %v13675_v41 = vrot.slane %v16948_v58, 2 }
0x1447   : > { %v13610_v56 = vadd.f32 %v13609_v11, %v17589_v44  ;;  %v13611_v39 = vpop.f32.mrb[102].mxu0 }
0x1448   : > { %v13612_v27 = vpop.f32.mrb[103].mxu0  ;;  %v13677_v23 = vsub.f32 1.0, %v13675_v41  ;;  %v13679_v46 = vmul.f32 %v13675_v41, %v20613_v3 }
0x1449   : > { %v13652_v0 = vcombine.low %v13608_v37, %v13610_v56 }
0x144b   : > { %v13659_v55 = vrot.slane %v13652_v0, %v17594_v51 }
0x144d   : > { %v13666_v57 = vrot.slane %v13659_v55, %v17594_v51 }
0x144f   : > { %v13668_v60 = vmul.f32 %v16948_v58, %v13666_v57 }
0x1451   : > { %v13672_v30 = vadd.f32 %v13670_v17, %v13668_v60 }
0x1453   : > { %16949 = vtanh.f32 %v13672_v30 }
0x145d   : > { %v16950_v44 = vpop.eup %16949 }
0x145e   : > { %v13678_v4 = vmul.f32 %v16950_v44, %v13677_v23 }
0x1460   : > { %v13680_v51 = vadd.f32 %v13679_v46, %v13678_v4 }
0x1462   : > { %15471 = vst.msk [vmem:[%s17400_s14 + $0x17] ss:$8 sm:$0x3] %vm17604_vm1, %v13680_v51  ;;  %13684 = vst.msk [vmem:[#allocation2] sm:$0x3] %vm17604_vm1, %v13680_v51 }
0x1463   : > { %17115 = shalt.err (!%p17112_p10)
}
0x1464   : > { %s17116_s14 = scalar_lea.hbm %s20671_s19, 512  ;;  %s17120_s20 = scalar_lea.hbm %s20727_s6, 1536 }
0x1465   : > { %p17117_p13 = scmp.ne.s32.totalorder %s20671_s19, %s17116_s14  ;;  %p17121_p11 = scmp.lt.u32.totalorder %s20671_s19, %s20727_s6 }
0x1466   : > { %p17122_p8 = scmp.lt.u32.totalorder %s17120_s20, %s17116_s14  ;;  %p17124_p2 = scmp.lt.u32.totalorder %s17116_s14, %s20671_s19 }
0x1467   : > { %p17118_p0 = pnand %p17117_p13, %p17333_p4 }
0x1468   : > { %p17123_p1 = por %p17122_p8, %p17121_p11 }
0x1469   : > { %p17119_p5 = pneg %p17118_p0 }
0x146a   : > { %p17125_p6 = por %p17124_p2, %p17123_p1 }
0x146c   : > { %p17126_p9 = pnand %p17125_p6, %p17119_p5 }
0x146e   : > { %17129 = shalt.err (!%p17126_p9)
}
0x146f   : > { %s17183_s30 = smov 256   ;;  %s17184_s10 = smov 16  }
0x1470   : > { %15492 = dma.vmem_to_hbm [thread:$0]  (%p17333_p4), %s20673_s18, 512, %s20671_s19, %s13686_s25, %s17183_s30, %s17183_s30, %s17184_s10  }
0x1471 PF: > { %p15514_p12 = scmp.ge.s32.totalorder %s17172_s24, 2  ;;  %s13715_s12 = sand.u32 1, %s17160_s21  }
0x1472   : > { %p21386_p3 = scmp.ne.s32.totalorder %s20951_s28, 0  ;;  %s13716_s29 = scalar_lea.sflag [#allocation6], %s13715_s12 }
0x1474   : > { %p15506_p7 = pnand %p15514_p12, %p21386_p3 }
0x1476   : > { %17155 = dma.done.wait (!%p15506_p7), %s13716_s29, 512  }
0x1477   : > { %17157 = vsyncadd (!%p15506_p7), %s13716_s29, 4294966784  ;;  %p20_p10 = scmp.ge.s32.totalorder %s17323_s26, 5   ;;  %s21387_s21 = smov %s17164_s22 }
0x1478   : > { %s21388_s22 = smov %s17168_s23  ;;  %s21389_s23 = smov %s17339_s11 }
0x1479   : > { %s21390_s24 = smov %s17323_s26  ;;  %22 = sbr.rel (!%p20_p10) target bundleno = 6 (0x6), region = 131 }
0x1480   :  { %13721 = vsyncpa [#allocation5], 1 }
0x1481   :  { %13723 = vsyncpa [#allocation5 + $0x1], 1 }
0x1482   :  { %13724 = vsyncpa [#allocation8], 1 }
0x1483   :  { %13725 = vsyncpa [#allocation6], 1 }
0x1484   :  { %13727 = vsyncpa [#allocation6 + $0x1], 1 }

</bundles_post_ra>
